<compile_context>
chip_gen: v7x
topology: tpu7x:2x2x1
jax: 0.10.0
libtpu: 0.0.40
codegen_flags: <defaults>
</compile_context>

<pallas_src>
import functools

import jax
import jax.numpy as jnp
from jax.experimental import pallas as pl
from jax.experimental.pallas import tpu as pltpu


_VMEM_LIMIT = 32 * 1024 * 1024


# ----------------------------- helpers ------------------------------------

def _sigmoid_f32(x):
    # Exact, overflow-free sigmoid living on the EUP: sigmoid(x)=0.5*tanh(x/2)+0.5
    return 0.5 * jnp.tanh(0.5 * x) + 0.5


def _pick_tm(M, K, rows):
    """Largest M tile whose (double-buffered) blocks stay under a VMEM budget."""
    budget = 2 * 1024 * 1024

    def step_bytes(t):
        # X (bf16) + cond_a + cond_b + out (f32), double buffered
        return 2 * (K * t * 2 + 3 * rows * t * 4)

    tm = M
    while tm % 2 == 0 and tm >= 256 and step_bytes(tm) > budget:
        tm //= 2
    return tm


# ----------------------------- Pallas kernels -----------------------------

def _input_glu_kernel(z_ref, wa_ref, wb_ref, ba_ref, bb_ref, o_ref):
    # z:(B,K1) bf16, wa/wb:(K1,Nh) bf16, ba/bb:(1,Nh) f32, o:(B,Nh) f32
    z = z_ref[...]
    a = jnp.dot(z, wa_ref[...], preferred_element_type=jnp.float32) + ba_ref[...]
    g = jnp.dot(z, wb_ref[...], preferred_element_type=jnp.float32) + bb_ref[...]
    o_ref[...] = _sigmoid_f32(a) * jnp.tanh(g)


def _cond_linear_kernel(x_ref, w_ref, b_ref, o_ref):
    # fused conditioning_2..4 GEMM: x:(B,nc) bf16, w:(nc,Ntot) bf16, b:(1,Ntot)
    o_ref[...] = (
        jnp.dot(x_ref[...], w_ref[...], preferred_element_type=jnp.float32)
        + b_ref[...]
    )


def _convt_glu_kernel(x_ref, wa_ref, wb_ref, ba_ref, bb_ref, ca_ref, cb_ref, o_ref):
    # one output parity, one M tile:
    # x:(1,K,tm) bf16, wa/wb:(1,Coh,K) bf16, ba/bb:(Coh,1) f32,
    # ca/cb:(1,Coh,tm) f32 (conditioning of the NEXT GLU), o:(1,Coh,tm) f32
    x = x_ref[0]
    a = (jnp.dot(wa_ref[0], x, preferred_element_type=jnp.float32)
         + ba_ref[...] + ca_ref[0])
    g = (jnp.dot(wb_ref[0], x, preferred_element_type=jnp.float32)
         + bb_ref[...] + cb_ref[0])
    o_ref[0] = _sigmoid_f32(a) * jnp.tanh(g)


def _convt_sig_kernel(x_ref, w_ref, b_ref, o_ref):
    # last ConvTranspose + sigmoid epilogue.
    acc = (jnp.dot(w_ref[0], x_ref[0], preferred_element_type=jnp.float32)
           + b_ref[...])
    o_ref[0] = _sigmoid_f32(acc)


# ----------------------------- pallas_call wrappers ------------------------

def _call_input_glu(z, wa, wb, ba, bb):
    B = z.shape[0]
    Nh = wa.shape[1]
    return pl.pallas_call(
        _input_glu_kernel,
        out_shape=jax.ShapeDtypeStruct((B, Nh), jnp.float32),
        compiler_params=pltpu.CompilerParams(vmem_limit_bytes=_VMEM_LIMIT),
    )(z, wa, wb, ba, bb)


def _call_cond_linear(x, w, b):
    return pl.pallas_call(
        _cond_linear_kernel,
        out_shape=jax.ShapeDtypeStruct((x.shape[0], w.shape[1]), jnp.float32),
        compiler_params=pltpu.CompilerParams(vmem_limit_bytes=_VMEM_LIMIT),
    )(x, w, b)


def _call_convt_glu(X, wa, wb, ba, bb, ca, cb):
    _, K, M = X.shape
    Coh = wa.shape[1]
    tm = _pick_tm(M, K, Coh)
    grid = (4, M // tm)
    return pl.pallas_call(
        _convt_glu_kernel,
        out_shape=jax.ShapeDtypeStruct((4, Coh, M), jnp.float32),
        grid=grid,
        in_specs=[
            pl.BlockSpec((1, K, tm), lambda p, m: (p, 0, m)),
            pl.BlockSpec((1, Coh, K), lambda p, m: (p, 0, 0)),
            pl.BlockSpec((1, Coh, K), lambda p, m: (p, 0, 0)),
            pl.BlockSpec((Coh, 1), lambda p, m: (0, 0)),
            pl.BlockSpec((Coh, 1), lambda p, m: (0, 0)),
            pl.BlockSpec((1, Coh, tm), lambda p, m: (p, 0, m)),
            pl.BlockSpec((1, Coh, tm), lambda p, m: (p, 0, m)),
        ],
        out_specs=pl.BlockSpec((1, Coh, tm), lambda p, m: (p, 0, m)),
        compiler_params=pltpu.CompilerParams(
            dimension_semantics=("parallel", "parallel"),
            vmem_limit_bytes=_VMEM_LIMIT),
    )(X, wa, wb, ba, bb, ca, cb)


def _call_convt_sig(X, w, b):
    _, K, M = X.shape
    Co = w.shape[1]
    tm = _pick_tm(M, K, Co)
    grid = (4, M // tm)
    return pl.pallas_call(
        _convt_sig_kernel,
        out_shape=jax.ShapeDtypeStruct((4, Co, M), jnp.float32),
        grid=grid,
        in_specs=[
            pl.BlockSpec((1, K, tm), lambda p, m: (p, 0, m)),
            pl.BlockSpec((1, Co, K), lambda p, m: (p, 0, 0)),
            pl.BlockSpec((Co, 1), lambda p, m: (0, 0)),
        ],
        out_specs=pl.BlockSpec((1, Co, tm), lambda p, m: (p, 0, m)),
        compiler_params=pltpu.CompilerParams(
            dimension_semantics=("parallel", "parallel"),
            vmem_limit_bytes=_VMEM_LIMIT),
    )(X, w, b)


# ----------------------------- layout glue (jit-fused XLA) -----------------

def _im2col(x):
    """NCHW activation -> per-parity tap matrix (4, 4*Ci, B*H*W) in bf16.

    Tap (dh, dw) of parity (ph, pw) reads the padded input at (i+ph+dh, j+pw+dw)
    and pairs with kernel entry (3-ph-2dh, 3-pw-2dw).
    """
    B, Ci, H, W = x.shape
    xp = jnp.pad(x.astype(jnp.bfloat16), ((0, 0), (0, 0), (1, 1), (1, 1)))
    cols = []
    for ph in range(2):
        for pw in range(2):
            taps = []
            for dh in range(2):
                for dw in range(2):
                    t = xp[:, :, ph + dh:ph + dh + H, pw + dw:pw + dw + W]
                    taps.append(t.transpose(1, 0, 2, 3).reshape(Ci, B * H * W))
            cols.append(jnp.concatenate(taps, axis=0))
    return jnp.stack(cols, axis=0)  # (4, 4*Ci, M)


def _deparity(y, B, C, Hh, Wh):
    """(4, C, B*Hh*Wh) parity planes -> NCHW (B, C, 2*Hh, 2*Wh)."""
    y = y.reshape(2, 2, C, B, Hh, Wh)          # (ph, pw, c, b, i, j)
    y = y.transpose(3, 2, 4, 0, 5, 1)          # (b, c, i, ph, j, pw)
    return y.reshape(B, C, 2 * Hh, 2 * Wh)


def _arrange_cond(flat, C, Hout, B):
    """Torch-layout conditioning (B, C*Hout*Hout) -> GLU-split parity planes.

    Returns (cond_a, cond_b), each (4, C//2, B*(Hout//2)*(Hout//2)), matching the
    parity/channel-first GEMM output of the producing ConvTranspose kernel.
    """
    Hh = Hout // 2
    c = flat.reshape(B, C // 2, 2, Hh, 2, Hh, 2)     # (b, ch, half, i, ph, j, pw)
    c = c.transpose(4, 6, 2, 1, 0, 3, 5)             # (ph, pw, half, ch, b, i, j)
    c = c.reshape(4, 2, C // 2, B * Hh * Hh)
    return c[:, 0], c[:, 1]


def _cond_meta(md):
    # (channels, spatial) of conditioning_2 .. conditioning_4 (torch reshape)
    return ((8 * md, 8), (4 * md, 16), (2 * md, 32), (md, 64))


# ----------------------------- parameters ----------------------------------

def init_params(key, num_classes, model_dim, latent_dim):
    """Parameters in the torch module's native layout (linear w stored (in,out))."""
    md = model_dim
    keys = iter(jax.random.split(key, 64))

    def linear(in_f, out_f):
        w = jax.random.normal(next(keys), (in_f, out_f), jnp.float32) * 0.25
        b = jax.random.normal(next(keys), (out_f,), jnp.float32) * 0.05
        return {"w": w, "b": b}

    def convt(ci, co):
        # torch ConvTranspose2d weight layout: (Ci, Co, KH, KW)
        w = jax.random.normal(next(keys), (ci, co, 4, 4), jnp.float32) * 0.25
        b = jax.random.normal(next(keys), (co,), jnp.float32) * 0.05
        return {"w": w, "b": b}

    return {
        "input_layer": linear(latent_dim + num_classes, 8 * 4 * 4 * md * 2),
        "conditioning_1": linear(num_classes, 8 * 4 * 4 * md * 2),
        "upsampling_1": convt(8 * md, 4 * md * 2),
        "conditioning_2": linear(num_classes, 4 * 8 * 8 * md * 2),
        "upsampling_2": convt(4 * md, 2 * md * 2),
        "conditioning_3": linear(num_classes, 2 * 16 * 16 * md * 2),
        "upsampling_3": convt(2 * md, md * 2),
        "conditioning_3_5": linear(num_classes, 32 * 32 * md * 2),
        "upsampling_3_5": convt(md, md),
        "conditioning_4": linear(num_classes, 64 * 64 * md),
        "upsampling_4": convt(md // 2, 3),
    }


def _split_glu_cols(w, b, C, HW):
    """Split linear output columns into GLU even/odd channel halves."""
    K = w.shape[0]
    Nh = (C // 2) * HW
    w4 = w.reshape(K, C // 2, 2, HW)
    b4 = b.reshape(C // 2, 2, HW)
    wa = w4[:, :, 0, :].reshape(K, Nh).astype(jnp.bfloat16)
    wb = w4[:, :, 1, :].reshape(K, Nh).astype(jnp.bfloat16)
    ba = b4[:, 0, :].reshape(1, Nh).astype(jnp.float32)
    bb = b4[:, 1, :].reshape(1, Nh).astype(jnp.float32)
    return wa, wb, ba, bb


def _prep_convt(wt, bias, glu):
    """torch (Ci, Co, 4, 4) -> per-parity GEMM weights (channel-first, GLU split)."""
    Ci, Co = wt.shape[0], wt.shape[1]
    per_parity = []
    for ph in range(2):
        for pw in range(2):
            taps = [wt[:, :, 3 - ph - 2 * dh, 3 - pw - 2 * dw]
                    for dh in range(2) for dw in range(2)]      # each (Ci, Co)
            per_parity.append(jnp.concatenate(taps, axis=0).T)   # (Co, 4*Ci)
    W = jnp.stack(per_parity, axis=0)                             # (4, Co, 4*Ci)
    if glu:
        W4 = W.reshape(4, Co // 2, 2, 4 * Ci)
        wa = W4[:, :, 0, :].astype(jnp.bfloat16)
        wb = W4[:, :, 1, :].astype(jnp.bfloat16)
        ba = bias[0::2].reshape(Co // 2, 1).astype(jnp.float32)
        bb = bias[1::2].reshape(Co // 2, 1).astype(jnp.float32)
        return wa, wb, ba, bb
    return W.astype(jnp.bfloat16), bias.reshape(Co, 1).astype(jnp.float32)


def prepare_params(params, model_dim, latent_dim):
    """One-time conversion of torch-layout params to kernel-friendly layout."""
    md = model_dim
    prep = {}

    # input layer (+ conditioning_1 folded into the class_vec rows of z)
    C1 = 8 * md * 2
    w_comb = params["input_layer"]["w"].at[latent_dim:].add(
        params["conditioning_1"]["w"])
    b_comb = params["input_layer"]["b"] + params["conditioning_1"]["b"]
    (prep["in_wa"], prep["in_wb"],
     prep["in_ba"], prep["in_bb"]) = _split_glu_cols(w_comb, b_comb, C1, 16)

    # conditioning_2 .. conditioning_4 fused into one GEMM (torch column order)
    cond_keys = ("conditioning_2", "conditioning_3", "conditioning_3_5",
                 "conditioning_4")
    prep["cond_w"] = jnp.concatenate(
        [params[k]["w"] for k in cond_keys], axis=1).astype(jnp.bfloat16)
    prep["cond_b"] = jnp.concatenate(
        [params[k]["b"] for k in cond_keys], axis=0).reshape(1, -1).astype(jnp.float32)

    conv_cfg = (("up1", "upsampling_1", True),
                ("up2", "upsampling_2", True),
                ("up3", "upsampling_3", True),
                ("up3_5", "upsampling_3_5", True),
                ("up4", "upsampling_4", False))
    for name, key_, glu in conv_cfg:
        if glu:
            wa, wb, ba, bb = _prep_convt(params[key_]["w"], params[key_]["b"], True)
            prep[name + "_wa"], prep[name + "_wb"] = wa, wb
            prep[name + "_ba"], prep[name + "_bb"] = ba, bb
        else:
            w, b = _prep_convt(params[key_]["w"], params[key_]["b"], False)
            prep[name + "_w"], prep[name + "_b"] = w, b
    return prep


# ----------------------------- forward pass ---------------------------------

def _forward_impl(prep, class_vec, noise, *, model_dim):
    md = model_dim
    B = class_vec.shape[0]

    cv16 = class_vec.astype(jnp.bfloat16)
    z = jnp.concatenate([noise, class_vec], axis=-1).astype(jnp.bfloat16)

    # input linear + conditioning_1 + GLU, fused (batch_norm_1 is Identity)
    x = _call_input_glu(z, prep["in_wa"], prep["in_wb"],
                        prep["in_ba"], prep["in_bb"])
    x = x.reshape(B, 8 * md, 4, 4)                     # NCHW GLU output

    # conditioning_2..4 in one lane-dense GEMM, then sliced per layer
    cond_all = _call_cond_linear(cv16, prep["cond_w"], prep["cond_b"])
    conds, off = [], 0
    for C, Hout in _cond_meta(md):
        n = C * Hout * Hout
        conds.append(_arrange_cond(cond_all[:, off:off + n], C, Hout, B))
        off += n

    # ConvTranspose layers with fused GLU epilogue (batch norms are Identity)
    for name, (ca, cb) in zip(("up1", "up2", "up3", "up3_5"), conds):
        H = x.shape[2]
        X = _im2col(x)                                  # (4, 4*Ci, B*H*H) bf16
        y = _call_convt_glu(X, prep[name + "_wa"], prep[name + "_wb"],
                            prep[name + "_ba"], prep[name + "_bb"], ca, cb)
        Coh = prep[name + "_wa"].shape[1]
        x = _deparity(y, B, Coh, H, H)                  # (B, Coh, 2H, 2H)

    # final ConvTranspose + sigmoid epilogue -> torch NCHW output
    H = x.shape[2]
    X = _im2col(x)
    y = _call_convt_sig(X, prep["up4_w"], prep["up4_b"])
    return _deparity(y, B, 3, H, H)                     # (B, 3, 2H, 2H)


gan_generator_forward = jax.jit(_forward_impl, static_argnames=("model_dim",))


# ----------------------------- pure-JAX reference ---------------------------

def _ref_convt(x, w, b):
    # PyTorch ConvTranspose2d(k=4, s=2, p=1) == dilated correlation with the
    # spatially flipped, (Ci,Co)->(Co,Ci) transposed kernel and padding k-1-p=2.
    rhs = jnp.flip(w, axis=(2, 3)).transpose(1, 0, 2, 3)
    y = jax.lax.conv_general_dilated(
        x, rhs, window_strides=(1, 1), padding=((2, 2), (2, 2)),
        lhs_dilation=(2, 2), dimension_numbers=("NCHW", "OIHW", "NCHW"),
        precision=jax.lax.Precision.HIGHEST)
    return y + b.reshape(1, -1, 1, 1)


def _ref_glu(x, cond):
    a, g = x[:, 0::2], x[:, 1::2]
    c, d = cond[:, 0::2], cond[:, 1::2]
    return jax.nn.sigmoid(a + c) * jnp.tanh(g + d)


def _reference_impl(params, class_vec, noise, *, model_dim):
    md = model_dim
    B = class_vec.shape[0]

    def lin(name, v):
        p = params[name]
        return jnp.dot(v, p["w"], precision=jax.lax.Precision.HIGHEST) + p["b"]

    z = jnp.concatenate([noise, class_vec], axis=-1)
    x = lin("input_layer", z).reshape(B, 16 * md, 4, 4)
    x = _ref_glu(x, lin("conditioning_1", class_vec).reshape(B, 16 * md, 4, 4))
    x = _ref_convt(x, params["upsampling_1"]["w"], params["upsampling_1"]["b"])
    x = _ref_glu(x, lin("conditioning_2", class_vec).reshape(B, 8 * md, 8, 8))
    x = _ref_convt(x, params["upsampling_2"]["w"], params["upsampling_2"]["b"])
    x = _ref_glu(x, lin("conditioning_3", class_vec).reshape(B, 4 * md, 16, 16))
    x = _ref_convt(x, params["upsampling_3"]["w"], params["upsampling_3"]["b"])
    x = _ref_glu(x, lin("conditioning_3_5", class_vec).reshape(B, 2 * md, 32, 32))
    x = _ref_convt(x, params["upsampling_3_5"]["w"], params["upsampling_3_5"]["b"])
    x = _ref_glu(x, lin("conditioning_4", class_vec).reshape(B, md, 64, 64))
    x = _ref_convt(x, params["upsampling_4"]["w"], params["upsampling_4"]["b"])
    return jax.nn.sigmoid(x)


reference_forward = jax.jit(_reference_impl, static_argnames=("model_dim",))


# ----------------------------- main -----------------------------------------

if __name__ == "__main__":
    num_classes = 4
    model_dim = 8
    latent_dim = 16   # small constructor arg (torch default is 128)
    batch = 2

    key = jax.random.PRNGKey(0)
    kp, kn, kc = jax.random.split(key, 3)

    params = init_params(kp, num_classes, model_dim, latent_dim)
    prep = prepare_params(params, model_dim, latent_dim)

    noise = jax.random.normal(kn, (batch, latent_dim), jnp.float32)
    class_idx = jax.random.randint(kc, (batch,), 0, num_classes)
    class_vec = jax.nn.one_hot(class_idx, num_classes, dtype=jnp.float32)

    out = gan_generator_forward(prep, class_vec, noise, model_dim=model_dim)
    out = jax.block_until_ready(out)

    assert out.shape == (batch, 3, 128, 128), out.shape
    assert bool(jnp.all(jnp.isfinite(out)))
    assert bool(jnp.all((out >= 0.0) & (out <= 1.0)))

    # semantics check vs a pure-JAX (f32) implementation of the torch module
    # (loose tolerance: kernel GEMM inputs are bf16)
    ref = reference_forward(params, class_vec, noise, model_dim=model_dim)
    max_diff = float(jnp.max(jnp.abs(out - ref)))
    assert max_diff < 0.15, f"kernel/reference mismatch: {max_diff}"

    print("KERNEL_OK")
</pallas_src>

<mosaic_0001>
module attributes {stable_mosaic.version = 11 : i64} {
  func.func @_input_glu_kernel(%arg0: memref<2x20xbf16, #tpu.memory_space<vmem>>, %arg1: memref<20x1024xbf16, #tpu.memory_space<vmem>>, %arg2: memref<20x1024xbf16, #tpu.memory_space<vmem>>, %arg3: memref<1x1024xf32, #tpu.memory_space<vmem>>, %arg4: memref<1x1024xf32, #tpu.memory_space<vmem>>, %arg5: memref<2x1024xf32, #tpu.memory_space<vmem>>) attributes {dimension_semantics = [], scalar_prefetch = 0 : i64, scratch_operands = 0 : i64, tpu.core_type = #tpu.core_type<tc>} {
    %c0 = arith.constant 0 : index
    %c0_0 = arith.constant 0 : index
    %0 = vector.load %arg0[%c0, %c0_0] : memref<2x20xbf16, #tpu.memory_space<vmem>>, vector<2x20xbf16>
    %c0_1 = arith.constant 0 : index
    %c0_2 = arith.constant 0 : index
    %1 = vector.load %arg1[%c0_1, %c0_2] : memref<20x1024xbf16, #tpu.memory_space<vmem>>, vector<20x1024xbf16>
    %cst = arith.constant dense<0.000000e+00> : vector<2x1024xf32>
    %2 = tpu.matmul %0, %1, %cst {dimension_numbers = #tpu.dot_dimension_numbers<[1], [0], [0], [1], [0, 0, 1, 1], [], []>} : vector<2x20xbf16>, vector<20x1024xbf16>, vector<2x1024xf32> -> vector<2x1024xf32>
    %c0_3 = arith.constant 0 : index
    %c0_4 = arith.constant 0 : index
    %3 = vector.load %arg3[%c0_3, %c0_4] : memref<1x1024xf32, #tpu.memory_space<vmem>>, vector<1x1024xf32>
    %4 = vector.broadcast %3 : vector<1x1024xf32> to vector<2x1024xf32>
    %5 = arith.addf %2, %4 : vector<2x1024xf32>
    %c0_5 = arith.constant 0 : index
    %c0_6 = arith.constant 0 : index
    %6 = vector.load %arg2[%c0_5, %c0_6] : memref<20x1024xbf16, #tpu.memory_space<vmem>>, vector<20x1024xbf16>
    %cst_7 = arith.constant dense<0.000000e+00> : vector<2x1024xf32>
    %7 = tpu.matmul %0, %6, %cst_7 {dimension_numbers = #tpu.dot_dimension_numbers<[1], [0], [0], [1], [0, 0, 1, 1], [], []>} : vector<2x20xbf16>, vector<20x1024xbf16>, vector<2x1024xf32> -> vector<2x1024xf32>
    %c0_8 = arith.constant 0 : index
    %c0_9 = arith.constant 0 : index
    %8 = vector.load %arg4[%c0_8, %c0_9] : memref<1x1024xf32, #tpu.memory_space<vmem>>, vector<1x1024xf32>
    %9 = vector.broadcast %8 : vector<1x1024xf32> to vector<2x1024xf32>
    %10 = arith.addf %7, %9 : vector<2x1024xf32>
    %cst_10 = arith.constant 5.000000e-01 : f32
    %11 = vector.broadcast %cst_10 : f32 to vector<2x1024xf32>
    %12 = arith.mulf %11, %5 : vector<2x1024xf32>
    %13 = math.tanh %12 : vector<2x1024xf32>
    %cst_11 = arith.constant 5.000000e-01 : f32
    %14 = vector.broadcast %cst_11 : f32 to vector<2x1024xf32>
    %15 = arith.mulf %14, %13 : vector<2x1024xf32>
    %cst_12 = arith.constant 5.000000e-01 : f32
    %16 = vector.broadcast %cst_12 : f32 to vector<2x1024xf32>
    %17 = arith.addf %15, %16 : vector<2x1024xf32>
    %18 = math.tanh %10 : vector<2x1024xf32>
    %19 = arith.mulf %17, %18 : vector<2x1024xf32>
    %c0_13 = arith.constant 0 : index
    %c0_14 = arith.constant 0 : index
    %20 = vector.load %arg5[%c0_13, %c0_14] : memref<2x1024xf32, #tpu.memory_space<vmem>>, vector<2x1024xf32>
    tpu.vector_store %arg5[%c0_13, %c0_14], %19 {strides = array<i32>} : memref<2x1024xf32, #tpu.memory_space<vmem>>, vector<2x1024xf32>,
    return
  }
}

module attributes {stable_mosaic.version = 11 : i64} {
  func.func @_cond_linear_kernel(%arg0: memref<2x4xbf16, #tpu.memory_space<vmem>>, %arg1: memref<4x61440xbf16, #tpu.memory_space<vmem>>, %arg2: memref<1x61440xf32, #tpu.memory_space<vmem>>, %arg3: memref<2x61440xf32, #tpu.memory_space<vmem>>) attributes {dimension_semantics = [], scalar_prefetch = 0 : i64, scratch_operands = 0 : i64, tpu.core_type = #tpu.core_type<tc>} {
    %c0 = arith.constant 0 : index
    %c0_0 = arith.constant 0 : index
    %0 = vector.load %arg0[%c0, %c0_0] : memref<2x4xbf16, #tpu.memory_space<vmem>>, vector<2x4xbf16>
    %c0_1 = arith.constant 0 : index
    %c0_2 = arith.constant 0 : index
    %1 = vector.load %arg1[%c0_1, %c0_2] : memref<4x61440xbf16, #tpu.memory_space<vmem>>, vector<4x61440xbf16>
    %cst = arith.constant dense<0.000000e+00> : vector<2x61440xf32>
    %2 = tpu.matmul %0, %1, %cst {dimension_numbers = #tpu.dot_dimension_numbers<[1], [0], [0], [1], [0, 0, 1, 1], [], []>} : vector<2x4xbf16>, vector<4x61440xbf16>, vector<2x61440xf32> -> vector<2x61440xf32>
    %c0_3 = arith.constant 0 : index
    %c0_4 = arith.constant 0 : index
    %3 = vector.load %arg2[%c0_3, %c0_4] : memref<1x61440xf32, #tpu.memory_space<vmem>>, vector<1x61440xf32>
    %4 = vector.broadcast %3 : vector<1x61440xf32> to vector<2x61440xf32>
    %5 = arith.addf %2, %4 : vector<2x61440xf32>
    %c0_5 = arith.constant 0 : index
    %c0_6 = arith.constant 0 : index
    %6 = vector.load %arg3[%c0_5, %c0_6] : memref<2x61440xf32, #tpu.memory_space<vmem>>, vector<2x61440xf32>
    tpu.vector_store %arg3[%c0_5, %c0_6], %5 {strides = array<i32>} : memref<2x61440xf32, #tpu.memory_space<vmem>>, vector<2x61440xf32>,
    return
  }
}

module attributes {stable_mosaic.version = 11 : i64} {
  func.func @_convt_glu_kernel(%arg0: i32, %arg1: i32, %arg2: memref<1x256x32xbf16, #tpu.memory_space<vmem>>, %arg3: memref<1x32x256xbf16, #tpu.memory_space<vmem>>, %arg4: memref<1x32x256xbf16, #tpu.memory_space<vmem>>, %arg5: memref<32x1xf32, #tpu.memory_space<vmem>>, %arg6: memref<32x1xf32, #tpu.memory_space<vmem>>, %arg7: memref<1x32x32xf32, #tpu.memory_space<vmem>>, %arg8: memref<1x32x32xf32, #tpu.memory_space<vmem>>, %arg9: memref<1x32x32xf32, #tpu.memory_space<vmem>>) attributes {dimension_semantics = [#tpu.dimension_semantics<parallel>, #tpu.dimension_semantics<parallel>], iteration_bounds = array<i64: 4, 1>, scalar_prefetch = 0 : i64, scratch_operands = 0 : i64, tpu.core_type = #tpu.core_type<tc>, window_params = [{transform_indices = @transform_0, window_bounds = array<i64: 1, 256, 32>}, {transform_indices = @transform_1, window_bounds = array<i64: 1, 32, 256>}, {transform_indices = @transform_2, window_bounds = array<i64: 1, 32, 256>}, {pipeline_mode = #tpu.pipeline_mode<synchronous>, transform_indices = @transform_3, window_bounds = array<i64: 32, 1>}, {pipeline_mode = #tpu.pipeline_mode<synchronous>, transform_indices = @transform_4, window_bounds = array<i64: 32, 1>}, {transform_indices = @transform_5, window_bounds = array<i64: 1, 32, 32>}, {transform_indices = @transform_6, window_bounds = array<i64: 1, 32, 32>}, {transform_indices = @transform_7, window_bounds = array<i64: 1, 32, 32>}]} {
    %c0 = arith.constant 0 : index
    %c0_0 = arith.constant 0 : index
    %c0_1 = arith.constant 0 : index
    %0 = vector.load %arg2[%c0, %c0_0, %c0_1] : memref<1x256x32xbf16, #tpu.memory_space<vmem>>, vector<1x256x32xbf16>
    %1 = vector.shape_cast %0 : vector<1x256x32xbf16> to vector<256x32xbf16>
    %c0_2 = arith.constant 0 : index
    %c0_3 = arith.constant 0 : index
    %c0_4 = arith.constant 0 : index
    %2 = vector.load %arg3[%c0_2, %c0_3, %c0_4] : memref<1x32x256xbf16, #tpu.memory_space<vmem>>, vector<1x32x256xbf16>
    %3 = vector.shape_cast %2 : vector<1x32x256xbf16> to vector<32x256xbf16>
    %cst = arith.constant dense<0.000000e+00> : vector<32x32xf32>
    %4 = tpu.matmul %3, %1, %cst {dimension_numbers = #tpu.dot_dimension_numbers<[1], [0], [0], [1], [0, 0, 1, 1], [], []>} : vector<32x256xbf16>, vector<256x32xbf16>, vector<32x32xf32> -> vector<32x32xf32>
    %c0_5 = arith.constant 0 : index
    %c0_6 = arith.constant 0 : index
    %5 = vector.load %arg5[%c0_5, %c0_6] : memref<32x1xf32, #tpu.memory_space<vmem>>, vector<32x1xf32>
    %6 = vector.broadcast %5 : vector<32x1xf32> to vector<32x32xf32>
    %7 = arith.addf %4, %6 : vector<32x32xf32>
    %c0_7 = arith.constant 0 : index
    %c0_8 = arith.constant 0 : index
    %c0_9 = arith.constant 0 : index
    %8 = vector.load %arg7[%c0_7, %c0_8, %c0_9] : memref<1x32x32xf32, #tpu.memory_space<vmem>>, vector<1x32x32xf32>
    %9 = vector.shape_cast %8 : vector<1x32x32xf32> to vector<32x32xf32>
    %10 = arith.addf %7, %9 : vector<32x32xf32>
    %c0_10 = arith.constant 0 : index
    %c0_11 = arith.constant 0 : index
    %c0_12 = arith.constant 0 : index
    %11 = vector.load %arg4[%c0_10, %c0_11, %c0_12] : memref<1x32x256xbf16, #tpu.memory_space<vmem>>, vector<1x32x256xbf16>
    %12 = vector.shape_cast %11 : vector<1x32x256xbf16> to vector<32x256xbf16>
    %cst_13 = arith.constant dense<0.000000e+00> : vector<32x32xf32>
    %13 = tpu.matmul %12, %1, %cst_13 {dimension_numbers = #tpu.dot_dimension_numbers<[1], [0], [0], [1], [0, 0, 1, 1], [], []>} : vector<32x256xbf16>, vector<256x32xbf16>, vector<32x32xf32> -> vector<32x32xf32>
    %c0_14 = arith.constant 0 : index
    %c0_15 = arith.constant 0 : index
    %14 = vector.load %arg6[%c0_14, %c0_15] : memref<32x1xf32, #tpu.memory_space<vmem>>, vector<32x1xf32>
    %15 = vector.broadcast %14 : vector<32x1xf32> to vector<32x32xf32>
    %16 = arith.addf %13, %15 : vector<32x32xf32>
    %c0_16 = arith.constant 0 : index
    %c0_17 = arith.constant 0 : index
    %c0_18 = arith.constant 0 : index
    %17 = vector.load %arg8[%c0_16, %c0_17, %c0_18] : memref<1x32x32xf32, #tpu.memory_space<vmem>>, vector<1x32x32xf32>
    %18 = vector.shape_cast %17 : vector<1x32x32xf32> to vector<32x32xf32>
    %19 = arith.addf %16, %18 : vector<32x32xf32>
    %cst_19 = arith.constant 5.000000e-01 : f32
    %20 = vector.broadcast %cst_19 : f32 to vector<32x32xf32>
    %21 = arith.mulf %20, %10 : vector<32x32xf32>
    %22 = math.tanh %21 : vector<32x32xf32>
    %cst_20 = arith.constant 5.000000e-01 : f32
    %23 = vector.broadcast %cst_20 : f32 to vector<32x32xf32>
    %24 = arith.mulf %23, %22 : vector<32x32xf32>
    %cst_21 = arith.constant 5.000000e-01 : f32
    %25 = vector.broadcast %cst_21 : f32 to vector<32x32xf32>
    %26 = arith.addf %24, %25 : vector<32x32xf32>
    %27 = math.tanh %19 : vector<32x32xf32>
    %28 = arith.mulf %26, %27 : vector<32x32xf32>
    %c0_22 = arith.constant 0 : index
    %c0_23 = arith.constant 0 : index
    %c0_24 = arith.constant 0 : index
    %29 = vector.load %arg9[%c0_22, %c0_23, %c0_24] : memref<1x32x32xf32, #tpu.memory_space<vmem>>, vector<1x32x32xf32>
    %30 = vector.shape_cast %29 : vector<1x32x32xf32> to vector<32x32xf32>
    %31 = vector.shape_cast %28 : vector<32x32xf32> to vector<1x32x32xf32>
    tpu.vector_store %arg9[%c0_22, %c0_23, %c0_24], %31 {strides = array<i32>} : memref<1x32x32xf32, #tpu.memory_space<vmem>>, vector<1x32x32xf32>,
    return
  }
  func.func @transform_0(%arg0: i32, %arg1: i32) -> (i32, i32, i32) {
    %c0_i32 = arith.constant 0 : i32
    %c0_i32_0 = arith.constant 0 : i32
    return %arg0, %c0_i32, %arg1 : i32, i32, i32
  }
  func.func @transform_1(%arg0: i32, %arg1: i32) -> (i32, i32, i32) {
    %c0_i32 = arith.constant 0 : i32
    %c0_i32_0 = arith.constant 0 : i32
    %c0_i32_1 = arith.constant 0 : i32
    return %arg0, %c0_i32, %c0_i32_0 : i32, i32, i32
  }
  func.func @transform_2(%arg0: i32, %arg1: i32) -> (i32, i32, i32) {
    %c0_i32 = arith.constant 0 : i32
    %c0_i32_0 = arith.constant 0 : i32
    %c0_i32_1 = arith.constant 0 : i32
    return %arg0, %c0_i32, %c0_i32_0 : i32, i32, i32
  }
  func.func @transform_3(%arg0: i32, %arg1: i32) -> (i32, i32) {
    %c0_i32 = arith.constant 0 : i32
    %c0_i32_0 = arith.constant 0 : i32
    %c0_i32_1 = arith.constant 0 : i32
    return %c0_i32, %c0_i32_0 : i32, i32
  }
  func.func @transform_4(%arg0: i32, %arg1: i32) -> (i32, i32) {
    %c0_i32 = arith.constant 0 : i32
    %c0_i32_0 = arith.constant 0 : i32
    %c0_i32_1 = arith.constant 0 : i32
    return %c0_i32, %c0_i32_0 : i32, i32
  }
  func.func @transform_5(%arg0: i32, %arg1: i32) -> (i32, i32, i32) {
    %c0_i32 = arith.constant 0 : i32
    %c0_i32_0 = arith.constant 0 : i32
    return %arg0, %c0_i32, %arg1 : i32, i32, i32
  }
  func.func @transform_6(%arg0: i32, %arg1: i32) -> (i32, i32, i32) {
    %c0_i32 = arith.constant 0 : i32
    %c0_i32_0 = arith.constant 0 : i32
    return %arg0, %c0_i32, %arg1 : i32, i32, i32
  }
  func.func @transform_7(%arg0: i32, %arg1: i32) -> (i32, i32, i32) {
    %c0_i32 = arith.constant 0 : i32
    %c0_i32_0 = arith.constant 0 : i32
    return %arg0, %c0_i32, %arg1 : i32, i32, i32
  }
}

module attributes {stable_mosaic.version = 11 : i64} {
  func.func @_convt_glu_kernel(%arg0: i32, %arg1: i32, %arg2: memref<1x128x128xbf16, #tpu.memory_space<vmem>>, %arg3: memref<1x16x128xbf16, #tpu.memory_space<vmem>>, %arg4: memref<1x16x128xbf16, #tpu.memory_space<vmem>>, %arg5: memref<16x1xf32, #tpu.memory_space<vmem>>, %arg6: memref<16x1xf32, #tpu.memory_space<vmem>>, %arg7: memref<1x16x128xf32, #tpu.memory_space<vmem>>, %arg8: memref<1x16x128xf32, #tpu.memory_space<vmem>>, %arg9: memref<1x16x128xf32, #tpu.memory_space<vmem>>) attributes {dimension_semantics = [#tpu.dimension_semantics<parallel>, #tpu.dimension_semantics<parallel>], iteration_bounds = array<i64: 4, 1>, scalar_prefetch = 0 : i64, scratch_operands = 0 : i64, tpu.core_type = #tpu.core_type<tc>, window_params = [{transform_indices = @transform_0, window_bounds = array<i64: 1, 128, 128>}, {transform_indices = @transform_1, window_bounds = array<i64: 1, 16, 128>}, {transform_indices = @transform_2, window_bounds = array<i64: 1, 16, 128>}, {pipeline_mode = #tpu.pipeline_mode<synchronous>, transform_indices = @transform_3, window_bounds = array<i64: 16, 1>}, {pipeline_mode = #tpu.pipeline_mode<synchronous>, transform_indices = @transform_4, window_bounds = array<i64: 16, 1>}, {transform_indices = @transform_5, window_bounds = array<i64: 1, 16, 128>}, {transform_indices = @transform_6, window_bounds = array<i64: 1, 16, 128>}, {transform_indices = @transform_7, window_bounds = array<i64: 1, 16, 128>}]} {
    %c0 = arith.constant 0 : index
    %c0_0 = arith.constant 0 : index
    %c0_1 = arith.constant 0 : index
    %0 = vector.load %arg2[%c0, %c0_0, %c0_1] : memref<1x128x128xbf16, #tpu.memory_space<vmem>>, vector<1x128x128xbf16>
    %1 = vector.shape_cast %0 : vector<1x128x128xbf16> to vector<128x128xbf16>
    %c0_2 = arith.constant 0 : index
    %c0_3 = arith.constant 0 : index
    %c0_4 = arith.constant 0 : index
    %2 = vector.load %arg3[%c0_2, %c0_3, %c0_4] : memref<1x16x128xbf16, #tpu.memory_space<vmem>>, vector<1x16x128xbf16>
    %3 = vector.shape_cast %2 : vector<1x16x128xbf16> to vector<16x128xbf16>
    %cst = arith.constant dense<0.000000e+00> : vector<16x128xf32>
    %4 = tpu.matmul %3, %1, %cst {dimension_numbers = #tpu.dot_dimension_numbers<[1], [0], [0], [1], [0, 0, 1, 1], [], []>} : vector<16x128xbf16>, vector<128x128xbf16>, vector<16x128xf32> -> vector<16x128xf32>
    %c0_5 = arith.constant 0 : index
    %c0_6 = arith.constant 0 : index
    %5 = vector.load %arg5[%c0_5, %c0_6] : memref<16x1xf32, #tpu.memory_space<vmem>>, vector<16x1xf32>
    %6 = vector.broadcast %5 : vector<16x1xf32> to vector<16x128xf32>
    %7 = arith.addf %4, %6 : vector<16x128xf32>
    %c0_7 = arith.constant 0 : index
    %c0_8 = arith.constant 0 : index
    %c0_9 = arith.constant 0 : index
    %8 = vector.load %arg7[%c0_7, %c0_8, %c0_9] : memref<1x16x128xf32, #tpu.memory_space<vmem>>, vector<1x16x128xf32>
    %9 = vector.shape_cast %8 : vector<1x16x128xf32> to vector<16x128xf32>
    %10 = arith.addf %7, %9 : vector<16x128xf32>
    %c0_10 = arith.constant 0 : index
    %c0_11 = arith.constant 0 : index
    %c0_12 = arith.constant 0 : index
    %11 = vector.load %arg4[%c0_10, %c0_11, %c0_12] : memref<1x16x128xbf16, #tpu.memory_space<vmem>>, vector<1x16x128xbf16>
    %12 = vector.shape_cast %11 : vector<1x16x128xbf16> to vector<16x128xbf16>
    %cst_13 = arith.constant dense<0.000000e+00> : vector<16x128xf32>
    %13 = tpu.matmul %12, %1, %cst_13 {dimension_numbers = #tpu.dot_dimension_numbers<[1], [0], [0], [1], [0, 0, 1, 1], [], []>} : vector<16x128xbf16>, vector<128x128xbf16>, vector<16x128xf32> -> vector<16x128xf32>
    %c0_14 = arith.constant 0 : index
    %c0_15 = arith.constant 0 : index
    %14 = vector.load %arg6[%c0_14, %c0_15] : memref<16x1xf32, #tpu.memory_space<vmem>>, vector<16x1xf32>
    %15 = vector.broadcast %14 : vector<16x1xf32> to vector<16x128xf32>
    %16 = arith.addf %13, %15 : vector<16x128xf32>
    %c0_16 = arith.constant 0 : index
    %c0_17 = arith.constant 0 : index
    %c0_18 = arith.constant 0 : index
    %17 = vector.load %arg8[%c0_16, %c0_17, %c0_18] : memref<1x16x128xf32, #tpu.memory_space<vmem>>, vector<1x16x128xf32>
    %18 = vector.shape_cast %17 : vector<1x16x128xf32> to vector<16x128xf32>
    %19 = arith.addf %16, %18 : vector<16x128xf32>
    %cst_19 = arith.constant 5.000000e-01 : f32
    %20 = vector.broadcast %cst_19 : f32 to vector<16x128xf32>
    %21 = arith.mulf %20, %10 : vector<16x128xf32>
    %22 = math.tanh %21 : vector<16x128xf32>
    %cst_20 = arith.constant 5.000000e-01 : f32
    %23 = vector.broadcast %cst_20 : f32 to vector<16x128xf32>
    %24 = arith.mulf %23, %22 : vector<16x128xf32>
    %cst_21 = arith.constant 5.000000e-01 : f32
    %25 = vector.broadcast %cst_21 : f32 to vector<16x128xf32>
    %26 = arith.addf %24, %25 : vector<16x128xf32>
    %27 = math.tanh %19 : vector<16x128xf32>
    %28 = arith.mulf %26, %27 : vector<16x128xf32>
    %c0_22 = arith.constant 0 : index
    %c0_23 = arith.constant 0 : index
    %c0_24 = arith.constant 0 : index
    %29 = vector.load %arg9[%c0_22, %c0_23, %c0_24] : memref<1x16x128xf32, #tpu.memory_space<vmem>>, vector<1x16x128xf32>
    %30 = vector.shape_cast %29 : vector<1x16x128xf32> to vector<16x128xf32>
    %31 = vector.shape_cast %28 : vector<16x128xf32> to vector<1x16x128xf32>
    tpu.vector_store %arg9[%c0_22, %c0_23, %c0_24], %31 {strides = array<i32>} : memref<1x16x128xf32, #tpu.memory_space<vmem>>, vector<1x16x128xf32>,
    return
  }
  func.func @transform_0(%arg0: i32, %arg1: i32) -> (i32, i32, i32) {
    %c0_i32 = arith.constant 0 : i32
    %c0_i32_0 = arith.constant 0 : i32
    return %arg0, %c0_i32, %arg1 : i32, i32, i32
  }
  func.func @transform_1(%arg0: i32, %arg1: i32) -> (i32, i32, i32) {
    %c0_i32 = arith.constant 0 : i32
    %c0_i32_0 = arith.constant 0 : i32
    %c0_i32_1 = arith.constant 0 : i32
    return %arg0, %c0_i32, %c0_i32_0 : i32, i32, i32
  }
  func.func @transform_2(%arg0: i32, %arg1: i32) -> (i32, i32, i32) {
    %c0_i32 = arith.constant 0 : i32
    %c0_i32_0 = arith.constant 0 : i32
    %c0_i32_1 = arith.constant 0 : i32
    return %arg0, %c0_i32, %c0_i32_0 : i32, i32, i32
  }
  func.func @transform_3(%arg0: i32, %arg1: i32) -> (i32, i32) {
    %c0_i32 = arith.constant 0 : i32
    %c0_i32_0 = arith.constant 0 : i32
    %c0_i32_1 = arith.constant 0 : i32
    return %c0_i32, %c0_i32_0 : i32, i32
  }
  func.func @transform_4(%arg0: i32, %arg1: i32) -> (i32, i32) {
    %c0_i32 = arith.constant 0 : i32
    %c0_i32_0 = arith.constant 0 : i32
    %c0_i32_1 = arith.constant 0 : i32
    return %c0_i32, %c0_i32_0 : i32, i32
  }
  func.func @transform_5(%arg0: i32, %arg1: i32) -> (i32, i32, i32) {
    %c0_i32 = arith.constant 0 : i32
    %c0_i32_0 = arith.constant 0 : i32
    return %arg0, %c0_i32, %arg1 : i32, i32, i32
  }
  func.func @transform_6(%arg0: i32, %arg1: i32) -> (i32, i32, i32) {
    %c0_i32 = arith.constant 0 : i32
    %c0_i32_0 = arith.constant 0 : i32
    return %arg0, %c0_i32, %arg1 : i32, i32, i32
  }
  func.func @transform_7(%arg0: i32, %arg1: i32) -> (i32, i32, i32) {
    %c0_i32 = arith.constant 0 : i32
    %c0_i32_0 = arith.constant 0 : i32
    return %arg0, %c0_i32, %arg1 : i32, i32, i32
  }
}

module attributes {stable_mosaic.version = 11 : i64} {
  func.func @_convt_glu_kernel(%arg0: i32, %arg1: i32, %arg2: memref<1x64x512xbf16, #tpu.memory_space<vmem>>, %arg3: memref<1x8x64xbf16, #tpu.memory_space<vmem>>, %arg4: memref<1x8x64xbf16, #tpu.memory_space<vmem>>, %arg5: memref<8x1xf32, #tpu.memory_space<vmem>>, %arg6: memref<8x1xf32, #tpu.memory_space<vmem>>, %arg7: memref<1x8x512xf32, #tpu.memory_space<vmem>>, %arg8: memref<1x8x512xf32, #tpu.memory_space<vmem>>, %arg9: memref<1x8x512xf32, #tpu.memory_space<vmem>>) attributes {dimension_semantics = [#tpu.dimension_semantics<parallel>, #tpu.dimension_semantics<parallel>], iteration_bounds = array<i64: 4, 1>, scalar_prefetch = 0 : i64, scratch_operands = 0 : i64, tpu.core_type = #tpu.core_type<tc>, window_params = [{transform_indices = @transform_0, window_bounds = array<i64: 1, 64, 512>}, {transform_indices = @transform_1, window_bounds = array<i64: 1, 8, 64>}, {transform_indices = @transform_2, window_bounds = array<i64: 1, 8, 64>}, {pipeline_mode = #tpu.pipeline_mode<synchronous>, transform_indices = @transform_3, window_bounds = array<i64: 8, 1>}, {pipeline_mode = #tpu.pipeline_mode<synchronous>, transform_indices = @transform_4, window_bounds = array<i64: 8, 1>}, {transform_indices = @transform_5, window_bounds = array<i64: 1, 8, 512>}, {transform_indices = @transform_6, window_bounds = array<i64: 1, 8, 512>}, {transform_indices = @transform_7, window_bounds = array<i64: 1, 8, 512>}]} {
    %c0 = arith.constant 0 : index
    %c0_0 = arith.constant 0 : index
    %c0_1 = arith.constant 0 : index
    %0 = vector.load %arg2[%c0, %c0_0, %c0_1] : memref<1x64x512xbf16, #tpu.memory_space<vmem>>, vector<1x64x512xbf16>
    %1 = vector.shape_cast %0 : vector<1x64x512xbf16> to vector<64x512xbf16>
    %c0_2 = arith.constant 0 : index
    %c0_3 = arith.constant 0 : index
    %c0_4 = arith.constant 0 : index
    %2 = vector.load %arg3[%c0_2, %c0_3, %c0_4] : memref<1x8x64xbf16, #tpu.memory_space<vmem>>, vector<1x8x64xbf16>
    %3 = vector.shape_cast %2 : vector<1x8x64xbf16> to vector<8x64xbf16>
    %cst = arith.constant dense<0.000000e+00> : vector<8x512xf32>
    %4 = tpu.matmul %3, %1, %cst {dimension_numbers = #tpu.dot_dimension_numbers<[1], [0], [0], [1], [0, 0, 1, 1], [], []>} : vector<8x64xbf16>, vector<64x512xbf16>, vector<8x512xf32> -> vector<8x512xf32>
    %c0_5 = arith.constant 0 : index
    %c0_6 = arith.constant 0 : index
    %5 = vector.load %arg5[%c0_5, %c0_6] : memref<8x1xf32, #tpu.memory_space<vmem>>, vector<8x1xf32>
    %6 = vector.broadcast %5 : vector<8x1xf32> to vector<8x512xf32>
    %7 = arith.addf %4, %6 : vector<8x512xf32>
    %c0_7 = arith.constant 0 : index
    %c0_8 = arith.constant 0 : index
    %c0_9 = arith.constant 0 : index
    %8 = vector.load %arg7[%c0_7, %c0_8, %c0_9] : memref<1x8x512xf32, #tpu.memory_space<vmem>>, vector<1x8x512xf32>
    %9 = vector.shape_cast %8 : vector<1x8x512xf32> to vector<8x512xf32>
    %10 = arith.addf %7, %9 : vector<8x512xf32>
    %c0_10 = arith.constant 0 : index
    %c0_11 = arith.constant 0 : index
    %c0_12 = arith.constant 0 : index
    %11 = vector.load %arg4[%c0_10, %c0_11, %c0_12] : memref<1x8x64xbf16, #tpu.memory_space<vmem>>, vector<1x8x64xbf16>
    %12 = vector.shape_cast %11 : vector<1x8x64xbf16> to vector<8x64xbf16>
    %cst_13 = arith.constant dense<0.000000e+00> : vector<8x512xf32>
    %13 = tpu.matmul %12, %1, %cst_13 {dimension_numbers = #tpu.dot_dimension_numbers<[1], [0], [0], [1], [0, 0, 1, 1], [], []>} : vector<8x64xbf16>, vector<64x512xbf16>, vector<8x512xf32> -> vector<8x512xf32>
    %c0_14 = arith.constant 0 : index
    %c0_15 = arith.constant 0 : index
    %14 = vector.load %arg6[%c0_14, %c0_15] : memref<8x1xf32, #tpu.memory_space<vmem>>, vector<8x1xf32>
    %15 = vector.broadcast %14 : vector<8x1xf32> to vector<8x512xf32>
    %16 = arith.addf %13, %15 : vector<8x512xf32>
    %c0_16 = arith.constant 0 : index
    %c0_17 = arith.constant 0 : index
    %c0_18 = arith.constant 0 : index
    %17 = vector.load %arg8[%c0_16, %c0_17, %c0_18] : memref<1x8x512xf32, #tpu.memory_space<vmem>>, vector<1x8x512xf32>
    %18 = vector.shape_cast %17 : vector<1x8x512xf32> to vector<8x512xf32>
    %19 = arith.addf %16, %18 : vector<8x512xf32>
    %cst_19 = arith.constant 5.000000e-01 : f32
    %20 = vector.broadcast %cst_19 : f32 to vector<8x512xf32>
    %21 = arith.mulf %20, %10 : vector<8x512xf32>
    %22 = math.tanh %21 : vector<8x512xf32>
    %cst_20 = arith.constant 5.000000e-01 : f32
    %23 = vector.broadcast %cst_20 : f32 to vector<8x512xf32>
    %24 = arith.mulf %23, %22 : vector<8x512xf32>
    %cst_21 = arith.constant 5.000000e-01 : f32
    %25 = vector.broadcast %cst_21 : f32 to vector<8x512xf32>
    %26 = arith.addf %24, %25 : vector<8x512xf32>
    %27 = math.tanh %19 : vector<8x512xf32>
    %28 = arith.mulf %26, %27 : vector<8x512xf32>
    %c0_22 = arith.constant 0 : index
    %c0_23 = arith.constant 0 : index
    %c0_24 = arith.constant 0 : index
    %29 = vector.load %arg9[%c0_22, %c0_23, %c0_24] : memref<1x8x512xf32, #tpu.memory_space<vmem>>, vector<1x8x512xf32>
    %30 = vector.shape_cast %29 : vector<1x8x512xf32> to vector<8x512xf32>
    %31 = vector.shape_cast %28 : vector<8x512xf32> to vector<1x8x512xf32>
    tpu.vector_store %arg9[%c0_22, %c0_23, %c0_24], %31 {strides = array<i32>} : memref<1x8x512xf32, #tpu.memory_space<vmem>>, vector<1x8x512xf32>,
    return
  }
  func.func @transform_0(%arg0: i32, %arg1: i32) -> (i32, i32, i32) {
    %c0_i32 = arith.constant 0 : i32
    %c0_i32_0 = arith.constant 0 : i32
    return %arg0, %c0_i32, %arg1 : i32, i32, i32
  }
  func.func @transform_1(%arg0: i32, %arg1: i32) -> (i32, i32, i32) {
    %c0_i32 = arith.constant 0 : i32
    %c0_i32_0 = arith.constant 0 : i32
    %c0_i32_1 = arith.constant 0 : i32
    return %arg0, %c0_i32, %c0_i32_0 : i32, i32, i32
  }
  func.func @transform_2(%arg0: i32, %arg1: i32) -> (i32, i32, i32) {
    %c0_i32 = arith.constant 0 : i32
    %c0_i32_0 = arith.constant 0 : i32
    %c0_i32_1 = arith.constant 0 : i32
    return %arg0, %c0_i32, %c0_i32_0 : i32, i32, i32
  }
  func.func @transform_3(%arg0: i32, %arg1: i32) -> (i32, i32) {
    %c0_i32 = arith.constant 0 : i32
    %c0_i32_0 = arith.constant 0 : i32
    %c0_i32_1 = arith.constant 0 : i32
    return %c0_i32, %c0_i32_0 : i32, i32
  }
  func.func @transform_4(%arg0: i32, %arg1: i32) -> (i32, i32) {
    %c0_i32 = arith.constant 0 : i32
    %c0_i32_0 = arith.constant 0 : i32
    %c0_i32_1 = arith.constant 0 : i32
    return %c0_i32, %c0_i32_0 : i32, i32
  }
  func.func @transform_5(%arg0: i32, %arg1: i32) -> (i32, i32, i32) {
    %c0_i32 = arith.constant 0 : i32
    %c0_i32_0 = arith.constant 0 : i32
    return %arg0, %c0_i32, %arg1 : i32, i32, i32
  }
  func.func @transform_6(%arg0: i32, %arg1: i32) -> (i32, i32, i32) {
    %c0_i32 = arith.constant 0 : i32
    %c0_i32_0 = arith.constant 0 : i32
    return %arg0, %c0_i32, %arg1 : i32, i32, i32
  }
  func.func @transform_7(%arg0: i32, %arg1: i32) -> (i32, i32, i32) {
    %c0_i32 = arith.constant 0 : i32
    %c0_i32_0 = arith.constant 0 : i32
    return %arg0, %c0_i32, %arg1 : i32, i32, i32
  }
}

module attributes {stable_mosaic.version = 11 : i64} {
  func.func @_convt_glu_kernel(%arg0: i32, %arg1: i32, %arg2: memref<1x32x2048xbf16, #tpu.memory_space<vmem>>, %arg3: memref<1x4x32xbf16, #tpu.memory_space<vmem>>, %arg4: memref<1x4x32xbf16, #tpu.memory_space<vmem>>, %arg5: memref<4x1xf32, #tpu.memory_space<vmem>>, %arg6: memref<4x1xf32, #tpu.memory_space<vmem>>, %arg7: memref<1x4x2048xf32, #tpu.memory_space<vmem>>, %arg8: memref<1x4x2048xf32, #tpu.memory_space<vmem>>, %arg9: memref<1x4x2048xf32, #tpu.memory_space<vmem>>) attributes {dimension_semantics = [#tpu.dimension_semantics<parallel>, #tpu.dimension_semantics<parallel>], iteration_bounds = array<i64: 4, 1>, scalar_prefetch = 0 : i64, scratch_operands = 0 : i64, tpu.core_type = #tpu.core_type<tc>, window_params = [{transform_indices = @transform_0, window_bounds = array<i64: 1, 32, 2048>}, {transform_indices = @transform_1, window_bounds = array<i64: 1, 4, 32>}, {transform_indices = @transform_2, window_bounds = array<i64: 1, 4, 32>}, {pipeline_mode = #tpu.pipeline_mode<synchronous>, transform_indices = @transform_3, window_bounds = array<i64: 4, 1>}, {pipeline_mode = #tpu.pipeline_mode<synchronous>, transform_indices = @transform_4, window_bounds = array<i64: 4, 1>}, {transform_indices = @transform_5, window_bounds = array<i64: 1, 4, 2048>}, {transform_indices = @transform_6, window_bounds = array<i64: 1, 4, 2048>}, {transform_indices = @transform_7, window_bounds = array<i64: 1, 4, 2048>}]} {
    %c0 = arith.constant 0 : index
    %c0_0 = arith.constant 0 : index
    %c0_1 = arith.constant 0 : index
    %0 = vector.load %arg2[%c0, %c0_0, %c0_1] : memref<1x32x2048xbf16, #tpu.memory_space<vmem>>, vector<1x32x2048xbf16>
    %1 = vector.shape_cast %0 : vector<1x32x2048xbf16> to vector<32x2048xbf16>
    %c0_2 = arith.constant 0 : index
    %c0_3 = arith.constant 0 : index
    %c0_4 = arith.constant 0 : index
    %2 = vector.load %arg3[%c0_2, %c0_3, %c0_4] : memref<1x4x32xbf16, #tpu.memory_space<vmem>>, vector<1x4x32xbf16>
    %3 = vector.shape_cast %2 : vector<1x4x32xbf16> to vector<4x32xbf16>
    %cst = arith.constant dense<0.000000e+00> : vector<4x2048xf32>
    %4 = tpu.matmul %3, %1, %cst {dimension_numbers = #tpu.dot_dimension_numbers<[1], [0], [0], [1], [0, 0, 1, 1], [], []>} : vector<4x32xbf16>, vector<32x2048xbf16>, vector<4x2048xf32> -> vector<4x2048xf32>
    %c0_5 = arith.constant 0 : index
    %c0_6 = arith.constant 0 : index
    %5 = vector.load %arg5[%c0_5, %c0_6] : memref<4x1xf32, #tpu.memory_space<vmem>>, vector<4x1xf32>
    %6 = vector.broadcast %5 : vector<4x1xf32> to vector<4x2048xf32>
    %7 = arith.addf %4, %6 : vector<4x2048xf32>
    %c0_7 = arith.constant 0 : index
    %c0_8 = arith.constant 0 : index
    %c0_9 = arith.constant 0 : index
    %8 = vector.load %arg7[%c0_7, %c0_8, %c0_9] : memref<1x4x2048xf32, #tpu.memory_space<vmem>>, vector<1x4x2048xf32>
    %9 = vector.shape_cast %8 : vector<1x4x2048xf32> to vector<4x2048xf32>
    %10 = arith.addf %7, %9 : vector<4x2048xf32>
    %c0_10 = arith.constant 0 : index
    %c0_11 = arith.constant 0 : index
    %c0_12 = arith.constant 0 : index
    %11 = vector.load %arg4[%c0_10, %c0_11, %c0_12] : memref<1x4x32xbf16, #tpu.memory_space<vmem>>, vector<1x4x32xbf16>
    %12 = vector.shape_cast %11 : vector<1x4x32xbf16> to vector<4x32xbf16>
    %cst_13 = arith.constant dense<0.000000e+00> : vector<4x2048xf32>
    %13 = tpu.matmul %12, %1, %cst_13 {dimension_numbers = #tpu.dot_dimension_numbers<[1], [0], [0], [1], [0, 0, 1, 1], [], []>} : vector<4x32xbf16>, vector<32x2048xbf16>, vector<4x2048xf32> -> vector<4x2048xf32>
    %c0_14 = arith.constant 0 : index
    %c0_15 = arith.constant 0 : index
    %14 = vector.load %arg6[%c0_14, %c0_15] : memref<4x1xf32, #tpu.memory_space<vmem>>, vector<4x1xf32>
    %15 = vector.broadcast %14 : vector<4x1xf32> to vector<4x2048xf32>
    %16 = arith.addf %13, %15 : vector<4x2048xf32>
    %c0_16 = arith.constant 0 : index
    %c0_17 = arith.constant 0 : index
    %c0_18 = arith.constant 0 : index
    %17 = vector.load %arg8[%c0_16, %c0_17, %c0_18] : memref<1x4x2048xf32, #tpu.memory_space<vmem>>, vector<1x4x2048xf32>
    %18 = vector.shape_cast %17 : vector<1x4x2048xf32> to vector<4x2048xf32>
    %19 = arith.addf %16, %18 : vector<4x2048xf32>
    %cst_19 = arith.constant 5.000000e-01 : f32
    %20 = vector.broadcast %cst_19 : f32 to vector<4x2048xf32>
    %21 = arith.mulf %20, %10 : vector<4x2048xf32>
    %22 = math.tanh %21 : vector<4x2048xf32>
    %cst_20 = arith.constant 5.000000e-01 : f32
    %23 = vector.broadcast %cst_20 : f32 to vector<4x2048xf32>
    %24 = arith.mulf %23, %22 : vector<4x2048xf32>
    %cst_21 = arith.constant 5.000000e-01 : f32
    %25 = vector.broadcast %cst_21 : f32 to vector<4x2048xf32>
    %26 = arith.addf %24, %25 : vector<4x2048xf32>
    %27 = math.tanh %19 : vector<4x2048xf32>
    %28 = arith.mulf %26, %27 : vector<4x2048xf32>
    %c0_22 = arith.constant 0 : index
    %c0_23 = arith.constant 0 : index
    %c0_24 = arith.constant 0 : index
    %29 = vector.load %arg9[%c0_22, %c0_23, %c0_24] : memref<1x4x2048xf32, #tpu.memory_space<vmem>>, vector<1x4x2048xf32>
    %30 = vector.shape_cast %29 : vector<1x4x2048xf32> to vector<4x2048xf32>
    %31 = vector.shape_cast %28 : vector<4x2048xf32> to vector<1x4x2048xf32>
    tpu.vector_store %arg9[%c0_22, %c0_23, %c0_24], %31 {strides = array<i32>} : memref<1x4x2048xf32, #tpu.memory_space<vmem>>, vector<1x4x2048xf32>,
    return
  }
  func.func @transform_0(%arg0: i32, %arg1: i32) -> (i32, i32, i32) {
    %c0_i32 = arith.constant 0 : i32
    %c0_i32_0 = arith.constant 0 : i32
    return %arg0, %c0_i32, %arg1 : i32, i32, i32
  }
  func.func @transform_1(%arg0: i32, %arg1: i32) -> (i32, i32, i32) {
    %c0_i32 = arith.constant 0 : i32
    %c0_i32_0 = arith.constant 0 : i32
    %c0_i32_1 = arith.constant 0 : i32
    return %arg0, %c0_i32, %c0_i32_0 : i32, i32, i32
  }
  func.func @transform_2(%arg0: i32, %arg1: i32) -> (i32, i32, i32) {
    %c0_i32 = arith.constant 0 : i32
    %c0_i32_0 = arith.constant 0 : i32
    %c0_i32_1 = arith.constant 0 : i32
    return %arg0, %c0_i32, %c0_i32_0 : i32, i32, i32
  }
  func.func @transform_3(%arg0: i32, %arg1: i32) -> (i32, i32) {
    %c0_i32 = arith.constant 0 : i32
    %c0_i32_0 = arith.constant 0 : i32
    %c0_i32_1 = arith.constant 0 : i32
    return %c0_i32, %c0_i32_0 : i32, i32
  }
  func.func @transform_4(%arg0: i32, %arg1: i32) -> (i32, i32) {
    %c0_i32 = arith.constant 0 : i32
    %c0_i32_0 = arith.constant 0 : i32
    %c0_i32_1 = arith.constant 0 : i32
    return %c0_i32, %c0_i32_0 : i32, i32
  }
  func.func @transform_5(%arg0: i32, %arg1: i32) -> (i32, i32, i32) {
    %c0_i32 = arith.constant 0 : i32
    %c0_i32_0 = arith.constant 0 : i32
    return %arg0, %c0_i32, %arg1 : i32, i32, i32
  }
  func.func @transform_6(%arg0: i32, %arg1: i32) -> (i32, i32, i32) {
    %c0_i32 = arith.constant 0 : i32
    %c0_i32_0 = arith.constant 0 : i32
    return %arg0, %c0_i32, %arg1 : i32, i32, i32
  }
  func.func @transform_7(%arg0: i32, %arg1: i32) -> (i32, i32, i32) {
    %c0_i32 = arith.constant 0 : i32
    %c0_i32_0 = arith.constant 0 : i32
    return %arg0, %c0_i32, %arg1 : i32, i32, i32
  }
}

module attributes {stable_mosaic.version = 11 : i64} {
  func.func @_convt_sig_kernel(%arg0: i32, %arg1: i32, %arg2: memref<1x16x8192xbf16, #tpu.memory_space<vmem>>, %arg3: memref<1x3x16xbf16, #tpu.memory_space<vmem>>, %arg4: memref<3x1xf32, #tpu.memory_space<vmem>>, %arg5: memref<1x3x8192xf32, #tpu.memory_space<vmem>>) attributes {dimension_semantics = [#tpu.dimension_semantics<parallel>, #tpu.dimension_semantics<parallel>], iteration_bounds = array<i64: 4, 1>, scalar_prefetch = 0 : i64, scratch_operands = 0 : i64, tpu.core_type = #tpu.core_type<tc>, window_params = [{transform_indices = @transform_0, window_bounds = array<i64: 1, 16, 8192>}, {transform_indices = @transform_1, window_bounds = array<i64: 1, 3, 16>}, {pipeline_mode = #tpu.pipeline_mode<synchronous>, transform_indices = @transform_2, window_bounds = array<i64: 3, 1>}, {transform_indices = @transform_3, window_bounds = array<i64: 1, 3, 8192>}]} {
    %c0 = arith.constant 0 : index
    %c0_0 = arith.constant 0 : index
    %c0_1 = arith.constant 0 : index
    %0 = vector.load %arg3[%c0, %c0_0, %c0_1] : memref<1x3x16xbf16, #tpu.memory_space<vmem>>, vector<1x3x16xbf16>
    %1 = vector.shape_cast %0 : vector<1x3x16xbf16> to vector<3x16xbf16>
    %c0_2 = arith.constant 0 : index
    %c0_3 = arith.constant 0 : index
    %c0_4 = arith.constant 0 : index
    %2 = vector.load %arg2[%c0_2, %c0_3, %c0_4] : memref<1x16x8192xbf16, #tpu.memory_space<vmem>>, vector<1x16x8192xbf16>
    %3 = vector.shape_cast %2 : vector<1x16x8192xbf16> to vector<16x8192xbf16>
    %cst = arith.constant dense<0.000000e+00> : vector<3x8192xf32>
    %4 = tpu.matmul %1, %3, %cst {dimension_numbers = #tpu.dot_dimension_numbers<[1], [0], [0], [1], [0, 0, 1, 1], [], []>} : vector<3x16xbf16>, vector<16x8192xbf16>, vector<3x8192xf32> -> vector<3x8192xf32>
    %c0_5 = arith.constant 0 : index
    %c0_6 = arith.constant 0 : index
    %5 = vector.load %arg4[%c0_5, %c0_6] : memref<3x1xf32, #tpu.memory_space<vmem>>, vector<3x1xf32>
    %6 = vector.broadcast %5 : vector<3x1xf32> to vector<3x8192xf32>
    %7 = arith.addf %4, %6 : vector<3x8192xf32>
    %cst_7 = arith.constant 5.000000e-01 : f32
    %8 = vector.broadcast %cst_7 : f32 to vector<3x8192xf32>
    %9 = arith.mulf %8, %7 : vector<3x8192xf32>
    %10 = math.tanh %9 : vector<3x8192xf32>
    %cst_8 = arith.constant 5.000000e-01 : f32
    %11 = vector.broadcast %cst_8 : f32 to vector<3x8192xf32>
    %12 = arith.mulf %11, %10 : vector<3x8192xf32>
    %cst_9 = arith.constant 5.000000e-01 : f32
    %13 = vector.broadcast %cst_9 : f32 to vector<3x8192xf32>
    %14 = arith.addf %12, %13 : vector<3x8192xf32>
    %c0_10 = arith.constant 0 : index
    %c0_11 = arith.constant 0 : index
    %c0_12 = arith.constant 0 : index
    %15 = vector.load %arg5[%c0_10, %c0_11, %c0_12] : memref<1x3x8192xf32, #tpu.memory_space<vmem>>, vector<1x3x8192xf32>
    %16 = vector.shape_cast %15 : vector<1x3x8192xf32> to vector<3x8192xf32>
    %17 = vector.shape_cast %14 : vector<3x8192xf32> to vector<1x3x8192xf32>
    tpu.vector_store %arg5[%c0_10, %c0_11, %c0_12], %17 {strides = array<i32>} : memref<1x3x8192xf32, #tpu.memory_space<vmem>>, vector<1x3x8192xf32>,
    return
  }
  func.func @transform_0(%arg0: i32, %arg1: i32) -> (i32, i32, i32) {
    %c0_i32 = arith.constant 0 : i32
    %c0_i32_0 = arith.constant 0 : i32
    return %arg0, %c0_i32, %arg1 : i32, i32, i32
  }
  func.func @transform_1(%arg0: i32, %arg1: i32) -> (i32, i32, i32) {
    %c0_i32 = arith.constant 0 : i32
    %c0_i32_0 = arith.constant 0 : i32
    %c0_i32_1 = arith.constant 0 : i32
    return %arg0, %c0_i32, %c0_i32_0 : i32, i32, i32
  }
  func.func @transform_2(%arg0: i32, %arg1: i32) -> (i32, i32) {
    %c0_i32 = arith.constant 0 : i32
    %c0_i32_0 = arith.constant 0 : i32
    %c0_i32_1 = arith.constant 0 : i32
    return %c0_i32, %c0_i32_0 : i32, i32
  }
  func.func @transform_3(%arg0: i32, %arg1: i32) -> (i32, i32, i32) {
    %c0_i32 = arith.constant 0 : i32
    %c0_i32_0 = arith.constant 0 : i32
    return %arg0, %c0_i32, %arg1 : i32, i32, i32
  }
}

</mosaic_0001>

<bundles_post_ra>
// kernel: _forward_impl.7
= control target key start
LH: loop header
LB: loop body
LE: loop exit
PB: predicated region body
PF: predicated region fallthrough
CT: control target
= control target key end

     0   :  { %10 = vsyncpa [#allocation3], 0  ;;  %s1152_s0 = inlined_call_operand.vmem [shape: bf16[2,20], index: 0, kind: input, shape index: {}]   ;;  %s1153_s1 = inlined_call_operand.hbm [shape: bf16[20,1024], index: 1, kind: input, shape index: {}]   ;;  %s1154_s2 = inlined_call_operand.hbm [shape: bf16[20,1024], index: 2, kind: input, shape index: {}]   ;;  %s1155_s3 = inlined_call_operand.hbm [shape: f32[1,1024], index: 3, kind: input, shape index: {}]   ;;  %s1156_s4 = inlined_call_operand.hbm [shape: f32[1,1024], index: 4, kind: input, shape index: {}]   ;;  %s1157_s5 = inlined_call_operand.vmem [shape: f32[2,1024], index: 5, kind: output, shape index: {}]  }
   0x1   :  { %11 = vsyncpa [#allocation5], 0 }
   0x2   :  { %12 = vsyncpa [#allocation8], 0  ;;  %s981_s18 = smov [#allocation4]   ;;  %s982_s20 = smov [#allocation2]  }
   0x3   :  { %s32_s19 = sshll.u32 %s981_s18, 4  ;;  %s20_s21 = sshll.u32 %s982_s20, 4  ;;  %s33_s19 = int_to_ptr.vmem [resolvable:$true] %s32_s19  ;;  %s1019_s21 = int_to_ptr.vmem [resolvable:$true] %s20_s21 }
   0x4   :  { %s887_s24 = scalar_lea.hbm %s1154_s2, 1536 }
   0x5   :  { %p888_p0 = scmp.ne.s32.totalorder %s1154_s2, %s887_s24  ;;  %p891_p1 = scmp.lt.u32.totalorder %s887_s24, %s1154_s2 }
   0x7   :  { %p893_p2 = pnand %p891_p1, %p888_p0 }
   0x9   :  { %896 = shalt.err (!%p893_p2)
}
   0xa   :  { %s897_s29 = scalar_lea.vmem %s33_s19, 1536  ;;  %p902_p4 = scmp.lt.s32.totalorder %s33_s19, %s33_s19 }
   0xb   :  { %p898_p3 = scmp.ne.s32.totalorder %s33_s19, %s897_s29  ;;  %p903_p5 = scmp.lt.s32.totalorder %s897_s29, %s897_s29 }
   0xd   :  { %p904_p6 = por %p903_p5, %p902_p4 }
   0xf   :  { %p905_p7 = pnand %p904_p6, %p898_p3 }
  0x11   :  { %908 = shalt.err (!%p905_p7)
}
  0x12   :  { %s983_s30 = smov 512   ;;  %s984_s6 = smov 32  }
  0x13   :  { %38 = dma.hbm_to_vmem [thread:$0]  %s1154_s2, 1536, %s33_s19, [#allocation5], %s983_s30, %s983_s30, %s984_s6  }
  0x14   :  { %s909_s11 = scalar_lea.hbm %s1153_s1, 1536 }
  0x15   :  { %p910_p8 = scmp.ne.s32.totalorder %s1153_s1, %s909_s11  ;;  %p913_p9 = scmp.lt.u32.totalorder %s909_s11, %s1153_s1 }
  0x17   :  { %p915_p10 = pnand %p913_p9, %p910_p8 }
  0x19   :  { %918 = shalt.err (!%p915_p10)
}
  0x1a   :  { %s919_s16 = scalar_lea.vmem %s1019_s21, 1536  ;;  %p924_p12 = scmp.lt.s32.totalorder %s1019_s21, %s1019_s21 }
  0x1b   :  { %p920_p11 = scmp.ne.s32.totalorder %s1019_s21, %s919_s16  ;;  %p925_p13 = scmp.lt.s32.totalorder %s919_s16, %s919_s16 }
  0x1d   :  { %p926_p0 = por %p925_p13, %p924_p12 }
  0x1f   :  { %p927_p1 = pnand %p926_p0, %p920_p11 }
  0x21   :  { %930 = shalt.err (!%p927_p1)
}
  0x22   :  { %26 = dma.hbm_to_vmem [thread:$0]  %s1153_s1, 1536, %s1019_s21, [#allocation3], %s983_s30, %s983_s30, %s984_s6  }
  0x23   :  { %s985_s18 = smov [#allocation6]   ;;  %s986_s20 = smov [#allocation7]  }
  0x24   :  { %s45_s19 = sshll.u32 %s985_s18, 4  ;;  %s55_s22 = sshll.u32 %s986_s20, 4  ;;  %s46_s19 = int_to_ptr.vmem [resolvable:$true] %s45_s19  ;;  %s56_s22 = int_to_ptr.vmem [resolvable:$true] %s55_s22 }
  0x25   :  { %s931_s25 = scalar_lea.hbm %s1155_s3, 128 }
  0x26   :  { %p932_p2 = scmp.ne.s32.totalorder %s1155_s3, %s931_s25  ;;  %p935_p3 = scmp.lt.u32.totalorder %s931_s25, %s1155_s3 }
  0x28   :  { %p937_p4 = pnand %p935_p3, %p932_p2 }
  0x2a   :  { %940 = shalt.err (!%p937_p4)
}
  0x2b   :  { %s941_s1 = scalar_lea.vmem %s46_s19, 128  ;;  %p946_p6 = scmp.lt.s32.totalorder %s46_s19, %s46_s19 }
  0x2c   :  { %p942_p5 = scmp.ne.s32.totalorder %s46_s19, %s941_s1  ;;  %p947_p7 = scmp.lt.s32.totalorder %s941_s1, %s941_s1 }
  0x2e   :  { %p948_p8 = por %p947_p7, %p946_p6 }
  0x30   :  { %p949_p9 = pnand %p948_p8, %p942_p5 }
  0x32   :  { %952 = shalt.err (!%p949_p9)
}
  0x33   :  { %48 = dma.hbm_to_vmem [thread:$0]  %s1155_s3, 128, %s46_s19, [#allocation5]  }
  0x34   :  { %s953_s8 = scalar_lea.hbm %s1156_s4, 128 }
  0x35   :  { %p954_p10 = scmp.ne.s32.totalorder %s1156_s4, %s953_s8  ;;  %p957_p11 = scmp.lt.u32.totalorder %s953_s8, %s1156_s4 }
  0x37   :  { %p959_p12 = pnand %p957_p11, %p954_p10 }
  0x39   :  { %962 = shalt.err (!%p959_p12)
}
  0x3a   :  { %s963_s13 = scalar_lea.vmem %s56_s22, 128  ;;  %p968_p0 = scmp.lt.s32.totalorder %s56_s22, %s56_s22 }
  0x3b   :  { %p964_p13 = scmp.ne.s32.totalorder %s56_s22, %s963_s13  ;;  %p969_p1 = scmp.lt.s32.totalorder %s963_s13, %s963_s13 }
  0x3d   :  { %p970_p2 = por %p969_p1, %p968_p0 }
  0x3f   :  { %p971_p3 = pnand %p970_p2, %p964_p13 }
  0x41   :  { %974 = shalt.err (!%p971_p3)
}
  0x42   :  { %58 = dma.hbm_to_vmem [thread:$0]  %s1156_s4, 128, %s56_s22, [#allocation8]  }
  0x43   :  { %975 = dma.done.wait [#allocation3], 1536  }
  0x44   :  { %976 = vsyncadd [#allocation3], 4294965760 }
  0x45   :  { %977 = dma.done.wait [#allocation5], 1664  }
  0x46   :  { %978 = vsyncadd [#allocation5], 4294965632 }
  0x47   :  { %979 = dma.done.wait [#allocation8], 128  }
  0x48   :  { %980 = vsyncadd [#allocation8], 4294967168  ;;  %v987_v0 = vmov 0   ;;  %v73_v1 = vld [vmem:[#allocation2] sm:$0xff]  ;;  %v74_v3 = vld [vmem:[#allocation2 + $0x8] sm:$0xff]  ;;  %vm191_vm0 = vcmask 1041408  }
  0x49   :  { %248 = vmatprep.mubr.bf16.mxu0 %v987_v0  ;;  %289 = vmatprep.mubr.bf16.mxu1 %v987_v0  ;;  %v77_v2 = vld [vmem:[#allocation2 + $0x20] sm:$0xff]  ;;  %v78_v5 = vld [vmem:[#allocation2 + $0x28] sm:$0xff]  ;;  %v75_v13 = vld [vmem:[#allocation2 + $0x10] sm:$0xff]  ;;  %vm187_vm1 = vcmask 162816  }
  0x4a   :  { %v784_v4 = vcombine.high %v73_v1, %v77_v2  ;;  %v783_v6 = vcombine.low %v73_v1, %v77_v2  ;;  %v81_v7 = vld [vmem:[#allocation2 + $0x40] sm:$0x33]  ;;  %v82_v8 = vld [vmem:[#allocation2 + $0x48] sm:$0x33]  ;;  %v786_v9 = vcombine.high %v74_v3, %v78_v5  ;;  %v785_v10 = vcombine.low %v74_v3, %v78_v5  ;;  %v79_v14 = vld [vmem:[#allocation2 + $0x30] sm:$0xff] }
  0x4b   :  { %v792_v11 = vcombine.high %v81_v7, %v81_v7  ;;  %v794_v12 = vcombine.high %v82_v8, %v82_v8  ;;  %v791_v15 = vcombine.low %v81_v7, %v81_v7  ;;  %v793_v16 = vcombine.low %v82_v8, %v82_v8  ;;  %v76_v17 = vld [vmem:[#allocation2 + $0x18] sm:$0xff]  ;;  %v83_v23 = vld [vmem:[#allocation2 + $0x50] sm:$0x33]  ;;  %v1083_v25 = vld [vmem:[%s1152_s0] sm:$0x1] }
  0x4c   :  { %216 = vmatprep.subr.bf16.mxu0 %v784_v4  ;;  %v80_v18 = vld [vmem:[#allocation2 + $0x38] sm:$0xff]  ;;  %257 = vmatprep.subr.bf16.mxu1 %v786_v9  ;;  %v788_v20 = vcombine.high %v75_v13, %v79_v14  ;;  %v787_v26 = vcombine.low %v75_v13, %v79_v14  ;;  %v796_v28 = vcombine.high %v83_v23, %v83_v23  ;;  %v380_v32 = vld [vmem:[#allocation4] sm:$0xff]  ;;  %v381_v34 = vld [vmem:[#allocation4 + $0x8] sm:$0xff]  ;;  %v87_v3 = vlaneseq }
  0x4d   :  { %217 = vmatpush1.bf16.msra.mxu0 %v783_v6  ;;  %258 = vmatpush1.bf16.msra.mxu1 %v785_v10  ;;  %v193_v19 = vsel %vm191_vm0, %v791_v15, 0  ;;  %v199_v21 = vsel %vm191_vm0, %v793_v16, 0  ;;  %v790_v22 = vcombine.high %v76_v17, %v80_v18  ;;  %v84_v24 = vld [vmem:[#allocation2 + $0x58] sm:$0x33]  ;;  %v789_v27 = vcombine.low %v76_v17, %v80_v18  ;;  %v384_v33 = vld [vmem:[#allocation4 + $0x20] sm:$0xff]  ;;  %v385_v35 = vld [vmem:[#allocation4 + $0x28] sm:$0xff] }
  0x4e   :  { %799 = vmatprep.subr.msk.bf16.mxu0 %vm191_vm0, %v792_v11  ;;  %801 = vmatprep.subr.msk.bf16.mxu1 %vm191_vm0, %v794_v12  ;;  %v795_v29 = vcombine.low %v83_v23, %v83_v23  ;;  %v798_v30 = vcombine.high %v84_v24, %v84_v24  ;;  %v797_v31 = vcombine.low %v84_v24, %v84_v24  ;;  %v388_v40 = vld [vmem:[#allocation4 + $0x40] sm:$0x33]  ;;  %v389_v41 = vld [vmem:[#allocation4 + $0x48] sm:$0x33]  ;;  %v382_v48 = vld [vmem:[#allocation4 + $0x10] sm:$0xff]  ;;  %v1119_v4 = vshrl.u32 %v87_v3, 7 }
  0x4f   :  { %v808_v37 = vcombine.high %v380_v32, %v384_v33  ;;  %v810_v39 = vcombine.high %v381_v34, %v385_v35  ;;  %v807_v42 = vcombine.low %v380_v32, %v384_v33  ;;  %v809_v43 = vcombine.low %v381_v34, %v385_v35  ;;  %v386_v49 = vld [vmem:[#allocation4 + $0x30] sm:$0xff]  ;;  %v383_v50 = vld [vmem:[#allocation4 + $0x18] sm:$0xff]  ;;  %v85_v6 = vld [vmem:[#allocation6] sm:$0xff] }
  0x50   :  { %v205_v36 = vsel %vm191_vm0, %v795_v29, 0  ;;  %v211_v38 = vsel %vm191_vm0, %v797_v31, 0  ;;  %v816_v44 = vcombine.high %v388_v40, %v388_v40  ;;  %v815_v45 = vcombine.low %v388_v40, %v388_v40  ;;  %v387_v51 = vld [vmem:[#allocation4 + $0x38] sm:$0xff]  ;;  %v390_v56 = vld [vmem:[#allocation4 + $0x50] sm:$0x33] }
  0x51   :  { %219 = vmatpush1.bf16.msra.mxu0 %v193_v19  ;;  %260 = vmatpush1.bf16.msra.mxu1 %v199_v21  ;;  %v818_v46 = vcombine.high %v389_v41, %v389_v41  ;;  %v817_v47 = vcombine.low %v389_v41, %v389_v41  ;;  %v812_v53 = vcombine.high %v382_v48, %v386_v49  ;;  %v391_v57 = vld [vmem:[#allocation4 + $0x58] sm:$0x33]  ;;  %v89_v5 = vsub.s32 0, %v1119_v4 }
  0x52   :  { %298 = vmatprep.subr.bf16.mxu0 %v788_v20  ;;  %339 = vmatprep.subr.bf16.mxu1 %v790_v22  ;;  %v495_v52 = vsel %vm191_vm0, %v815_v45, 0  ;;  %v814_v55 = vcombine.high %v383_v50, %v387_v51  ;;  %v811_v58 = vcombine.low %v382_v48, %v386_v49  ;;  %v813_v59 = vcombine.low %v383_v50, %v387_v51  ;;  %v392_v45 = vld [vmem:[#allocation7] sm:$0xff] }
  0x53   :  { %v501_v54 = vsel %vm191_vm0, %v817_v47, 0  ;;  %v820_v60 = vcombine.high %v390_v56, %v390_v56  ;;  %v819_v61 = vcombine.low %v390_v56, %v390_v56  ;;  %v822_v62 = vcombine.high %v391_v57, %v391_v57 }
  0x54   :  { %800 = vmatmul.mubr.msk.bf16.vlgmr.msra.gmra.mrb[0].mxu0 %vm187_vm1, %v1083_v25  ;;  %802 = vmatmul.mubr.msk.bf16.vlgmr.msra.gmra.mrb[0].mxu1 %vm187_vm1, %v1083_v25  ;;  %v821_v63 = vcombine.low %v391_v57, %v391_v57  ;;  %v97_v7 = vsub.s32 2, %v1119_v4  ;;  %v93_v8 = vsub.s32 1, %v1119_v4  ;;  %v90_v9 = vrot.slane %v85_v6, %v89_v5 }
  0x55   :  { %299 = vmatpush1.bf16.msra.mxu0 %v787_v26  ;;  %340 = vmatpush1.bf16.msra.mxu1 %v789_v27  ;;  %v507_v1 = vsel %vm191_vm0, %v819_v61, 0  ;;  %v105_v15 = vsub.s32 4, %v1119_v4  ;;  %v113_v19 = vsub.s32 6, %v1119_v4  ;;  %v109_v20 = vsub.s32 5, %v1119_v4 }
  0x56   :  { %803 = vmatprep.subr.msk.bf16.mxu0 %vm191_vm0, %v796_v28  ;;  %805 = vmatprep.subr.msk.bf16.mxu1 %vm191_vm0, %v798_v30  ;;  %v513_v2 = vsel %vm191_vm0, %v821_v63, 0  ;;  %v98_v11 = vrot.slane %v85_v6, %v97_v7  ;;  %v94_v13 = vrot.slane %v85_v6, %v93_v8  ;;  %v117_v24 = vsub.s32 7, %v1119_v4 }
  0x57   :  { %330 = vmatprep.mubr.bf16.mxu0 %v987_v0  ;;  %371 = vmatprep.mubr.bf16.mxu1 %v987_v0  ;;  %v106_v28 = vrot.slane %v85_v6, %v105_v15  ;;  %v114_v30 = vrot.slane %v85_v6, %v113_v19  ;;  %v110_v31 = vrot.slane %v85_v6, %v109_v20 }
  0x58   :  { %v118_v33 = vrot.slane %v85_v6, %v117_v24  ;;  %v401_v56 = vrot.slane %v392_v45, %v93_v8 }
  0x59   :  { %301 = vmatpush1.bf16.msra.mxu0 %v205_v36  ;;  %342 = vmatpush1.bf16.msra.mxu1 %v211_v38 }
  0x5a   :  { %518 = vmatprep.subr.bf16.mxu0 %v808_v37  ;;  %559 = vmatprep.subr.bf16.mxu1 %v810_v39 }
  0x5c   :  { %804 = vmatmul.mubr.msk.bf16.vlgmr.msra.gmra.mrb[4].mxu0 %vm187_vm1, %v1083_v25  ;;  %806 = vmatmul.mubr.msk.bf16.vlgmr.msra.gmra.mrb[4].mxu1 %vm187_vm1, %v1083_v25 }
  0x5d   :  { %519 = vmatpush1.bf16.msra.mxu0 %v807_v42  ;;  %560 = vmatpush1.bf16.msra.mxu1 %v809_v43 }
  0x5e   :  { %823 = vmatprep.subr.msk.bf16.mxu0 %vm191_vm0, %v816_v44  ;;  %825 = vmatprep.subr.msk.bf16.mxu1 %vm191_vm0, %v818_v46 }
  0x5f   :  { %550 = vmatprep.mubr.bf16.mxu0 %v987_v0  ;;  %591 = vmatprep.mubr.bf16.mxu1 %v987_v0 }
  0x61   :  { %521 = vmatpush1.bf16.msra.mxu0 %v495_v52  ;;  %562 = vmatpush1.bf16.msra.mxu1 %v501_v54 }
  0x62   :  { %600 = vmatprep.subr.bf16.mxu0 %v812_v53  ;;  %641 = vmatprep.subr.bf16.mxu1 %v814_v55  ;;  %v397_v53 = vrot.slane %v392_v45, %v89_v5  ;;  %v405_v55 = vrot.slane %v392_v45, %v97_v7 }
  0x64   :  { %824 = vmatmul.mubr.msk.bf16.vlgmr.msra.gmra.mrb[8].mxu0 %vm187_vm1, %v1083_v25  ;;  %826 = vmatmul.mubr.msk.bf16.vlgmr.msra.gmra.mrb[8].mxu1 %vm187_vm1, %v1083_v25 }
  0x65   :  { %601 = vmatpush1.bf16.msra.mxu0 %v811_v58  ;;  %642 = vmatpush1.bf16.msra.mxu1 %v813_v59 }
  0x66   :  { %827 = vmatprep.subr.msk.bf16.mxu0 %vm191_vm0, %v820_v60  ;;  %829 = vmatprep.subr.msk.bf16.mxu1 %vm191_vm0, %v822_v62 }
  0x67   :  { %632 = vmatprep.mubr.bf16.mxu0 %v987_v0  ;;  %673 = vmatprep.mubr.bf16.mxu1 %v987_v0  ;;  %v101_v0 = vsub.s32 3, %v1119_v4 }
  0x69   :  { %603 = vmatpush1.bf16.msra.mxu0 %v507_v1  ;;  %644 = vmatpush1.bf16.msra.mxu1 %v513_v2  ;;  %v102_v16 = vrot.slane %v85_v6, %v101_v0  ;;  %v409_v57 = vrot.slane %v392_v45, %v101_v0  ;;  %v413_v0 = vrot.slane %v392_v45, %v105_v15 }
  0x6c   :  { %828 = vmatmul.mubr.msk.bf16.vlgmr.msra.gmra.mrb[12].mxu0 %vm187_vm1, %v1083_v25  ;;  %830 = vmatmul.mubr.msk.bf16.vlgmr.msra.gmra.mrb[12].mxu1 %vm187_vm1, %v1083_v25 }
 0x127   :  { %v250_v10 = vpop.f32.mrb[0].mxu0  ;;  %v291_v12 = vpop.f32.mrb[0].mxu1 }
 0x128   :  { %v252_v14 = vpop.f32.mrb[1].mxu0  ;;  %v293_v17 = vpop.f32.mrb[1].mxu1  ;;  %v251_v21 = vadd.f32 %v250_v10, %v90_v9  ;;  %v292_v25 = vadd.f32 %v291_v12, %v98_v11  ;;  %v421_v10 = vrot.slane %v392_v45, %v113_v19  ;;  %v417_v11 = vrot.slane %v392_v45, %v109_v20 }
 0x129   :  { %v254_v18 = vpop.f32.mrb[2].mxu0  ;;  %v295_v22 = vpop.f32.mrb[2].mxu1  ;;  %v253_v27 = vadd.f32 %v252_v14, %v94_v13  ;;  %v294_v29 = vadd.f32 %v293_v17, %v102_v16  ;;  %v425_v13 = vrot.slane %v392_v45, %v117_v24  ;;  %v988_v17 = vmov 1983009808  }
 0x12a   :  { %v255_v23 = vpop.f32.mrb[3].mxu0  ;;  %v296_v26 = vpop.f32.mrb[3].mxu1  ;;  %v682_v32 = vmul.f32 0.5, %v251_v21  ;;  %v684_v34 = vmul.f32 0.5, %v292_v25  ;;  %v741_v18 = vunpack.c.l.s4 %v988_v17 }
 0x12b   :  { %v683_v36 = vmul.f32 0.5, %v253_v27  ;;  %v685_v40 = vmul.f32 0.5, %v294_v29 }
 0x12c   :  { %855 = vtanh.f32 %v682_v32 }
 0x12d   :  { %857 = vtanh.f32 %v684_v34 }
 0x12e   :  { %859 = vtanh.f32 %v683_v36 }
 0x12f   :  { %v332_v35 = vpop.f32.mrb[4].mxu0  ;;  %v373_v38 = vpop.f32.mrb[4].mxu1  ;;  %861 = vtanh.f32 %v685_v40 }
 0x130   :  { %v333_v37 = vadd.f32 %v332_v35, %v106_v28  ;;  %v334_v39 = vpop.f32.mrb[5].mxu0  ;;  %v374_v41 = vadd.f32 %v373_v38, %v114_v30  ;;  %v375_v43 = vpop.f32.mrb[5].mxu1 }
 0x131   :  { %v335_v42 = vadd.f32 %v334_v39, %v110_v31  ;;  %v336_v44 = vpop.f32.mrb[6].mxu0  ;;  %v376_v47 = vadd.f32 %v375_v43, %v118_v33  ;;  %v377_v48 = vpop.f32.mrb[6].mxu1 }
 0x132   :  { %v686_v46 = vmul.f32 0.5, %v333_v37  ;;  %v337_v49 = vpop.f32.mrb[7].mxu0  ;;  %v688_v50 = vmul.f32 0.5, %v374_v41  ;;  %v378_v51 = vpop.f32.mrb[7].mxu1  ;;  %v742_v37 = vunpack.c.0.s8 %v741_v18 }
 0x133   :  { %v687_v52 = vmul.f32 0.5, %v335_v42  ;;  %v689_v54 = vmul.f32 0.5, %v376_v47 }
 0x134   :  { %863 = vtanh.f32 %v686_v46 }
 0x135   :  { %865 = vtanh.f32 %v688_v50  ;;  %v745_v50 = vsub.s32 %v742_v37, %v1119_v4 }
 0x136   :  { %867 = vtanh.f32 %v687_v52  ;;  %v856_v8 = vpop.eup %855 }
 0x137   :  { %v552_v58 = vpop.f32.mrb[8].mxu0  ;;  %v593_v60 = vpop.f32.mrb[8].mxu1  ;;  %869 = vtanh.f32 %v689_v54  ;;  %v698_v16 = vmul.f32 0.5, %v856_v8 }
 0x138   :  { %v553_v59 = vadd.f32 %v552_v58, %v397_v53  ;;  %v554_v61 = vpop.f32.mrb[9].mxu0  ;;  %v594_v62 = vadd.f32 %v593_v60, %v405_v55  ;;  %v595_v1 = vpop.f32.mrb[9].mxu1 }
 0x139   :  { %v555_v63 = vadd.f32 %v554_v61, %v401_v56  ;;  %v556_v2 = vpop.f32.mrb[10].mxu0  ;;  %v596_v3 = vadd.f32 %v595_v1, %v409_v57  ;;  %v597_v5 = vpop.f32.mrb[10].mxu1  ;;  %v706_v36 = vadd.f32 0.5, %v698_v16 }
 0x13a   :  { %871 = vtanh.f32 %v553_v59  ;;  %v557_v6 = vpop.f32.mrb[11].mxu0  ;;  %v598_v7 = vpop.f32.mrb[11].mxu1 }
 0x13b   :  { %873 = vtanh.f32 %v594_v62  ;;  %v858_v9 = vpop.eup %857 }
 0x13c   :  { %875 = vtanh.f32 %v555_v63  ;;  %v860_v12 = vpop.eup %859  ;;  %v700_v23 = vmul.f32 0.5, %v858_v9 }
 0x13d   :  { %877 = vtanh.f32 %v596_v3  ;;  %v862_v14 = vpop.eup %861  ;;  %v699_v28 = vmul.f32 0.5, %v860_v12 }
 0x13e   :  { %v864_v22 = vpop.eup %863  ;;  %v701_v32 = vmul.f32 0.5, %v862_v14  ;;  %v708_v40 = vadd.f32 0.5, %v700_v23 }
 0x13f   :  { %v634_v21 = vpop.f32.mrb[12].mxu0  ;;  %v675_v25 = vpop.f32.mrb[12].mxu1  ;;  %v707_v42 = vadd.f32 0.5, %v699_v28  ;;  %v702_v48 = vmul.f32 0.5, %v864_v22 }
 0x140   :  { %v635_v15 = vadd.f32 %v634_v21, %v413_v0  ;;  %v636_v26 = vpop.f32.mrb[13].mxu0  ;;  %v866_v27 = vpop.eup %865  ;;  %v676_v19 = vadd.f32 %v675_v25, %v421_v10  ;;  %v709_v45 = vadd.f32 0.5, %v701_v32 }
 0x141   :  { %v637_v29 = vadd.f32 %v636_v26, %v417_v11  ;;  %v677_v30 = vpop.f32.mrb[13].mxu1  ;;  %v638_v20 = vpop.f32.mrb[14].mxu0  ;;  %v704_v51 = vmul.f32 0.5, %v866_v27  ;;  %v710_v57 = vadd.f32 0.5, %v702_v48 }
 0x142   :  { %v868_v31 = vpop.eup %867  ;;  %879 = vtanh.f32 %v635_v15  ;;  %v678_v24 = vadd.f32 %v677_v30, %v425_v13  ;;  %v679_v33 = vpop.f32.mrb[14].mxu1 }
 0x143   :  { %v639_v34 = vpop.f32.mrb[15].mxu0  ;;  %v870_v35 = vpop.eup %869  ;;  %881 = vtanh.f32 %v676_v19  ;;  %v703_v53 = vmul.f32 0.5, %v868_v31  ;;  %v712_v60 = vadd.f32 0.5, %v704_v51 }
 0x144   :  { %v680_v38 = vpop.f32.mrb[15].mxu1  ;;  %v872_v39 = vpop.eup %871  ;;  %883 = vtanh.f32 %v637_v29  ;;  %v705_v55 = vmul.f32 0.5, %v870_v35 }
 0x145   :  { %v874_v41 = vpop.eup %873  ;;  %v722_v43 = vmul.f32 %v872_v39, %v706_v36  ;;  %885 = vtanh.f32 %v678_v24  ;;  %v711_v63 = vadd.f32 0.5, %v703_v53 }
 0x146   :  { %v876_v44 = vpop.eup %875  ;;  %v724_v46 = vmul.f32 %v874_v41, %v708_v40  ;;  %v713_v3 = vadd.f32 0.5, %v705_v55 }
 0x147   :  { %v878_v47 = vpop.eup %877  ;;  %v723_v49 = vmul.f32 %v876_v44, %v707_v42 }
 0x148   :  { %v725_v52 = vmul.f32 %v878_v47, %v709_v45 }
 0x149   :  { %v738_v54 = vcombine.low %v722_v43, %v723_v49 }
 0x14a   :  { %v739_v56 = vcombine.low %v724_v46, %v725_v52 }
 0x14b   :  { %v746_v58 = vrot.slane %v738_v54, %v745_v50 }
 0x14c   :  { %v880_v59 = vpop.eup %879  ;;  %v753_v61 = vrot.slane %v739_v56, %v745_v50 }
 0x14d   :  { %v882_v62 = vpop.eup %881  ;;  %v726_v1 = vmul.f32 %v880_v59, %v710_v57 }
 0x14e   :  { %v884_v2 = vpop.eup %883  ;;  %v754_v5 = vcombine.low %v746_v58, %v753_v61  ;;  %v728_v6 = vmul.f32 %v882_v62, %v712_v60 }
 0x14f   :  { %v886_v7 = vpop.eup %885  ;;  %v727_v4 = vmul.f32 %v884_v2, %v711_v63 }
 0x150   :  { %774 = vst [vmem:[%s1157_s5] sm:$0xff] %v754_v5  ;;  %v729_v8 = vmul.f32 %v886_v7, %v713_v3 }
 0x151   :  { %v755_v0 = vcombine.low %v726_v1, %v727_v4 }
 0x152   :  { %v756_v9 = vcombine.low %v728_v6, %v729_v8 }
 0x153   :  { %v763_v10 = vrot.slane %v755_v0, %v745_v50 }
 0x154   :  { %v770_v11 = vrot.slane %v756_v9, %v745_v50 }
 0x156   :  { %v771_v12 = vcombine.low %v763_v10, %v770_v11 }
 0x158   :  { %775 = vst [vmem:[%s1157_s5 + $0x8] sm:$0xff] %v771_v12 }
 0x159   :  { %780 = vsyncpa [#allocation3], 1 }
 0x15a   :  { %781 = vsyncpa [#allocation5], 1 }
 0x15b   :  { %782 = vsyncpa [#allocation8], 1 }

// kernel: _forward_impl.8
= control target key start
LH: loop header
LB: loop body
LE: loop exit
PB: predicated region body
PF: predicated region fallthrough
CT: control target
= control target key end

     0   :  { %8 = vsyncpa [#allocation3], 0  ;;  %s22647_s0 = inlined_call_operand.vmem [shape: bf16[2,4], index: 0, kind: input, shape index: {}]   ;;  %s22648_s1 = inlined_call_operand.hbm [shape: bf16[4,61440], index: 1, kind: input, shape index: {}]   ;;  %s22649_s2 = inlined_call_operand.hbm [shape: f32[1,61440], index: 2, kind: input, shape index: {}]   ;;  %s22650_s3 = inlined_call_operand.vmem [shape: f32[2,61440], index: 3, kind: output, shape index: {}]  }
   0x1   :  { %9 = vsyncpa [#allocation5], 0  ;;  %s19550_s12 = smov [#allocation2]   ;;  %s19551_s14 = smov [#allocation4]  }
   0x2   :  { %s18_s13 = sshll.u32 %s19550_s12, 4  ;;  %s28_s15 = sshll.u32 %s19551_s14, 4  ;;  %s19_s13 = int_to_ptr.vmem [resolvable:$true] %s18_s13  ;;  %s29_s15 = int_to_ptr.vmem [resolvable:$true] %s28_s15 }
   0x3   :  { %s19502_s18 = scalar_lea.hbm %s22648_s1, 15360 }
   0x4   :  { %p19503_p0 = scmp.ne.s32.totalorder %s22648_s1, %s19502_s18  ;;  %p19506_p1 = scmp.lt.u32.totalorder %s19502_s18, %s22648_s1 }
   0x6   :  { %p19508_p2 = pnand %p19506_p1, %p19503_p0 }
   0x8   :  { %19511 = shalt.err (!%p19508_p2)
}
   0x9   :  { %s19512_s23 = scalar_lea.vmem %s19_s13, 15360  ;;  %p19517_p4 = scmp.lt.s32.totalorder %s19_s13, %s19_s13 }
   0xa   :  { %p19513_p3 = scmp.ne.s32.totalorder %s19_s13, %s19512_s23  ;;  %p19518_p5 = scmp.lt.s32.totalorder %s19512_s23, %s19512_s23 }
   0xc   :  { %p19519_p6 = por %p19518_p5, %p19517_p4 }
   0xe   :  { %p19520_p7 = pnand %p19519_p6, %p19513_p3 }
  0x10   :  { %19523 = shalt.err (!%p19520_p7)
}
  0x11   :  { %21 = dma.hbm_to_vmem [thread:$0]  %s22648_s1, 15360, %s19_s13, [#allocation3]  }
  0x12   :  { %s19524_s28 = scalar_lea.hbm %s22649_s2, 7680 }
  0x13   :  { %p19525_p8 = scmp.ne.s32.totalorder %s22649_s2, %s19524_s28  ;;  %p19528_p9 = scmp.lt.u32.totalorder %s19524_s28, %s22649_s2 }
  0x15   :  { %p19530_p10 = pnand %p19528_p9, %p19525_p8 }
  0x17   :  { %19533 = shalt.err (!%p19530_p10)
}
  0x18   :  { %s19534_s6 = scalar_lea.vmem %s29_s15, 7680  ;;  %p19539_p12 = scmp.lt.s32.totalorder %s29_s15, %s29_s15 }
  0x19   :  { %p19535_p11 = scmp.ne.s32.totalorder %s29_s15, %s19534_s6  ;;  %p19540_p13 = scmp.lt.s32.totalorder %s19534_s6, %s19534_s6 }
  0x1b   :  { %p19541_p0 = por %p19540_p13, %p19539_p12 }
  0x1d   :  { %p19542_p1 = pnand %p19541_p0, %p19535_p11 }
  0x1f   :  { %19545 = shalt.err (!%p19542_p1)
}
  0x20   :  { %31 = dma.hbm_to_vmem [thread:$0]  %s22649_s2, 7680, %s29_s15, [#allocation5]  }
  0x21   :  { %19546 = dma.done.wait [#allocation3], 15360  }
  0x22   :  { %19547 = vsyncadd [#allocation3], 4294951936 }
  0x23   :  { %19548 = dma.done.wait [#allocation5], 7680  }
  0x24   :  { %19549 = vsyncadd [#allocation5], 4294959616  ;;  %v280_v0 = vlaneseq  ;;  %v19552_v1 = vmov 1983009808   ;;  %v19553_v3 = vmov 0   ;;  %v40_v7 = vld [vmem:[#allocation2] sm:$0xff] }
  0x25   :  { %v2802_v2 = vunpack.c.l.s4 %v19552_v1  ;;  %6317 = vmatprep.mubr.bf16.mxu0 %v19553_v3  ;;  %6358 = vmatprep.mubr.bf16.mxu1 %v19553_v3  ;;  %vm4844_vm0 = vcmask 1041408   ;;  %v41_v8 = vld [vmem:[#allocation2 + $0x8] sm:$0xff]  ;;  %v2800_v10 = vcombine.high %v40_v7, %v40_v7  ;;  %v42_v13 = vld [vmem:[#allocation2 + $0x10] sm:$0xff]  ;;  %v19617_v24 = vld [vmem:[%s22647_s0] sm:$0x1]  ;;  %vm4840_vm1 = vcmask 31744  }
  0x26   :  { %v19600_v4 = vshrl.u32 %v280_v0, 7  ;;  %v2817_v12 = vcombine.high %v41_v8, %v41_v8  ;;  %v2834_v15 = vcombine.high %v42_v13, %v42_v13  ;;  %v43_v26 = vld [vmem:[#allocation2 + $0x18] sm:$0xff]  ;;  %v44_v34 = vld [vmem:[#allocation2 + $0x20] sm:$0xff]  ;;  %v45_v42 = vld [vmem:[#allocation2 + $0x28] sm:$0xff] }
  0x27   :  { %v2803_v5 = vunpack.c.0.s8 %v2802_v2  ;;  %v2851_v31 = vcombine.high %v43_v26, %v43_v26  ;;  %v2868_v39 = vcombine.high %v44_v34, %v44_v34  ;;  %v2885_v47 = vcombine.high %v45_v42, %v45_v42  ;;  %v46_v50 = vld [vmem:[#allocation2 + $0x30] sm:$0xff]  ;;  %v47_v58 = vld [vmem:[#allocation2 + $0x38] sm:$0xff]  ;;  %v48_v2 = vld [vmem:[#allocation2 + $0x40] sm:$0xff] }
  0x28   :  { %v2902_v55 = vcombine.high %v46_v50, %v46_v50  ;;  %v2919_v63 = vcombine.high %v47_v58, %v47_v58 }
  0x29   :  { %v19603_v6 = vsub.s32 %v2803_v5, %v19600_v4 }
  0x2b   :  { %v2807_v9 = vrot.slane %v40_v7, %v19603_v6  ;;  %v2824_v11 = vrot.slane %v41_v8, %v19603_v6  ;;  %v2841_v14 = vrot.slane %v42_v13, %v19603_v6  ;;  %v2814_v18 = vrot.slane %v2800_v10, %v19603_v6  ;;  %v49_v13 = vld [vmem:[#allocation2 + $0x48] sm:$0xff] }
  0x2c   :  { %v2831_v20 = vrot.slane %v2817_v12, %v19603_v6  ;;  %v2848_v23 = vrot.slane %v2834_v15, %v19603_v6  ;;  %v2858_v32 = vrot.slane %v43_v26, %v19603_v6  ;;  %v2865_v33 = vrot.slane %v2851_v31, %v19603_v6 }
  0x2d   :  { %v2815_v16 = vcombine.high %v2807_v9, %v2807_v9  ;;  %v4846_v17 = vsel %vm4844_vm0, %v2807_v9, 0  ;;  %v2832_v19 = vcombine.high %v2824_v11, %v2824_v11  ;;  %v2816_v21 = vcombine.high %v2814_v18, %v2814_v18 }
  0x2e   :  { %v4852_v22 = vsel %vm4844_vm0, %v2814_v18, 0  ;;  %v2833_v25 = vcombine.high %v2831_v20, %v2831_v20  ;;  %v4858_v27 = vsel %vm4844_vm0, %v2824_v11, 0  ;;  %v2849_v28 = vcombine.high %v2841_v14, %v2841_v14 }
  0x2f   :  { %18891 = vmatprep.subr.msk.bf16.mxu0 %vm4844_vm0, %v2815_v16  ;;  %18893 = vmatprep.subr.msk.bf16.mxu1 %vm4844_vm0, %v2816_v21  ;;  %v4864_v29 = vsel %vm4844_vm0, %v2831_v20, 0  ;;  %v2850_v30 = vcombine.high %v2848_v23, %v2848_v23  ;;  %v4870_v35 = vsel %vm4844_vm0, %v2841_v14, 0  ;;  %v2866_v36 = vcombine.high %v2858_v32, %v2858_v32  ;;  %v50_v21 = vld [vmem:[#allocation2 + $0x50] sm:$0xff] }
  0x30   :  { %6286 = vmatpush1.bf16.msra.mxu0 %v4846_v17  ;;  %6327 = vmatpush1.bf16.msra.mxu1 %v4852_v22  ;;  %v4876_v37 = vsel %vm4844_vm0, %v2848_v23, 0  ;;  %v2867_v38 = vcombine.high %v2865_v33, %v2865_v33  ;;  %v2875_v40 = vrot.slane %v44_v34, %v19603_v6  ;;  %v2882_v41 = vrot.slane %v2868_v39, %v19603_v6 }
  0x31   :  { %18895 = vmatprep.subr.msk.bf16.mxu0 %vm4844_vm0, %v2832_v19  ;;  %18897 = vmatprep.subr.msk.bf16.mxu1 %vm4844_vm0, %v2833_v25  ;;  %v4882_v43 = vsel %vm4844_vm0, %v2858_v32, 0  ;;  %v4888_v45 = vsel %vm4844_vm0, %v2865_v33, 0  ;;  %v2892_v48 = vrot.slane %v45_v42, %v19603_v6  ;;  %v2899_v49 = vrot.slane %v2885_v47, %v19603_v6 }
  0x32   :  { %v2883_v44 = vcombine.high %v2875_v40, %v2875_v40  ;;  %v2884_v46 = vcombine.high %v2882_v41, %v2882_v41  ;;  %v4894_v51 = vsel %vm4844_vm0, %v2875_v40, 0  ;;  %v4900_v53 = vsel %vm4844_vm0, %v2882_v41, 0 }
  0x33   :  { %18892 = vmatmul.mubr.msk.bf16.vlgmr.msra.gmra.mrb[0].mxu0 %vm4840_vm1, %v19617_v24  ;;  %18894 = vmatmul.mubr.msk.bf16.vlgmr.msra.gmra.mrb[0].mxu1 %vm4840_vm1, %v19617_v24  ;;  %v2900_v52 = vcombine.high %v2892_v48, %v2892_v48  ;;  %v2901_v54 = vcombine.high %v2899_v49, %v2899_v49  ;;  %v2909_v56 = vrot.slane %v46_v50, %v19603_v6  ;;  %v4906_v59 = vsel %vm4844_vm0, %v2892_v48, 0 }
  0x34   :  { %6368 = vmatpush1.bf16.msra.mxu0 %v4858_v27  ;;  %6399 = vmatprep.mubr.bf16.mxu0 %v19553_v3  ;;  %v2916_v57 = vrot.slane %v2902_v55, %v19603_v6  ;;  %v4912_v61 = vsel %vm4844_vm0, %v2899_v49, 0  ;;  %v2926_v0 = vrot.slane %v47_v58, %v19603_v6  ;;  %v2933_v1 = vrot.slane %v2919_v63, %v19603_v6 }
  0x35   :  { %18899 = vmatprep.subr.msk.bf16.mxu0 %vm4844_vm0, %v2849_v28  ;;  %6409 = vmatpush1.bf16.msra.mxu1 %v4864_v29  ;;  %v2917_v60 = vcombine.high %v2909_v56, %v2909_v56  ;;  %v4918_v5 = vsel %vm4844_vm0, %v2909_v56, 0  ;;  %v2936_v10 = vcombine.high %v48_v2, %v48_v2  ;;  %v2943_v11 = vrot.slane %v48_v2, %v19603_v6 }
  0x36   :  { %6440 = vmatprep.mubr.bf16.mxu1 %v19553_v3  ;;  %18901 = vmatprep.subr.msk.bf16.mxu1 %vm4844_vm0, %v2850_v30  ;;  %v2918_v62 = vcombine.high %v2916_v57, %v2916_v57  ;;  %v2934_v7 = vcombine.high %v2926_v0, %v2926_v0  ;;  %v4924_v8 = vsel %vm4844_vm0, %v2916_v57, 0  ;;  %v2935_v9 = vcombine.high %v2933_v1, %v2933_v1  ;;  %v51_v30 = vld [vmem:[#allocation2 + $0x58] sm:$0xff] }
  0x37   :  { %v2950_v12 = vrot.slane %v2936_v10, %v19603_v6  ;;  %v4930_v14 = vsel %vm4844_vm0, %v2926_v0, 0  ;;  %v2951_v15 = vcombine.high %v2943_v11, %v2943_v11  ;;  %v4936_v16 = vsel %vm4844_vm0, %v2933_v1, 0 }
  0x38   :  { %v2953_v18 = vcombine.high %v49_v13, %v49_v13  ;;  %v2960_v19 = vrot.slane %v49_v13, %v19603_v6  ;;  %v4942_v22 = vsel %vm4844_vm0, %v2943_v11, 0  ;;  %v2970_v27 = vcombine.high %v50_v21, %v50_v21 }
  0x39   :  { %v2952_v17 = vcombine.high %v2950_v12, %v2950_v12  ;;  %v4948_v25 = vsel %vm4844_vm0, %v2950_v12, 0  ;;  %v2977_v28 = vrot.slane %v50_v21, %v19603_v6 }
  0x3a   :  { %v2967_v20 = vrot.slane %v2953_v18, %v19603_v6  ;;  %v2968_v23 = vcombine.high %v2960_v19, %v2960_v19  ;;  %v2984_v29 = vrot.slane %v2970_v27, %v19603_v6  ;;  %v4954_v31 = vsel %vm4844_vm0, %v2960_v19, 0 }
  0x3b   :  { %18896 = vmatmul.mubr.msk.bf16.vlgmr.msra.gmra.mrb[4].mxu0 %vm4840_vm1, %v19617_v24  ;;  %18898 = vmatmul.mubr.msk.bf16.vlgmr.msra.gmra.mrb[4].mxu1 %vm4840_vm1, %v19617_v24  ;;  %v2985_v32 = vcombine.high %v2977_v28, %v2977_v28  ;;  %v4966_v39 = vsel %vm4844_vm0, %v2977_v28, 0 }
  0x3c   :  { %6450 = vmatpush1.bf16.msra.mxu0 %v4870_v35  ;;  %6481 = vmatprep.mubr.bf16.mxu0 %v19553_v3  ;;  %v2969_v26 = vcombine.high %v2967_v20, %v2967_v20  ;;  %v4960_v33 = vsel %vm4844_vm0, %v2967_v20, 0  ;;  %v2986_v34 = vcombine.high %v2984_v29, %v2984_v29  ;;  %v2987_v35 = vcombine.high %v51_v30, %v51_v30 }
  0x3d   :  { %18903 = vmatprep.subr.msk.bf16.mxu0 %vm4844_vm0, %v2866_v36  ;;  %6491 = vmatpush1.bf16.msra.mxu1 %v4876_v37  ;;  %v2994_v36 = vrot.slane %v51_v30, %v19603_v6  ;;  %v4972_v41 = vsel %vm4844_vm0, %v2984_v29, 0 }
  0x3e   :  { %6522 = vmatprep.mubr.bf16.mxu1 %v19553_v3  ;;  %18905 = vmatprep.subr.msk.bf16.mxu1 %vm4844_vm0, %v2867_v38  ;;  %v3001_v37 = vrot.slane %v2987_v35, %v19603_v6  ;;  %v52_v38 = vld [vmem:[#allocation2 + $0x60] sm:$0xff] }
  0x3f   :  { %v3002_v40 = vcombine.high %v2994_v36, %v2994_v36  ;;  %v4978_v47 = vsel %vm4844_vm0, %v2994_v36, 0 }
  0x40   :  { %v3003_v42 = vcombine.high %v3001_v37, %v3001_v37  ;;  %v4984_v49 = vsel %vm4844_vm0, %v3001_v37, 0 }
  0x43   :  { %18900 = vmatmul.mubr.msk.bf16.vlgmr.msra.gmra.mrb[8].mxu0 %vm4840_vm1, %v19617_v24  ;;  %18902 = vmatmul.mubr.msk.bf16.vlgmr.msra.gmra.mrb[8].mxu1 %vm4840_vm1, %v19617_v24 }
  0x44   :  { %6532 = vmatpush1.bf16.msra.mxu0 %v4882_v43  ;;  %6563 = vmatprep.mubr.bf16.mxu0 %v19553_v3  ;;  %v3004_v43 = vcombine.high %v52_v38, %v52_v38 }
  0x45   :  { %18907 = vmatprep.subr.msk.bf16.mxu0 %vm4844_vm0, %v2883_v44  ;;  %6573 = vmatpush1.bf16.msra.mxu1 %v4888_v45  ;;  %v3011_v44 = vrot.slane %v52_v38, %v19603_v6 }
  0x46   :  { %6604 = vmatprep.mubr.bf16.mxu1 %v19553_v3  ;;  %18909 = vmatprep.subr.msk.bf16.mxu1 %vm4844_vm0, %v2884_v46  ;;  %v3018_v45 = vrot.slane %v3004_v43, %v19603_v6  ;;  %v53_v46 = vld [vmem:[#allocation2 + $0x68] sm:$0xff] }
  0x47   :  { %v3019_v48 = vcombine.high %v3011_v44, %v3011_v44  ;;  %v4990_v55 = vsel %vm4844_vm0, %v3011_v44, 0 }
  0x48   :  { %v3020_v50 = vcombine.high %v3018_v45, %v3018_v45  ;;  %v4996_v57 = vsel %vm4844_vm0, %v3018_v45, 0 }
  0x4b   :  { %18904 = vmatmul.mubr.msk.bf16.vlgmr.msra.gmra.mrb[12].mxu0 %vm4840_vm1, %v19617_v24  ;;  %18906 = vmatmul.mubr.msk.bf16.vlgmr.msra.gmra.mrb[12].mxu1 %vm4840_vm1, %v19617_v24 }
  0x4c   :  { %6614 = vmatpush1.bf16.msra.mxu0 %v4894_v51  ;;  %6645 = vmatprep.mubr.bf16.mxu0 %v19553_v3  ;;  %v3021_v51 = vcombine.high %v53_v46, %v53_v46 }
  0x4d   :  { %18911 = vmatprep.subr.msk.bf16.mxu0 %vm4844_vm0, %v2900_v52  ;;  %6655 = vmatpush1.bf16.msra.mxu1 %v4900_v53  ;;  %v3028_v52 = vrot.slane %v53_v46, %v19603_v6 }
  0x4e   :  { %6686 = vmatprep.mubr.bf16.mxu1 %v19553_v3  ;;  %18913 = vmatprep.subr.msk.bf16.mxu1 %vm4844_vm0, %v2901_v54  ;;  %v3035_v53 = vrot.slane %v3021_v51, %v19603_v6  ;;  %v54_v54 = vld [vmem:[#allocation2 + $0x70] sm:$0xff] }
  0x4f   :  { %v3036_v56 = vcombine.high %v3028_v52, %v3028_v52  ;;  %v5002_v63 = vsel %vm4844_vm0, %v3028_v52, 0 }
  0x50   :  { %v3037_v58 = vcombine.high %v3035_v53, %v3035_v53  ;;  %v5008_v1 = vsel %vm4844_vm0, %v3035_v53, 0 }
  0x53   :  { %18908 = vmatmul.mubr.msk.bf16.vlgmr.msra.gmra.mrb[16].mxu0 %vm4840_vm1, %v19617_v24  ;;  %18910 = vmatmul.mubr.msk.bf16.vlgmr.msra.gmra.mrb[16].mxu1 %vm4840_vm1, %v19617_v24 }
  0x54   :  { %6696 = vmatpush1.bf16.msra.mxu0 %v4906_v59  ;;  %6727 = vmatprep.mubr.bf16.mxu0 %v19553_v3  ;;  %v3038_v59 = vcombine.high %v54_v54, %v54_v54 }
  0x55   :  { %18915 = vmatprep.subr.msk.bf16.mxu0 %vm4844_vm0, %v2917_v60  ;;  %6737 = vmatpush1.bf16.msra.mxu1 %v4912_v61  ;;  %v3045_v60 = vrot.slane %v54_v54, %v19603_v6 }
  0x56   :  { %6768 = vmatprep.mubr.bf16.mxu1 %v19553_v3  ;;  %18917 = vmatprep.subr.msk.bf16.mxu1 %vm4844_vm0, %v2918_v62  ;;  %v3052_v61 = vrot.slane %v3038_v59, %v19603_v6  ;;  %v55_v62 = vld [vmem:[#allocation2 + $0x78] sm:$0xff] }
  0x57   :  { %v3053_v0 = vcombine.high %v3045_v60, %v3045_v60  ;;  %v5014_v10 = vsel %vm4844_vm0, %v3045_v60, 0 }
  0x58   :  { %v3054_v2 = vcombine.high %v3052_v61, %v3052_v61  ;;  %v5020_v12 = vsel %vm4844_vm0, %v3052_v61, 0 }
  0x5b   :  { %18912 = vmatmul.mubr.msk.bf16.vlgmr.msra.gmra.mrb[20].mxu0 %vm4840_vm1, %v19617_v24  ;;  %18914 = vmatmul.mubr.msk.bf16.vlgmr.msra.gmra.mrb[20].mxu1 %vm4840_vm1, %v19617_v24 }
  0x5c   :  { %6778 = vmatpush1.bf16.msra.mxu0 %v4918_v5  ;;  %6809 = vmatprep.mubr.bf16.mxu0 %v19553_v3  ;;  %v3055_v5 = vcombine.high %v55_v62, %v55_v62 }
  0x5d   :  { %18919 = vmatprep.subr.msk.bf16.mxu0 %vm4844_vm0, %v2934_v7  ;;  %6819 = vmatpush1.bf16.msra.mxu1 %v4924_v8  ;;  %v3062_v7 = vrot.slane %v55_v62, %v19603_v6 }
  0x5e   :  { %6850 = vmatprep.mubr.bf16.mxu1 %v19553_v3  ;;  %18921 = vmatprep.subr.msk.bf16.mxu1 %vm4844_vm0, %v2935_v9  ;;  %v3069_v8 = vrot.slane %v3055_v5, %v19603_v6  ;;  %v56_v9 = vld [vmem:[#allocation2 + $0x80] sm:$0xff] }
  0x5f   :  { %v3070_v11 = vcombine.high %v3062_v7, %v3062_v7  ;;  %v5026_v18 = vsel %vm4844_vm0, %v3062_v7, 0 }
  0x60   :  { %v3071_v13 = vcombine.high %v3069_v8, %v3069_v8  ;;  %v5032_v20 = vsel %vm4844_vm0, %v3069_v8, 0 }
  0x63   :  { %18916 = vmatmul.mubr.msk.bf16.vlgmr.msra.gmra.mrb[24].mxu0 %vm4840_vm1, %v19617_v24  ;;  %18918 = vmatmul.mubr.msk.bf16.vlgmr.msra.gmra.mrb[24].mxu1 %vm4840_vm1, %v19617_v24 }
  0x64   :  { %6860 = vmatpush1.bf16.msra.mxu0 %v4930_v14  ;;  %6891 = vmatprep.mubr.bf16.mxu0 %v19553_v3  ;;  %v3072_v14 = vcombine.high %v56_v9, %v56_v9 }
  0x65   :  { %18923 = vmatprep.subr.msk.bf16.mxu0 %vm4844_vm0, %v2951_v15  ;;  %6901 = vmatpush1.bf16.msra.mxu1 %v4936_v16  ;;  %v3079_v15 = vrot.slane %v56_v9, %v19603_v6 }
  0x66   :  { %6932 = vmatprep.mubr.bf16.mxu1 %v19553_v3  ;;  %18925 = vmatprep.subr.msk.bf16.mxu1 %vm4844_vm0, %v2952_v17  ;;  %v3086_v16 = vrot.slane %v3072_v14, %v19603_v6  ;;  %v57_v17 = vld [vmem:[#allocation2 + $0x88] sm:$0xff] }
  0x67   :  { %v3087_v19 = vcombine.high %v3079_v15, %v3079_v15  ;;  %v5038_v27 = vsel %vm4844_vm0, %v3079_v15, 0 }
  0x68   :  { %v3088_v21 = vcombine.high %v3086_v16, %v3086_v16  ;;  %v5044_v29 = vsel %vm4844_vm0, %v3086_v16, 0 }
  0x6b   :  { %18920 = vmatmul.mubr.msk.bf16.vlgmr.msra.gmra.mrb[28].mxu0 %vm4840_vm1, %v19617_v24  ;;  %18922 = vmatmul.mubr.msk.bf16.vlgmr.msra.gmra.mrb[28].mxu1 %vm4840_vm1, %v19617_v24 }
  0x6c   :  { %6942 = vmatpush1.bf16.msra.mxu0 %v4942_v22  ;;  %6973 = vmatprep.mubr.bf16.mxu0 %v19553_v3  ;;  %v3089_v22 = vcombine.high %v57_v17, %v57_v17 }
  0x6d   :  { %18927 = vmatprep.subr.msk.bf16.mxu0 %vm4844_vm0, %v2968_v23  ;;  %6983 = vmatpush1.bf16.msra.mxu1 %v4948_v25  ;;  %v3096_v23 = vrot.slane %v57_v17, %v19603_v6 }
  0x6e   :  { %7014 = vmatprep.mubr.bf16.mxu1 %v19553_v3  ;;  %18929 = vmatprep.subr.msk.bf16.mxu1 %vm4844_vm0, %v2969_v26  ;;  %v3103_v25 = vrot.slane %v3089_v22, %v19603_v6  ;;  %v58_v26 = vld [vmem:[#allocation2 + $0x90] sm:$0xff] }
  0x6f   :  { %v3104_v28 = vcombine.high %v3096_v23, %v3096_v23  ;;  %v5050_v35 = vsel %vm4844_vm0, %v3096_v23, 0 }
  0x70   :  { %v3105_v30 = vcombine.high %v3103_v25, %v3103_v25  ;;  %v5056_v37 = vsel %vm4844_vm0, %v3103_v25, 0 }
  0x73   :  { %18924 = vmatmul.mubr.msk.bf16.vlgmr.msra.gmra.mrb[32].mxu0 %vm4840_vm1, %v19617_v24  ;;  %18926 = vmatmul.mubr.msk.bf16.vlgmr.msra.gmra.mrb[32].mxu1 %vm4840_vm1, %v19617_v24 }
  0x74   :  { %7024 = vmatpush1.bf16.msra.mxu0 %v4954_v31  ;;  %7055 = vmatprep.mubr.bf16.mxu0 %v19553_v3  ;;  %v3106_v31 = vcombine.high %v58_v26, %v58_v26 }
  0x75   :  { %18931 = vmatprep.subr.msk.bf16.mxu0 %vm4844_vm0, %v2985_v32  ;;  %7065 = vmatpush1.bf16.msra.mxu1 %v4960_v33  ;;  %v3113_v32 = vrot.slane %v58_v26, %v19603_v6 }
  0x76   :  { %7096 = vmatprep.mubr.bf16.mxu1 %v19553_v3  ;;  %18933 = vmatprep.subr.msk.bf16.mxu1 %vm4844_vm0, %v2986_v34  ;;  %v3120_v33 = vrot.slane %v3106_v31, %v19603_v6  ;;  %v59_v34 = vld [vmem:[#allocation2 + $0x98] sm:$0xff] }
  0x77   :  { %v3121_v36 = vcombine.high %v3113_v32, %v3113_v32  ;;  %v5062_v43 = vsel %vm4844_vm0, %v3113_v32, 0 }
  0x78   :  { %v3122_v38 = vcombine.high %v3120_v33, %v3120_v33  ;;  %v5068_v45 = vsel %vm4844_vm0, %v3120_v33, 0 }
  0x7b   :  { %18928 = vmatmul.mubr.msk.bf16.vlgmr.msra.gmra.mrb[36].mxu0 %vm4840_vm1, %v19617_v24  ;;  %18930 = vmatmul.mubr.msk.bf16.vlgmr.msra.gmra.mrb[36].mxu1 %vm4840_vm1, %v19617_v24 }
  0x7c   :  { %7106 = vmatpush1.bf16.msra.mxu0 %v4966_v39  ;;  %7137 = vmatprep.mubr.bf16.mxu0 %v19553_v3  ;;  %v3123_v39 = vcombine.high %v59_v34, %v59_v34 }
  0x7d   :  { %18935 = vmatprep.subr.msk.bf16.mxu0 %vm4844_vm0, %v3002_v40  ;;  %7147 = vmatpush1.bf16.msra.mxu1 %v4972_v41  ;;  %v3130_v40 = vrot.slane %v59_v34, %v19603_v6 }
  0x7e   :  { %7178 = vmatprep.mubr.bf16.mxu1 %v19553_v3  ;;  %18937 = vmatprep.subr.msk.bf16.mxu1 %vm4844_vm0, %v3003_v42  ;;  %v3137_v41 = vrot.slane %v3123_v39, %v19603_v6  ;;  %v60_v42 = vld [vmem:[#allocation2 + $0xa0] sm:$0xff] }
  0x7f   :  { %v3138_v44 = vcombine.high %v3130_v40, %v3130_v40  ;;  %v5074_v51 = vsel %vm4844_vm0, %v3130_v40, 0 }
  0x80   :  { %v3139_v46 = vcombine.high %v3137_v41, %v3137_v41  ;;  %v5080_v53 = vsel %vm4844_vm0, %v3137_v41, 0 }
  0x83   :  { %18932 = vmatmul.mubr.msk.bf16.vlgmr.msra.gmra.mrb[40].mxu0 %vm4840_vm1, %v19617_v24  ;;  %18934 = vmatmul.mubr.msk.bf16.vlgmr.msra.gmra.mrb[40].mxu1 %vm4840_vm1, %v19617_v24 }
  0x84   :  { %7188 = vmatpush1.bf16.msra.mxu0 %v4978_v47  ;;  %7219 = vmatprep.mubr.bf16.mxu0 %v19553_v3  ;;  %v3140_v47 = vcombine.high %v60_v42, %v60_v42 }
  0x85   :  { %18939 = vmatprep.subr.msk.bf16.mxu0 %vm4844_vm0, %v3019_v48  ;;  %7229 = vmatpush1.bf16.msra.mxu1 %v4984_v49  ;;  %v3147_v48 = vrot.slane %v60_v42, %v19603_v6 }
  0x86   :  { %7260 = vmatprep.mubr.bf16.mxu1 %v19553_v3  ;;  %18941 = vmatprep.subr.msk.bf16.mxu1 %vm4844_vm0, %v3020_v50  ;;  %v3154_v49 = vrot.slane %v3140_v47, %v19603_v6  ;;  %v61_v50 = vld [vmem:[#allocation2 + $0xa8] sm:$0xff] }
  0x87   :  { %v3155_v52 = vcombine.high %v3147_v48, %v3147_v48  ;;  %v5086_v59 = vsel %vm4844_vm0, %v3147_v48, 0 }
  0x88   :  { %v3156_v54 = vcombine.high %v3154_v49, %v3154_v49  ;;  %v5092_v61 = vsel %vm4844_vm0, %v3154_v49, 0 }
  0x8b   :  { %18936 = vmatmul.mubr.msk.bf16.vlgmr.msra.gmra.mrb[44].mxu0 %vm4840_vm1, %v19617_v24  ;;  %18938 = vmatmul.mubr.msk.bf16.vlgmr.msra.gmra.mrb[44].mxu1 %vm4840_vm1, %v19617_v24 }
  0x8c   :  { %7270 = vmatpush1.bf16.msra.mxu0 %v4990_v55  ;;  %7301 = vmatprep.mubr.bf16.mxu0 %v19553_v3  ;;  %v3157_v55 = vcombine.high %v61_v50, %v61_v50 }
  0x8d   :  { %18943 = vmatprep.subr.msk.bf16.mxu0 %vm4844_vm0, %v3036_v56  ;;  %7311 = vmatpush1.bf16.msra.mxu1 %v4996_v57  ;;  %v3164_v56 = vrot.slane %v61_v50, %v19603_v6 }
  0x8e   :  { %7342 = vmatprep.mubr.bf16.mxu1 %v19553_v3  ;;  %18945 = vmatprep.subr.msk.bf16.mxu1 %vm4844_vm0, %v3037_v58  ;;  %v3171_v57 = vrot.slane %v3157_v55, %v19603_v6  ;;  %v62_v58 = vld [vmem:[#allocation2 + $0xb0] sm:$0xff]  ;;  %v19937_v55 = vld [vmem:[#allocation4] sm:$0xff] }
  0x8f   :  { %v3172_v60 = vcombine.high %v3164_v56, %v3164_v56  ;;  %v5098_v5 = vsel %vm4844_vm0, %v3164_v56, 0  ;;  %v19940_v56 = vsub.s32 1, %v19600_v4 }
  0x90   :  { %v3173_v62 = vcombine.high %v3171_v57, %v3171_v57  ;;  %v5104_v8 = vsel %vm4844_vm0, %v3171_v57, 0  ;;  %v69_v57 = vld [vmem:[#allocation2 + $0xe8] sm:$0xff] }
  0x93   :  { %18940 = vmatmul.mubr.msk.bf16.vlgmr.msra.gmra.mrb[48].mxu0 %vm4840_vm1, %v19617_v24  ;;  %18942 = vmatmul.mubr.msk.bf16.vlgmr.msra.gmra.mrb[48].mxu1 %vm4840_vm1, %v19617_v24 }
  0x94   :  { %7352 = vmatpush1.bf16.msra.mxu0 %v5002_v63  ;;  %7383 = vmatprep.mubr.bf16.mxu0 %v19553_v3  ;;  %v3174_v63 = vcombine.high %v62_v58, %v62_v58 }
  0x95   :  { %18947 = vmatprep.subr.msk.bf16.mxu0 %vm4844_vm0, %v3053_v0  ;;  %7393 = vmatpush1.bf16.msra.mxu1 %v5008_v1  ;;  %v3181_v0 = vrot.slane %v62_v58, %v19603_v6 }
  0x96   :  { %7424 = vmatprep.mubr.bf16.mxu1 %v19553_v3  ;;  %18949 = vmatprep.subr.msk.bf16.mxu1 %vm4844_vm0, %v3054_v2  ;;  %v3188_v1 = vrot.slane %v3174_v63, %v19603_v6  ;;  %v63_v2 = vld [vmem:[#allocation2 + $0xb8] sm:$0xff] }
  0x97   :  { %v3189_v7 = vcombine.high %v3181_v0, %v3181_v0  ;;  %v5110_v14 = vsel %vm4844_vm0, %v3181_v0, 0 }
  0x98   :  { %v3190_v9 = vcombine.high %v3188_v1, %v3188_v1  ;;  %v5116_v16 = vsel %vm4844_vm0, %v3188_v1, 0  ;;  %v3293_v1 = vcombine.high %v69_v57, %v69_v57 }
  0x9b   :  { %18944 = vmatmul.mubr.msk.bf16.vlgmr.msra.gmra.mrb[52].mxu0 %vm4840_vm1, %v19617_v24  ;;  %18946 = vmatmul.mubr.msk.bf16.vlgmr.msra.gmra.mrb[52].mxu1 %vm4840_vm1, %v19617_v24 }
  0x9c   :  { %7434 = vmatpush1.bf16.msra.mxu0 %v5014_v10  ;;  %7465 = vmatprep.mubr.bf16.mxu0 %v19553_v3  ;;  %v3191_v10 = vcombine.high %v63_v2, %v63_v2 }
  0x9d   :  { %18951 = vmatprep.subr.msk.bf16.mxu0 %vm4844_vm0, %v3070_v11  ;;  %7475 = vmatpush1.bf16.msra.mxu1 %v5020_v12  ;;  %v3198_v11 = vrot.slane %v63_v2, %v19603_v6  ;;  %v287_v2 = vrot.slane %v19937_v55, %v19940_v56 }
  0x9e   :  { %7506 = vmatprep.mubr.bf16.mxu1 %v19553_v3  ;;  %18953 = vmatprep.subr.msk.bf16.mxu1 %vm4844_vm0, %v3071_v13  ;;  %v3205_v12 = vrot.slane %v3191_v10, %v19603_v6  ;;  %v64_v13 = vld [vmem:[#allocation2 + $0xc0] sm:$0xff] }
  0x9f   :  { %v3206_v15 = vcombine.high %v3198_v11, %v3198_v11  ;;  %v5122_v22 = vsel %vm4844_vm0, %v3198_v11, 0 }
  0xa0   :  { %v3207_v17 = vcombine.high %v3205_v12, %v3205_v12  ;;  %v5128_v25 = vsel %vm4844_vm0, %v3205_v12, 0  ;;  %v19968_v12 = vsub.s32 4, %v19600_v4 }
  0xa3   :  { %18948 = vmatmul.mubr.msk.bf16.vlgmr.msra.gmra.mrb[56].mxu0 %vm4840_vm1, %v19617_v24  ;;  %18950 = vmatmul.mubr.msk.bf16.vlgmr.msra.gmra.mrb[56].mxu1 %vm4840_vm1, %v19617_v24 }
  0xa4   :  { %7516 = vmatpush1.bf16.msra.mxu0 %v5026_v18  ;;  %7547 = vmatprep.mubr.bf16.mxu0 %v19553_v3  ;;  %v3208_v18 = vcombine.high %v64_v13, %v64_v13 }
  0xa5   :  { %18955 = vmatprep.subr.msk.bf16.mxu0 %vm4844_vm0, %v3087_v19  ;;  %7557 = vmatpush1.bf16.msra.mxu1 %v5032_v20  ;;  %v3215_v19 = vrot.slane %v64_v13, %v19603_v6  ;;  %v3307_v13 = vrot.slane %v3293_v1, %v19603_v6 }
  0xa6   :  { %7588 = vmatprep.mubr.bf16.mxu1 %v19553_v3  ;;  %18957 = vmatprep.subr.msk.bf16.mxu1 %vm4844_vm0, %v3088_v21  ;;  %v3222_v20 = vrot.slane %v3208_v18, %v19603_v6  ;;  %v65_v21 = vld [vmem:[#allocation2 + $0xc8] sm:$0xff]  ;;  %v70_v18 = vld [vmem:[#allocation2 + $0xf0] sm:$0xff] }
  0xa7   :  { %v3223_v23 = vcombine.high %v3215_v19, %v3215_v19  ;;  %v5134_v31 = vsel %vm4844_vm0, %v3215_v19, 0  ;;  %v5200_v1 = vsel %vm4844_vm0, %v3307_v13, 0 }
  0xa8   :  { %v3224_v26 = vcombine.high %v3222_v20, %v3222_v20  ;;  %v5140_v33 = vsel %vm4844_vm0, %v3222_v20, 0 }
  0xab   :  { %18952 = vmatmul.mubr.msk.bf16.vlgmr.msra.gmra.mrb[60].mxu0 %vm4840_vm1, %v19617_v24  ;;  %18954 = vmatmul.mubr.msk.bf16.vlgmr.msra.gmra.mrb[60].mxu1 %vm4840_vm1, %v19617_v24 }
  0xac   :  { %7598 = vmatpush1.bf16.msra.mxu0 %v5038_v27  ;;  %7629 = vmatprep.mubr.bf16.mxu0 %v19553_v3  ;;  %v3225_v27 = vcombine.high %v65_v21, %v65_v21 }
  0xad   :  { %18959 = vmatprep.subr.msk.bf16.mxu0 %vm4844_vm0, %v3104_v28  ;;  %7639 = vmatpush1.bf16.msra.mxu1 %v5044_v29  ;;  %v3232_v28 = vrot.slane %v65_v21, %v19603_v6 }
  0xae   :  { %7670 = vmatprep.mubr.bf16.mxu1 %v19553_v3  ;;  %18961 = vmatprep.subr.msk.bf16.mxu1 %vm4844_vm0, %v3105_v30  ;;  %v3239_v29 = vrot.slane %v3225_v27, %v19603_v6  ;;  %v66_v30 = vld [vmem:[#allocation2 + $0xd0] sm:$0xff] }
  0xaf   :  { %v3240_v32 = vcombine.high %v3232_v28, %v3232_v28  ;;  %v5146_v39 = vsel %vm4844_vm0, %v3232_v28, 0 }
  0xb0   :  { %v3241_v34 = vcombine.high %v3239_v29, %v3239_v29  ;;  %v5152_v41 = vsel %vm4844_vm0, %v3239_v29, 0  ;;  %v19979_v29 = vsub.s32 7, %v19600_v4 }
  0xb3   :  { %18956 = vmatmul.mubr.msk.bf16.vlgmr.msra.gmra.mrb[64].mxu0 %vm4840_vm1, %v19617_v24  ;;  %18958 = vmatmul.mubr.msk.bf16.vlgmr.msra.gmra.mrb[64].mxu1 %vm4840_vm1, %v19617_v24 }
  0xb4   :  { %7680 = vmatpush1.bf16.msra.mxu0 %v5050_v35  ;;  %7711 = vmatprep.mubr.bf16.mxu0 %v19553_v3  ;;  %v3242_v35 = vcombine.high %v66_v30, %v66_v30 }
  0xb5   :  { %18963 = vmatprep.subr.msk.bf16.mxu0 %vm4844_vm0, %v3121_v36  ;;  %7721 = vmatpush1.bf16.msra.mxu1 %v5056_v37  ;;  %v3249_v36 = vrot.slane %v66_v30, %v19603_v6 }
  0xb6   :  { %7752 = vmatprep.mubr.bf16.mxu1 %v19553_v3  ;;  %18965 = vmatprep.subr.msk.bf16.mxu1 %vm4844_vm0, %v3122_v38  ;;  %v3256_v37 = vrot.slane %v3242_v35, %v19603_v6  ;;  %v67_v38 = vld [vmem:[#allocation2 + $0xd8] sm:$0xff] }
  0xb7   :  { %v3257_v40 = vcombine.high %v3249_v36, %v3249_v36  ;;  %v5158_v47 = vsel %vm4844_vm0, %v3249_v36, 0 }
  0xb8   :  { %v3258_v42 = vcombine.high %v3256_v37, %v3256_v37  ;;  %v5164_v49 = vsel %vm4844_vm0, %v3256_v37, 0 }
  0xbb   :  { %18960 = vmatmul.mubr.msk.bf16.vlgmr.msra.gmra.mrb[68].mxu0 %vm4840_vm1, %v19617_v24  ;;  %18962 = vmatmul.mubr.msk.bf16.vlgmr.msra.gmra.mrb[68].mxu1 %vm4840_vm1, %v19617_v24 }
  0xbc   :  { %7762 = vmatpush1.bf16.msra.mxu0 %v5062_v43  ;;  %7793 = vmatprep.mubr.bf16.mxu0 %v19553_v3  ;;  %v3259_v43 = vcombine.high %v67_v38, %v67_v38 }
  0xbd   :  { %18967 = vmatprep.subr.msk.bf16.mxu0 %vm4844_vm0, %v3138_v44  ;;  %7803 = vmatpush1.bf16.msra.mxu1 %v5068_v45  ;;  %v3266_v44 = vrot.slane %v67_v38, %v19603_v6  ;;  %v3317_v38 = vrot.slane %v70_v18, %v19603_v6 }
  0xbe   :  { %7834 = vmatprep.mubr.bf16.mxu1 %v19553_v3  ;;  %18969 = vmatprep.subr.msk.bf16.mxu1 %vm4844_vm0, %v3139_v46  ;;  %v3273_v45 = vrot.slane %v3259_v43, %v19603_v6  ;;  %v68_v46 = vld [vmem:[#allocation2 + $0xe0] sm:$0xff] }
  0xbf   :  { %v3274_v48 = vcombine.high %v3266_v44, %v3266_v44  ;;  %v5170_v58 = vsel %vm4844_vm0, %v3266_v44, 0 }
  0xc0   :  { %v3275_v50 = vcombine.high %v3273_v45, %v3273_v45  ;;  %v5176_v63 = vsel %vm4844_vm0, %v3273_v45, 0 }
  0xc3   :  { %18964 = vmatmul.mubr.msk.bf16.vlgmr.msra.gmra.mrb[72].mxu0 %vm4840_vm1, %v19617_v24  ;;  %18966 = vmatmul.mubr.msk.bf16.vlgmr.msra.gmra.mrb[72].mxu1 %vm4840_vm1, %v19617_v24 }
  0xc4   :  { %7844 = vmatpush1.bf16.msra.mxu0 %v5074_v51  ;;  %7875 = vmatprep.mubr.bf16.mxu0 %v19553_v3  ;;  %v3276_v51 = vcombine.high %v68_v46, %v68_v46 }
  0xc5   :  { %18971 = vmatprep.subr.msk.bf16.mxu0 %vm4844_vm0, %v3155_v52  ;;  %7885 = vmatpush1.bf16.msra.mxu1 %v5080_v53  ;;  %v3283_v52 = vrot.slane %v68_v46, %v19603_v6  ;;  %v19934_v53 = vsub.s32 0, %v19600_v4 }
  0xc6   :  { %7916 = vmatprep.mubr.bf16.mxu1 %v19553_v3  ;;  %18973 = vmatprep.subr.msk.bf16.mxu1 %vm4844_vm0, %v3156_v54  ;;  %v3290_v54 = vrot.slane %v3276_v51, %v19603_v6 }
  0xc8   :  { %v3292_v0 = vcombine.high %v3290_v54, %v3290_v54 }
  0xcb   :  { %18968 = vmatmul.mubr.msk.bf16.vlgmr.msra.gmra.mrb[76].mxu0 %vm4840_vm1, %v19617_v24  ;;  %18970 = vmatmul.mubr.msk.bf16.vlgmr.msra.gmra.mrb[76].mxu1 %vm4840_vm1, %v19617_v24 }
  0xcc   :  { %7926 = vmatpush1.bf16.msra.mxu0 %v5086_v59  ;;  %7957 = vmatprep.mubr.bf16.mxu0 %v19553_v3  ;;  %v19944_v59 = vsub.s32 2, %v19600_v4 }
  0xcd   :  { %18975 = vmatprep.subr.msk.bf16.mxu0 %vm4844_vm0, %v3172_v60  ;;  %7967 = vmatpush1.bf16.msra.mxu1 %v5092_v61  ;;  %v3291_v60 = vcombine.high %v3283_v52, %v3283_v52  ;;  %v19947_v61 = vsub.s32 3, %v19600_v4 }
  0xce   :  { %7998 = vmatprep.mubr.bf16.mxu1 %v19553_v3  ;;  %18977 = vmatprep.subr.msk.bf16.mxu1 %vm4844_vm0, %v3173_v62  ;;  %v283_v62 = vrot.slane %v19937_v55, %v19934_v53 }
  0xd3   :  { %18972 = vmatmul.mubr.msk.bf16.vlgmr.msra.gmra.mrb[80].mxu0 %vm4840_vm1, %v19617_v24  ;;  %18974 = vmatmul.mubr.msk.bf16.vlgmr.msra.gmra.mrb[80].mxu1 %vm4840_vm1, %v19617_v24 }
  0xd4   :  { %8008 = vmatpush1.bf16.msra.mxu0 %v5098_v5  ;;  %8039 = vmatprep.mubr.bf16.mxu0 %v19553_v3  ;;  %v291_v5 = vrot.slane %v19937_v55, %v19944_v59 }
  0xd5   :  { %18979 = vmatprep.subr.msk.bf16.mxu0 %vm4844_vm0, %v3189_v7  ;;  %8049 = vmatpush1.bf16.msra.mxu1 %v5104_v8  ;;  %v3300_v7 = vrot.slane %v69_v57, %v19603_v6  ;;  %v3325_v57 = vcombine.high %v3317_v38, %v3317_v38 }
  0xd6   :  { %8080 = vmatprep.mubr.bf16.mxu1 %v19553_v3  ;;  %18981 = vmatprep.subr.msk.bf16.mxu1 %vm4844_vm0, %v3190_v9  ;;  %v295_v9 = vrot.slane %v19937_v55, %v19947_v61 }
  0xdb   :  { %18976 = vmatmul.mubr.msk.bf16.vlgmr.msra.gmra.mrb[84].mxu0 %vm4840_vm1, %v19617_v24  ;;  %18978 = vmatmul.mubr.msk.bf16.vlgmr.msra.gmra.mrb[84].mxu1 %vm4840_vm1, %v19617_v24 }
  0xdc   :  { %8090 = vmatpush1.bf16.msra.mxu0 %v5110_v14  ;;  %8121 = vmatprep.mubr.bf16.mxu0 %v19553_v3 }
  0xdd   :  { %18983 = vmatprep.subr.msk.bf16.mxu0 %vm4844_vm0, %v3206_v15  ;;  %8131 = vmatpush1.bf16.msra.mxu1 %v5116_v16 }
  0xde   :  { %8162 = vmatprep.mubr.bf16.mxu1 %v19553_v3  ;;  %18985 = vmatprep.subr.msk.bf16.mxu1 %vm4844_vm0, %v3207_v17  ;;  %v19972_v17 = vsub.s32 5, %v19600_v4 }
  0xe0   :  { %v303_v37 = vrot.slane %v19937_v55, %v19972_v17 }
  0xe3   :  { %18980 = vmatmul.mubr.msk.bf16.vlgmr.msra.gmra.mrb[88].mxu0 %vm4840_vm1, %v19617_v24  ;;  %18982 = vmatmul.mubr.msk.bf16.vlgmr.msra.gmra.mrb[88].mxu1 %vm4840_vm1, %v19617_v24 }
  0xe4   :  { %8172 = vmatpush1.bf16.msra.mxu0 %v5122_v22  ;;  %8203 = vmatprep.mubr.bf16.mxu0 %v19553_v3  ;;  %v5182_v22 = vsel %vm4844_vm0, %v3283_v52, 0 }
  0xe5   :  { %18987 = vmatprep.subr.msk.bf16.mxu0 %vm4844_vm0, %v3223_v23  ;;  %8213 = vmatpush1.bf16.msra.mxu1 %v5128_v25  ;;  %v19976_v23 = vsub.s32 6, %v19600_v4  ;;  %v3308_v25 = vcombine.high %v3300_v7, %v3300_v7 }
  0xe6   :  { %8244 = vmatprep.mubr.bf16.mxu1 %v19553_v3  ;;  %18989 = vmatprep.subr.msk.bf16.mxu1 %vm4844_vm0, %v3224_v26 }
  0xe7   :  { %v307_v4 = vrot.slane %v19937_v55, %v19976_v23 }
  0xeb   :  { %18984 = vmatmul.mubr.msk.bf16.vlgmr.msra.gmra.mrb[92].mxu0 %vm4840_vm1, %v19617_v24  ;;  %18986 = vmatmul.mubr.msk.bf16.vlgmr.msra.gmra.mrb[92].mxu1 %vm4840_vm1, %v19617_v24 }
  0xec   :  { %8254 = vmatpush1.bf16.msra.mxu0 %v5134_v31  ;;  %8285 = vmatprep.mubr.bf16.mxu0 %v19553_v3  ;;  %v299_v31 = vrot.slane %v19937_v55, %v19968_v12 }
  0xed   :  { %18991 = vmatprep.subr.msk.bf16.mxu0 %vm4844_vm0, %v3240_v32  ;;  %8295 = vmatpush1.bf16.msra.mxu1 %v5140_v33  ;;  %v5188_v32 = vsel %vm4844_vm0, %v3290_v54, 0  ;;  %v3309_v33 = vcombine.high %v3307_v13, %v3307_v13 }
  0xee   :  { %8326 = vmatprep.mubr.bf16.mxu1 %v19553_v3  ;;  %18993 = vmatprep.subr.msk.bf16.mxu1 %vm4844_vm0, %v3241_v34  ;;  %v3310_v34 = vcombine.high %v70_v18, %v70_v18 }
  0xf0   :  { %v3324_v44 = vrot.slane %v3310_v34, %v19603_v6 }
  0xf3   :  { %18988 = vmatmul.mubr.msk.bf16.vlgmr.msra.gmra.mrb[96].mxu0 %vm4840_vm1, %v19617_v24  ;;  %18990 = vmatmul.mubr.msk.bf16.vlgmr.msra.gmra.mrb[96].mxu1 %vm4840_vm1, %v19617_v24 }
  0xf4   :  { %8336 = vmatpush1.bf16.msra.mxu0 %v5146_v39  ;;  %8367 = vmatprep.mubr.bf16.mxu0 %v19553_v3 }
  0xf5   :  { %18995 = vmatprep.subr.msk.bf16.mxu0 %vm4844_vm0, %v3257_v40  ;;  %8377 = vmatpush1.bf16.msra.mxu1 %v5152_v41  ;;  %v311_v41 = vrot.slane %v19937_v55, %v19979_v29  ;;  %v5194_v55 = vsel %vm4844_vm0, %v3300_v7, 0 }
  0xf6   :  { %8408 = vmatprep.mubr.bf16.mxu1 %v19553_v3  ;;  %18997 = vmatprep.subr.msk.bf16.mxu1 %vm4844_vm0, %v3258_v42 }
  0xfb   :  { %18992 = vmatmul.mubr.msk.bf16.vlgmr.msra.gmra.mrb[100].mxu0 %vm4840_vm1, %v19617_v24  ;;  %18994 = vmatmul.mubr.msk.bf16.vlgmr.msra.gmra.mrb[100].mxu1 %vm4840_vm1, %v19617_v24 }
  0xfc   :  { %8418 = vmatpush1.bf16.msra.mxu0 %v5158_v47  ;;  %8449 = vmatprep.mubr.bf16.mxu0 %v19553_v3 }
  0xfd   :  { %18999 = vmatprep.subr.msk.bf16.mxu0 %vm4844_vm0, %v3274_v48  ;;  %8459 = vmatpush1.bf16.msra.mxu1 %v5164_v49  ;;  %v20002_v49 = vld [vmem:[#allocation4 + $0x8] sm:$0xff] }
  0xfe   :  { %8490 = vmatprep.mubr.bf16.mxu1 %v19553_v3  ;;  %19001 = vmatprep.subr.msk.bf16.mxu1 %vm4844_vm0, %v3275_v50  ;;  %v71_v50 = vld [vmem:[#allocation2 + $0xf8] sm:$0xff] }
 0x103   :  { %18996 = vmatmul.mubr.msk.bf16.vlgmr.msra.gmra.mrb[104].mxu0 %vm4840_vm1, %v19617_v24  ;;  %18998 = vmatmul.mubr.msk.bf16.vlgmr.msra.gmra.mrb[104].mxu1 %vm4840_vm1, %v19617_v24 }
 0x104   :  { %8500 = vmatpush1.bf16.msra.mxu0 %v5170_v58  ;;  %8531 = vmatprep.mubr.bf16.mxu0 %v19553_v3 }
 0x105   :  { %19003 = vmatprep.subr.msk.bf16.mxu0 %vm4844_vm0, %v3291_v60  ;;  %8541 = vmatpush1.bf16.msra.mxu1 %v5176_v63 }
 0x106   :  { %v6319_v8 = vpop.f32.mrb[0].mxu0  ;;  %8572 = vmatprep.mubr.bf16.mxu1 %v19553_v3  ;;  %19005 = vmatprep.subr.msk.bf16.mxu1 %vm4844_vm0, %v3292_v0  ;;  %v6360_v16 = vpop.f32.mrb[0].mxu1  ;;  %v315_v0 = vrot.slane %v20002_v49, %v19934_v53 }
 0x107   :  { %v6320_v10 = vadd.f32 %v6319_v8, %v283_v62  ;;  %v6321_v11 = vpop.f32.mrb[1].mxu0  ;;  %v6361_v19 = vadd.f32 %v6360_v16, %v291_v5  ;;  %v6362_v21 = vpop.f32.mrb[1].mxu1  ;;  %v3327_v5 = vcombine.high %v71_v50, %v71_v50 }
 0x108   :  { %v6322_v14 = vadd.f32 %v6321_v11, %v287_v2  ;;  %v6323_v15 = vpop.f32.mrb[2].mxu0  ;;  %v6363_v27 = vadd.f32 %v6362_v21, %v295_v9  ;;  %v6364_v28 = vpop.f32.mrb[2].mxu1  ;;  %v3326_v2 = vcombine.high %v3324_v44, %v3324_v44  ;;  %v319_v9 = vrot.slane %v20002_v49, %v19940_v56 }
 0x109   :  { %v6324_v20 = vpop.f32.mrb[3].mxu0  ;;  %v6365_v30 = vpop.f32.mrb[3].mxu1  ;;  %v3334_v11 = vrot.slane %v71_v50, %v19603_v6  ;;  %v327_v15 = vrot.slane %v20002_v49, %v19947_v61 }
 0x10a   :  { %v16605_v26 = vcombine.low %v6320_v10, %v6322_v14  ;;  %v16606_v36 = vcombine.low %v6361_v19, %v6363_v27  ;;  %v323_v10 = vrot.slane %v20002_v49, %v19944_v59  ;;  %v3341_v19 = vrot.slane %v3327_v5, %v19603_v6 }
 0x10b   :  { %19000 = vmatmul.mubr.msk.bf16.vlgmr.msra.gmra.mrb[108].mxu0 %vm4840_vm1, %v19617_v24  ;;  %19002 = vmatmul.mubr.msk.bf16.vlgmr.msra.gmra.mrb[108].mxu1 %vm4840_vm1, %v19617_v24 }
 0x10c   :  { %v16613_v35 = vrot.slane %v16605_v26, %v19603_v6  ;;  %8582 = vmatpush1.bf16.msra.mxu0 %v5182_v22  ;;  %8613 = vmatprep.mubr.bf16.mxu0 %v19553_v3  ;;  %v16620_v39 = vrot.slane %v16606_v36, %v19603_v6  ;;  %v72_v26 = vld [vmem:[#allocation2 + $0x100] sm:$0xff] }
 0x10d   :  { %19007 = vmatprep.subr.msk.bf16.mxu0 %vm4844_vm0, %v3308_v25  ;;  %8623 = vmatpush1.bf16.msra.mxu1 %v5188_v32  ;;  %v3342_v32 = vcombine.high %v3334_v11, %v3334_v11 }
 0x10e   :  { %v6401_v40 = vpop.f32.mrb[4].mxu0  ;;  %8654 = vmatprep.mubr.bf16.mxu1 %v19553_v3  ;;  %19009 = vmatprep.subr.msk.bf16.mxu1 %vm4844_vm0, %v3309_v33  ;;  %v16621_v45 = vcombine.low %v16613_v35, %v16620_v39  ;;  %v6442_v48 = vpop.f32.mrb[4].mxu1  ;;  %v3343_v39 = vcombine.high %v3341_v19, %v3341_v19 }
 0x10f   :  { %v6402_v42 = vadd.f32 %v6401_v40, %v299_v31  ;;  %v6403_v43 = vpop.f32.mrb[5].mxu0  ;;  %v6443_v51 = vadd.f32 %v6442_v48, %v307_v4  ;;  %v6444_v54 = vpop.f32.mrb[5].mxu1  ;;  %v5206_v31 = vsel %vm4844_vm0, %v3317_v38, 0  ;;  %v5212_v4 = vsel %vm4844_vm0, %v3324_v44, 0 }
 0x110   :  { %v6404_v46 = vadd.f32 %v6403_v43, %v303_v37  ;;  %v6405_v47 = vpop.f32.mrb[6].mxu0  ;;  %18765 = vst [vmem:[%s22650_s3] sm:$0xff] %v16621_v45  ;;  %v6445_v60 = vadd.f32 %v6444_v54, %v311_v41  ;;  %v6446_v62 = vpop.f32.mrb[6].mxu1  ;;  %v331_v37 = vrot.slane %v20002_v49, %v19968_v12  ;;  %v3344_v40 = vcombine.high %v72_v26, %v72_v26 }
 0x111   :  { %v6406_v52 = vpop.f32.mrb[7].mxu0  ;;  %v6447_v63 = vpop.f32.mrb[7].mxu1  ;;  %v339_v43 = vrot.slane %v20002_v49, %v19976_v23  ;;  %v3351_v44 = vrot.slane %v72_v26, %v19603_v6  ;;  %v343_v47 = vrot.slane %v20002_v49, %v19979_v29 }
 0x112   :  { %v16622_v58 = vcombine.low %v6402_v42, %v6404_v46  ;;  %v16623_v8 = vcombine.low %v6443_v51, %v6445_v60  ;;  %v335_v42 = vrot.slane %v20002_v49, %v19972_v17  ;;  %v3358_v51 = vrot.slane %v3344_v40, %v19603_v6  ;;  %v73_v60 = vld [vmem:[#allocation2 + $0x108] sm:$0xff] }
 0x113   :  { %19004 = vmatmul.mubr.msk.bf16.vlgmr.msra.gmra.mrb[112].mxu0 %vm4840_vm1, %v19617_v24  ;;  %v20020_v24 = vld [vmem:[%s22647_s0] sm:$0x1]  ;;  %v5218_v49 = vsel %vm4844_vm0, %v3334_v11, 0 }
 0x114   :  { %v16630_v7 = vrot.slane %v16622_v58, %v19603_v6  ;;  %8664 = vmatpush1.bf16.msra.mxu0 %v5194_v55  ;;  %8695 = vmatprep.mubr.bf16.mxu0 %v19553_v3  ;;  %v16637_v13 = vrot.slane %v16623_v8, %v19603_v6  ;;  %v20059_v58 = vld [vmem:[#allocation4 + $0x10] sm:$0xff] }
 0x115   :  { %19006 = vmatmul.mubr.msk.bf16.vlgmr.msra.gmra.mrb[112].mxu1 %vm4840_vm1, %v20020_v24  ;;  %19011 = vmatprep.subr.msk.bf16.mxu0 %vm4844_vm0, %v3325_v57 }
 0x116   :  { %v6483_v14 = vpop.f32.mrb[8].mxu0  ;;  %8705 = vmatpush1.bf16.msra.mxu1 %v5200_v1  ;;  %8736 = vmatprep.mubr.bf16.mxu1 %v19553_v3  ;;  %v16638_v20 = vcombine.low %v16630_v7, %v16637_v13  ;;  %v6524_v25 = vpop.f32.mrb[8].mxu1  ;;  %v3359_v1 = vcombine.high %v3351_v44, %v3351_v44  ;;  %v3360_v13 = vcombine.high %v3358_v51, %v3358_v51 }
 0x117   :  { %v6484_v16 = vadd.f32 %v6483_v14, %v315_v0  ;;  %v6485_v18 = vpop.f32.mrb[9].mxu0  ;;  %19013 = vmatprep.subr.msk.bf16.mxu1 %vm4844_vm0, %v3326_v2  ;;  %v6525_v27 = vadd.f32 %v6524_v25, %v323_v10  ;;  %v6526_v30 = vpop.f32.mrb[9].mxu1  ;;  %v5224_v10 = vsel %vm4844_vm0, %v3341_v19, 0  ;;  %v3361_v14 = vcombine.high %v73_v60, %v73_v60 }
 0x118   :  { %v6486_v21 = vadd.f32 %v6485_v18, %v319_v9  ;;  %v6487_v22 = vpop.f32.mrb[10].mxu0  ;;  %18766 = vst [vmem:[%s22650_s3 + $0x8] sm:$0xff] %v16638_v20  ;;  %v6527_v34 = vadd.f32 %v6526_v30, %v327_v15  ;;  %v6528_v35 = vpop.f32.mrb[10].mxu1  ;;  %v347_v9 = vrot.slane %v20059_v58, %v19934_v53  ;;  %v355_v18 = vrot.slane %v20059_v58, %v19944_v59 }
 0x119   :  { %v6488_v28 = vpop.f32.mrb[11].mxu0  ;;  %v6529_v36 = vpop.f32.mrb[11].mxu1  ;;  %v3368_v19 = vrot.slane %v73_v60, %v19603_v6  ;;  %v359_v22 = vrot.slane %v20059_v58, %v19947_v61 }
 0x11a   :  { %v16639_v33 = vcombine.low %v6484_v16, %v6486_v21  ;;  %v16640_v41 = vcombine.low %v6525_v27, %v6527_v34  ;;  %v351_v16 = vrot.slane %v20059_v58, %v19940_v56  ;;  %v3375_v27 = vrot.slane %v3361_v14, %v19603_v6 }
 0x11b   :  { %19008 = vmatmul.mubr.msk.bf16.vlgmr.msra.gmra.mrb[116].mxu0 %vm4840_vm1, %v20020_v24 }
 0x11c   :  { %v16647_v38 = vrot.slane %v16639_v33, %v19603_v6  ;;  %8746 = vmatpush1.bf16.msra.mxu0 %v5206_v31  ;;  %8777 = vmatprep.mubr.bf16.mxu0 %v19553_v3  ;;  %v16654_v45 = vrot.slane %v16640_v41, %v19603_v6  ;;  %v74_v33 = vld [vmem:[#allocation2 + $0x110] sm:$0xff] }
 0x11d   :  { %19010 = vmatmul.mubr.msk.bf16.vlgmr.msra.gmra.mrb[116].mxu1 %vm4840_vm1, %v20020_v24  ;;  %19015 = vmatprep.subr.msk.bf16.mxu0 %vm4844_vm0, %v3342_v32 }
 0x11e   :  { %v6565_v46 = vpop.f32.mrb[12].mxu0  ;;  %8787 = vmatpush1.bf16.msra.mxu1 %v5212_v4  ;;  %8818 = vmatprep.mubr.bf16.mxu1 %v19553_v3  ;;  %v16655_v52 = vcombine.low %v16647_v38, %v16654_v45  ;;  %v6606_v57 = vpop.f32.mrb[12].mxu1  ;;  %v3376_v4 = vcombine.high %v3368_v19, %v3368_v19  ;;  %v3377_v45 = vcombine.high %v3375_v27, %v3375_v27 }
 0x11f   :  { %v6566_v48 = vadd.f32 %v6565_v46, %v331_v37  ;;  %v6567_v50 = vpop.f32.mrb[13].mxu0  ;;  %19017 = vmatprep.subr.msk.bf16.mxu1 %vm4844_vm0, %v3343_v39  ;;  %v6607_v62 = vadd.f32 %v6606_v57, %v339_v43  ;;  %v6608_v0 = vpop.f32.mrb[13].mxu1  ;;  %v5230_v37 = vsel %vm4844_vm0, %v3351_v44, 0  ;;  %v5236_v43 = vsel %vm4844_vm0, %v3358_v51, 0 }
 0x120   :  { %v6568_v54 = vadd.f32 %v6567_v50, %v335_v42  ;;  %v6569_v55 = vpop.f32.mrb[14].mxu0  ;;  %18767 = vst [vmem:[%s22650_s3 + $0x10] sm:$0xff] %v16655_v52  ;;  %v6609_v5 = vadd.f32 %v6608_v0, %v343_v47  ;;  %v6610_v7 = vpop.f32.mrb[14].mxu1  ;;  %v363_v42 = vrot.slane %v20059_v58, %v19968_v12  ;;  %v3378_v46 = vcombine.high %v74_v33, %v74_v33 }
 0x121   :  { %v6570_v63 = vpop.f32.mrb[15].mxu0  ;;  %v6611_v8 = vpop.f32.mrb[15].mxu1  ;;  %v371_v50 = vrot.slane %v20059_v58, %v19976_v23  ;;  %v3385_v51 = vrot.slane %v74_v33, %v19603_v6  ;;  %v375_v55 = vrot.slane %v20059_v58, %v19979_v29 }
 0x122   :  { %v16656_v2 = vcombine.low %v6566_v48, %v6568_v54  ;;  %v16657_v15 = vcombine.low %v6607_v62, %v6609_v5  ;;  %v367_v48 = vrot.slane %v20059_v58, %v19972_v17  ;;  %v3392_v62 = vrot.slane %v3378_v46, %v19603_v6  ;;  %v75_v5 = vld [vmem:[#allocation2 + $0x118] sm:$0xff] }
 0x123   :  { %19012 = vmatmul.mubr.msk.bf16.vlgmr.msra.gmra.mrb[120].mxu0 %vm4840_vm1, %v20020_v24  ;;  %v5242_v58 = vsel %vm4844_vm0, %v3368_v19, 0 }
 0x124   :  { %v16664_v11 = vrot.slane %v16656_v2, %v19603_v6  ;;  %8828 = vmatpush1.bf16.msra.mxu0 %v5218_v49  ;;  %8859 = vmatprep.mubr.bf16.mxu0 %v19553_v3  ;;  %v16671_v20 = vrot.slane %v16657_v15, %v19603_v6  ;;  %v20111_v2 = vld [vmem:[#allocation4 + $0x18] sm:$0xff] }
 0x125   :  { %19014 = vmatmul.mubr.msk.bf16.vlgmr.msra.gmra.mrb[120].mxu1 %vm4840_vm1, %v20020_v24  ;;  %19019 = vmatprep.subr.msk.bf16.mxu0 %vm4844_vm0, %v3359_v1 }
 0x126   :  { %v6647_v21 = vpop.f32.mrb[16].mxu0  ;;  %8869 = vmatpush1.bf16.msra.mxu1 %v5224_v10  ;;  %8900 = vmatprep.mubr.bf16.mxu1 %v19553_v3  ;;  %v16672_v28 = vcombine.low %v16664_v11, %v16671_v20  ;;  %v6688_v32 = vpop.f32.mrb[16].mxu1  ;;  %v3393_v10 = vcombine.high %v3385_v51, %v3385_v51  ;;  %v3394_v20 = vcombine.high %v3392_v62, %v3392_v62 }
 0x127   :  { %v6648_v25 = vadd.f32 %v6647_v21, %v347_v9  ;;  %v6649_v26 = vpop.f32.mrb[17].mxu0  ;;  %19021 = vmatprep.subr.msk.bf16.mxu1 %vm4844_vm0, %v3360_v13  ;;  %v6689_v34 = vadd.f32 %v6688_v32, %v355_v18  ;;  %v6690_v36 = vpop.f32.mrb[17].mxu1  ;;  %v5248_v18 = vsel %vm4844_vm0, %v3375_v27, 0  ;;  %v3395_v21 = vcombine.high %v75_v5, %v75_v5 }
 0x128   :  { %v6650_v30 = vadd.f32 %v6649_v26, %v351_v16  ;;  %v6651_v31 = vpop.f32.mrb[18].mxu0  ;;  %18768 = vst [vmem:[%s22650_s3 + $0x18] sm:$0xff] %v16672_v28  ;;  %v6691_v40 = vadd.f32 %v6690_v36, %v359_v22  ;;  %v6692_v38 = vpop.f32.mrb[18].mxu1  ;;  %v379_v16 = vrot.slane %v20111_v2, %v19934_v53  ;;  %v387_v26 = vrot.slane %v20111_v2, %v19944_v59 }
 0x129   :  { %v6652_v35 = vpop.f32.mrb[19].mxu0  ;;  %v6693_v41 = vpop.f32.mrb[19].mxu1  ;;  %v3402_v27 = vrot.slane %v75_v5, %v19603_v6  ;;  %v391_v31 = vrot.slane %v20111_v2, %v19947_v61 }
 0x12a   :  { %v16673_v39 = vcombine.low %v6648_v25, %v6650_v30  ;;  %v16674_v47 = vcombine.low %v6689_v34, %v6691_v40  ;;  %v383_v25 = vrot.slane %v20111_v2, %v19940_v56  ;;  %v3409_v34 = vrot.slane %v3395_v21, %v19603_v6 }
 0x12b   :  { %19016 = vmatmul.mubr.msk.bf16.vlgmr.msra.gmra.mrb[124].mxu0 %vm4840_vm1, %v20020_v24 }
 0x12c   :  { %v16681_v44 = vrot.slane %v16673_v39, %v19603_v6  ;;  %8910 = vmatpush1.bf16.msra.mxu0 %v5230_v37  ;;  %8941 = vmatprep.mubr.bf16.mxu0 %v19553_v3  ;;  %v16688_v52 = vrot.slane %v16674_v47, %v19603_v6  ;;  %v76_v39 = vld [vmem:[#allocation2 + $0x120] sm:$0xff] }
 0x12d   :  { %19018 = vmatmul.mubr.msk.bf16.vlgmr.msra.gmra.mrb[124].mxu1 %vm4840_vm1, %v20020_v24  ;;  %19023 = vmatprep.subr.msk.bf16.mxu0 %vm4844_vm0, %v3376_v4 }
 0x12e   :  { %v6729_v54 = vpop.f32.mrb[20].mxu0  ;;  %8951 = vmatpush1.bf16.msra.mxu1 %v5236_v43  ;;  %8982 = vmatprep.mubr.bf16.mxu1 %v19553_v3  ;;  %v16689_v63 = vcombine.low %v16681_v44, %v16688_v52  ;;  %v6770_v1 = vpop.f32.mrb[20].mxu1  ;;  %v3410_v43 = vcombine.high %v3402_v27, %v3402_v27  ;;  %v3411_v52 = vcombine.high %v3409_v34, %v3409_v34 }
 0x12f   :  { %v6730_v57 = vadd.f32 %v6729_v54, %v363_v42  ;;  %v6731_v60 = vpop.f32.mrb[21].mxu0  ;;  %19025 = vmatprep.subr.msk.bf16.mxu1 %vm4844_vm0, %v3377_v45  ;;  %v6771_v7 = vadd.f32 %v6770_v1, %v371_v50  ;;  %v6772_v9 = vpop.f32.mrb[21].mxu1  ;;  %v5254_v42 = vsel %vm4844_vm0, %v3385_v51, 0  ;;  %v5260_v50 = vsel %vm4844_vm0, %v3392_v62, 0 }
 0x130   :  { %v6732_v0 = vadd.f32 %v6731_v60, %v367_v48  ;;  %v6733_v49 = vpop.f32.mrb[22].mxu0  ;;  %18769 = vst [vmem:[%s22650_s3 + $0x20] sm:$0xff] %v16689_v63  ;;  %v6773_v14 = vadd.f32 %v6772_v9, %v375_v55  ;;  %v6774_v11 = vpop.f32.mrb[22].mxu1  ;;  %v395_v48 = vrot.slane %v20111_v2, %v19968_v12  ;;  %v3412_v54 = vcombine.high %v76_v39, %v76_v39 }
 0x131   :  { %v6734_v8 = vpop.f32.mrb[23].mxu0  ;;  %v6775_v15 = vpop.f32.mrb[23].mxu1  ;;  %v403_v60 = vrot.slane %v20111_v2, %v19976_v23  ;;  %v3419_v62 = vrot.slane %v76_v39, %v19603_v6  ;;  %v407_v49 = vrot.slane %v20111_v2, %v19979_v29 }
 0x132   :  { %v16690_v13 = vcombine.low %v6730_v57, %v6732_v0  ;;  %v16691_v22 = vcombine.low %v6771_v7, %v6773_v14  ;;  %v399_v57 = vrot.slane %v20111_v2, %v19972_v17  ;;  %v3426_v7 = vrot.slane %v3412_v54, %v19603_v6  ;;  %v77_v14 = vld [vmem:[#allocation2 + $0x128] sm:$0xff] }
 0x133   :  { %19020 = vmatmul.mubr.msk.bf16.vlgmr.msra.gmra.mrb[128].mxu0 %vm4840_vm1, %v20020_v24  ;;  %v5266_v2 = vsel %vm4844_vm0, %v3402_v27, 0 }
 0x134   :  { %v16698_v19 = vrot.slane %v16690_v13, %v19603_v6  ;;  %8992 = vmatpush1.bf16.msra.mxu0 %v5242_v58  ;;  %9023 = vmatprep.mubr.bf16.mxu0 %v19553_v3  ;;  %v16705_v28 = vrot.slane %v16691_v22, %v19603_v6  ;;  %v20163_v13 = vld [vmem:[#allocation4 + $0x20] sm:$0xff] }
 0x135   :  { %19022 = vmatmul.mubr.msk.bf16.vlgmr.msra.gmra.mrb[128].mxu1 %vm4840_vm1, %v20020_v24  ;;  %19027 = vmatprep.subr.msk.bf16.mxu0 %vm4844_vm0, %v3393_v10 }
 0x136   :  { %v6811_v30 = vpop.f32.mrb[24].mxu0  ;;  %9033 = vmatpush1.bf16.msra.mxu1 %v5248_v18  ;;  %9064 = vmatprep.mubr.bf16.mxu1 %v19553_v3  ;;  %v16706_v35 = vcombine.low %v16698_v19, %v16705_v28  ;;  %v6852_v4 = vpop.f32.mrb[24].mxu1  ;;  %v3427_v18 = vcombine.high %v3419_v62, %v3419_v62  ;;  %v3428_v28 = vcombine.high %v3426_v7, %v3426_v7 }
 0x137   :  { %v6812_v32 = vadd.f32 %v6811_v30, %v379_v16  ;;  %v6813_v33 = vpop.f32.mrb[25].mxu0  ;;  %19029 = vmatprep.subr.msk.bf16.mxu1 %vm4844_vm0, %v3394_v20  ;;  %v6853_v40 = vadd.f32 %v6852_v4, %v387_v26  ;;  %v6854_v41 = vpop.f32.mrb[25].mxu1  ;;  %v5272_v26 = vsel %vm4844_vm0, %v3409_v34, 0  ;;  %v3429_v30 = vcombine.high %v77_v14, %v77_v14 }
 0x138   :  { %v6814_v36 = vadd.f32 %v6813_v33, %v383_v25  ;;  %v6815_v37 = vpop.f32.mrb[26].mxu0  ;;  %18770 = vst [vmem:[%s22650_s3 + $0x28] sm:$0xff] %v16706_v35  ;;  %v6855_v46 = vadd.f32 %v6854_v41, %v391_v31  ;;  %v6856_v44 = vpop.f32.mrb[26].mxu1  ;;  %v411_v25 = vrot.slane %v20163_v13, %v19934_v53  ;;  %v419_v33 = vrot.slane %v20163_v13, %v19944_v59 }
 0x139   :  { %v6816_v38 = vpop.f32.mrb[27].mxu0  ;;  %v6857_v47 = vpop.f32.mrb[27].mxu1  ;;  %v3436_v34 = vrot.slane %v77_v14, %v19603_v6  ;;  %v423_v37 = vrot.slane %v20163_v13, %v19947_v61 }
 0x13a   :  { %v16707_v45 = vcombine.low %v6812_v32, %v6814_v36  ;;  %v16708_v55 = vcombine.low %v6853_v40, %v6855_v46  ;;  %v415_v32 = vrot.slane %v20163_v13, %v19940_v56  ;;  %v3443_v40 = vrot.slane %v3429_v30, %v19603_v6 }
 0x13b   :  { %19024 = vmatmul.mubr.msk.bf16.vlgmr.msra.gmra.mrb[132].mxu0 %vm4840_vm1, %v20020_v24 }
 0x13c   :  { %v16715_v51 = vrot.slane %v16707_v45, %v19603_v6  ;;  %9074 = vmatpush1.bf16.msra.mxu0 %v5254_v42  ;;  %9105 = vmatprep.mubr.bf16.mxu0 %v19553_v3  ;;  %v16722_v63 = vrot.slane %v16708_v55, %v19603_v6  ;;  %v78_v45 = vld [vmem:[#allocation2 + $0x130] sm:$0xff] }
 0x13d   :  { %19026 = vmatmul.mubr.msk.bf16.vlgmr.msra.gmra.mrb[132].mxu1 %vm4840_vm1, %v20020_v24  ;;  %19031 = vmatprep.subr.msk.bf16.mxu0 %vm4844_vm0, %v3410_v43 }
 0x13e   :  { %v6893_v0 = vpop.f32.mrb[28].mxu0  ;;  %9115 = vmatpush1.bf16.msra.mxu1 %v5260_v50  ;;  %9146 = vmatprep.mubr.bf16.mxu1 %v19553_v3  ;;  %v16723_v8 = vcombine.low %v16715_v51, %v16722_v63  ;;  %v6934_v10 = vpop.f32.mrb[28].mxu1  ;;  %v3444_v50 = vcombine.high %v3436_v34, %v3436_v34  ;;  %v3445_v63 = vcombine.high %v3443_v40, %v3443_v40 }
 0x13f   :  { %v6894_v1 = vadd.f32 %v6893_v0, %v395_v48  ;;  %v6895_v5 = vpop.f32.mrb[29].mxu0  ;;  %19033 = vmatprep.subr.msk.bf16.mxu1 %vm4844_vm0, %v3411_v52  ;;  %v6935_v11 = vadd.f32 %v6934_v10, %v403_v60  ;;  %v6936_v16 = vpop.f32.mrb[29].mxu1  ;;  %v5278_v48 = vsel %vm4844_vm0, %v3419_v62, 0  ;;  %v5284_v60 = vsel %vm4844_vm0, %v3426_v7, 0 }
 0x140   :  { %v6896_v9 = vadd.f32 %v6895_v5, %v399_v57  ;;  %v6897_v58 = vpop.f32.mrb[30].mxu0  ;;  %18771 = vst [vmem:[%s22650_s3 + $0x30] sm:$0xff] %v16723_v8  ;;  %v6937_v21 = vadd.f32 %v6936_v16, %v407_v49  ;;  %v6938_v19 = vpop.f32.mrb[30].mxu1  ;;  %v427_v57 = vrot.slane %v20163_v13, %v19968_v12  ;;  %v3446_v0 = vcombine.high %v78_v45, %v78_v45 }
 0x141   :  { %v6898_v15 = vpop.f32.mrb[31].mxu0  ;;  %v6939_v22 = vpop.f32.mrb[31].mxu1  ;;  %v435_v5 = vrot.slane %v20163_v13, %v19976_v23  ;;  %v3453_v7 = vrot.slane %v78_v45, %v19603_v6  ;;  %v439_v58 = vrot.slane %v20163_v13, %v19979_v29 }
 0x142   :  { %v16724_v20 = vcombine.low %v6894_v1, %v6896_v9  ;;  %v16725_v31 = vcombine.low %v6935_v11, %v6937_v21  ;;  %v431_v1 = vrot.slane %v20163_v13, %v19972_v17  ;;  %v3460_v11 = vrot.slane %v3446_v0, %v19603_v6  ;;  %v79_v21 = vld [vmem:[#allocation2 + $0x138] sm:$0xff] }
 0x143   :  { %19028 = vmatmul.mubr.msk.bf16.vlgmr.msra.gmra.mrb[136].mxu0 %vm4840_vm1, %v20020_v24  ;;  %v5290_v13 = vsel %vm4844_vm0, %v3436_v34, 0 }
 0x144   :  { %v16732_v27 = vrot.slane %v16724_v20, %v19603_v6  ;;  %9156 = vmatpush1.bf16.msra.mxu0 %v5266_v2  ;;  %9187 = vmatprep.mubr.bf16.mxu0 %v19553_v3  ;;  %v16739_v35 = vrot.slane %v16725_v31, %v19603_v6  ;;  %v20215_v20 = vld [vmem:[#allocation4 + $0x28] sm:$0xff] }
 0x145   :  { %19030 = vmatmul.mubr.msk.bf16.vlgmr.msra.gmra.mrb[136].mxu1 %vm4840_vm1, %v20020_v24  ;;  %19035 = vmatprep.subr.msk.bf16.mxu0 %vm4844_vm0, %v3427_v18 }
 0x146   :  { %v6975_v36 = vpop.f32.mrb[32].mxu0  ;;  %9197 = vmatpush1.bf16.msra.mxu1 %v5272_v26  ;;  %9228 = vmatprep.mubr.bf16.mxu1 %v19553_v3  ;;  %v16740_v38 = vcombine.low %v16732_v27, %v16739_v35  ;;  %v7016_v43 = vpop.f32.mrb[32].mxu1  ;;  %v3461_v26 = vcombine.high %v3453_v7, %v3453_v7  ;;  %v3462_v35 = vcombine.high %v3460_v11, %v3460_v11 }
 0x147   :  { %v6976_v4 = vadd.f32 %v6975_v36, %v411_v25  ;;  %v6977_v39 = vpop.f32.mrb[33].mxu0  ;;  %19037 = vmatprep.subr.msk.bf16.mxu1 %vm4844_vm0, %v3428_v28  ;;  %v7017_v46 = vadd.f32 %v7016_v43, %v419_v33  ;;  %v7018_v47 = vpop.f32.mrb[33].mxu1  ;;  %v5296_v33 = vsel %vm4844_vm0, %v3443_v40, 0  ;;  %v3463_v36 = vcombine.high %v79_v21, %v79_v21 }
 0x148   :  { %v6978_v41 = vadd.f32 %v6977_v39, %v415_v32  ;;  %v6979_v42 = vpop.f32.mrb[34].mxu0  ;;  %18772 = vst [vmem:[%s22650_s3 + $0x38] sm:$0xff] %v16740_v38  ;;  %v7019_v54 = vadd.f32 %v7018_v47, %v423_v37  ;;  %v7020_v51 = vpop.f32.mrb[34].mxu1  ;;  %v443_v32 = vrot.slane %v20215_v20, %v19934_v53  ;;  %v451_v39 = vrot.slane %v20215_v20, %v19944_v59 }
 0x149   :  { %v6980_v44 = vpop.f32.mrb[35].mxu0  ;;  %v7021_v55 = vpop.f32.mrb[35].mxu1  ;;  %v3470_v40 = vrot.slane %v79_v21, %v19603_v6  ;;  %v455_v42 = vrot.slane %v20215_v20, %v19947_v61 }
 0x14a   :  { %v16741_v52 = vcombine.low %v6976_v4, %v6978_v41  ;;  %v16742_v49 = vcombine.low %v7017_v46, %v7019_v54  ;;  %v447_v4 = vrot.slane %v20215_v20, %v19940_v56  ;;  %v3477_v46 = vrot.slane %v3463_v36, %v19603_v6 }
 0x14b   :  { %19032 = vmatmul.mubr.msk.bf16.vlgmr.msra.gmra.mrb[140].mxu0 %vm4840_vm1, %v20020_v24 }
 0x14c   :  { %v16749_v62 = vrot.slane %v16741_v52, %v19603_v6  ;;  %9238 = vmatpush1.bf16.msra.mxu0 %v5278_v48  ;;  %9269 = vmatprep.mubr.bf16.mxu0 %v19553_v3  ;;  %v16756_v8 = vrot.slane %v16742_v49, %v19603_v6  ;;  %v80_v52 = vld [vmem:[#allocation2 + $0x140] sm:$0xff] }
 0x14d   :  { %19034 = vmatmul.mubr.msk.bf16.vlgmr.msra.gmra.mrb[140].mxu1 %vm4840_vm1, %v20020_v24  ;;  %19039 = vmatprep.subr.msk.bf16.mxu0 %vm4844_vm0, %v3444_v50 }
 0x14e   :  { %v7057_v9 = vpop.f32.mrb[36].mxu0  ;;  %9279 = vmatpush1.bf16.msra.mxu1 %v5284_v60  ;;  %9310 = vmatprep.mubr.bf16.mxu1 %v19553_v3  ;;  %v16757_v15 = vcombine.low %v16749_v62, %v16756_v8  ;;  %v7098_v18 = vpop.f32.mrb[36].mxu1  ;;  %v3478_v60 = vcombine.high %v3470_v40, %v3470_v40  ;;  %v3479_v8 = vcombine.high %v3477_v46, %v3477_v46 }
 0x14f   :  { %v7058_v10 = vadd.f32 %v7057_v9, %v427_v57  ;;  %v7059_v14 = vpop.f32.mrb[37].mxu0  ;;  %19041 = vmatprep.subr.msk.bf16.mxu1 %vm4844_vm0, %v3445_v63  ;;  %v7099_v19 = vadd.f32 %v7098_v18, %v435_v5  ;;  %v7100_v25 = vpop.f32.mrb[37].mxu1  ;;  %v5302_v57 = vsel %vm4844_vm0, %v3453_v7, 0  ;;  %v5308_v5 = vsel %vm4844_vm0, %v3460_v11, 0 }
 0x150   :  { %v7060_v16 = vadd.f32 %v7059_v14, %v431_v1  ;;  %v7061_v2 = vpop.f32.mrb[38].mxu0  ;;  %18773 = vst [vmem:[%s22650_s3 + $0x40] sm:$0xff] %v16757_v15  ;;  %v7101_v30 = vadd.f32 %v7100_v25, %v439_v58  ;;  %v7102_v27 = vpop.f32.mrb[38].mxu1  ;;  %v459_v1 = vrot.slane %v20215_v20, %v19968_v12  ;;  %v3480_v9 = vcombine.high %v80_v52, %v80_v52 }
 0x151   :  { %v7062_v22 = vpop.f32.mrb[39].mxu0  ;;  %v7103_v31 = vpop.f32.mrb[39].mxu1  ;;  %v467_v14 = vrot.slane %v20215_v20, %v19976_v23  ;;  %v3487_v11 = vrot.slane %v80_v52, %v19603_v6  ;;  %v471_v2 = vrot.slane %v20215_v20, %v19979_v29 }
 0x152   :  { %v16758_v28 = vcombine.low %v7058_v10, %v7060_v16  ;;  %v16759_v37 = vcombine.low %v7099_v19, %v7101_v30  ;;  %v463_v10 = vrot.slane %v20215_v20, %v19972_v17  ;;  %v3494_v19 = vrot.slane %v3480_v9, %v19603_v6  ;;  %v81_v30 = vld [vmem:[#allocation2 + $0x148] sm:$0xff] }
 0x153   :  { %19036 = vmatmul.mubr.msk.bf16.vlgmr.msra.gmra.mrb[144].mxu0 %vm4840_vm1, %v20020_v24  ;;  %v5314_v20 = vsel %vm4844_vm0, %v3470_v40, 0 }
 0x154   :  { %v16766_v34 = vrot.slane %v16758_v28, %v19603_v6  ;;  %9320 = vmatpush1.bf16.msra.mxu0 %v5290_v13  ;;  %9351 = vmatprep.mubr.bf16.mxu0 %v19553_v3  ;;  %v16773_v38 = vrot.slane %v16759_v37, %v19603_v6  ;;  %v20267_v28 = vld [vmem:[#allocation4 + $0x30] sm:$0xff] }
 0x155   :  { %19038 = vmatmul.mubr.msk.bf16.vlgmr.msra.gmra.mrb[144].mxu1 %vm4840_vm1, %v20020_v24  ;;  %19043 = vmatprep.subr.msk.bf16.mxu0 %vm4844_vm0, %v3461_v26 }
 0x156   :  { %v7139_v41 = vpop.f32.mrb[40].mxu0  ;;  %9361 = vmatpush1.bf16.msra.mxu1 %v5296_v33  ;;  %9392 = vmatprep.mubr.bf16.mxu1 %v19553_v3  ;;  %v16774_v44 = vcombine.low %v16766_v34, %v16773_v38  ;;  %v7180_v50 = vpop.f32.mrb[40].mxu1  ;;  %v3495_v33 = vcombine.high %v3487_v11, %v3487_v11  ;;  %v3496_v38 = vcombine.high %v3494_v19, %v3494_v19 }
 0x157   :  { %v7140_v43 = vadd.f32 %v7139_v41, %v443_v32  ;;  %v7141_v45 = vpop.f32.mrb[41].mxu0  ;;  %19045 = vmatprep.subr.msk.bf16.mxu1 %vm4844_vm0, %v3462_v35  ;;  %v7181_v54 = vadd.f32 %v7180_v50, %v451_v39  ;;  %v7182_v55 = vpop.f32.mrb[41].mxu1  ;;  %v5320_v39 = vsel %vm4844_vm0, %v3477_v46, 0  ;;  %v3497_v41 = vcombine.high %v81_v30, %v81_v30 }
 0x158   :  { %v7142_v47 = vadd.f32 %v7141_v45, %v447_v4  ;;  %v7143_v48 = vpop.f32.mrb[42].mxu0  ;;  %18774 = vst [vmem:[%s22650_s3 + $0x48] sm:$0xff] %v16774_v44  ;;  %v7183_v0 = vadd.f32 %v7182_v55, %v455_v42  ;;  %v7184_v62 = vpop.f32.mrb[42].mxu1  ;;  %v475_v4 = vrot.slane %v20267_v28, %v19934_v53  ;;  %v483_v45 = vrot.slane %v20267_v28, %v19944_v59 }
 0x159   :  { %v7144_v51 = vpop.f32.mrb[43].mxu0  ;;  %v7185_v49 = vpop.f32.mrb[43].mxu1  ;;  %v3504_v46 = vrot.slane %v81_v30, %v19603_v6  ;;  %v487_v48 = vrot.slane %v20267_v28, %v19947_v61 }
 0x15a   :  { %v16775_v63 = vcombine.low %v7140_v43, %v7142_v47  ;;  %v16776_v58 = vcombine.low %v7181_v54, %v7183_v0  ;;  %v479_v43 = vrot.slane %v20267_v28, %v19940_v56  ;;  %v3511_v54 = vrot.slane %v3497_v41, %v19603_v6 }
 0x15b   :  { %19040 = vmatmul.mubr.msk.bf16.vlgmr.msra.gmra.mrb[148].mxu0 %vm4840_vm1, %v20020_v24 }
 0x15c   :  { %v16783_v7 = vrot.slane %v16775_v63, %v19603_v6  ;;  %9402 = vmatpush1.bf16.msra.mxu0 %v5302_v57  ;;  %9433 = vmatprep.mubr.bf16.mxu0 %v19553_v3  ;;  %v16790_v15 = vrot.slane %v16776_v58, %v19603_v6  ;;  %v82_v63 = vld [vmem:[#allocation2 + $0x150] sm:$0xff] }
 0x15d   :  { %19042 = vmatmul.mubr.msk.bf16.vlgmr.msra.gmra.mrb[148].mxu1 %vm4840_vm1, %v20020_v24  ;;  %19047 = vmatprep.subr.msk.bf16.mxu0 %vm4844_vm0, %v3478_v60 }
 0x15e   :  { %v7221_v16 = vpop.f32.mrb[44].mxu0  ;;  %9443 = vmatpush1.bf16.msra.mxu1 %v5308_v5  ;;  %9474 = vmatprep.mubr.bf16.mxu1 %v19553_v3  ;;  %v16791_v22 = vcombine.low %v16783_v7, %v16790_v15  ;;  %v7262_v26 = vpop.f32.mrb[44].mxu1  ;;  %v3512_v5 = vcombine.high %v3504_v46, %v3504_v46  ;;  %v3513_v15 = vcombine.high %v3511_v54, %v3511_v54 }
 0x15f   :  { %v7222_v18 = vadd.f32 %v7221_v16, %v459_v1  ;;  %v7223_v21 = vpop.f32.mrb[45].mxu0  ;;  %19049 = vmatprep.subr.msk.bf16.mxu1 %vm4844_vm0, %v3479_v8  ;;  %v7263_v27 = vadd.f32 %v7262_v26, %v467_v14  ;;  %v7264_v32 = vpop.f32.mrb[45].mxu1  ;;  %v5326_v1 = vsel %vm4844_vm0, %v3487_v11, 0  ;;  %v5332_v14 = vsel %vm4844_vm0, %v3494_v19, 0 }
 0x160   :  { %v7224_v25 = vadd.f32 %v7223_v21, %v463_v10  ;;  %v7225_v13 = vpop.f32.mrb[46].mxu0  ;;  %18775 = vst [vmem:[%s22650_s3 + $0x50] sm:$0xff] %v16791_v22  ;;  %v7265_v36 = vadd.f32 %v7264_v32, %v471_v2  ;;  %v7266_v34 = vpop.f32.mrb[46].mxu1  ;;  %v491_v10 = vrot.slane %v20267_v28, %v19968_v12  ;;  %v3514_v16 = vcombine.high %v82_v63, %v82_v63 }
 0x161   :  { %v7226_v31 = vpop.f32.mrb[47].mxu0  ;;  %v7267_v37 = vpop.f32.mrb[47].mxu1  ;;  %v499_v21 = vrot.slane %v20267_v28, %v19976_v23  ;;  %v3521_v19 = vrot.slane %v82_v63, %v19603_v6  ;;  %v503_v13 = vrot.slane %v20267_v28, %v19979_v29 }
 0x162   :  { %v16792_v35 = vcombine.low %v7222_v18, %v7224_v25  ;;  %v16793_v42 = vcombine.low %v7263_v27, %v7265_v36  ;;  %v495_v18 = vrot.slane %v20267_v28, %v19972_v17  ;;  %v3528_v27 = vrot.slane %v3514_v16, %v19603_v6  ;;  %v83_v36 = vld [vmem:[#allocation2 + $0x158] sm:$0xff] }
 0x163   :  { %19044 = vmatmul.mubr.msk.bf16.vlgmr.msra.gmra.mrb[152].mxu0 %vm4840_vm1, %v20020_v24  ;;  %v5338_v28 = vsel %vm4844_vm0, %v3504_v46, 0 }
 0x164   :  { %v16800_v40 = vrot.slane %v16792_v35, %v19603_v6  ;;  %9484 = vmatpush1.bf16.msra.mxu0 %v5314_v20  ;;  %9515 = vmatprep.mubr.bf16.mxu0 %v19553_v3  ;;  %v16807_v44 = vrot.slane %v16793_v42, %v19603_v6  ;;  %v20319_v35 = vld [vmem:[#allocation4 + $0x38] sm:$0xff] }
 0x165   :  { %19046 = vmatmul.mubr.msk.bf16.vlgmr.msra.gmra.mrb[152].mxu1 %vm4840_vm1, %v20020_v24  ;;  %19051 = vmatprep.subr.msk.bf16.mxu0 %vm4844_vm0, %v3495_v33 }
 0x166   :  { %v7303_v47 = vpop.f32.mrb[48].mxu0  ;;  %9525 = vmatpush1.bf16.msra.mxu1 %v5320_v39  ;;  %9556 = vmatprep.mubr.bf16.mxu1 %v19553_v3  ;;  %v16808_v51 = vcombine.low %v16800_v40, %v16807_v44  ;;  %v7344_v60 = vpop.f32.mrb[48].mxu1  ;;  %v3529_v39 = vcombine.high %v3521_v19, %v3521_v19  ;;  %v3530_v44 = vcombine.high %v3528_v27, %v3528_v27 }
 0x167   :  { %v7304_v50 = vadd.f32 %v7303_v47, %v475_v4  ;;  %v7305_v52 = vpop.f32.mrb[49].mxu0  ;;  %19053 = vmatprep.subr.msk.bf16.mxu1 %vm4844_vm0, %v3496_v38  ;;  %v7345_v0 = vadd.f32 %v7344_v60, %v483_v45  ;;  %v7346_v49 = vpop.f32.mrb[49].mxu1  ;;  %v5344_v45 = vsel %vm4844_vm0, %v3511_v54, 0  ;;  %v3531_v47 = vcombine.high %v83_v36, %v83_v36 }
 0x168   :  { %v7306_v55 = vadd.f32 %v7305_v52, %v479_v43  ;;  %v7307_v57 = vpop.f32.mrb[50].mxu0  ;;  %18776 = vst [vmem:[%s22650_s3 + $0x58] sm:$0xff] %v16808_v51  ;;  %v7347_v9 = vadd.f32 %v7346_v49, %v487_v48  ;;  %v7348_v7 = vpop.f32.mrb[50].mxu1  ;;  %v507_v43 = vrot.slane %v20319_v35, %v19934_v53  ;;  %v515_v52 = vrot.slane %v20319_v35, %v19944_v59 }
 0x169   :  { %v7308_v62 = vpop.f32.mrb[51].mxu0  ;;  %v7349_v58 = vpop.f32.mrb[51].mxu1  ;;  %v3538_v54 = vrot.slane %v83_v36, %v19603_v6  ;;  %v519_v57 = vrot.slane %v20319_v35, %v19947_v61 }
 0x16a   :  { %v16809_v8 = vcombine.low %v7304_v50, %v7306_v55  ;;  %v16810_v2 = vcombine.low %v7345_v0, %v7347_v9  ;;  %v511_v50 = vrot.slane %v20319_v35, %v19940_v56  ;;  %v3545_v0 = vrot.slane %v3531_v47, %v19603_v6 }
 0x16b   :  { %19048 = vmatmul.mubr.msk.bf16.vlgmr.msra.gmra.mrb[156].mxu0 %vm4840_vm1, %v20020_v24 }
 0x16c   :  { %v16817_v11 = vrot.slane %v16809_v8, %v19603_v6  ;;  %9566 = vmatpush1.bf16.msra.mxu0 %v5326_v1  ;;  %9597 = vmatprep.mubr.bf16.mxu0 %v19553_v3  ;;  %v16824_v22 = vrot.slane %v16810_v2, %v19603_v6  ;;  %v84_v8 = vld [vmem:[#allocation2 + $0x160] sm:$0xff] }
 0x16d   :  { %19050 = vmatmul.mubr.msk.bf16.vlgmr.msra.gmra.mrb[156].mxu1 %vm4840_vm1, %v20020_v24  ;;  %19055 = vmatprep.subr.msk.bf16.mxu0 %vm4844_vm0, %v3512_v5 }
 0x16e   :  { %v7385_v25 = vpop.f32.mrb[52].mxu0  ;;  %9607 = vmatpush1.bf16.msra.mxu1 %v5332_v14  ;;  %9638 = vmatprep.mubr.bf16.mxu1 %v19553_v3  ;;  %v16825_v31 = vcombine.low %v16817_v11, %v16824_v22  ;;  %v7426_v33 = vpop.f32.mrb[52].mxu1  ;;  %v3546_v14 = vcombine.high %v3538_v54, %v3538_v54  ;;  %v3547_v22 = vcombine.high %v3545_v0, %v3545_v0 }
 0x16f   :  { %v7386_v26 = vadd.f32 %v7385_v25, %v491_v10  ;;  %v7387_v30 = vpop.f32.mrb[53].mxu0  ;;  %19057 = vmatprep.subr.msk.bf16.mxu1 %vm4844_vm0, %v3513_v15  ;;  %v7427_v34 = vadd.f32 %v7426_v33, %v499_v21  ;;  %v7428_v4 = vpop.f32.mrb[53].mxu1  ;;  %v5350_v10 = vsel %vm4844_vm0, %v3521_v19, 0  ;;  %v5356_v21 = vsel %vm4844_vm0, %v3528_v27, 0 }
 0x170   :  { %v7388_v32 = vadd.f32 %v7387_v30, %v495_v18  ;;  %v7389_v20 = vpop.f32.mrb[54].mxu0  ;;  %18777 = vst [vmem:[%s22650_s3 + $0x60] sm:$0xff] %v16825_v31  ;;  %v7429_v41 = vadd.f32 %v7428_v4, %v503_v13  ;;  %v7430_v40 = vpop.f32.mrb[54].mxu1  ;;  %v523_v18 = vrot.slane %v20319_v35, %v19968_v12  ;;  %v3548_v25 = vcombine.high %v84_v8, %v84_v8 }
 0x171   :  { %v7390_v37 = vpop.f32.mrb[55].mxu0  ;;  %v7431_v42 = vpop.f32.mrb[55].mxu1  ;;  %v531_v30 = vrot.slane %v20319_v35, %v19976_v23  ;;  %v3555_v27 = vrot.slane %v84_v8, %v19603_v6  ;;  %v535_v20 = vrot.slane %v20319_v35, %v19979_v29 }
 0x172   :  { %v16826_v38 = vcombine.low %v7386_v26, %v7388_v32  ;;  %v16827_v48 = vcombine.low %v7427_v34, %v7429_v41  ;;  %v527_v26 = vrot.slane %v20319_v35, %v19972_v17  ;;  %v5362_v35 = vsel %vm4844_vm0, %v3538_v54, 0 }
 0x173   :  { %19052 = vmatmul.mubr.msk.bf16.vlgmr.msra.gmra.mrb[160].mxu0 %vm4840_vm1, %v20020_v24 }
 0x174   :  { %v16834_v46 = vrot.slane %v16826_v38, %v19603_v6  ;;  %9648 = vmatpush1.bf16.msra.mxu0 %v5338_v28  ;;  %9679 = vmatprep.mubr.bf16.mxu0 %v19553_v3  ;;  %v16841_v51 = vrot.slane %v16827_v48, %v19603_v6  ;;  %v85_v38 = vld [vmem:[#allocation2 + $0x168] sm:$0xff]  ;;  %v20380_v48 = vld [vmem:[%s22647_s0] sm:$0x1] }
 0x175   :  { %19054 = vmatmul.mubr.msk.bf16.vlgmr.msra.gmra.mrb[160].mxu1 %vm4840_vm1, %v20020_v24  ;;  %19059 = vmatprep.subr.msk.bf16.mxu0 %vm4844_vm0, %v3529_v39  ;;  %v20371_v39 = vld [vmem:[#allocation4 + $0x40] sm:$0xff] }
 0x176   :  { %v7467_v55 = vpop.f32.mrb[56].mxu0  ;;  %9689 = vmatpush1.bf16.msra.mxu1 %v5344_v45  ;;  %9720 = vmatprep.mubr.bf16.mxu1 %v19553_v3  ;;  %v16842_v62 = vcombine.low %v16834_v46, %v16841_v51  ;;  %v7508_v5 = vpop.f32.mrb[56].mxu1  ;;  %v3565_v51 = vcombine.high %v85_v38, %v85_v38 }
 0x177   :  { %v7468_v60 = vadd.f32 %v7467_v55, %v507_v43  ;;  %v7469_v63 = vpop.f32.mrb[57].mxu0  ;;  %19061 = vmatprep.subr.msk.bf16.mxu1 %vm4844_vm0, %v3530_v44  ;;  %v7509_v9 = vadd.f32 %v7508_v5, %v515_v52  ;;  %v7510_v58 = vpop.f32.mrb[57].mxu1  ;;  %v3563_v43 = vcombine.high %v3555_v27, %v3555_v27  ;;  %v5368_v52 = vsel %vm4844_vm0, %v3545_v0, 0 }
 0x178   :  { %v7470_v49 = vadd.f32 %v7469_v63, %v511_v50  ;;  %v7471_v1 = vpop.f32.mrb[58].mxu0  ;;  %18778 = vst [vmem:[%s22650_s3 + $0x68] sm:$0xff] %v16842_v62  ;;  %v7511_v16 = vadd.f32 %v7510_v58, %v519_v57  ;;  %v7512_v11 = vpop.f32.mrb[58].mxu1  ;;  %v539_v50 = vrot.slane %v20371_v39, %v19934_v53  ;;  %v547_v63 = vrot.slane %v20371_v39, %v19944_v59 }
 0x179   :  { %v7472_v7 = vpop.f32.mrb[59].mxu0  ;;  %v7513_v2 = vpop.f32.mrb[59].mxu1  ;;  %v3572_v0 = vrot.slane %v85_v38, %v19603_v6  ;;  %v551_v1 = vrot.slane %v20371_v39, %v19947_v61 }
 0x17a   :  { %v16843_v15 = vcombine.low %v7468_v60, %v7470_v49  ;;  %v16844_v13 = vcombine.low %v7509_v9, %v7511_v16  ;;  %v543_v60 = vrot.slane %v20371_v39, %v19940_v56  ;;  %v3579_v9 = vrot.slane %v3565_v51, %v19603_v6 }
 0x17b   :  { %19056 = vmatmul.mubr.msk.bf16.vlgmr.msra.gmra.mrb[164].mxu0 %vm4840_vm1, %v20020_v24 }
 0x17c   :  { %v16851_v19 = vrot.slane %v16843_v15, %v19603_v6  ;;  %9730 = vmatpush1.bf16.msra.mxu0 %v5350_v10  ;;  %9761 = vmatprep.mubr.bf16.mxu0 %v19553_v3  ;;  %v16858_v31 = vrot.slane %v16844_v13, %v19603_v6  ;;  %v86_v15 = vld [vmem:[#allocation2 + $0x170] sm:$0xff] }
 0x17d   :  { %19058 = vmatmul.mubr.msk.bf16.vlgmr.msra.gmra.mrb[164].mxu1 %vm4840_vm1, %v20020_v24  ;;  %19063 = vmatprep.subr.msk.bf16.mxu0 %vm4844_vm0, %v3546_v14  ;;  %v3562_v24 = vrot.slane %v3548_v25, %v19603_v6 }
 0x17e   :  { %v7549_v32 = vpop.f32.mrb[60].mxu0  ;;  %9771 = vmatpush1.bf16.msra.mxu1 %v5356_v21  ;;  %9802 = vmatprep.mubr.bf16.mxu1 %v19553_v3  ;;  %v16859_v34 = vcombine.low %v16851_v19, %v16858_v31  ;;  %v7590_v28 = vpop.f32.mrb[60].mxu1  ;;  %v3580_v21 = vcombine.high %v3572_v0, %v3572_v0  ;;  %v3581_v31 = vcombine.high %v3579_v9, %v3579_v9 }
 0x17f   :  { %v7550_v33 = vadd.f32 %v7549_v32, %v523_v18  ;;  %v7551_v36 = vpop.f32.mrb[61].mxu0  ;;  %19065 = vmatprep.subr.msk.bf16.mxu1 %vm4844_vm0, %v3547_v22  ;;  %v7591_v41 = vadd.f32 %v7590_v28, %v531_v30  ;;  %v7592_v42 = vpop.f32.mrb[61].mxu1  ;;  %v3564_v54 = vcombine.high %v3562_v24, %v3562_v24  ;;  %v5374_v18 = vsel %vm4844_vm0, %v3555_v27, 0 }
 0x180   :  { %v7552_v37 = vadd.f32 %v7551_v36, %v527_v26  ;;  %v7553_v4 = vpop.f32.mrb[62].mxu0  ;;  %18779 = vst [vmem:[%s22650_s3 + $0x70] sm:$0xff] %v16859_v34  ;;  %v7593_v44 = vadd.f32 %v7592_v42, %v535_v20  ;;  %v7594_v47 = vpop.f32.mrb[62].mxu1  ;;  %v555_v26 = vrot.slane %v20371_v39, %v19968_v12  ;;  %v5380_v30 = vsel %vm4844_vm0, %v3562_v24, 0 }
 0x181   :  { %v7554_v40 = vpop.f32.mrb[63].mxu0  ;;  %v7595_v46 = vpop.f32.mrb[63].mxu1  ;;  %v3582_v32 = vcombine.high %v86_v15, %v86_v15  ;;  %v563_v36 = vrot.slane %v20371_v39, %v19976_v23  ;;  %v3589_v24 = vrot.slane %v86_v15, %v19603_v6  ;;  %v567_v4 = vrot.slane %v20371_v39, %v19979_v29 }
 0x182   :  { %v16860_v45 = vcombine.low %v7550_v33, %v7552_v37  ;;  %v16861_v57 = vcombine.low %v7591_v41, %v7593_v44  ;;  %v559_v33 = vrot.slane %v20371_v39, %v19972_v17  ;;  %v87_v44 = vld [vmem:[#allocation2 + $0x178] sm:$0xff]  ;;  %v5386_v39 = vsel %vm4844_vm0, %v3572_v0, 0 }
 0x183   :  { %19060 = vmatmul.mubr.msk.bf16.vlgmr.msra.gmra.mrb[168].mxu0 %vm4840_vm1, %v20380_v48  ;;  %v3596_v41 = vrot.slane %v3582_v32, %v19603_v6 }
 0x184   :  { %v16868_v55 = vrot.slane %v16860_v45, %v19603_v6  ;;  %9812 = vmatpush1.bf16.msra.mxu0 %v5362_v35  ;;  %9843 = vmatprep.mubr.bf16.mxu0 %v19553_v3  ;;  %v16875_v62 = vrot.slane %v16861_v57, %v19603_v6  ;;  %v20428_v45 = vld [vmem:[#allocation4 + $0x48] sm:$0xff] }
 0x185   :  { %19062 = vmatmul.mubr.msk.bf16.vlgmr.msra.gmra.mrb[168].mxu1 %vm4840_vm1, %v20380_v48  ;;  %19067 = vmatprep.subr.msk.bf16.mxu0 %vm4844_vm0, %v3563_v43 }
 0x186   :  { %v7631_v49 = vpop.f32.mrb[64].mxu0  ;;  %9853 = vmatpush1.bf16.msra.mxu1 %v5368_v52  ;;  %9884 = vmatprep.mubr.bf16.mxu1 %v19553_v3  ;;  %v16876_v7 = vcombine.low %v16868_v55, %v16875_v62  ;;  %v7672_v14 = vpop.f32.mrb[64].mxu1  ;;  %v3597_v52 = vcombine.high %v3589_v24, %v3589_v24  ;;  %v3598_v62 = vcombine.high %v3596_v41, %v3596_v41 }
 0x187   :  { %v7632_v5 = vadd.f32 %v7631_v49, %v539_v50  ;;  %v7633_v8 = vpop.f32.mrb[65].mxu0  ;;  %19069 = vmatprep.subr.msk.bf16.mxu1 %vm4844_vm0, %v3564_v54  ;;  %v7673_v16 = vadd.f32 %v7672_v14, %v547_v63  ;;  %v7674_v2 = vpop.f32.mrb[65].mxu1  ;;  %v5392_v63 = vsel %vm4844_vm0, %v3579_v9, 0  ;;  %v3599_v49 = vcombine.high %v87_v44, %v87_v44 }
 0x188   :  { %v7634_v58 = vadd.f32 %v7633_v8, %v543_v60  ;;  %v7635_v10 = vpop.f32.mrb[66].mxu0  ;;  %18780 = vst [vmem:[%s22650_s3 + $0x78] sm:$0xff] %v16876_v7  ;;  %v7675_v25 = vadd.f32 %v7674_v2, %v551_v1  ;;  %v7676_v19 = vpop.f32.mrb[66].mxu1  ;;  %v571_v60 = vrot.slane %v20428_v45, %v19934_v53  ;;  %v579_v8 = vrot.slane %v20428_v45, %v19944_v59 }
 0x189   :  { %v7636_v11 = vpop.f32.mrb[67].mxu0  ;;  %v7677_v13 = vpop.f32.mrb[67].mxu1  ;;  %v3606_v9 = vrot.slane %v87_v44, %v19603_v6  ;;  %v583_v10 = vrot.slane %v20428_v45, %v19947_v61 }
 0x18a   :  { %v16877_v22 = vcombine.low %v7632_v5, %v7634_v58  ;;  %v16878_v20 = vcombine.low %v7673_v16, %v7675_v25  ;;  %v575_v5 = vrot.slane %v20428_v45, %v19940_v56  ;;  %v3613_v16 = vrot.slane %v3599_v49, %v19603_v6 }
 0x18b   :  { %19064 = vmatmul.mubr.msk.bf16.vlgmr.msra.gmra.mrb[172].mxu0 %vm4840_vm1, %v20380_v48 }
 0x18c   :  { %v16885_v27 = vrot.slane %v16877_v22, %v19603_v6  ;;  %9894 = vmatpush1.bf16.msra.mxu0 %v5374_v18  ;;  %9925 = vmatprep.mubr.bf16.mxu0 %v19553_v3  ;;  %v16892_v34 = vrot.slane %v16878_v20, %v19603_v6  ;;  %v88_v22 = vld [vmem:[#allocation2 + $0x180] sm:$0xff] }
 0x18d   :  { %19066 = vmatmul.mubr.msk.bf16.vlgmr.msra.gmra.mrb[172].mxu1 %vm4840_vm1, %v20380_v48  ;;  %19071 = vmatprep.subr.msk.bf16.mxu0 %vm4844_vm0, %v3580_v21 }
 0x18e   :  { %v7713_v37 = vpop.f32.mrb[68].mxu0  ;;  %9935 = vmatpush1.bf16.msra.mxu1 %v5380_v30  ;;  %9966 = vmatprep.mubr.bf16.mxu1 %v19553_v3  ;;  %v16893_v40 = vcombine.low %v16885_v27, %v16892_v34  ;;  %v7754_v43 = vpop.f32.mrb[68].mxu1  ;;  %v3614_v30 = vcombine.high %v3606_v9, %v3606_v9  ;;  %v3615_v34 = vcombine.high %v3613_v16, %v3613_v16 }
 0x18f   :  { %v7714_v28 = vadd.f32 %v7713_v37, %v555_v26  ;;  %v7715_v38 = vpop.f32.mrb[69].mxu0  ;;  %19073 = vmatprep.subr.msk.bf16.mxu1 %vm4844_vm0, %v3581_v31  ;;  %v7755_v47 = vadd.f32 %v7754_v43, %v563_v36  ;;  %v7756_v50 = vpop.f32.mrb[69].mxu1  ;;  %v5398_v26 = vsel %vm4844_vm0, %v3589_v24, 0  ;;  %v5404_v36 = vsel %vm4844_vm0, %v3596_v41, 0 }
 0x190   :  { %v7716_v42 = vadd.f32 %v7715_v38, %v559_v33  ;;  %v7717_v35 = vpop.f32.mrb[70].mxu0  ;;  %18781 = vst [vmem:[%s22650_s3 + $0x80] sm:$0xff] %v16893_v40  ;;  %v7757_v51 = vadd.f32 %v7756_v50, %v567_v4  ;;  %v7758_v55 = vpop.f32.mrb[70].mxu1  ;;  %v587_v33 = vrot.slane %v20428_v45, %v19968_v12  ;;  %v3616_v37 = vcombine.high %v88_v22, %v88_v22 }
 0x191   :  { %v7718_v46 = vpop.f32.mrb[71].mxu0  ;;  %v7759_v57 = vpop.f32.mrb[71].mxu1  ;;  %v595_v38 = vrot.slane %v20428_v45, %v19976_v23  ;;  %v3623_v41 = vrot.slane %v88_v22, %v19603_v6  ;;  %v599_v35 = vrot.slane %v20428_v45, %v19979_v29 }
 0x192   :  { %v16894_v54 = vcombine.low %v7714_v28, %v7716_v42  ;;  %v16895_v1 = vcombine.low %v7755_v47, %v7757_v51  ;;  %v591_v28 = vrot.slane %v20428_v45, %v19972_v17  ;;  %v3630_v47 = vrot.slane %v3616_v37, %v19603_v6  ;;  %v89_v51 = vld [vmem:[#allocation2 + $0x188] sm:$0xff] }
 0x193   :  { %19068 = vmatmul.mubr.msk.bf16.vlgmr.msra.gmra.mrb[176].mxu0 %vm4840_vm1, %v20380_v48  ;;  %v5410_v45 = vsel %vm4844_vm0, %v3606_v9, 0 }
 0x194   :  { %v16902_v0 = vrot.slane %v16894_v54, %v19603_v6  ;;  %9976 = vmatpush1.bf16.msra.mxu0 %v5386_v39  ;;  %10007 = vmatprep.mubr.bf16.mxu0 %v19553_v3  ;;  %v16909_v7 = vrot.slane %v16895_v1, %v19603_v6  ;;  %v20480_v54 = vld [vmem:[#allocation4 + $0x50] sm:$0xff] }
 0x195   :  { %19070 = vmatmul.mubr.msk.bf16.vlgmr.msra.gmra.mrb[176].mxu1 %vm4840_vm1, %v20380_v48  ;;  %19075 = vmatprep.subr.msk.bf16.mxu0 %vm4844_vm0, %v3597_v52 }
 0x196   :  { %v7795_v58 = vpop.f32.mrb[72].mxu0  ;;  %10017 = vmatpush1.bf16.msra.mxu1 %v5392_v63  ;;  %10048 = vmatprep.mubr.bf16.mxu1 %v19553_v3  ;;  %v16910_v11 = vcombine.low %v16902_v0, %v16909_v7  ;;  %v7836_v21 = vpop.f32.mrb[72].mxu1  ;;  %v3631_v63 = vcombine.high %v3623_v41, %v3623_v41  ;;  %v3632_v7 = vcombine.high %v3630_v47, %v3630_v47 }
 0x197   :  { %v7796_v14 = vadd.f32 %v7795_v58, %v571_v60  ;;  %v7797_v15 = vpop.f32.mrb[73].mxu0  ;;  %19077 = vmatprep.subr.msk.bf16.mxu1 %vm4844_vm0, %v3598_v62  ;;  %v7837_v25 = vadd.f32 %v7836_v21, %v579_v8  ;;  %v7838_v13 = vpop.f32.mrb[73].mxu1  ;;  %v5416_v8 = vsel %vm4844_vm0, %v3613_v16, 0  ;;  %v3633_v58 = vcombine.high %v89_v51, %v89_v51 }
 0x198   :  { %v7798_v2 = vadd.f32 %v7797_v15, %v575_v5  ;;  %v7799_v18 = vpop.f32.mrb[74].mxu0  ;;  %18782 = vst [vmem:[%s22650_s3 + $0x88] sm:$0xff] %v16910_v11  ;;  %v7839_v32 = vadd.f32 %v7838_v13, %v583_v10  ;;  %v7840_v27 = vpop.f32.mrb[74].mxu1  ;;  %v603_v5 = vrot.slane %v20480_v54, %v19934_v53  ;;  %v611_v15 = vrot.slane %v20480_v54, %v19944_v59 }
 0x199   :  { %v7800_v19 = vpop.f32.mrb[75].mxu0  ;;  %v7841_v20 = vpop.f32.mrb[75].mxu1  ;;  %v3640_v16 = vrot.slane %v89_v51, %v19603_v6  ;;  %v615_v18 = vrot.slane %v20480_v54, %v19947_v61 }
 0x19a   :  { %v16911_v31 = vcombine.low %v7796_v14, %v7798_v2  ;;  %v16912_v4 = vcombine.low %v7837_v25, %v7839_v32  ;;  %v607_v14 = vrot.slane %v20480_v54, %v19940_v56  ;;  %v3647_v25 = vrot.slane %v3633_v58, %v19603_v6 }
 0x19b   :  { %19072 = vmatmul.mubr.msk.bf16.vlgmr.msra.gmra.mrb[180].mxu0 %vm4840_vm1, %v20380_v48 }
 0x19c   :  { %v16919_v24 = vrot.slane %v16911_v31, %v19603_v6  ;;  %10058 = vmatpush1.bf16.msra.mxu0 %v5398_v26  ;;  %10089 = vmatprep.mubr.bf16.mxu0 %v19553_v3  ;;  %v16926_v40 = vrot.slane %v16912_v4, %v19603_v6  ;;  %v90_v31 = vld [vmem:[#allocation2 + $0x190] sm:$0xff] }
 0x19d   :  { %19074 = vmatmul.mubr.msk.bf16.vlgmr.msra.gmra.mrb[180].mxu1 %vm4840_vm1, %v20380_v48  ;;  %19079 = vmatprep.subr.msk.bf16.mxu0 %vm4844_vm0, %v3614_v30 }
 0x19e   :  { %v7877_v42 = vpop.f32.mrb[76].mxu0  ;;  %10099 = vmatpush1.bf16.msra.mxu1 %v5404_v36  ;;  %10130 = vmatprep.mubr.bf16.mxu1 %v19553_v3  ;;  %v16927_v46 = vcombine.low %v16919_v24, %v16926_v40  ;;  %v7918_v52 = vpop.f32.mrb[76].mxu1  ;;  %v3648_v36 = vcombine.high %v3640_v16, %v3640_v16  ;;  %v3649_v40 = vcombine.high %v3647_v25, %v3647_v25 }
 0x19f   :  { %v7878_v43 = vadd.f32 %v7877_v42, %v587_v33  ;;  %v7879_v44 = vpop.f32.mrb[77].mxu0  ;;  %19081 = vmatprep.subr.msk.bf16.mxu1 %vm4844_vm0, %v3615_v34  ;;  %v7919_v55 = vadd.f32 %v7918_v52, %v595_v38  ;;  %v7920_v60 = vpop.f32.mrb[77].mxu1  ;;  %v5422_v33 = vsel %vm4844_vm0, %v3623_v41, 0  ;;  %v5428_v38 = vsel %vm4844_vm0, %v3630_v47, 0 }
 0x1a0   :  { %v7880_v50 = vadd.f32 %v7879_v44, %v591_v28  ;;  %v7881_v39 = vpop.f32.mrb[78].mxu0  ;;  %18783 = vst [vmem:[%s22650_s3 + $0x90] sm:$0xff] %v16927_v46  ;;  %v7921_v49 = vadd.f32 %v7920_v60, %v599_v35  ;;  %v7922_v0 = vpop.f32.mrb[78].mxu1  ;;  %v619_v28 = vrot.slane %v20480_v54, %v19968_v12  ;;  %v3650_v42 = vcombine.high %v90_v31, %v90_v31 }
 0x1a1   :  { %v7882_v57 = vpop.f32.mrb[79].mxu0  ;;  %v7923_v1 = vpop.f32.mrb[79].mxu1  ;;  %v627_v44 = vrot.slane %v20480_v54, %v19976_v23  ;;  %v3657_v47 = vrot.slane %v90_v31, %v19603_v6  ;;  %v631_v39 = vrot.slane %v20480_v54, %v19979_v29 }
 0x1a2   :  { %v16928_v62 = vcombine.low %v7878_v43, %v7880_v50  ;;  %v16929_v10 = vcombine.low %v7919_v55, %v7921_v49  ;;  %v623_v43 = vrot.slane %v20480_v54, %v19972_v17  ;;  %v3664_v55 = vrot.slane %v3650_v42, %v19603_v6  ;;  %v91_v49 = vld [vmem:[#allocation2 + $0x198] sm:$0xff] }
 0x1a3   :  { %19076 = vmatmul.mubr.msk.bf16.vlgmr.msra.gmra.mrb[184].mxu0 %vm4840_vm1, %v20380_v48  ;;  %v5434_v54 = vsel %vm4844_vm0, %v3640_v16, 0 }
 0x1a4   :  { %v16936_v9 = vrot.slane %v16928_v62, %v19603_v6  ;;  %10140 = vmatpush1.bf16.msra.mxu0 %v5410_v45  ;;  %10171 = vmatprep.mubr.bf16.mxu0 %v19553_v3  ;;  %v16943_v11 = vrot.slane %v16929_v10, %v19603_v6  ;;  %v20532_v62 = vld [vmem:[#allocation4 + $0x58] sm:$0xff] }
 0x1a5   :  { %19078 = vmatmul.mubr.msk.bf16.vlgmr.msra.gmra.mrb[184].mxu1 %vm4840_vm1, %v20380_v48  ;;  %19083 = vmatprep.subr.msk.bf16.mxu0 %vm4844_vm0, %v3631_v63 }
 0x1a6   :  { %v7959_v2 = vpop.f32.mrb[80].mxu0  ;;  %10181 = vmatpush1.bf16.msra.mxu1 %v5416_v8  ;;  %10212 = vmatprep.mubr.bf16.mxu1 %v19553_v3  ;;  %v16944_v19 = vcombine.low %v16936_v9, %v16943_v11  ;;  %v8000_v30 = vpop.f32.mrb[80].mxu1  ;;  %v3665_v8 = vcombine.high %v3657_v47, %v3657_v47  ;;  %v3666_v11 = vcombine.high %v3664_v55, %v3664_v55 }
 0x1a7   :  { %v7960_v21 = vadd.f32 %v7959_v2, %v603_v5  ;;  %v7961_v22 = vpop.f32.mrb[81].mxu0  ;;  %19085 = vmatprep.subr.msk.bf16.mxu1 %vm4844_vm0, %v3632_v7  ;;  %v8001_v32 = vadd.f32 %v8000_v30, %v611_v15  ;;  %v8002_v20 = vpop.f32.mrb[81].mxu1  ;;  %v5440_v15 = vsel %vm4844_vm0, %v3647_v25, 0  ;;  %v3667_v2 = vcombine.high %v91_v49, %v91_v49 }
 0x1a8   :  { %v7962_v13 = vadd.f32 %v7961_v22, %v607_v14  ;;  %v7963_v26 = vpop.f32.mrb[82].mxu0  ;;  %18784 = vst [vmem:[%s22650_s3 + $0x98] sm:$0xff] %v16944_v19  ;;  %v8003_v37 = vadd.f32 %v8002_v20, %v615_v18  ;;  %v8004_v24 = vpop.f32.mrb[82].mxu1  ;;  %v635_v14 = vrot.slane %v20532_v62, %v19934_v53  ;;  %v643_v22 = vrot.slane %v20532_v62, %v19944_v59 }
 0x1a9   :  { %v7964_v27 = vpop.f32.mrb[83].mxu0  ;;  %v8005_v4 = vpop.f32.mrb[83].mxu1  ;;  %v3674_v25 = vrot.slane %v91_v49, %v19603_v6  ;;  %v647_v26 = vrot.slane %v20532_v62, %v19947_v61 }
 0x1aa   :  { %v16945_v34 = vcombine.low %v7960_v21, %v7962_v13  ;;  %v16946_v35 = vcombine.low %v8001_v32, %v8003_v37  ;;  %v639_v21 = vrot.slane %v20532_v62, %v19940_v56  ;;  %v3681_v32 = vrot.slane %v3667_v2, %v19603_v6 }
 0x1ab   :  { %19080 = vmatmul.mubr.msk.bf16.vlgmr.msra.gmra.mrb[188].mxu0 %vm4840_vm1, %v20380_v48 }
 0x1ac   :  { %v16953_v41 = vrot.slane %v16945_v34, %v19603_v6  ;;  %10222 = vmatpush1.bf16.msra.mxu0 %v5422_v33  ;;  %10253 = vmatprep.mubr.bf16.mxu0 %v19553_v3  ;;  %v16960_v46 = vrot.slane %v16946_v35, %v19603_v6  ;;  %v92_v34 = vld [vmem:[#allocation2 + $0x1a0] sm:$0xff] }
 0x1ad   :  { %19082 = vmatmul.mubr.msk.bf16.vlgmr.msra.gmra.mrb[188].mxu1 %vm4840_vm1, %v20380_v48  ;;  %19087 = vmatprep.subr.msk.bf16.mxu0 %vm4844_vm0, %v3648_v36 }
 0x1ae   :  { %v8041_v50 = vpop.f32.mrb[84].mxu0  ;;  %10263 = vmatpush1.bf16.msra.mxu1 %v5428_v38  ;;  %10294 = vmatprep.mubr.bf16.mxu1 %v19553_v3  ;;  %v16961_v57 = vcombine.low %v16953_v41, %v16960_v46  ;;  %v8082_v63 = vpop.f32.mrb[84].mxu1  ;;  %v3682_v38 = vcombine.high %v3674_v25, %v3674_v25  ;;  %v3683_v46 = vcombine.high %v3681_v32, %v3681_v32 }
 0x1af   :  { %v8042_v52 = vadd.f32 %v8041_v50, %v619_v28  ;;  %v8043_v51 = vpop.f32.mrb[85].mxu0  ;;  %19089 = vmatprep.subr.msk.bf16.mxu1 %vm4844_vm0, %v3649_v40  ;;  %v8083_v0 = vadd.f32 %v8082_v63, %v627_v44  ;;  %v8084_v5 = vpop.f32.mrb[85].mxu1  ;;  %v5446_v28 = vsel %vm4844_vm0, %v3657_v47, 0  ;;  %v5452_v44 = vsel %vm4844_vm0, %v3664_v55, 0 }
 0x1b0   :  { %v8044_v60 = vadd.f32 %v8043_v51, %v623_v43  ;;  %v8045_v45 = vpop.f32.mrb[86].mxu0  ;;  %18785 = vst [vmem:[%s22650_s3 + $0xa0] sm:$0xff] %v16961_v57  ;;  %v8085_v58 = vadd.f32 %v8084_v5, %v631_v39  ;;  %v8086_v9 = vpop.f32.mrb[86].mxu1  ;;  %v651_v43 = vrot.slane %v20532_v62, %v19968_v12  ;;  %v3684_v50 = vcombine.high %v92_v34, %v92_v34 }
 0x1b1   :  { %v8046_v1 = vpop.f32.mrb[87].mxu0  ;;  %v8087_v10 = vpop.f32.mrb[87].mxu1  ;;  %v659_v51 = vrot.slane %v20532_v62, %v19976_v23  ;;  %v3691_v55 = vrot.slane %v92_v34, %v19603_v6  ;;  %v663_v45 = vrot.slane %v20532_v62, %v19979_v29 }
 0x1b2   :  { %v16962_v7 = vcombine.low %v8042_v52, %v8044_v60  ;;  %v16963_v18 = vcombine.low %v8083_v0, %v8085_v58  ;;  %v655_v52 = vrot.slane %v20532_v62, %v19972_v17  ;;  %v3698_v0 = vrot.slane %v3684_v50, %v19603_v6  ;;  %v93_v58 = vld [vmem:[#allocation2 + $0x1a8] sm:$0xff] }
 0x1b3   :  { %19084 = vmatmul.mubr.msk.bf16.vlgmr.msra.gmra.mrb[192].mxu0 %vm4840_vm1, %v20380_v48  ;;  %v5458_v62 = vsel %vm4844_vm0, %v3674_v25, 0 }
 0x1b4   :  { %v16970_v16 = vrot.slane %v16962_v7, %v19603_v6  ;;  %10304 = vmatpush1.bf16.msra.mxu0 %v5434_v54  ;;  %10335 = vmatprep.mubr.bf16.mxu0 %v19553_v3  ;;  %v16977_v19 = vrot.slane %v16963_v18, %v19603_v6  ;;  %v20584_v7 = vld [vmem:[#allocation4 + $0x60] sm:$0xff] }
 0x1b5   :  { %19086 = vmatmul.mubr.msk.bf16.vlgmr.msra.gmra.mrb[192].mxu1 %vm4840_vm1, %v20380_v48  ;;  %19091 = vmatprep.subr.msk.bf16.mxu0 %vm4844_vm0, %v3665_v8 }
 0x1b6   :  { %v8123_v13 = vpop.f32.mrb[88].mxu0  ;;  %10345 = vmatpush1.bf16.msra.mxu1 %v5440_v15  ;;  %10376 = vmatprep.mubr.bf16.mxu1 %v19553_v3  ;;  %v16978_v27 = vcombine.low %v16970_v16, %v16977_v19  ;;  %v8164_v36 = vpop.f32.mrb[88].mxu1  ;;  %v3699_v15 = vcombine.high %v3691_v55, %v3691_v55  ;;  %v3700_v19 = vcombine.high %v3698_v0, %v3698_v0 }
 0x1b7   :  { %v8124_v30 = vadd.f32 %v8123_v13, %v635_v14  ;;  %v8125_v31 = vpop.f32.mrb[89].mxu0  ;;  %19093 = vmatprep.subr.msk.bf16.mxu1 %vm4844_vm0, %v3666_v11  ;;  %v8165_v37 = vadd.f32 %v8164_v36, %v643_v22  ;;  %v8166_v4 = vpop.f32.mrb[89].mxu1  ;;  %v5464_v22 = vsel %vm4844_vm0, %v3681_v32, 0  ;;  %v3701_v13 = vcombine.high %v93_v58, %v93_v58 }
 0x1b8   :  { %v8126_v20 = vadd.f32 %v8125_v31, %v639_v21  ;;  %v8127_v33 = vpop.f32.mrb[90].mxu0  ;;  %18786 = vst [vmem:[%s22650_s3 + $0xa8] sm:$0xff] %v16978_v27  ;;  %v8167_v42 = vadd.f32 %v8166_v4, %v647_v26  ;;  %v8168_v41 = vpop.f32.mrb[90].mxu1  ;;  %v667_v21 = vrot.slane %v20584_v7, %v19934_v53  ;;  %v675_v31 = vrot.slane %v20584_v7, %v19944_v59 }
 0x1b9   :  { %v8128_v24 = vpop.f32.mrb[91].mxu0  ;;  %v8169_v35 = vpop.f32.mrb[91].mxu1  ;;  %v3708_v32 = vrot.slane %v93_v58, %v19603_v6  ;;  %v679_v33 = vrot.slane %v20584_v7, %v19947_v61 }
 0x1ba   :  { %v16979_v40 = vcombine.low %v8124_v30, %v8126_v20  ;;  %v16980_v39 = vcombine.low %v8165_v37, %v8167_v42  ;;  %v671_v30 = vrot.slane %v20584_v7, %v19940_v56  ;;  %v3715_v37 = vrot.slane %v3701_v13, %v19603_v6 }
 0x1bb   :  { %19088 = vmatmul.mubr.msk.bf16.vlgmr.msra.gmra.mrb[196].mxu0 %vm4840_vm1, %v20380_v48 }
 0x1bc   :  { %v16987_v47 = vrot.slane %v16979_v40, %v19603_v6  ;;  %10386 = vmatpush1.bf16.msra.mxu0 %v5446_v28  ;;  %10417 = vmatprep.mubr.bf16.mxu0 %v19553_v3  ;;  %v16994_v57 = vrot.slane %v16980_v39, %v19603_v6  ;;  %v94_v40 = vld [vmem:[#allocation2 + $0x1b0] sm:$0xff] }
 0x1bd   :  { %19090 = vmatmul.mubr.msk.bf16.vlgmr.msra.gmra.mrb[196].mxu1 %vm4840_vm1, %v20380_v48  ;;  %19095 = vmatprep.subr.msk.bf16.mxu0 %vm4844_vm0, %v3682_v38 }
 0x1be   :  { %v8205_v60 = vpop.f32.mrb[92].mxu0  ;;  %10427 = vmatpush1.bf16.msra.mxu1 %v5452_v44  ;;  %10458 = vmatprep.mubr.bf16.mxu1 %v19553_v3  ;;  %v16995_v1 = vcombine.low %v16987_v47, %v16994_v57  ;;  %v8246_v8 = vpop.f32.mrb[92].mxu1  ;;  %v3716_v44 = vcombine.high %v3708_v32, %v3708_v32  ;;  %v3717_v57 = vcombine.high %v3715_v37, %v3715_v37 }
 0x1bf   :  { %v8206_v63 = vadd.f32 %v8205_v60, %v651_v43  ;;  %v8207_v49 = vpop.f32.mrb[93].mxu0  ;;  %19097 = vmatprep.subr.msk.bf16.mxu1 %vm4844_vm0, %v3683_v46  ;;  %v8247_v9 = vadd.f32 %v8246_v8, %v659_v51  ;;  %v8248_v14 = vpop.f32.mrb[93].mxu1  ;;  %v5470_v43 = vsel %vm4844_vm0, %v3691_v55, 0  ;;  %v5476_v51 = vsel %vm4844_vm0, %v3698_v0, 0 }
 0x1c0   :  { %v8208_v5 = vadd.f32 %v8207_v49, %v655_v52  ;;  %v8209_v54 = vpop.f32.mrb[94].mxu0  ;;  %18787 = vst [vmem:[%s22650_s3 + $0xb0] sm:$0xff] %v16995_v1  ;;  %v8249_v2 = vadd.f32 %v8248_v14, %v663_v45  ;;  %v8250_v16 = vpop.f32.mrb[94].mxu1  ;;  %v683_v52 = vrot.slane %v20584_v7, %v19968_v12  ;;  %v3718_v60 = vcombine.high %v94_v40, %v94_v40 }
 0x1c1   :  { %v8210_v10 = vpop.f32.mrb[95].mxu0  ;;  %v8251_v18 = vpop.f32.mrb[95].mxu1  ;;  %v691_v49 = vrot.slane %v20584_v7, %v19976_v23  ;;  %v3725_v0 = vrot.slane %v94_v40, %v19603_v6  ;;  %v695_v54 = vrot.slane %v20584_v7, %v19979_v29 }
 0x1c2   :  { %v16996_v11 = vcombine.low %v8206_v63, %v8208_v5  ;;  %v16997_v26 = vcombine.low %v8247_v9, %v8249_v2  ;;  %v687_v63 = vrot.slane %v20584_v7, %v19972_v17  ;;  %v3732_v9 = vrot.slane %v3718_v60, %v19603_v6  ;;  %v95_v2 = vld [vmem:[#allocation2 + $0x1b8] sm:$0xff] }
 0x1c3   :  { %19092 = vmatmul.mubr.msk.bf16.vlgmr.msra.gmra.mrb[200].mxu0 %vm4840_vm1, %v20380_v48  ;;  %v5482_v7 = vsel %vm4844_vm0, %v3708_v32, 0 }
 0x1c4   :  { %v17004_v25 = vrot.slane %v16996_v11, %v19603_v6  ;;  %10468 = vmatpush1.bf16.msra.mxu0 %v5458_v62  ;;  %10499 = vmatprep.mubr.bf16.mxu0 %v19553_v3  ;;  %v17011_v27 = vrot.slane %v16997_v26, %v19603_v6  ;;  %v20636_v11 = vld [vmem:[#allocation4 + $0x68] sm:$0xff] }
 0x1c5   :  { %19094 = vmatmul.mubr.msk.bf16.vlgmr.msra.gmra.mrb[200].mxu1 %vm4840_vm1, %v20380_v48  ;;  %19099 = vmatprep.subr.msk.bf16.mxu0 %vm4844_vm0, %v3699_v15 }
 0x1c6   :  { %v8287_v20 = vpop.f32.mrb[96].mxu0  ;;  %10509 = vmatpush1.bf16.msra.mxu1 %v5464_v22  ;;  %10540 = vmatprep.mubr.bf16.mxu1 %v19553_v3  ;;  %v17012_v24 = vcombine.low %v17004_v25, %v17011_v27  ;;  %v8328_v38 = vpop.f32.mrb[96].mxu1  ;;  %v3733_v22 = vcombine.high %v3725_v0, %v3725_v0  ;;  %v3734_v27 = vcombine.high %v3732_v9, %v3732_v9 }
 0x1c7   :  { %v8288_v36 = vadd.f32 %v8287_v20, %v667_v21  ;;  %v8289_v34 = vpop.f32.mrb[97].mxu0  ;;  %19101 = vmatprep.subr.msk.bf16.mxu1 %vm4844_vm0, %v3700_v19  ;;  %v8329_v42 = vadd.f32 %v8328_v38, %v675_v31  ;;  %v8330_v35 = vpop.f32.mrb[97].mxu1  ;;  %v5488_v31 = vsel %vm4844_vm0, %v3715_v37, 0  ;;  %v3735_v20 = vcombine.high %v95_v2, %v95_v2 }
 0x1c8   :  { %v8290_v4 = vadd.f32 %v8289_v34, %v671_v30  ;;  %v8291_v28 = vpop.f32.mrb[98].mxu0  ;;  %18788 = vst [vmem:[%s22650_s3 + $0xb8] sm:$0xff] %v17012_v24  ;;  %v8331_v50 = vadd.f32 %v8330_v35, %v679_v33  ;;  %v8332_v47 = vpop.f32.mrb[98].mxu1  ;;  %v699_v30 = vrot.slane %v20636_v11, %v19934_v53  ;;  %v707_v34 = vrot.slane %v20636_v11, %v19944_v59 }
 0x1c9   :  { %v8292_v41 = vpop.f32.mrb[99].mxu0  ;;  %v8333_v39 = vpop.f32.mrb[99].mxu1  ;;  %v3742_v37 = vrot.slane %v95_v2, %v19603_v6  ;;  %v711_v28 = vrot.slane %v20636_v11, %v19947_v61 }
 0x1ca   :  { %v17013_v46 = vcombine.low %v8288_v36, %v8290_v4  ;;  %v17014_v45 = vcombine.low %v8329_v42, %v8331_v50  ;;  %v703_v36 = vrot.slane %v20636_v11, %v19940_v56  ;;  %v3749_v42 = vrot.slane %v3735_v20, %v19603_v6 }
 0x1cb   :  { %19096 = vmatmul.mubr.msk.bf16.vlgmr.msra.gmra.mrb[204].mxu0 %vm4840_vm1, %v20380_v48 }
 0x1cc   :  { %v17021_v55 = vrot.slane %v17013_v46, %v19603_v6  ;;  %10550 = vmatpush1.bf16.msra.mxu0 %v5470_v43  ;;  %10581 = vmatprep.mubr.bf16.mxu0 %v19553_v3  ;;  %v17028_v1 = vrot.slane %v17014_v45, %v19603_v6  ;;  %v96_v46 = vld [vmem:[#allocation2 + $0x1c0] sm:$0xff] }
 0x1cd   :  { %19098 = vmatmul.mubr.msk.bf16.vlgmr.msra.gmra.mrb[204].mxu1 %vm4840_vm1, %v20380_v48  ;;  %19103 = vmatprep.subr.msk.bf16.mxu0 %vm4844_vm0, %v3716_v44 }
 0x1ce   :  { %v8369_v5 = vpop.f32.mrb[100].mxu0  ;;  %10591 = vmatpush1.bf16.msra.mxu1 %v5476_v51  ;;  %10622 = vmatprep.mubr.bf16.mxu1 %v19553_v3  ;;  %v17029_v10 = vcombine.low %v17021_v55, %v17028_v1  ;;  %v8410_v15 = vpop.f32.mrb[100].mxu1  ;;  %v3750_v51 = vcombine.high %v3742_v37, %v3742_v37  ;;  %v3751_v1 = vcombine.high %v3749_v42, %v3749_v42 }
 0x1cf   :  { %v8370_v8 = vadd.f32 %v8369_v5, %v683_v52  ;;  %v8371_v58 = vpop.f32.mrb[101].mxu0  ;;  %19105 = vmatprep.subr.msk.bf16.mxu1 %vm4844_vm0, %v3717_v57  ;;  %v8411_v16 = vadd.f32 %v8410_v15, %v691_v49  ;;  %v8412_v21 = vpop.f32.mrb[101].mxu1  ;;  %v5494_v52 = vsel %vm4844_vm0, %v3725_v0, 0  ;;  %v5500_v49 = vsel %vm4844_vm0, %v3732_v9, 0 }
 0x1d0   :  { %v8372_v14 = vadd.f32 %v8371_v58, %v687_v63  ;;  %v8373_v62 = vpop.f32.mrb[102].mxu0  ;;  %18789 = vst [vmem:[%s22650_s3 + $0xc0] sm:$0xff] %v17029_v10  ;;  %v8413_v13 = vadd.f32 %v8412_v21, %v695_v54  ;;  %v8414_v25 = vpop.f32.mrb[102].mxu1  ;;  %v715_v63 = vrot.slane %v20636_v11, %v19968_v12  ;;  %v3752_v5 = vcombine.high %v96_v46, %v96_v46 }
 0x1d1   :  { %v8374_v18 = vpop.f32.mrb[103].mxu0  ;;  %v8415_v26 = vpop.f32.mrb[103].mxu1  ;;  %v723_v58 = vrot.slane %v20636_v11, %v19976_v23  ;;  %v3759_v9 = vrot.slane %v96_v46, %v19603_v6  ;;  %v727_v62 = vrot.slane %v20636_v11, %v19979_v29 }
 0x1d2   :  { %v17030_v19 = vcombine.low %v8370_v8, %v8372_v14  ;;  %v17031_v33 = vcombine.low %v8411_v16, %v8413_v13  ;;  %v719_v8 = vrot.slane %v20636_v11, %v19972_v17  ;;  %v3766_v16 = vrot.slane %v3752_v5, %v19603_v6  ;;  %v97_v13 = vld [vmem:[#allocation2 + $0x1c8] sm:$0xff] }
 0x1d3   :  { %19100 = vmatmul.mubr.msk.bf16.vlgmr.msra.gmra.mrb[208].mxu0 %vm4840_vm1, %v20380_v48  ;;  %v5506_v11 = vsel %vm4844_vm0, %v3742_v37, 0 }
 0x1d4   :  { %v17038_v32 = vrot.slane %v17030_v19, %v19603_v6  ;;  %10632 = vmatpush1.bf16.msra.mxu0 %v5482_v7  ;;  %10663 = vmatprep.mubr.bf16.mxu0 %v19553_v3  ;;  %v17045_v24 = vrot.slane %v17031_v33, %v19603_v6  ;;  %v20688_v19 = vld [vmem:[#allocation4 + $0x70] sm:$0xff] }
 0x1d5   :  { %19102 = vmatmul.mubr.msk.bf16.vlgmr.msra.gmra.mrb[208].mxu1 %vm4840_vm1, %v20380_v48  ;;  %19107 = vmatprep.subr.msk.bf16.mxu0 %vm4844_vm0, %v3733_v22 }
 0x1d6   :  { %v8451_v4 = vpop.f32.mrb[104].mxu0  ;;  %10673 = vmatpush1.bf16.msra.mxu1 %v5488_v31  ;;  %10704 = vmatprep.mubr.bf16.mxu1 %v19553_v3  ;;  %v17046_v41 = vcombine.low %v17038_v32, %v17045_v24  ;;  %v8492_v44 = vpop.f32.mrb[104].mxu1  ;;  %v3767_v31 = vcombine.high %v3759_v9, %v3759_v9  ;;  %v3768_v24 = vcombine.high %v3766_v16, %v3766_v16 }
 0x1d7   :  { %v8452_v38 = vadd.f32 %v8451_v4, %v699_v30  ;;  %v8453_v40 = vpop.f32.mrb[105].mxu0  ;;  %19109 = vmatprep.subr.msk.bf16.mxu1 %vm4844_vm0, %v3734_v27  ;;  %v8493_v50 = vadd.f32 %v8492_v44, %v707_v34  ;;  %v8494_v39 = vpop.f32.mrb[105].mxu1  ;;  %v5512_v34 = vsel %vm4844_vm0, %v3749_v42, 0  ;;  %v3769_v4 = vcombine.high %v97_v13, %v97_v13 }
 0x1d8   :  { %v8454_v35 = vadd.f32 %v8453_v40, %v703_v36  ;;  %v8455_v43 = vpop.f32.mrb[106].mxu0  ;;  %18790 = vst [vmem:[%s22650_s3 + $0xc8] sm:$0xff] %v17046_v41  ;;  %v8495_v60 = vadd.f32 %v8494_v39, %v711_v28  ;;  %v8496_v55 = vpop.f32.mrb[106].mxu1  ;;  %v731_v36 = vrot.slane %v20688_v19, %v19934_v53  ;;  %v739_v40 = vrot.slane %v20688_v19, %v19944_v59 }
 0x1d9   :  { %v8456_v47 = vpop.f32.mrb[107].mxu0  ;;  %v8497_v45 = vpop.f32.mrb[107].mxu1  ;;  %v3776_v42 = vrot.slane %v97_v13, %v19603_v6  ;;  %v743_v43 = vrot.slane %v20688_v19, %v19947_v61 }
 0x1da   :  { %v17047_v57 = vcombine.low %v8452_v38, %v8454_v35  ;;  %v17048_v54 = vcombine.low %v8493_v50, %v8495_v60  ;;  %v735_v38 = vrot.slane %v20688_v19, %v19940_v56  ;;  %v3783_v50 = vrot.slane %v3769_v4, %v19603_v6 }
 0x1db   :  { %19104 = vmatmul.mubr.msk.bf16.vlgmr.msra.gmra.mrb[212].mxu0 %vm4840_vm1, %v20380_v48 }
 0x1dc   :  { %v17055_v0 = vrot.slane %v17047_v57, %v19603_v6  ;;  %10714 = vmatpush1.bf16.msra.mxu0 %v5494_v52  ;;  %10745 = vmatprep.mubr.bf16.mxu0 %v19553_v3  ;;  %v17062_v10 = vrot.slane %v17048_v54, %v19603_v6  ;;  %v98_v57 = vld [vmem:[#allocation2 + $0x1d0] sm:$0xff] }
 0x1dd   :  { %19106 = vmatmul.mubr.msk.bf16.vlgmr.msra.gmra.mrb[212].mxu1 %vm4840_vm1, %v20380_v48  ;;  %19111 = vmatprep.subr.msk.bf16.mxu0 %vm4844_vm0, %v3750_v51 }
 0x1de   :  { %v8533_v14 = vpop.f32.mrb[108].mxu0  ;;  %10755 = vmatpush1.bf16.msra.mxu1 %v5500_v49  ;;  %10786 = vmatprep.mubr.bf16.mxu1 %v19553_v3  ;;  %v17063_v18 = vcombine.low %v17055_v0, %v17062_v10  ;;  %v8574_v22 = vpop.f32.mrb[108].mxu1  ;;  %v3784_v49 = vcombine.high %v3776_v42, %v3776_v42  ;;  %v3785_v10 = vcombine.high %v3783_v50, %v3783_v50 }
 0x1df   :  { %v8534_v15 = vadd.f32 %v8533_v14, %v715_v63  ;;  %v8535_v2 = vpop.f32.mrb[109].mxu0  ;;  %19113 = vmatprep.subr.msk.bf16.mxu1 %vm4844_vm0, %v3751_v1  ;;  %v8575_v25 = vadd.f32 %v8574_v22, %v723_v58  ;;  %v8576_v30 = vpop.f32.mrb[109].mxu1  ;;  %v5518_v63 = vsel %vm4844_vm0, %v3759_v9, 0  ;;  %v5524_v58 = vsel %vm4844_vm0, %v3766_v16, 0 }
 0x1e0   :  { %v8536_v21 = vadd.f32 %v8535_v2, %v719_v8  ;;  %v8537_v7 = vpop.f32.mrb[110].mxu0  ;;  %18791 = vst [vmem:[%s22650_s3 + $0xd0] sm:$0xff] %v17063_v18  ;;  %v8577_v20 = vadd.f32 %v8576_v30, %v727_v62  ;;  %v8578_v32 = vpop.f32.mrb[110].mxu1  ;;  %v747_v8 = vrot.slane %v20688_v19, %v19968_v12  ;;  %v3786_v14 = vcombine.high %v98_v57, %v98_v57 }
 0x1e1   :  { %v8538_v26 = vpop.f32.mrb[111].mxu0  ;;  %v8579_v33 = vpop.f32.mrb[111].mxu1  ;;  %v755_v2 = vrot.slane %v20688_v19, %v19976_v23  ;;  %v3793_v16 = vrot.slane %v98_v57, %v19603_v6  ;;  %v759_v7 = vrot.slane %v20688_v19, %v19979_v29 }
 0x1e2   :  { %v17064_v27 = vcombine.low %v8534_v15, %v8536_v21  ;;  %v17065_v28 = vcombine.low %v8575_v25, %v8577_v20  ;;  %v751_v15 = vrot.slane %v20688_v19, %v19972_v17  ;;  %v5530_v19 = vsel %vm4844_vm0, %v3776_v42, 0 }
 0x1e3   :  { %19108 = vmatmul.mubr.msk.bf16.vlgmr.msra.gmra.mrb[216].mxu0 %vm4840_vm1, %v20380_v48 }
 0x1e4   :  { %v17072_v37 = vrot.slane %v17064_v27, %v19603_v6  ;;  %10796 = vmatpush1.bf16.msra.mxu0 %v5506_v11  ;;  %10827 = vmatprep.mubr.bf16.mxu0 %v19553_v3  ;;  %v17079_v41 = vrot.slane %v17065_v28, %v19603_v6  ;;  %v99_v27 = vld [vmem:[#allocation2 + $0x1d8] sm:$0xff]  ;;  %v20749_v28 = vld [vmem:[%s22647_s0] sm:$0x1] }
 0x1e5   :  { %19110 = vmatmul.mubr.msk.bf16.vlgmr.msra.gmra.mrb[216].mxu1 %vm4840_vm1, %v20380_v48  ;;  %19115 = vmatprep.subr.msk.bf16.mxu0 %vm4844_vm0, %v3767_v31  ;;  %v20740_v31 = vld [vmem:[#allocation4 + $0x78] sm:$0xff] }
 0x1e6   :  { %v8615_v35 = vpop.f32.mrb[112].mxu0  ;;  %10837 = vmatpush1.bf16.msra.mxu1 %v5512_v34  ;;  %10868 = vmatprep.mubr.bf16.mxu1 %v19553_v3  ;;  %v17080_v47 = vcombine.low %v17072_v37, %v17079_v41  ;;  %v3803_v41 = vcombine.high %v99_v27, %v99_v27 }
 0x1e7   :  { %v8616_v44 = vadd.f32 %v8615_v35, %v731_v36  ;;  %v8617_v46 = vpop.f32.mrb[113].mxu0  ;;  %19117 = vmatprep.subr.msk.bf16.mxu1 %vm4844_vm0, %v3768_v24  ;;  %v3801_v36 = vcombine.high %v3793_v16, %v3793_v16 }
 0x1e8   :  { %v8618_v39 = vadd.f32 %v8617_v46, %v735_v38  ;;  %v8619_v52 = vpop.f32.mrb[114].mxu0  ;;  %v8656_v51 = vpop.f32.mrb[112].mxu1  ;;  %18792 = vst [vmem:[%s22650_s3 + $0xd8] sm:$0xff] %v17080_v47  ;;  %v763_v38 = vrot.slane %v20740_v31, %v19934_v53  ;;  %v771_v46 = vrot.slane %v20740_v31, %v19944_v59 }
 0x1e9   :  { %v8657_v60 = vadd.f32 %v8656_v51, %v739_v40  ;;  %v8620_v55 = vpop.f32.mrb[115].mxu0  ;;  %v8658_v45 = vpop.f32.mrb[113].mxu1  ;;  %v5536_v40 = vsel %vm4844_vm0, %v3783_v50, 0  ;;  %v3810_v50 = vrot.slane %v99_v27, %v19603_v6  ;;  %v775_v52 = vrot.slane %v20740_v31, %v19947_v61 }
 0x1ea   :  { %v17081_v1 = vcombine.low %v8616_v44, %v8618_v39  ;;  %v8659_v5 = vadd.f32 %v8658_v45, %v743_v43  ;;  %v8660_v0 = vpop.f32.mrb[114].mxu1  ;;  %v767_v44 = vrot.slane %v20740_v31, %v19940_v56 }
 0x1eb   :  { %v8661_v54 = vpop.f32.mrb[115].mxu1  ;;  %19112 = vmatmul.mubr.msk.bf16.vlgmr.msra.gmra.mrb[220].mxu0 %vm4840_vm1, %v20380_v48 }
 0x1ec   :  { %v17089_v9 = vrot.slane %v17081_v1, %v19603_v6  ;;  %v17082_v62 = vcombine.low %v8657_v60, %v8659_v5  ;;  %10878 = vmatpush1.bf16.msra.mxu0 %v5518_v63  ;;  %10909 = vmatprep.mubr.bf16.mxu0 %v19553_v3  ;;  %v3817_v60 = vrot.slane %v3803_v41, %v19603_v6  ;;  %v100_v1 = vld [vmem:[#allocation2 + $0x1e0] sm:$0xff] }
 0x1ed   :  { %19114 = vmatmul.mubr.msk.bf16.vlgmr.msra.gmra.mrb[220].mxu1 %vm4840_vm1, %v20380_v48  ;;  %19119 = vmatprep.subr.msk.bf16.mxu0 %vm4844_vm0, %v3784_v49  ;;  %v3800_v48 = vrot.slane %v3786_v14, %v19603_v6 }
 0x1ee   :  { %v17096_v18 = vrot.slane %v17082_v62, %v19603_v6  ;;  %v8697_v21 = vpop.f32.mrb[116].mxu0  ;;  %10919 = vmatpush1.bf16.msra.mxu1 %v5524_v58  ;;  %10950 = vmatprep.mubr.bf16.mxu1 %v19553_v3  ;;  %v3818_v58 = vcombine.high %v3810_v50, %v3810_v50 }
 0x1ef   :  { %v8698_v22 = vadd.f32 %v8697_v21, %v747_v8  ;;  %v8699_v13 = vpop.f32.mrb[117].mxu0  ;;  %19121 = vmatprep.subr.msk.bf16.mxu1 %vm4844_vm0, %v3785_v10  ;;  %v3802_v42 = vcombine.high %v3800_v48, %v3800_v48  ;;  %v5542_v8 = vsel %vm4844_vm0, %v3793_v16, 0  ;;  %v3820_v21 = vcombine.high %v100_v1, %v100_v1 }
 0x1f0   :  { %v17097_v25 = vcombine.low %v17089_v9, %v17096_v18  ;;  %v8700_v26 = vadd.f32 %v8699_v13, %v751_v15  ;;  %v8701_v30 = vpop.f32.mrb[118].mxu0  ;;  %v8738_v11 = vpop.f32.mrb[116].mxu1  ;;  %v779_v15 = vrot.slane %v20740_v31, %v19968_v12  ;;  %v3819_v18 = vcombine.high %v3817_v60, %v3817_v60 }
 0x1f1   :  { %v8739_v20 = vadd.f32 %v8738_v11, %v755_v2  ;;  %v8702_v32 = vpop.f32.mrb[119].mxu0  ;;  %v8740_v33 = vpop.f32.mrb[117].mxu1  ;;  %v5548_v2 = vsel %vm4844_vm0, %v3800_v48, 0  ;;  %v787_v13 = vrot.slane %v20740_v31, %v19976_v23  ;;  %v3827_v48 = vrot.slane %v100_v1, %v19603_v6 }
 0x1f2   :  { %18793 = vst [vmem:[%s22650_s3 + $0xe0] sm:$0xff] %v17097_v25  ;;  %v17098_v34 = vcombine.low %v8698_v22, %v8700_v26  ;;  %v8741_v24 = vadd.f32 %v8740_v33, %v759_v7  ;;  %v8742_v4 = vpop.f32.mrb[118].mxu1  ;;  %v783_v22 = vrot.slane %v20740_v31, %v19972_v17  ;;  %v791_v30 = vrot.slane %v20740_v31, %v19979_v29 }
 0x1f3   :  { %v8743_v37 = vpop.f32.mrb[119].mxu1  ;;  %19116 = vmatmul.mubr.msk.bf16.vlgmr.msra.gmra.mrb[224].mxu0 %vm4840_vm1, %v20749_v28  ;;  %v5554_v31 = vsel %vm4844_vm0, %v3810_v50, 0 }
 0x1f4   :  { %v17106_v35 = vrot.slane %v17098_v34, %v19603_v6  ;;  %v17099_v43 = vcombine.low %v8739_v20, %v8741_v24  ;;  %10960 = vmatpush1.bf16.msra.mxu0 %v5530_v19  ;;  %10991 = vmatprep.mubr.bf16.mxu0 %v19553_v3  ;;  %v3834_v20 = vrot.slane %v3820_v21, %v19603_v6  ;;  %v20797_v34 = vld [vmem:[#allocation4 + $0x80] sm:$0xff]  ;;  %v101_v24 = vld [vmem:[#allocation2 + $0x1e8] sm:$0xff] }
 0x1f5   :  { %19118 = vmatmul.mubr.msk.bf16.vlgmr.msra.gmra.mrb[224].mxu1 %vm4840_vm1, %v20749_v28  ;;  %19123 = vmatprep.subr.msk.bf16.mxu0 %vm4844_vm0, %v3801_v36 }
 0x1f6   :  { %v17113_v47 = vrot.slane %v17099_v43, %v19603_v6  ;;  %v8779_v39 = vpop.f32.mrb[120].mxu0  ;;  %11001 = vmatpush1.bf16.msra.mxu1 %v5536_v40  ;;  %11032 = vmatprep.mubr.bf16.mxu1 %v19553_v3  ;;  %v3835_v40 = vcombine.high %v3827_v48, %v3827_v48 }
 0x1f7   :  { %v8780_v51 = vadd.f32 %v8779_v39, %v763_v38  ;;  %v8781_v57 = vpop.f32.mrb[121].mxu0  ;;  %19125 = vmatprep.subr.msk.bf16.mxu1 %vm4844_vm0, %v3802_v42  ;;  %v3837_v39 = vcombine.high %v101_v24, %v101_v24 }
 0x1f8   :  { %v17114_v55 = vcombine.low %v17106_v35, %v17113_v47  ;;  %v8782_v45 = vadd.f32 %v8781_v57, %v767_v44  ;;  %v8783_v63 = vpop.f32.mrb[122].mxu0  ;;  %v8820_v49 = vpop.f32.mrb[120].mxu1  ;;  %v795_v44 = vrot.slane %v20797_v34, %v19934_v53  ;;  %v3836_v47 = vcombine.high %v3834_v20, %v3834_v20 }
 0x1f9   :  { %v8821_v5 = vadd.f32 %v8820_v49, %v771_v46  ;;  %v8784_v0 = vpop.f32.mrb[123].mxu0  ;;  %v8822_v54 = vpop.f32.mrb[121].mxu1  ;;  %v5560_v46 = vsel %vm4844_vm0, %v3817_v60, 0  ;;  %v803_v57 = vrot.slane %v20797_v34, %v19944_v59  ;;  %v3844_v60 = vrot.slane %v101_v24, %v19603_v6 }
 0x1fa   :  { %18794 = vst [vmem:[%s22650_s3 + $0xe8] sm:$0xff] %v17114_v55  ;;  %v17115_v10 = vcombine.low %v8780_v51, %v8782_v45  ;;  %v8823_v14 = vadd.f32 %v8822_v54, %v775_v52  ;;  %v8824_v9 = vpop.f32.mrb[122].mxu1  ;;  %v799_v51 = vrot.slane %v20797_v34, %v19940_v56  ;;  %v807_v63 = vrot.slane %v20797_v34, %v19947_v61 }
 0x1fb   :  { %v8825_v62 = vpop.f32.mrb[123].mxu1  ;;  %19120 = vmatmul.mubr.msk.bf16.vlgmr.msra.gmra.mrb[228].mxu0 %vm4840_vm1, %v20749_v28 }
 0x1fc   :  { %v17123_v16 = vrot.slane %v17115_v10, %v19603_v6  ;;  %v17116_v7 = vcombine.low %v8821_v5, %v8823_v14  ;;  %11042 = vmatpush1.bf16.msra.mxu0 %v5542_v8  ;;  %11073 = vmatprep.mubr.bf16.mxu0 %v19553_v3  ;;  %v3851_v5 = vrot.slane %v3837_v39, %v19603_v6  ;;  %v102_v10 = vld [vmem:[#allocation2 + $0x1f0] sm:$0xff] }
 0x1fd   :  { %19122 = vmatmul.mubr.msk.bf16.vlgmr.msra.gmra.mrb[228].mxu1 %vm4840_vm1, %v20749_v28  ;;  %19127 = vmatprep.subr.msk.bf16.mxu0 %vm4844_vm0, %v3818_v58 }
 0x1fe   :  { %v17130_v25 = vrot.slane %v17116_v7, %v19603_v6  ;;  %v8861_v26 = vpop.f32.mrb[124].mxu0  ;;  %11083 = vmatpush1.bf16.msra.mxu1 %v5548_v2  ;;  %11114 = vmatprep.mubr.bf16.mxu1 %v19553_v3  ;;  %v3852_v2 = vcombine.high %v3844_v60, %v3844_v60 }
 0x1ff   :  { %v8862_v11 = vadd.f32 %v8861_v26, %v779_v15  ;;  %v8863_v27 = vpop.f32.mrb[125].mxu0  ;;  %19129 = vmatprep.subr.msk.bf16.mxu1 %vm4844_vm0, %v3819_v18  ;;  %v5566_v15 = vsel %vm4844_vm0, %v3827_v48, 0  ;;  %v3854_v26 = vcombine.high %v102_v10, %v102_v10 }
 0x200   :  { %v17131_v32 = vcombine.low %v17123_v16, %v17130_v25  ;;  %v8864_v33 = vadd.f32 %v8863_v27, %v783_v22  ;;  %v8865_v19 = vpop.f32.mrb[126].mxu0  ;;  %v8902_v36 = vpop.f32.mrb[124].mxu1  ;;  %v811_v22 = vrot.slane %v20797_v34, %v19968_v12  ;;  %v3853_v25 = vcombine.high %v3851_v5, %v3851_v5 }
 0x201   :  { %v8903_v4 = vadd.f32 %v8902_v36, %v787_v13  ;;  %v8866_v37 = vpop.f32.mrb[127].mxu0  ;;  %v8904_v38 = vpop.f32.mrb[125].mxu1  ;;  %v5572_v13 = vsel %vm4844_vm0, %v3834_v20, 0  ;;  %v819_v27 = vrot.slane %v20797_v34, %v19976_v23  ;;  %v3861_v20 = vrot.slane %v102_v10, %v19603_v6 }
 0x202   :  { %18795 = vst [vmem:[%s22650_s3 + $0xf0] sm:$0xff] %v17131_v32  ;;  %v17132_v42 = vcombine.low %v8862_v11, %v8864_v33  ;;  %v8905_v41 = vadd.f32 %v8904_v38, %v791_v30  ;;  %v8906_v35 = vpop.f32.mrb[126].mxu1  ;;  %v815_v11 = vrot.slane %v20797_v34, %v19972_v17  ;;  %v823_v19 = vrot.slane %v20797_v34, %v19979_v29 }
 0x203   :  { %v8907_v43 = vpop.f32.mrb[127].mxu1  ;;  %19124 = vmatmul.mubr.msk.bf16.vlgmr.msra.gmra.mrb[232].mxu0 %vm4840_vm1, %v20749_v28  ;;  %v5578_v34 = vsel %vm4844_vm0, %v3844_v60, 0 }
 0x204   :  { %v17140_v50 = vrot.slane %v17132_v42, %v19603_v6  ;;  %v17133_v52 = vcombine.low %v8903_v4, %v8905_v41  ;;  %11124 = vmatpush1.bf16.msra.mxu0 %v5554_v31  ;;  %11155 = vmatprep.mubr.bf16.mxu0 %v19553_v3  ;;  %v3868_v4 = vrot.slane %v3854_v26, %v19603_v6  ;;  %v20849_v42 = vld [vmem:[#allocation4 + $0x88] sm:$0xff]  ;;  %v103_v41 = vld [vmem:[#allocation2 + $0x1f8] sm:$0xff] }
 0x205   :  { %19126 = vmatmul.mubr.msk.bf16.vlgmr.msra.gmra.mrb[232].mxu1 %vm4840_vm1, %v20749_v28  ;;  %19131 = vmatprep.subr.msk.bf16.mxu0 %vm4844_vm0, %v3835_v40 }
 0x206   :  { %v17147_v55 = vrot.slane %v17133_v52, %v19603_v6  ;;  %v8943_v45 = vpop.f32.mrb[128].mxu0  ;;  %11165 = vmatpush1.bf16.msra.mxu1 %v5560_v46  ;;  %11196 = vmatprep.mubr.bf16.mxu1 %v19553_v3  ;;  %v3869_v46 = vcombine.high %v3861_v20, %v3861_v20 }
 0x207   :  { %v8944_v49 = vadd.f32 %v8943_v45, %v795_v44  ;;  %v8945_v1 = vpop.f32.mrb[129].mxu0  ;;  %19133 = vmatprep.subr.msk.bf16.mxu1 %vm4844_vm0, %v3836_v47  ;;  %v3871_v45 = vcombine.high %v103_v41, %v103_v41 }
 0x208   :  { %v17148_v0 = vcombine.low %v17140_v50, %v17147_v55  ;;  %v8946_v54 = vadd.f32 %v8945_v1, %v799_v51  ;;  %v8947_v8 = vpop.f32.mrb[130].mxu0  ;;  %v8984_v58 = vpop.f32.mrb[128].mxu1  ;;  %v827_v51 = vrot.slane %v20849_v42, %v19934_v53  ;;  %v3870_v55 = vcombine.high %v3868_v4, %v3868_v4 }
 0x209   :  { %v8985_v14 = vadd.f32 %v8984_v58, %v803_v57  ;;  %v8948_v9 = vpop.f32.mrb[131].mxu0  ;;  %v8986_v62 = vpop.f32.mrb[129].mxu1  ;;  %v5584_v57 = vsel %vm4844_vm0, %v3851_v5, 0  ;;  %v835_v1 = vrot.slane %v20849_v42, %v19944_v59  ;;  %v3878_v5 = vrot.slane %v103_v41, %v19603_v6 }
 0x20a   :  { %18796 = vst [vmem:[%s22650_s3 + $0xf8] sm:$0xff] %v17148_v0  ;;  %v17149_v18 = vcombine.low %v8944_v49, %v8946_v54  ;;  %v8987_v21 = vadd.f32 %v8986_v62, %v807_v63  ;;  %v8988_v16 = vpop.f32.mrb[130].mxu1  ;;  %v831_v49 = vrot.slane %v20849_v42, %v19940_v56  ;;  %v839_v8 = vrot.slane %v20849_v42, %v19947_v61 }
 0x20b   :  { %v8989_v7 = vpop.f32.mrb[131].mxu1  ;;  %19128 = vmatmul.mubr.msk.bf16.vlgmr.msra.gmra.mrb[236].mxu0 %vm4840_vm1, %v20749_v28 }
 0x20c   :  { %v17157_v48 = vrot.slane %v17149_v18, %v19603_v6  ;;  %v17150_v30 = vcombine.low %v8985_v14, %v8987_v21  ;;  %11206 = vmatpush1.bf16.msra.mxu0 %v5566_v15  ;;  %11237 = vmatprep.mubr.bf16.mxu0 %v19553_v3  ;;  %v3885_v14 = vrot.slane %v3871_v45, %v19603_v6  ;;  %v104_v18 = vld [vmem:[#allocation2 + $0x200] sm:$0xff] }
 0x20d   :  { %19130 = vmatmul.mubr.msk.bf16.vlgmr.msra.gmra.mrb[236].mxu1 %vm4840_vm1, %v20749_v28  ;;  %19135 = vmatprep.subr.msk.bf16.mxu0 %vm4844_vm0, %v3852_v2 }
 0x20e   :  { %v17164_v32 = vrot.slane %v17150_v30, %v19603_v6  ;;  %v9025_v33 = vpop.f32.mrb[132].mxu0  ;;  %11247 = vmatpush1.bf16.msra.mxu1 %v5572_v13  ;;  %11278 = vmatprep.mubr.bf16.mxu1 %v19553_v3  ;;  %v3886_v13 = vcombine.high %v3878_v5, %v3878_v5 }
 0x20f   :  { %v9026_v36 = vadd.f32 %v9025_v33, %v811_v22  ;;  %v9027_v24 = vpop.f32.mrb[133].mxu0  ;;  %19137 = vmatprep.subr.msk.bf16.mxu1 %vm4844_vm0, %v3853_v25  ;;  %v5590_v22 = vsel %vm4844_vm0, %v3861_v20, 0  ;;  %v3888_v33 = vcombine.high %v104_v18, %v104_v18 }
 0x210   :  { %v17165_v37 = vcombine.low %v17157_v48, %v17164_v32  ;;  %v9028_v38 = vadd.f32 %v9027_v24, %v815_v11  ;;  %v9029_v31 = vpop.f32.mrb[134].mxu0  ;;  %v9066_v40 = vpop.f32.mrb[132].mxu1  ;;  %v843_v11 = vrot.slane %v20849_v42, %v19968_v12  ;;  %v3887_v32 = vcombine.high %v3885_v14, %v3885_v14 }
 0x211   :  { %v9067_v35 = vadd.f32 %v9066_v40, %v819_v27  ;;  %v9030_v43 = vpop.f32.mrb[135].mxu0  ;;  %v9068_v44 = vpop.f32.mrb[133].mxu1  ;;  %v5596_v27 = vsel %vm4844_vm0, %v3868_v4, 0  ;;  %v851_v24 = vrot.slane %v20849_v42, %v19976_v23  ;;  %v3895_v4 = vrot.slane %v104_v18, %v19603_v6 }
 0x212   :  { %18797 = vst [vmem:[%s22650_s3 + $0x100] sm:$0xff] %v17165_v37  ;;  %v17166_v47 = vcombine.low %v9026_v36, %v9028_v38  ;;  %v9069_v39 = vadd.f32 %v9068_v44, %v823_v19  ;;  %v9070_v50 = vpop.f32.mrb[134].mxu1  ;;  %v847_v36 = vrot.slane %v20849_v42, %v19972_v17  ;;  %v855_v31 = vrot.slane %v20849_v42, %v19979_v29 }
 0x213   :  { %v9071_v52 = vpop.f32.mrb[135].mxu1  ;;  %19132 = vmatmul.mubr.msk.bf16.vlgmr.msra.gmra.mrb[240].mxu0 %vm4840_vm1, %v20749_v28  ;;  %v5602_v42 = vsel %vm4844_vm0, %v3878_v5, 0 }
 0x214   :  { %v17174_v60 = vrot.slane %v17166_v47, %v19603_v6  ;;  %v17167_v63 = vcombine.low %v9067_v35, %v9069_v39  ;;  %11288 = vmatpush1.bf16.msra.mxu0 %v5578_v34  ;;  %11319 = vmatprep.mubr.bf16.mxu0 %v19553_v3  ;;  %v3902_v35 = vrot.slane %v3888_v33, %v19603_v6  ;;  %v20901_v47 = vld [vmem:[#allocation4 + $0x90] sm:$0xff]  ;;  %v105_v39 = vld [vmem:[#allocation2 + $0x208] sm:$0xff] }
 0x215   :  { %19134 = vmatmul.mubr.msk.bf16.vlgmr.msra.gmra.mrb[240].mxu1 %vm4840_vm1, %v20749_v28  ;;  %19139 = vmatprep.subr.msk.bf16.mxu0 %vm4844_vm0, %v3869_v46 }
 0x216   :  { %v17181_v0 = vrot.slane %v17167_v63, %v19603_v6  ;;  %v9107_v54 = vpop.f32.mrb[136].mxu0  ;;  %11329 = vmatpush1.bf16.msra.mxu1 %v5584_v57  ;;  %11360 = vmatprep.mubr.bf16.mxu1 %v19553_v3  ;;  %v3903_v57 = vcombine.high %v3895_v4, %v3895_v4 }
 0x217   :  { %v9108_v58 = vadd.f32 %v9107_v54, %v827_v51  ;;  %v9109_v10 = vpop.f32.mrb[137].mxu0  ;;  %19141 = vmatprep.subr.msk.bf16.mxu1 %vm4844_vm0, %v3870_v55  ;;  %v3905_v54 = vcombine.high %v105_v39, %v105_v39 }
 0x218   :  { %v17182_v9 = vcombine.low %v17174_v60, %v17181_v0  ;;  %v9110_v62 = vadd.f32 %v9109_v10, %v831_v49  ;;  %v9111_v15 = vpop.f32.mrb[138].mxu0  ;;  %v9148_v2 = vpop.f32.mrb[136].mxu1  ;;  %v859_v49 = vrot.slane %v20901_v47, %v19934_v53  ;;  %v3904_v0 = vcombine.high %v3902_v35, %v3902_v35 }
 0x219   :  { %v9149_v21 = vadd.f32 %v9148_v2, %v835_v1  ;;  %v9112_v16 = vpop.f32.mrb[139].mxu0  ;;  %v9150_v7 = vpop.f32.mrb[137].mxu1  ;;  %v5608_v1 = vsel %vm4844_vm0, %v3885_v14, 0  ;;  %v867_v10 = vrot.slane %v20901_v47, %v19944_v59  ;;  %v3912_v14 = vrot.slane %v105_v39, %v19603_v6 }
 0x21a   :  { %18798 = vst [vmem:[%s22650_s3 + $0x108] sm:$0xff] %v17182_v9  ;;  %v17183_v25 = vcombine.low %v9108_v58, %v9110_v62  ;;  %v9151_v26 = vadd.f32 %v9150_v7, %v839_v8  ;;  %v9152_v48 = vpop.f32.mrb[138].mxu1  ;;  %v863_v58 = vrot.slane %v20901_v47, %v19940_v56  ;;  %v871_v15 = vrot.slane %v20901_v47, %v19947_v61 }
 0x21b   :  { %v9153_v30 = vpop.f32.mrb[139].mxu1  ;;  %19136 = vmatmul.mubr.msk.bf16.vlgmr.msra.gmra.mrb[244].mxu0 %vm4840_vm1, %v20749_v28 }
 0x21c   :  { %v17191_v20 = vrot.slane %v17183_v25, %v19603_v6  ;;  %v17184_v19 = vcombine.low %v9149_v21, %v9151_v26  ;;  %11370 = vmatpush1.bf16.msra.mxu0 %v5590_v22  ;;  %11401 = vmatprep.mubr.bf16.mxu0 %v19553_v3  ;;  %v3919_v21 = vrot.slane %v3905_v54, %v19603_v6  ;;  %v106_v25 = vld [vmem:[#allocation2 + $0x210] sm:$0xff] }
 0x21d   :  { %19138 = vmatmul.mubr.msk.bf16.vlgmr.msra.gmra.mrb[244].mxu1 %vm4840_vm1, %v20749_v28  ;;  %19143 = vmatprep.subr.msk.bf16.mxu0 %vm4844_vm0, %v3886_v13 }
 0x21e   :  { %v17198_v37 = vrot.slane %v17184_v19, %v19603_v6  ;;  %v9189_v38 = vpop.f32.mrb[140].mxu0  ;;  %11411 = vmatpush1.bf16.msra.mxu1 %v5596_v27  ;;  %11442 = vmatprep.mubr.bf16.mxu1 %v19553_v3  ;;  %v3920_v27 = vcombine.high %v3912_v14, %v3912_v14 }
 0x21f   :  { %v9190_v40 = vadd.f32 %v9189_v38, %v843_v11  ;;  %v9191_v41 = vpop.f32.mrb[141].mxu0  ;;  %19145 = vmatprep.subr.msk.bf16.mxu1 %vm4844_vm0, %v3887_v32  ;;  %v5614_v11 = vsel %vm4844_vm0, %v3895_v4, 0  ;;  %v3922_v38 = vcombine.high %v106_v25, %v106_v25 }
 0x220   :  { %v17199_v43 = vcombine.low %v17191_v20, %v17198_v37  ;;  %v9192_v44 = vadd.f32 %v9191_v41, %v847_v36  ;;  %v9193_v34 = vpop.f32.mrb[142].mxu0  ;;  %v9230_v46 = vpop.f32.mrb[140].mxu1  ;;  %v875_v36 = vrot.slane %v20901_v47, %v19968_v12  ;;  %v3921_v37 = vcombine.high %v3919_v21, %v3919_v21 }
 0x221   :  { %v9231_v50 = vadd.f32 %v9230_v46, %v851_v24  ;;  %v9194_v52 = vpop.f32.mrb[143].mxu0  ;;  %v9232_v51 = vpop.f32.mrb[141].mxu1  ;;  %v5620_v24 = vsel %vm4844_vm0, %v3902_v35, 0  ;;  %v883_v41 = vrot.slane %v20901_v47, %v19976_v23  ;;  %v3929_v35 = vrot.slane %v106_v25, %v19603_v6 }
 0x222   :  { %18799 = vst [vmem:[%s22650_s3 + $0x110] sm:$0xff] %v17199_v43  ;;  %v17200_v55 = vcombine.low %v9190_v40, %v9192_v44  ;;  %v9233_v45 = vadd.f32 %v9232_v51, %v855_v31  ;;  %v9234_v60 = vpop.f32.mrb[142].mxu1  ;;  %v879_v40 = vrot.slane %v20901_v47, %v19972_v17  ;;  %v887_v34 = vrot.slane %v20901_v47, %v19979_v29 }
 0x223   :  { %v9235_v63 = vpop.f32.mrb[143].mxu1  ;;  %19140 = vmatmul.mubr.msk.bf16.vlgmr.msra.gmra.mrb[248].mxu0 %vm4840_vm1, %v20749_v28  ;;  %v5626_v47 = vsel %vm4844_vm0, %v3912_v14, 0 }
 0x224   :  { %v17208_v5 = vrot.slane %v17200_v55, %v19603_v6  ;;  %v17201_v8 = vcombine.low %v9231_v50, %v9233_v45  ;;  %11452 = vmatpush1.bf16.msra.mxu0 %v5602_v42  ;;  %11483 = vmatprep.mubr.bf16.mxu0 %v19553_v3  ;;  %v3936_v50 = vrot.slane %v3922_v38, %v19603_v6  ;;  %v20953_v55 = vld [vmem:[#allocation4 + $0x98] sm:$0xff] }
 0x225   :  { %19142 = vmatmul.mubr.msk.bf16.vlgmr.msra.gmra.mrb[248].mxu1 %vm4840_vm1, %v20749_v28  ;;  %19147 = vmatprep.subr.msk.bf16.mxu0 %vm4844_vm0, %v3903_v57  ;;  %v107_v45 = vld [vmem:[#allocation2 + $0x218] sm:$0xff] }
 0x226   :  { %v17215_v9 = vrot.slane %v17201_v8, %v19603_v6  ;;  %v9271_v62 = vpop.f32.mrb[144].mxu0  ;;  %11493 = vmatpush1.bf16.msra.mxu1 %v5608_v1  ;;  %11524 = vmatprep.mubr.bf16.mxu1 %v19553_v3  ;;  %v3937_v1 = vcombine.high %v3929_v35, %v3929_v35 }
 0x227   :  { %v9272_v2 = vadd.f32 %v9271_v62, %v859_v49  ;;  %v9273_v18 = vpop.f32.mrb[145].mxu0  ;;  %19149 = vmatprep.subr.msk.bf16.mxu1 %vm4844_vm0, %v3904_v0  ;;  %v3939_v62 = vcombine.high %v107_v45, %v107_v45 }
 0x228   :  { %v17216_v16 = vcombine.low %v17208_v5, %v17215_v9  ;;  %v9274_v7 = vadd.f32 %v9273_v18, %v863_v58  ;;  %v9275_v22 = vpop.f32.mrb[146].mxu0  ;;  %v9312_v13 = vpop.f32.mrb[144].mxu1  ;;  %v891_v58 = vrot.slane %v20953_v55, %v19934_v53  ;;  %v3938_v9 = vcombine.high %v3936_v50, %v3936_v50 }
 0x229   :  { %v9313_v26 = vadd.f32 %v9312_v13, %v867_v10  ;;  %v9276_v48 = vpop.f32.mrb[147].mxu0  ;;  %v9314_v30 = vpop.f32.mrb[145].mxu1  ;;  %v5632_v10 = vsel %vm4844_vm0, %v3919_v21, 0  ;;  %v899_v18 = vrot.slane %v20953_v55, %v19944_v59  ;;  %v3946_v21 = vrot.slane %v107_v45, %v19603_v6 }
 0x22a   :  { %18800 = vst [vmem:[%s22650_s3 + $0x118] sm:$0xff] %v17216_v16  ;;  %v17217_v32 = vcombine.low %v9272_v2, %v9274_v7  ;;  %v9315_v33 = vadd.f32 %v9314_v30, %v871_v15  ;;  %v9316_v20 = vpop.f32.mrb[146].mxu1  ;;  %v895_v2 = vrot.slane %v20953_v55, %v19940_v56  ;;  %v903_v22 = vrot.slane %v20953_v55, %v19947_v61 }
 0x22b   :  { %v9317_v19 = vpop.f32.mrb[147].mxu1  ;;  %19144 = vmatmul.mubr.msk.bf16.vlgmr.msra.gmra.mrb[252].mxu0 %vm4840_vm1, %v20749_v28 }
 0x22c   :  { %v17225_v4 = vrot.slane %v17217_v32, %v19603_v6  ;;  %v17218_v31 = vcombine.low %v9313_v26, %v9315_v33  ;;  %11534 = vmatpush1.bf16.msra.mxu0 %v5614_v11  ;;  %11565 = vmatprep.mubr.bf16.mxu0 %v19553_v3  ;;  %v3953_v26 = vrot.slane %v3939_v62, %v19603_v6  ;;  %v108_v32 = vld [vmem:[#allocation2 + $0x220] sm:$0xff] }
 0x22d   :  { %19146 = vmatmul.mubr.msk.bf16.vlgmr.msra.gmra.mrb[252].mxu1 %vm4840_vm1, %v20749_v28  ;;  %19151 = vmatprep.subr.msk.bf16.mxu0 %vm4844_vm0, %v3920_v27 }
 0x22e   :  { %v17232_v43 = vrot.slane %v17218_v31, %v19603_v6  ;;  %v9353_v44 = vpop.f32.mrb[148].mxu0  ;;  %11575 = vmatpush1.bf16.msra.mxu1 %v5620_v24  ;;  %11606 = vmatprep.mubr.bf16.mxu1 %v19553_v3  ;;  %v3954_v24 = vcombine.high %v3946_v21, %v3946_v21 }
 0x22f   :  { %v9354_v46 = vadd.f32 %v9353_v44, %v875_v36  ;;  %v9355_v39 = vpop.f32.mrb[149].mxu0  ;;  %19153 = vmatprep.subr.msk.bf16.mxu1 %vm4844_vm0, %v3921_v37  ;;  %v5638_v36 = vsel %vm4844_vm0, %v3929_v35, 0  ;;  %v3956_v44 = vcombine.high %v108_v32, %v108_v32 }
 0x230   :  { %v17233_v52 = vcombine.low %v17225_v4, %v17232_v43  ;;  %v9356_v51 = vadd.f32 %v9355_v39, %v879_v40  ;;  %v9357_v42 = vpop.f32.mrb[150].mxu0  ;;  %v9394_v57 = vpop.f32.mrb[148].mxu1  ;;  %v907_v40 = vrot.slane %v20953_v55, %v19968_v12  ;;  %v3955_v43 = vcombine.high %v3953_v26, %v3953_v26 }
 0x231   :  { %v9395_v60 = vadd.f32 %v9394_v57, %v883_v41  ;;  %v9358_v63 = vpop.f32.mrb[151].mxu0  ;;  %v9396_v49 = vpop.f32.mrb[149].mxu1  ;;  %v5644_v41 = vsel %vm4844_vm0, %v3936_v50, 0  ;;  %v915_v39 = vrot.slane %v20953_v55, %v19976_v23  ;;  %v3963_v50 = vrot.slane %v108_v32, %v19603_v6 }
 0x232   :  { %18801 = vst [vmem:[%s22650_s3 + $0x120] sm:$0xff] %v17233_v52  ;;  %v17234_v0 = vcombine.low %v9354_v46, %v9356_v51  ;;  %v9397_v54 = vadd.f32 %v9396_v49, %v887_v34  ;;  %v9398_v5 = vpop.f32.mrb[150].mxu1  ;;  %v911_v46 = vrot.slane %v20953_v55, %v19972_v17  ;;  %v919_v42 = vrot.slane %v20953_v55, %v19979_v29 }
 0x233   :  { %v9399_v8 = vpop.f32.mrb[151].mxu1  ;;  %19148 = vmatmul.mubr.msk.bf16.vlgmr.msra.gmra.mrb[0].mxu0 %vm4840_vm1, %v20749_v28  ;;  %v5650_v55 = vsel %vm4844_vm0, %v3946_v21, 0 }
 0x234   :  { %v17242_v14 = vrot.slane %v17234_v0, %v19603_v6  ;;  %v17235_v15 = vcombine.low %v9395_v60, %v9397_v54  ;;  %11616 = vmatpush1.bf16.msra.mxu0 %v5626_v47  ;;  %11647 = vmatprep.mubr.bf16.mxu0 %v19553_v3  ;;  %v3970_v60 = vrot.slane %v3956_v44, %v19603_v6  ;;  %v21005_v0 = vld [vmem:[#allocation4 + $0xa0] sm:$0xff]  ;;  %v109_v54 = vld [vmem:[#allocation2 + $0x228] sm:$0xff] }
 0x235   :  { %19150 = vmatmul.mubr.msk.bf16.vlgmr.msra.gmra.mrb[0].mxu1 %vm4840_vm1, %v20749_v28  ;;  %19155 = vmatprep.subr.msk.bf16.mxu0 %vm4844_vm0, %v3937_v1 }
 0x236   :  { %v17249_v16 = vrot.slane %v17235_v15, %v19603_v6  ;;  %v9435_v7 = vpop.f32.mrb[152].mxu0  ;;  %11657 = vmatpush1.bf16.msra.mxu1 %v5632_v10  ;;  %11688 = vmatprep.mubr.bf16.mxu1 %v19553_v3  ;;  %v3971_v10 = vcombine.high %v3963_v50, %v3963_v50 }
 0x237   :  { %v9436_v13 = vadd.f32 %v9435_v7, %v891_v58  ;;  %v9437_v25 = vpop.f32.mrb[153].mxu0  ;;  %19157 = vmatprep.subr.msk.bf16.mxu1 %vm4844_vm0, %v3938_v9  ;;  %v3973_v7 = vcombine.high %v109_v54, %v109_v54 }
 0x238   :  { %v17250_v48 = vcombine.low %v17242_v14, %v17249_v16  ;;  %v9438_v30 = vadd.f32 %v9437_v25, %v895_v2  ;;  %v9439_v11 = vpop.f32.mrb[154].mxu0  ;;  %v9476_v27 = vpop.f32.mrb[152].mxu1  ;;  %v923_v2 = vrot.slane %v21005_v0, %v19934_v53  ;;  %v3972_v16 = vcombine.high %v3970_v60, %v3970_v60 }
 0x239   :  { %v9477_v33 = vadd.f32 %v9476_v27, %v899_v18  ;;  %v9440_v20 = vpop.f32.mrb[155].mxu0  ;;  %v9478_v19 = vpop.f32.mrb[153].mxu1  ;;  %v5656_v18 = vsel %vm4844_vm0, %v3953_v26, 0  ;;  %v931_v25 = vrot.slane %v21005_v0, %v19944_v59  ;;  %v3980_v26 = vrot.slane %v109_v54, %v19603_v6 }
 0x23a   :  { %18802 = vst [vmem:[%s22650_s3 + $0x128] sm:$0xff] %v17250_v48  ;;  %v17251_v37 = vcombine.low %v9436_v13, %v9438_v30  ;;  %v9479_v38 = vadd.f32 %v9478_v19, %v903_v22  ;;  %v9480_v4 = vpop.f32.mrb[154].mxu1  ;;  %v927_v13 = vrot.slane %v21005_v0, %v19940_v56  ;;  %v935_v11 = vrot.slane %v21005_v0, %v19947_v61 }
 0x23b   :  { %v9481_v31 = vpop.f32.mrb[155].mxu1  ;;  %19152 = vmatmul.mubr.msk.bf16.vlgmr.msra.gmra.mrb[4].mxu0 %vm4840_vm1, %v20749_v28 }
 0x23c   :  { %v17259_v35 = vrot.slane %v17251_v37, %v19603_v6  ;;  %v17252_v34 = vcombine.low %v9477_v33, %v9479_v38  ;;  %11698 = vmatpush1.bf16.msra.mxu0 %v5638_v36  ;;  %11729 = vmatprep.mubr.bf16.mxu0 %v19553_v3  ;;  %v3987_v33 = vrot.slane %v3973_v7, %v19603_v6  ;;  %v110_v37 = vld [vmem:[#allocation2 + $0x230] sm:$0xff] }
 0x23d   :  { %19154 = vmatmul.mubr.msk.bf16.vlgmr.msra.gmra.mrb[4].mxu1 %vm4840_vm1, %v20749_v28  ;;  %19159 = vmatprep.subr.msk.bf16.mxu0 %vm4844_vm0, %v3954_v24 }
 0x23e   :  { %v17266_v52 = vrot.slane %v17252_v34, %v19603_v6  ;;  %v9517_v51 = vpop.f32.mrb[156].mxu0  ;;  %11739 = vmatpush1.bf16.msra.mxu1 %v5644_v41  ;;  %11770 = vmatprep.mubr.bf16.mxu1 %v19553_v3  ;;  %v3988_v41 = vcombine.high %v3980_v26, %v3980_v26 }
 0x23f   :  { %v9518_v57 = vadd.f32 %v9517_v51, %v907_v40  ;;  %v9519_v45 = vpop.f32.mrb[157].mxu0  ;;  %19161 = vmatprep.subr.msk.bf16.mxu1 %vm4844_vm0, %v3955_v43  ;;  %v5662_v40 = vsel %vm4844_vm0, %v3963_v50, 0  ;;  %v3990_v51 = vcombine.high %v110_v37, %v110_v37 }
 0x240   :  { %v17267_v63 = vcombine.low %v17259_v35, %v17266_v52  ;;  %v9520_v49 = vadd.f32 %v9519_v45, %v911_v46  ;;  %v9521_v47 = vpop.f32.mrb[158].mxu0  ;;  %v9558_v1 = vpop.f32.mrb[156].mxu1  ;;  %v939_v46 = vrot.slane %v21005_v0, %v19968_v12  ;;  %v3989_v52 = vcombine.high %v3987_v33, %v3987_v33 }
 0x241   :  { %v9559_v5 = vadd.f32 %v9558_v1, %v915_v39  ;;  %v9522_v8 = vpop.f32.mrb[159].mxu0  ;;  %v9560_v58 = vpop.f32.mrb[157].mxu1  ;;  %v5668_v39 = vsel %vm4844_vm0, %v3970_v60, 0  ;;  %v947_v45 = vrot.slane %v21005_v0, %v19976_v23  ;;  %v3997_v60 = vrot.slane %v110_v37, %v19603_v6 }
 0x242   :  { %18803 = vst [vmem:[%s22650_s3 + $0x130] sm:$0xff] %v17267_v63  ;;  %v17268_v9 = vcombine.low %v9518_v57, %v9520_v49  ;;  %v9561_v62 = vadd.f32 %v9560_v58, %v919_v42  ;;  %v9562_v14 = vpop.f32.mrb[158].mxu1  ;;  %v943_v57 = vrot.slane %v21005_v0, %v19972_v17  ;;  %v951_v47 = vrot.slane %v21005_v0, %v19979_v29 }
 0x243   :  { %v9563_v15 = vpop.f32.mrb[159].mxu1  ;;  %19156 = vmatmul.mubr.msk.bf16.vlgmr.msra.gmra.mrb[8].mxu0 %vm4840_vm1, %v20749_v28  ;;  %v5674_v0 = vsel %vm4844_vm0, %v3980_v26, 0 }
 0x244   :  { %v17276_v21 = vrot.slane %v17268_v9, %v19603_v6  ;;  %v17269_v22 = vcombine.low %v9559_v5, %v9561_v62  ;;  %11780 = vmatpush1.bf16.msra.mxu0 %v5650_v55  ;;  %11811 = vmatprep.mubr.bf16.mxu0 %v19553_v3  ;;  %v4004_v5 = vrot.slane %v3990_v51, %v19603_v6  ;;  %v21057_v9 = vld [vmem:[#allocation4 + $0xa8] sm:$0xff]  ;;  %v111_v62 = vld [vmem:[#allocation2 + $0x238] sm:$0xff] }
 0x245   :  { %19158 = vmatmul.mubr.msk.bf16.vlgmr.msra.gmra.mrb[8].mxu1 %vm4840_vm1, %v20749_v28  ;;  %19163 = vmatprep.subr.msk.bf16.mxu0 %vm4844_vm0, %v3971_v10 }
 0x246   :  { %v17283_v48 = vrot.slane %v17269_v22, %v19603_v6  ;;  %v9599_v30 = vpop.f32.mrb[160].mxu0  ;;  %11821 = vmatpush1.bf16.msra.mxu1 %v5656_v18  ;;  %11852 = vmatprep.mubr.bf16.mxu1 %v19553_v3  ;;  %v4005_v18 = vcombine.high %v3997_v60, %v3997_v60 }
 0x247   :  { %v9600_v27 = vadd.f32 %v9599_v30, %v923_v2  ;;  %v9601_v32 = vpop.f32.mrb[161].mxu0  ;;  %19165 = vmatprep.subr.msk.bf16.mxu1 %vm4844_vm0, %v3972_v16  ;;  %v4007_v30 = vcombine.high %v111_v62, %v111_v62 }
 0x248   :  { %v17284_v20 = vcombine.low %v17276_v21, %v17283_v48  ;;  %v9602_v19 = vadd.f32 %v9601_v32, %v927_v13  ;;  %v9603_v36 = vpop.f32.mrb[162].mxu0  ;;  %v9640_v24 = vpop.f32.mrb[160].mxu1  ;;  %v955_v13 = vrot.slane %v21057_v9, %v19934_v53  ;;  %v4006_v48 = vcombine.high %v4004_v5, %v4004_v5 }
 0x249   :  { %v9641_v38 = vadd.f32 %v9640_v24, %v931_v25  ;;  %v9604_v4 = vpop.f32.mrb[163].mxu0  ;;  %v9642_v31 = vpop.f32.mrb[161].mxu1  ;;  %v5680_v25 = vsel %vm4844_vm0, %v3987_v33, 0  ;;  %v963_v32 = vrot.slane %v21057_v9, %v19944_v59  ;;  %v4014_v33 = vrot.slane %v111_v62, %v19603_v6 }
 0x24a   :  { %18804 = vst [vmem:[%s22650_s3 + $0x138] sm:$0xff] %v17284_v20  ;;  %v17285_v43 = vcombine.low %v9600_v27, %v9602_v19  ;;  %v9643_v44 = vadd.f32 %v9642_v31, %v935_v11  ;;  %v9644_v35 = vpop.f32.mrb[162].mxu1  ;;  %v959_v27 = vrot.slane %v21057_v9, %v19940_v56  ;;  %v967_v36 = vrot.slane %v21057_v9, %v19947_v61 }
 0x24b   :  { %v9645_v34 = vpop.f32.mrb[163].mxu1  ;;  %19160 = vmatmul.mubr.msk.bf16.vlgmr.msra.gmra.mrb[12].mxu0 %vm4840_vm1, %v20749_v28 }
 0x24c   :  { %v17293_v50 = vrot.slane %v17285_v43, %v19603_v6  ;;  %v17286_v42 = vcombine.low %v9641_v38, %v9643_v44  ;;  %11862 = vmatpush1.bf16.msra.mxu0 %v5662_v40  ;;  %11893 = vmatprep.mubr.bf16.mxu0 %v19553_v3  ;;  %v4021_v38 = vrot.slane %v4007_v30, %v19603_v6  ;;  %v112_v43 = vld [vmem:[#allocation2 + $0x240] sm:$0xff] }
 0x24d   :  { %19162 = vmatmul.mubr.msk.bf16.vlgmr.msra.gmra.mrb[12].mxu1 %vm4840_vm1, %v20749_v28  ;;  %19167 = vmatprep.subr.msk.bf16.mxu0 %vm4844_vm0, %v3988_v41 }
 0x24e   :  { %v17300_v63 = vrot.slane %v17286_v42, %v19603_v6  ;;  %v9681_v49 = vpop.f32.mrb[164].mxu0  ;;  %11903 = vmatpush1.bf16.msra.mxu1 %v5668_v39  ;;  %11934 = vmatprep.mubr.bf16.mxu1 %v19553_v3  ;;  %v4022_v39 = vcombine.high %v4014_v33, %v4014_v33 }
 0x24f   :  { %v9682_v1 = vadd.f32 %v9681_v49, %v939_v46  ;;  %v9683_v54 = vpop.f32.mrb[165].mxu0  ;;  %19169 = vmatprep.subr.msk.bf16.mxu1 %vm4844_vm0, %v3989_v52  ;;  %v5686_v46 = vsel %vm4844_vm0, %v3997_v60, 0  ;;  %v4024_v49 = vcombine.high %v112_v43, %v112_v43 }
 0x250   :  { %v17301_v8 = vcombine.low %v17293_v50, %v17300_v63  ;;  %v9684_v58 = vadd.f32 %v9683_v54, %v943_v57  ;;  %v9685_v55 = vpop.f32.mrb[166].mxu0  ;;  %v9722_v10 = vpop.f32.mrb[164].mxu1  ;;  %v971_v57 = vrot.slane %v21057_v9, %v19968_v12  ;;  %v4023_v63 = vcombine.high %v4021_v38, %v4021_v38 }
 0x251   :  { %v9723_v14 = vadd.f32 %v9722_v10, %v947_v45  ;;  %v9686_v15 = vpop.f32.mrb[167].mxu0  ;;  %v9724_v2 = vpop.f32.mrb[165].mxu1  ;;  %v5692_v45 = vsel %vm4844_vm0, %v4004_v5, 0  ;;  %v979_v54 = vrot.slane %v21057_v9, %v19976_v23  ;;  %v4031_v5 = vrot.slane %v112_v43, %v19603_v6 }
 0x252   :  { %18805 = vst [vmem:[%s22650_s3 + $0x140] sm:$0xff] %v17301_v8  ;;  %v17302_v16 = vcombine.low %v9682_v1, %v9684_v58  ;;  %v9725_v7 = vadd.f32 %v9724_v2, %v951_v47  ;;  %v9726_v21 = vpop.f32.mrb[166].mxu1  ;;  %v975_v1 = vrot.slane %v21057_v9, %v19972_v17  ;;  %v983_v55 = vrot.slane %v21057_v9, %v19979_v29 }
 0x253   :  { %v9727_v22 = vpop.f32.mrb[167].mxu1  ;;  %19164 = vmatmul.mubr.msk.bf16.vlgmr.msra.gmra.mrb[16].mxu0 %vm4840_vm1, %v20749_v28  ;;  %v5698_v9 = vsel %vm4844_vm0, %v4014_v33, 0 }
 0x254   :  { %v17310_v26 = vrot.slane %v17302_v16, %v19603_v6  ;;  %v17303_v11 = vcombine.low %v9723_v14, %v9725_v7  ;;  %11944 = vmatpush1.bf16.msra.mxu0 %v5674_v0  ;;  %11975 = vmatprep.mubr.bf16.mxu0 %v19553_v3  ;;  %v113_v16 = vld [vmem:[#allocation2 + $0x248] sm:$0xff] }
 0x255   :  { %19166 = vmatmul.mubr.msk.bf16.vlgmr.msra.gmra.mrb[16].mxu1 %vm4840_vm1, %v20749_v28  ;;  %19171 = vmatprep.subr.msk.bf16.mxu0 %vm4844_vm0, %v4005_v18  ;;  %v21109_v18 = vld [vmem:[#allocation4 + $0xb0] sm:$0xff] }
 0x256   :  { %v17317_v20 = vrot.slane %v17303_v11, %v19603_v6  ;;  %v9763_v19 = vpop.f32.mrb[168].mxu0  ;;  %11985 = vmatpush1.bf16.msra.mxu1 %v5680_v25  ;;  %12016 = vmatprep.mubr.bf16.mxu1 %v19553_v3  ;;  %v21118_v11 = vld [vmem:[%s22647_s0] sm:$0x1] }
 0x257   :  { %v9764_v24 = vadd.f32 %v9763_v19, %v955_v13  ;;  %v9765_v37 = vpop.f32.mrb[169].mxu0  ;;  %19173 = vmatprep.subr.msk.bf16.mxu1 %vm4844_vm0, %v4006_v48  ;;  %v4039_v13 = vcombine.high %v4031_v5, %v4031_v5 }
 0x258   :  { %v17318_v4 = vcombine.low %v17310_v26, %v17317_v20  ;;  %v9766_v31 = vadd.f32 %v9765_v37, %v959_v27  ;;  %v9767_v40 = vpop.f32.mrb[170].mxu0  ;;  %v9804_v41 = vpop.f32.mrb[168].mxu1  ;;  %v987_v27 = vrot.slane %v21109_v18, %v19934_v53  ;;  %v4041_v20 = vcombine.high %v113_v16, %v113_v16 }
 0x259   :  { %v9805_v44 = vadd.f32 %v9804_v41, %v963_v32  ;;  %v9768_v35 = vpop.f32.mrb[171].mxu0  ;;  %v9806_v34 = vpop.f32.mrb[169].mxu1  ;;  %v5704_v32 = vsel %vm4844_vm0, %v4021_v38, 0  ;;  %v995_v37 = vrot.slane %v21109_v18, %v19944_v59  ;;  %v4048_v38 = vrot.slane %v113_v16, %v19603_v6 }
 0x25a   :  { %18806 = vst [vmem:[%s22650_s3 + $0x148] sm:$0xff] %v17318_v4  ;;  %v17319_v52 = vcombine.low %v9764_v24, %v9766_v31  ;;  %v9807_v51 = vadd.f32 %v9806_v34, %v967_v36  ;;  %v9808_v50 = vpop.f32.mrb[170].mxu1  ;;  %v991_v24 = vrot.slane %v21109_v18, %v19940_v56  ;;  %v999_v40 = vrot.slane %v21109_v18, %v19947_v61 }
 0x25b   :  { %v9809_v42 = vpop.f32.mrb[171].mxu1  ;;  %19168 = vmatmul.mubr.msk.bf16.vlgmr.msra.gmra.mrb[20].mxu0 %vm4840_vm1, %v20749_v28 }
 0x25c   :  { %v17327_v60 = vrot.slane %v17319_v52, %v19603_v6  ;;  %v17320_v47 = vcombine.low %v9805_v44, %v9807_v51  ;;  %12026 = vmatpush1.bf16.msra.mxu0 %v5686_v46  ;;  %12057 = vmatprep.mubr.bf16.mxu0 %v19553_v3  ;;  %v4055_v44 = vrot.slane %v4041_v20, %v19603_v6  ;;  %v114_v52 = vld [vmem:[#allocation2 + $0x250] sm:$0xff] }
 0x25d   :  { %19170 = vmatmul.mubr.msk.bf16.vlgmr.msra.gmra.mrb[20].mxu1 %vm4840_vm1, %v20749_v28  ;;  %19175 = vmatprep.subr.msk.bf16.mxu0 %vm4844_vm0, %v4022_v39  ;;  %v4038_v28 = vrot.slane %v4024_v49, %v19603_v6 }
 0x25e   :  { %v17334_v8 = vrot.slane %v17320_v47, %v19603_v6  ;;  %v9845_v58 = vpop.f32.mrb[172].mxu0  ;;  %12067 = vmatpush1.bf16.msra.mxu1 %v5692_v45  ;;  %12098 = vmatprep.mubr.bf16.mxu1 %v19553_v3  ;;  %v4056_v45 = vcombine.high %v4048_v38, %v4048_v38 }
 0x25f   :  { %v9846_v10 = vadd.f32 %v9845_v58, %v971_v57  ;;  %v9847_v62 = vpop.f32.mrb[173].mxu0  ;;  %19177 = vmatprep.subr.msk.bf16.mxu1 %vm4844_vm0, %v4023_v63  ;;  %v4040_v33 = vcombine.high %v4038_v28, %v4038_v28  ;;  %v5710_v57 = vsel %vm4844_vm0, %v4031_v5, 0  ;;  %v4058_v58 = vcombine.high %v114_v52, %v114_v52 }
 0x260   :  { %v17335_v14 = vcombine.low %v17327_v60, %v17334_v8  ;;  %v9848_v15 = vadd.f32 %v9847_v62, %v975_v1  ;;  %v9849_v2 = vpop.f32.mrb[174].mxu0  ;;  %v9886_v0 = vpop.f32.mrb[172].mxu1  ;;  %v1003_v1 = vrot.slane %v21109_v18, %v19968_v12  ;;  %v4057_v8 = vcombine.high %v4055_v44, %v4055_v44 }
 0x261   :  { %v9887_v7 = vadd.f32 %v9886_v0, %v979_v54  ;;  %v9850_v21 = vpop.f32.mrb[175].mxu0  ;;  %v9888_v22 = vpop.f32.mrb[173].mxu1  ;;  %v5716_v54 = vsel %vm4844_vm0, %v4038_v28, 0  ;;  %v1011_v62 = vrot.slane %v21109_v18, %v19976_v23  ;;  %v4065_v28 = vrot.slane %v114_v52, %v19603_v6 }
 0x262   :  { %18807 = vst [vmem:[%s22650_s3 + $0x150] sm:$0xff] %v17335_v14  ;;  %v17336_v25 = vcombine.low %v9846_v10, %v9848_v15  ;;  %v9889_v48 = vadd.f32 %v9888_v22, %v983_v55  ;;  %v9890_v30 = vpop.f32.mrb[174].mxu1  ;;  %v1007_v10 = vrot.slane %v21109_v18, %v19972_v17  ;;  %v1015_v2 = vrot.slane %v21109_v18, %v19979_v29 }
 0x263   :  { %v9891_v26 = vpop.f32.mrb[175].mxu1  ;;  %19172 = vmatmul.mubr.msk.bf16.vlgmr.msra.gmra.mrb[24].mxu0 %vm4840_vm1, %v21118_v11  ;;  %v5722_v18 = vsel %vm4844_vm0, %v4048_v38, 0 }
 0x264   :  { %v17344_v19 = vrot.slane %v17336_v25, %v19603_v6  ;;  %v17337_v36 = vcombine.low %v9887_v7, %v9889_v48  ;;  %12108 = vmatpush1.bf16.msra.mxu0 %v5698_v9  ;;  %12139 = vmatprep.mubr.bf16.mxu0 %v19553_v3  ;;  %v4072_v7 = vrot.slane %v4058_v58, %v19603_v6  ;;  %v21166_v25 = vld [vmem:[#allocation4 + $0xb8] sm:$0xff] }
 0x265   :  { %19174 = vmatmul.mubr.msk.bf16.vlgmr.msra.gmra.mrb[24].mxu1 %vm4840_vm1, %v21118_v11  ;;  %19179 = vmatprep.subr.msk.bf16.mxu0 %vm4844_vm0, %v4039_v13  ;;  %v115_v48 = vld [vmem:[#allocation2 + $0x258] sm:$0xff] }
 0x266   :  { %v17351_v4 = vrot.slane %v17337_v36, %v19603_v6  ;;  %v9927_v31 = vpop.f32.mrb[176].mxu0  ;;  %12149 = vmatpush1.bf16.msra.mxu1 %v5704_v32  ;;  %12180 = vmatprep.mubr.bf16.mxu1 %v19553_v3  ;;  %v4073_v32 = vcombine.high %v4065_v28, %v4065_v28 }
 0x267   :  { %v9928_v41 = vadd.f32 %v9927_v31, %v987_v27  ;;  %v9929_v43 = vpop.f32.mrb[177].mxu0  ;;  %19181 = vmatprep.subr.msk.bf16.mxu1 %vm4844_vm0, %v4040_v33  ;;  %v4075_v31 = vcombine.high %v115_v48, %v115_v48 }
 0x268   :  { %v17352_v35 = vcombine.low %v17344_v19, %v17351_v4  ;;  %v9930_v34 = vadd.f32 %v9929_v43, %v991_v24  ;;  %v9931_v46 = vpop.f32.mrb[178].mxu0  ;;  %v9968_v39 = vpop.f32.mrb[176].mxu1  ;;  %v1019_v24 = vrot.slane %v21166_v25, %v19934_v53  ;;  %v4074_v4 = vcombine.high %v4072_v7, %v4072_v7 }
 0x269   :  { %v9969_v51 = vadd.f32 %v9968_v39, %v995_v37  ;;  %v9932_v50 = vpop.f32.mrb[179].mxu0  ;;  %v9970_v42 = vpop.f32.mrb[177].mxu1  ;;  %v5728_v37 = vsel %vm4844_vm0, %v4055_v44, 0  ;;  %v1027_v43 = vrot.slane %v21166_v25, %v19944_v59  ;;  %v4082_v44 = vrot.slane %v115_v48, %v19603_v6 }
 0x26a   :  { %18808 = vst [vmem:[%s22650_s3 + $0x158] sm:$0xff] %v17352_v35  ;;  %v17353_v63 = vcombine.low %v9928_v41, %v9930_v34  ;;  %v9971_v49 = vadd.f32 %v9970_v42, %v999_v40  ;;  %v9972_v60 = vpop.f32.mrb[178].mxu1  ;;  %v1023_v41 = vrot.slane %v21166_v25, %v19940_v56  ;;  %v1031_v46 = vrot.slane %v21166_v25, %v19947_v61 }
 0x26b   :  { %v9973_v47 = vpop.f32.mrb[179].mxu1  ;;  %19176 = vmatmul.mubr.msk.bf16.vlgmr.msra.gmra.mrb[28].mxu0 %vm4840_vm1, %v21118_v11 }
 0x26c   :  { %v17361_v5 = vrot.slane %v17353_v63, %v19603_v6  ;;  %v17354_v55 = vcombine.low %v9969_v51, %v9971_v49  ;;  %12190 = vmatpush1.bf16.msra.mxu0 %v5710_v57  ;;  %12221 = vmatprep.mubr.bf16.mxu0 %v19553_v3  ;;  %v4089_v51 = vrot.slane %v4075_v31, %v19603_v6  ;;  %v116_v63 = vld [vmem:[#allocation2 + $0x260] sm:$0xff] }
 0x26d   :  { %19178 = vmatmul.mubr.msk.bf16.vlgmr.msra.gmra.mrb[28].mxu1 %vm4840_vm1, %v21118_v11  ;;  %19183 = vmatprep.subr.msk.bf16.mxu0 %vm4844_vm0, %v4056_v45 }
 0x26e   :  { %v17368_v14 = vrot.slane %v17354_v55, %v19603_v6  ;;  %v10009_v15 = vpop.f32.mrb[180].mxu0  ;;  %12231 = vmatpush1.bf16.msra.mxu1 %v5716_v54  ;;  %12262 = vmatprep.mubr.bf16.mxu1 %v19553_v3  ;;  %v4090_v54 = vcombine.high %v4082_v44, %v4082_v44 }
 0x26f   :  { %v10010_v0 = vadd.f32 %v10009_v15, %v1003_v1  ;;  %v10011_v16 = vpop.f32.mrb[181].mxu0  ;;  %19185 = vmatprep.subr.msk.bf16.mxu1 %vm4844_vm0, %v4057_v8  ;;  %v5734_v1 = vsel %vm4844_vm0, %v4065_v28, 0  ;;  %v4092_v15 = vcombine.high %v116_v63, %v116_v63 }
 0x270   :  { %v17369_v21 = vcombine.low %v17361_v5, %v17368_v14  ;;  %v10012_v22 = vadd.f32 %v10011_v16, %v1007_v10  ;;  %v10013_v9 = vpop.f32.mrb[182].mxu0  ;;  %v10050_v13 = vpop.f32.mrb[180].mxu1  ;;  %v1035_v10 = vrot.slane %v21166_v25, %v19968_v12  ;;  %v4091_v14 = vcombine.high %v4089_v51, %v4089_v51 }
 0x271   :  { %v10051_v30 = vadd.f32 %v10050_v13, %v1011_v62  ;;  %v10014_v26 = vpop.f32.mrb[183].mxu0  ;;  %v10052_v27 = vpop.f32.mrb[181].mxu1  ;;  %v5740_v62 = vsel %vm4844_vm0, %v4072_v7, 0  ;;  %v1043_v16 = vrot.slane %v21166_v25, %v19976_v23  ;;  %v4099_v7 = vrot.slane %v116_v63, %v19603_v6 }
 0x272   :  { %18809 = vst [vmem:[%s22650_s3 + $0x160] sm:$0xff] %v17369_v21  ;;  %v17370_v33 = vcombine.low %v10010_v0, %v10012_v22  ;;  %v10053_v20 = vadd.f32 %v10052_v27, %v1015_v2  ;;  %v10054_v19 = vpop.f32.mrb[182].mxu1  ;;  %v1039_v0 = vrot.slane %v21166_v25, %v19972_v17  ;;  %v1047_v9 = vrot.slane %v21166_v25, %v19979_v29 }
 0x273   :  { %v10055_v36 = vpop.f32.mrb[183].mxu1  ;;  %19180 = vmatmul.mubr.msk.bf16.vlgmr.msra.gmra.mrb[32].mxu0 %vm4840_vm1, %v21118_v11  ;;  %v5746_v25 = vsel %vm4844_vm0, %v4082_v44, 0 }
 0x274   :  { %v17378_v38 = vrot.slane %v17370_v33, %v19603_v6  ;;  %v17371_v40 = vcombine.low %v10051_v30, %v10053_v20  ;;  %12272 = vmatpush1.bf16.msra.mxu0 %v5722_v18  ;;  %12303 = vmatprep.mubr.bf16.mxu0 %v19553_v3  ;;  %v4106_v30 = vrot.slane %v4092_v15, %v19603_v6  ;;  %v21218_v33 = vld [vmem:[#allocation4 + $0xc0] sm:$0xff]  ;;  %v117_v20 = vld [vmem:[#allocation2 + $0x268] sm:$0xff] }
 0x275   :  { %19182 = vmatmul.mubr.msk.bf16.vlgmr.msra.gmra.mrb[32].mxu1 %vm4840_vm1, %v21118_v11  ;;  %19187 = vmatprep.subr.msk.bf16.mxu0 %vm4844_vm0, %v4073_v32 }
 0x276   :  { %v17385_v35 = vrot.slane %v17371_v40, %v19603_v6  ;;  %v10091_v34 = vpop.f32.mrb[184].mxu0  ;;  %12313 = vmatpush1.bf16.msra.mxu1 %v5728_v37  ;;  %12344 = vmatprep.mubr.bf16.mxu1 %v19553_v3  ;;  %v4107_v37 = vcombine.high %v4099_v7, %v4099_v7 }
 0x277   :  { %v10092_v39 = vadd.f32 %v10091_v34, %v1019_v24  ;;  %v10093_v52 = vpop.f32.mrb[185].mxu0  ;;  %19189 = vmatprep.subr.msk.bf16.mxu1 %vm4844_vm0, %v4074_v4  ;;  %v4109_v34 = vcombine.high %v117_v20, %v117_v20 }
 0x278   :  { %v17386_v50 = vcombine.low %v17378_v38, %v17385_v35  ;;  %v10094_v42 = vadd.f32 %v10093_v52, %v1023_v41  ;;  %v10095_v57 = vpop.f32.mrb[186].mxu0  ;;  %v10132_v45 = vpop.f32.mrb[184].mxu1  ;;  %v1051_v41 = vrot.slane %v21218_v33, %v19934_v53  ;;  %v4108_v35 = vcombine.high %v4106_v30, %v4106_v30 }
 0x279   :  { %v10133_v49 = vadd.f32 %v10132_v45, %v1027_v43  ;;  %v10096_v60 = vpop.f32.mrb[187].mxu0  ;;  %v10134_v47 = vpop.f32.mrb[185].mxu1  ;;  %v5752_v43 = vsel %vm4844_vm0, %v4089_v51, 0  ;;  %v1059_v52 = vrot.slane %v21218_v33, %v19944_v59  ;;  %v4116_v51 = vrot.slane %v117_v20, %v19603_v6 }
 0x27a   :  { %18810 = vst [vmem:[%s22650_s3 + $0x168] sm:$0xff] %v17386_v50  ;;  %v17387_v8 = vcombine.low %v10092_v39, %v10094_v42  ;;  %v10135_v58 = vadd.f32 %v10134_v47, %v1031_v46  ;;  %v10136_v5 = vpop.f32.mrb[186].mxu1  ;;  %v1055_v39 = vrot.slane %v21218_v33, %v19940_v56  ;;  %v1063_v57 = vrot.slane %v21218_v33, %v19947_v61 }
 0x27b   :  { %v10137_v55 = vpop.f32.mrb[187].mxu1  ;;  %19184 = vmatmul.mubr.msk.bf16.vlgmr.msra.gmra.mrb[36].mxu0 %vm4840_vm1, %v21118_v11 }
 0x27c   :  { %v17395_v28 = vrot.slane %v17387_v8, %v19603_v6  ;;  %v17388_v2 = vcombine.low %v10133_v49, %v10135_v58  ;;  %12354 = vmatpush1.bf16.msra.mxu0 %v5734_v1  ;;  %12385 = vmatprep.mubr.bf16.mxu0 %v19553_v3  ;;  %v4123_v49 = vrot.slane %v4109_v34, %v19603_v6  ;;  %v118_v8 = vld [vmem:[#allocation2 + $0x270] sm:$0xff] }
 0x27d   :  { %19186 = vmatmul.mubr.msk.bf16.vlgmr.msra.gmra.mrb[36].mxu1 %vm4840_vm1, %v21118_v11  ;;  %19191 = vmatprep.subr.msk.bf16.mxu0 %vm4844_vm0, %v4090_v54 }
 0x27e   :  { %v17402_v21 = vrot.slane %v17388_v2, %v19603_v6  ;;  %v10173_v22 = vpop.f32.mrb[188].mxu0  ;;  %12395 = vmatpush1.bf16.msra.mxu1 %v5740_v62  ;;  %12426 = vmatprep.mubr.bf16.mxu1 %v19553_v3  ;;  %v4124_v62 = vcombine.high %v4116_v51, %v4116_v51 }
 0x27f   :  { %v10174_v13 = vadd.f32 %v10173_v22, %v1035_v10  ;;  %v10175_v48 = vpop.f32.mrb[189].mxu0  ;;  %19193 = vmatprep.subr.msk.bf16.mxu1 %vm4844_vm0, %v4091_v14  ;;  %v5758_v10 = vsel %vm4844_vm0, %v4099_v7, 0  ;;  %v4126_v22 = vcombine.high %v118_v8, %v118_v8 }
 0x280   :  { %v17403_v26 = vcombine.low %v17395_v28, %v17402_v21  ;;  %v10176_v27 = vadd.f32 %v10175_v48, %v1039_v0  ;;  %v10177_v18 = vpop.f32.mrb[190].mxu0  ;;  %v10214_v32 = vpop.f32.mrb[188].mxu1  ;;  %v1067_v0 = vrot.slane %v21218_v33, %v19968_v12  ;;  %v4125_v21 = vcombine.high %v4123_v49, %v4123_v49 }
 0x281   :  { %v10215_v19 = vadd.f32 %v10214_v32, %v1043_v16  ;;  %v10178_v36 = vpop.f32.mrb[191].mxu0  ;;  %v10216_v24 = vpop.f32.mrb[189].mxu1  ;;  %v5764_v16 = vsel %vm4844_vm0, %v4106_v30, 0  ;;  %v1075_v48 = vrot.slane %v21218_v33, %v19976_v23  ;;  %v4133_v30 = vrot.slane %v118_v8, %v19603_v6 }
 0x282   :  { %18811 = vst [vmem:[%s22650_s3 + $0x170] sm:$0xff] %v17403_v26  ;;  %v17404_v4 = vcombine.low %v10174_v13, %v10176_v27  ;;  %v10217_v31 = vadd.f32 %v10216_v24, %v1047_v9  ;;  %v10218_v38 = vpop.f32.mrb[190].mxu1  ;;  %v1071_v13 = vrot.slane %v21218_v33, %v19972_v17  ;;  %v1079_v18 = vrot.slane %v21218_v33, %v19979_v29 }
 0x283   :  { %v10219_v40 = vpop.f32.mrb[191].mxu1  ;;  %19188 = vmatmul.mubr.msk.bf16.vlgmr.msra.gmra.mrb[40].mxu0 %vm4840_vm1, %v21118_v11  ;;  %v5770_v33 = vsel %vm4844_vm0, %v4116_v51, 0 }
 0x284   :  { %v17412_v44 = vrot.slane %v17404_v4, %v19603_v6  ;;  %v17405_v46 = vcombine.low %v10215_v19, %v10217_v31  ;;  %12436 = vmatpush1.bf16.msra.mxu0 %v5746_v25  ;;  %12467 = vmatprep.mubr.bf16.mxu0 %v19553_v3  ;;  %v4140_v19 = vrot.slane %v4126_v22, %v19603_v6  ;;  %v21270_v4 = vld [vmem:[#allocation4 + $0xc8] sm:$0xff]  ;;  %v119_v31 = vld [vmem:[#allocation2 + $0x278] sm:$0xff] }
 0x285   :  { %19190 = vmatmul.mubr.msk.bf16.vlgmr.msra.gmra.mrb[40].mxu1 %vm4840_vm1, %v21118_v11  ;;  %19195 = vmatprep.subr.msk.bf16.mxu0 %vm4844_vm0, %v4107_v37 }
 0x286   :  { %v17419_v50 = vrot.slane %v17405_v46, %v19603_v6  ;;  %v10255_v42 = vpop.f32.mrb[192].mxu0  ;;  %12477 = vmatpush1.bf16.msra.mxu1 %v5752_v43  ;;  %12508 = vmatprep.mubr.bf16.mxu1 %v19553_v3  ;;  %v4141_v43 = vcombine.high %v4133_v30, %v4133_v30 }
 0x287   :  { %v10256_v45 = vadd.f32 %v10255_v42, %v1051_v41  ;;  %v10257_v63 = vpop.f32.mrb[193].mxu0  ;;  %19197 = vmatprep.subr.msk.bf16.mxu1 %vm4844_vm0, %v4108_v35  ;;  %v4143_v42 = vcombine.high %v119_v31, %v119_v31 }
 0x288   :  { %v17420_v60 = vcombine.low %v17412_v44, %v17419_v50  ;;  %v10258_v47 = vadd.f32 %v10257_v63, %v1055_v39  ;;  %v10259_v1 = vpop.f32.mrb[194].mxu0  ;;  %v10296_v54 = vpop.f32.mrb[192].mxu1  ;;  %v1083_v39 = vrot.slane %v21270_v4, %v19934_v53  ;;  %v4142_v50 = vcombine.high %v4140_v19, %v4140_v19 }
 0x289   :  { %v10297_v58 = vadd.f32 %v10296_v54, %v1059_v52  ;;  %v10260_v5 = vpop.f32.mrb[195].mxu0  ;;  %v10298_v55 = vpop.f32.mrb[193].mxu1  ;;  %v5776_v52 = vsel %vm4844_vm0, %v4123_v49, 0  ;;  %v1091_v63 = vrot.slane %v21270_v4, %v19944_v59  ;;  %v4150_v49 = vrot.slane %v119_v31, %v19603_v6 }
 0x28a   :  { %18812 = vst [vmem:[%s22650_s3 + $0x178] sm:$0xff] %v17420_v60  ;;  %v17421_v14 = vcombine.low %v10256_v45, %v10258_v47  ;;  %v10299_v15 = vadd.f32 %v10298_v55, %v1063_v57  ;;  %v10300_v28 = vpop.f32.mrb[194].mxu1  ;;  %v1087_v45 = vrot.slane %v21270_v4, %v19940_v56  ;;  %v1095_v1 = vrot.slane %v21270_v4, %v19947_v61 }
 0x28b   :  { %v10301_v2 = vpop.f32.mrb[195].mxu1  ;;  %19192 = vmatmul.mubr.msk.bf16.vlgmr.msra.gmra.mrb[44].mxu0 %vm4840_vm1, %v21118_v11 }
 0x28c   :  { %v17429_v7 = vrot.slane %v17421_v14, %v19603_v6  ;;  %v17422_v9 = vcombine.low %v10297_v58, %v10299_v15  ;;  %12518 = vmatpush1.bf16.msra.mxu0 %v5758_v10  ;;  %12549 = vmatprep.mubr.bf16.mxu0 %v19553_v3  ;;  %v4157_v58 = vrot.slane %v4143_v42, %v19603_v6  ;;  %v120_v14 = vld [vmem:[#allocation2 + $0x280] sm:$0xff] }
 0x28d   :  { %19194 = vmatmul.mubr.msk.bf16.vlgmr.msra.gmra.mrb[44].mxu1 %vm4840_vm1, %v21118_v11  ;;  %19199 = vmatprep.subr.msk.bf16.mxu0 %vm4844_vm0, %v4124_v62 }
 0x28e   :  { %v17436_v26 = vrot.slane %v17422_v9, %v19603_v6  ;;  %v10337_v27 = vpop.f32.mrb[196].mxu0  ;;  %12559 = vmatpush1.bf16.msra.mxu1 %v5764_v16  ;;  %12590 = vmatprep.mubr.bf16.mxu1 %v19553_v3  ;;  %v4158_v16 = vcombine.high %v4150_v49, %v4150_v49 }
 0x28f   :  { %v10338_v32 = vadd.f32 %v10337_v27, %v1067_v0  ;;  %v10339_v20 = vpop.f32.mrb[197].mxu0  ;;  %19201 = vmatprep.subr.msk.bf16.mxu1 %vm4844_vm0, %v4125_v21  ;;  %v5782_v0 = vsel %vm4844_vm0, %v4133_v30, 0  ;;  %v4160_v27 = vcombine.high %v120_v14, %v120_v14 }
 0x290   :  { %v17437_v36 = vcombine.low %v17429_v7, %v17436_v26  ;;  %v10340_v24 = vadd.f32 %v10339_v20, %v1071_v13  ;;  %v10341_v25 = vpop.f32.mrb[198].mxu0  ;;  %v10378_v37 = vpop.f32.mrb[196].mxu1  ;;  %v1099_v13 = vrot.slane %v21270_v4, %v19968_v12  ;;  %v4159_v26 = vcombine.high %v4157_v58, %v4157_v58 }
 0x291   :  { %v10379_v38 = vadd.f32 %v10378_v37, %v1075_v48  ;;  %v10342_v40 = vpop.f32.mrb[199].mxu0  ;;  %v10380_v41 = vpop.f32.mrb[197].mxu1  ;;  %v5788_v48 = vsel %vm4844_vm0, %v4140_v19, 0  ;;  %v1107_v20 = vrot.slane %v21270_v4, %v19976_v23  ;;  %v4167_v19 = vrot.slane %v120_v14, %v19603_v6 }
 0x292   :  { %18813 = vst [vmem:[%s22650_s3 + $0x180] sm:$0xff] %v17437_v36  ;;  %v17438_v35 = vcombine.low %v10338_v32, %v10340_v24  ;;  %v10381_v34 = vadd.f32 %v10380_v41, %v1079_v18  ;;  %v10382_v44 = vpop.f32.mrb[198].mxu1  ;;  %v1103_v32 = vrot.slane %v21270_v4, %v19972_v17  ;;  %v1111_v25 = vrot.slane %v21270_v4, %v19979_v29 }
 0x293   :  { %v10383_v46 = vpop.f32.mrb[199].mxu1  ;;  %19196 = vmatmul.mubr.msk.bf16.vlgmr.msra.gmra.mrb[48].mxu0 %vm4840_vm1, %v21118_v11  ;;  %v5794_v4 = vsel %vm4844_vm0, %v4150_v49, 0 }
 0x294   :  { %v17446_v51 = vrot.slane %v17438_v35, %v19603_v6  ;;  %v17439_v57 = vcombine.low %v10379_v38, %v10381_v34  ;;  %12600 = vmatpush1.bf16.msra.mxu0 %v5770_v33  ;;  %12631 = vmatprep.mubr.bf16.mxu0 %v19553_v3  ;;  %v4174_v38 = vrot.slane %v4160_v27, %v19603_v6  ;;  %v21322_v35 = vld [vmem:[#allocation4 + $0xd0] sm:$0xff]  ;;  %v121_v34 = vld [vmem:[#allocation2 + $0x288] sm:$0xff] }
 0x295   :  { %19198 = vmatmul.mubr.msk.bf16.vlgmr.msra.gmra.mrb[48].mxu1 %vm4840_vm1, %v21118_v11  ;;  %19203 = vmatprep.subr.msk.bf16.mxu0 %vm4844_vm0, %v4141_v43 }
 0x296   :  { %v17453_v60 = vrot.slane %v17439_v57, %v19603_v6  ;;  %v10419_v47 = vpop.f32.mrb[200].mxu0  ;;  %12641 = vmatpush1.bf16.msra.mxu1 %v5776_v52  ;;  %12672 = vmatprep.mubr.bf16.mxu1 %v19553_v3  ;;  %v4175_v52 = vcombine.high %v4167_v19, %v4167_v19 }
 0x297   :  { %v10420_v54 = vadd.f32 %v10419_v47, %v1083_v39  ;;  %v10421_v8 = vpop.f32.mrb[201].mxu0  ;;  %19205 = vmatprep.subr.msk.bf16.mxu1 %vm4844_vm0, %v4142_v50  ;;  %v4177_v47 = vcombine.high %v121_v34, %v121_v34 }
 0x298   :  { %v17454_v5 = vcombine.low %v17446_v51, %v17453_v60  ;;  %v10422_v55 = vadd.f32 %v10421_v8, %v1087_v45  ;;  %v10423_v10 = vpop.f32.mrb[202].mxu0  ;;  %v10460_v62 = vpop.f32.mrb[200].mxu1  ;;  %v1115_v45 = vrot.slane %v21322_v35, %v19934_v53  ;;  %v4176_v60 = vcombine.high %v4174_v38, %v4174_v38 }
 0x299   :  { %v10461_v15 = vadd.f32 %v10460_v62, %v1091_v63  ;;  %v10424_v28 = vpop.f32.mrb[203].mxu0  ;;  %v10462_v2 = vpop.f32.mrb[201].mxu1  ;;  %v5800_v63 = vsel %vm4844_vm0, %v4157_v58, 0  ;;  %v1123_v8 = vrot.slane %v21322_v35, %v19944_v59  ;;  %v4184_v58 = vrot.slane %v121_v34, %v19603_v6 }
 0x29a   :  { %18814 = vst [vmem:[%s22650_s3 + $0x188] sm:$0xff] %v17454_v5  ;;  %v17455_v21 = vcombine.low %v10420_v54, %v10422_v55  ;;  %v10463_v22 = vadd.f32 %v10462_v2, %v1095_v1  ;;  %v10464_v7 = vpop.f32.mrb[202].mxu1  ;;  %v1119_v54 = vrot.slane %v21322_v35, %v19940_v56  ;;  %v1127_v10 = vrot.slane %v21322_v35, %v19947_v61 }
 0x29b   :  { %v10465_v9 = vpop.f32.mrb[203].mxu1  ;;  %19200 = vmatmul.mubr.msk.bf16.vlgmr.msra.gmra.mrb[52].mxu0 %vm4840_vm1, %v21118_v11 }
 0x29c   :  { %v17463_v30 = vrot.slane %v17455_v21, %v19603_v6  ;;  %v17456_v18 = vcombine.low %v10461_v15, %v10463_v22  ;;  %12682 = vmatpush1.bf16.msra.mxu0 %v5782_v0  ;;  %12713 = vmatprep.mubr.bf16.mxu0 %v19553_v3  ;;  %v4191_v15 = vrot.slane %v4177_v47, %v19603_v6  ;;  %v122_v21 = vld [vmem:[#allocation2 + $0x290] sm:$0xff] }
 0x29d   :  { %19202 = vmatmul.mubr.msk.bf16.vlgmr.msra.gmra.mrb[52].mxu1 %vm4840_vm1, %v21118_v11  ;;  %19207 = vmatprep.subr.msk.bf16.mxu0 %vm4844_vm0, %v4158_v16 }
 0x29e   :  { %v17470_v36 = vrot.slane %v17456_v18, %v19603_v6  ;;  %v10501_v24 = vpop.f32.mrb[204].mxu0  ;;  %12723 = vmatpush1.bf16.msra.mxu1 %v5788_v48  ;;  %12754 = vmatprep.mubr.bf16.mxu1 %v19553_v3  ;;  %v4192_v48 = vcombine.high %v4184_v58, %v4184_v58 }
 0x29f   :  { %v10502_v37 = vadd.f32 %v10501_v24, %v1099_v13  ;;  %v10503_v31 = vpop.f32.mrb[205].mxu0  ;;  %19209 = vmatprep.subr.msk.bf16.mxu1 %vm4844_vm0, %v4159_v26  ;;  %v5806_v13 = vsel %vm4844_vm0, %v4167_v19, 0  ;;  %v4194_v24 = vcombine.high %v122_v21, %v122_v21 }
 0x2a0   :  { %v17471_v40 = vcombine.low %v17463_v30, %v17470_v36  ;;  %v10504_v41 = vadd.f32 %v10503_v31, %v1103_v32  ;;  %v10505_v33 = vpop.f32.mrb[206].mxu0  ;;  %v10542_v43 = vpop.f32.mrb[204].mxu1  ;;  %v1131_v32 = vrot.slane %v21322_v35, %v19968_v12  ;;  %v4193_v36 = vcombine.high %v4191_v15, %v4191_v15 }
 0x2a1   :  { %v10543_v44 = vadd.f32 %v10542_v43, %v1107_v20  ;;  %v10506_v46 = vpop.f32.mrb[207].mxu0  ;;  %v10544_v39 = vpop.f32.mrb[205].mxu1  ;;  %v5812_v20 = vsel %vm4844_vm0, %v4174_v38, 0  ;;  %v1139_v31 = vrot.slane %v21322_v35, %v19976_v23  ;;  %v4201_v38 = vrot.slane %v122_v21, %v19603_v6 }
 0x2a2   :  { %18815 = vst [vmem:[%s22650_s3 + $0x190] sm:$0xff] %v17471_v40  ;;  %v17472_v50 = vcombine.low %v10502_v37, %v10504_v41  ;;  %v10545_v42 = vadd.f32 %v10544_v39, %v1111_v25  ;;  %v10546_v51 = vpop.f32.mrb[206].mxu1  ;;  %v1135_v37 = vrot.slane %v21322_v35, %v19972_v17  ;;  %v1143_v33 = vrot.slane %v21322_v35, %v19979_v29 }
 0x2a3   :  { %v10547_v57 = vpop.f32.mrb[207].mxu1  ;;  %19204 = vmatmul.mubr.msk.bf16.vlgmr.msra.gmra.mrb[56].mxu0 %vm4840_vm1, %v21118_v11  ;;  %v5818_v35 = vsel %vm4844_vm0, %v4184_v58, 0 }
 0x2a4   :  { %v17480_v49 = vrot.slane %v17472_v50, %v19603_v6  ;;  %v17473_v1 = vcombine.low %v10543_v44, %v10545_v42  ;;  %12764 = vmatpush1.bf16.msra.mxu0 %v5794_v4  ;;  %12795 = vmatprep.mubr.bf16.mxu0 %v19553_v3  ;;  %v4208_v44 = vrot.slane %v4194_v24, %v19603_v6  ;;  %v21374_v50 = vld [vmem:[#allocation4 + $0xd8] sm:$0xff] }
 0x2a5   :  { %19206 = vmatmul.mubr.msk.bf16.vlgmr.msra.gmra.mrb[56].mxu1 %vm4840_vm1, %v21118_v11  ;;  %19211 = vmatprep.subr.msk.bf16.mxu0 %vm4844_vm0, %v4175_v52  ;;  %v123_v42 = vld [vmem:[#allocation2 + $0x298] sm:$0xff] }
 0x2a6   :  { %v17487_v5 = vrot.slane %v17473_v1, %v19603_v6  ;;  %v10583_v55 = vpop.f32.mrb[208].mxu0  ;;  %12805 = vmatpush1.bf16.msra.mxu1 %v5800_v63  ;;  %12836 = vmatprep.mubr.bf16.mxu1 %v19553_v3  ;;  %v4209_v63 = vcombine.high %v4201_v38, %v4201_v38 }
 0x2a7   :  { %v10584_v62 = vadd.f32 %v10583_v55, %v1115_v45  ;;  %v10585_v14 = vpop.f32.mrb[209].mxu0  ;;  %19213 = vmatprep.subr.msk.bf16.mxu1 %vm4844_vm0, %v4176_v60  ;;  %v4211_v55 = vcombine.high %v123_v42, %v123_v42 }
 0x2a8   :  { %v17488_v28 = vcombine.low %v17480_v49, %v17487_v5  ;;  %v10586_v2 = vadd.f32 %v10585_v14, %v1119_v54  ;;  %v10587_v0 = vpop.f32.mrb[210].mxu0  ;;  %v10624_v16 = vpop.f32.mrb[208].mxu1  ;;  %v1147_v54 = vrot.slane %v21374_v50, %v19934_v53  ;;  %v4210_v5 = vcombine.high %v4208_v44, %v4208_v44 }
 0x2a9   :  { %v10625_v22 = vadd.f32 %v10624_v16, %v1123_v8  ;;  %v10588_v7 = vpop.f32.mrb[211].mxu0  ;;  %v10626_v9 = vpop.f32.mrb[209].mxu1  ;;  %v5824_v8 = vsel %vm4844_vm0, %v4191_v15, 0  ;;  %v1155_v14 = vrot.slane %v21374_v50, %v19944_v59  ;;  %v4218_v15 = vrot.slane %v123_v42, %v19603_v6 }
 0x2aa   :  { %18816 = vst [vmem:[%s22650_s3 + $0x198] sm:$0xff] %v17488_v28  ;;  %v17489_v26 = vcombine.low %v10584_v62, %v10586_v2  ;;  %v10627_v27 = vadd.f32 %v10626_v9, %v1127_v10  ;;  %v10628_v30 = vpop.f32.mrb[210].mxu1  ;;  %v1151_v62 = vrot.slane %v21374_v50, %v19940_v56  ;;  %v1159_v0 = vrot.slane %v21374_v50, %v19947_v61 }
 0x2ab   :  { %v10629_v18 = vpop.f32.mrb[211].mxu1  ;;  %19208 = vmatmul.mubr.msk.bf16.vlgmr.msra.gmra.mrb[60].mxu0 %vm4840_vm1, %v21118_v11 }
 0x2ac   :  { %v17497_v19 = vrot.slane %v17489_v26, %v19603_v6  ;;  %v17490_v25 = vcombine.low %v10625_v22, %v10627_v27  ;;  %12846 = vmatpush1.bf16.msra.mxu0 %v5806_v13  ;;  %12877 = vmatprep.mubr.bf16.mxu0 %v19553_v3  ;;  %v4225_v22 = vrot.slane %v4211_v55, %v19603_v6  ;;  %v124_v26 = vld [vmem:[#allocation2 + $0x2a0] sm:$0xff] }
 0x2ad   :  { %19210 = vmatmul.mubr.msk.bf16.vlgmr.msra.gmra.mrb[60].mxu1 %vm4840_vm1, %v21118_v11  ;;  %19215 = vmatprep.subr.msk.bf16.mxu0 %vm4844_vm0, %v4192_v48 }
 0x2ae   :  { %v17504_v40 = vrot.slane %v17490_v25, %v19603_v6  ;;  %v10665_v41 = vpop.f32.mrb[212].mxu0  ;;  %12887 = vmatpush1.bf16.msra.mxu1 %v5812_v20  ;;  %12918 = vmatprep.mubr.bf16.mxu1 %v19553_v3  ;;  %v4226_v20 = vcombine.high %v4218_v15, %v4218_v15 }
 0x2af   :  { %v10666_v43 = vadd.f32 %v10665_v41, %v1131_v32  ;;  %v10667_v34 = vpop.f32.mrb[213].mxu0  ;;  %19217 = vmatprep.subr.msk.bf16.mxu1 %vm4844_vm0, %v4193_v36  ;;  %v5830_v32 = vsel %vm4844_vm0, %v4201_v38, 0  ;;  %v4228_v41 = vcombine.high %v124_v26, %v124_v26 }
 0x2b0   :  { %v17505_v46 = vcombine.low %v17497_v19, %v17504_v40  ;;  %v10668_v39 = vadd.f32 %v10667_v34, %v1135_v37  ;;  %v10669_v4 = vpop.f32.mrb[214].mxu0  ;;  %v10706_v52 = vpop.f32.mrb[212].mxu1  ;;  %v1163_v37 = vrot.slane %v21374_v50, %v19968_v12  ;;  %v4227_v40 = vcombine.high %v4225_v22, %v4225_v22 }
 0x2b1   :  { %v10707_v51 = vadd.f32 %v10706_v52, %v1139_v31  ;;  %v10670_v57 = vpop.f32.mrb[215].mxu0  ;;  %v10708_v45 = vpop.f32.mrb[213].mxu1  ;;  %v5836_v31 = vsel %vm4844_vm0, %v4208_v44, 0  ;;  %v1171_v34 = vrot.slane %v21374_v50, %v19976_v23  ;;  %v4235_v44 = vrot.slane %v124_v26, %v19603_v6 }
 0x2b2   :  { %18817 = vst [vmem:[%s22650_s3 + $0x1a0] sm:$0xff] %v17505_v46  ;;  %v17506_v60 = vcombine.low %v10666_v43, %v10668_v39  ;;  %v10709_v47 = vadd.f32 %v10708_v45, %v1143_v33  ;;  %v10710_v49 = vpop.f32.mrb[214].mxu1  ;;  %v1167_v43 = vrot.slane %v21374_v50, %v19972_v17  ;;  %v1175_v4 = vrot.slane %v21374_v50, %v19979_v29 }
 0x2b3   :  { %v10711_v1 = vpop.f32.mrb[215].mxu1  ;;  %19212 = vmatmul.mubr.msk.bf16.vlgmr.msra.gmra.mrb[64].mxu0 %vm4840_vm1, %v21118_v11  ;;  %v5842_v50 = vsel %vm4844_vm0, %v4218_v15, 0 }
 0x2b4   :  { %v17514_v58 = vrot.slane %v17506_v60, %v19603_v6  ;;  %v17507_v10 = vcombine.low %v10707_v51, %v10709_v47  ;;  %12928 = vmatpush1.bf16.msra.mxu0 %v5818_v35  ;;  %12959 = vmatprep.mubr.bf16.mxu0 %v19553_v3  ;;  %v4242_v51 = vrot.slane %v4228_v41, %v19603_v6  ;;  %v21426_v60 = vld [vmem:[#allocation4 + $0xe0] sm:$0xff]  ;;  %v125_v47 = vld [vmem:[#allocation2 + $0x2a8] sm:$0xff] }
 0x2b5   :  { %19214 = vmatmul.mubr.msk.bf16.vlgmr.msra.gmra.mrb[64].mxu1 %vm4840_vm1, %v21118_v11  ;;  %19219 = vmatprep.subr.msk.bf16.mxu0 %vm4844_vm0, %v4209_v63 }
 0x2b6   :  { %v17521_v28 = vrot.slane %v17507_v10, %v19603_v6  ;;  %v10747_v2 = vpop.f32.mrb[216].mxu0  ;;  %12969 = vmatpush1.bf16.msra.mxu1 %v5824_v8  ;;  %13000 = vmatprep.mubr.bf16.mxu1 %v19553_v3  ;;  %v4243_v8 = vcombine.high %v4235_v44, %v4235_v44 }
 0x2b7   :  { %v10748_v16 = vadd.f32 %v10747_v2, %v1147_v54  ;;  %v10749_v21 = vpop.f32.mrb[217].mxu0  ;;  %19221 = vmatprep.subr.msk.bf16.mxu1 %vm4844_vm0, %v4210_v5  ;;  %v4245_v2 = vcombine.high %v125_v47, %v125_v47 }
 0x2b8   :  { %v17522_v7 = vcombine.low %v17514_v58, %v17521_v28  ;;  %v10750_v9 = vadd.f32 %v10749_v21, %v1151_v62  ;;  %v10751_v13 = vpop.f32.mrb[218].mxu0  ;;  %v10788_v48 = vpop.f32.mrb[216].mxu1  ;;  %v1179_v62 = vrot.slane %v21426_v60, %v19934_v53  ;;  %v4244_v28 = vcombine.high %v4242_v51, %v4242_v51 }
 0x2b9   :  { %v10789_v27 = vadd.f32 %v10788_v48, %v1155_v14  ;;  %v10752_v30 = vpop.f32.mrb[219].mxu0  ;;  %v10790_v18 = vpop.f32.mrb[217].mxu1  ;;  %v5848_v14 = vsel %vm4844_vm0, %v4225_v22, 0  ;;  %v1187_v21 = vrot.slane %v21426_v60, %v19944_v59  ;;  %v4252_v22 = vrot.slane %v125_v47, %v19603_v6 }
 0x2ba   :  { %18818 = vst [vmem:[%s22650_s3 + $0x1a8] sm:$0xff] %v17522_v7  ;;  %v17523_v36 = vcombine.low %v10748_v16, %v10750_v9  ;;  %v10791_v24 = vadd.f32 %v10790_v18, %v1159_v0  ;;  %v10792_v19 = vpop.f32.mrb[218].mxu1  ;;  %v1183_v16 = vrot.slane %v21426_v60, %v19940_v56  ;;  %v1191_v13 = vrot.slane %v21426_v60, %v19947_v61 }
 0x2bb   :  { %v10793_v25 = vpop.f32.mrb[219].mxu1  ;;  %19216 = vmatmul.mubr.msk.bf16.vlgmr.msra.gmra.mrb[68].mxu0 %vm4840_vm1, %v21118_v11 }
 0x2bc   :  { %v17531_v38 = vrot.slane %v17523_v36, %v19603_v6  ;;  %v17524_v33 = vcombine.low %v10789_v27, %v10791_v24  ;;  %13010 = vmatpush1.bf16.msra.mxu0 %v5830_v32  ;;  %13041 = vmatprep.mubr.bf16.mxu0 %v19553_v3  ;;  %v4259_v27 = vrot.slane %v4245_v2, %v19603_v6  ;;  %v126_v36 = vld [vmem:[#allocation2 + $0x2b0] sm:$0xff] }
 0x2bd   :  { %19218 = vmatmul.mubr.msk.bf16.vlgmr.msra.gmra.mrb[68].mxu1 %vm4840_vm1, %v21118_v11  ;;  %19223 = vmatprep.subr.msk.bf16.mxu0 %vm4844_vm0, %v4226_v20 }
 0x2be   :  { %v17538_v46 = vrot.slane %v17524_v33, %v19603_v6  ;;  %v10829_v39 = vpop.f32.mrb[220].mxu0  ;;  %13051 = vmatpush1.bf16.msra.mxu1 %v5836_v31  ;;  %13082 = vmatprep.mubr.bf16.mxu1 %v19553_v3  ;;  %v4260_v31 = vcombine.high %v4252_v22, %v4252_v22 }
 0x2bf   :  { %v10830_v52 = vadd.f32 %v10829_v39, %v1163_v37  ;;  %v10831_v42 = vpop.f32.mrb[221].mxu0  ;;  %19225 = vmatprep.subr.msk.bf16.mxu1 %vm4844_vm0, %v4227_v40  ;;  %v5854_v37 = vsel %vm4844_vm0, %v4235_v44, 0  ;;  %v4262_v39 = vcombine.high %v126_v36, %v126_v36 }
 0x2c0   :  { %v17539_v57 = vcombine.low %v17531_v38, %v17538_v46  ;;  %v10832_v45 = vadd.f32 %v10831_v42, %v1167_v43  ;;  %v10833_v35 = vpop.f32.mrb[222].mxu0  ;;  %v10870_v63 = vpop.f32.mrb[220].mxu1  ;;  %v1195_v43 = vrot.slane %v21426_v60, %v19968_v12  ;;  %v4261_v46 = vcombine.high %v4259_v27, %v4259_v27 }
 0x2c1   :  { %v10871_v49 = vadd.f32 %v10870_v63, %v1171_v34  ;;  %v10834_v1 = vpop.f32.mrb[223].mxu0  ;;  %v10872_v54 = vpop.f32.mrb[221].mxu1  ;;  %v5860_v34 = vsel %vm4844_vm0, %v4242_v51, 0  ;;  %v1203_v42 = vrot.slane %v21426_v60, %v19976_v23  ;;  %v4269_v51 = vrot.slane %v126_v36, %v19603_v6 }
 0x2c2   :  { %18819 = vst [vmem:[%s22650_s3 + $0x1b0] sm:$0xff] %v17539_v57  ;;  %v17540_v5 = vcombine.low %v10830_v52, %v10832_v45  ;;  %v10873_v55 = vadd.f32 %v10872_v54, %v1175_v4  ;;  %v10874_v58 = vpop.f32.mrb[222].mxu1  ;;  %v1199_v52 = vrot.slane %v21426_v60, %v19972_v17  ;;  %v1207_v35 = vrot.slane %v21426_v60, %v19979_v29 }
 0x2c3   :  { %v10875_v10 = vpop.f32.mrb[223].mxu1  ;;  %19220 = vmatmul.mubr.msk.bf16.vlgmr.msra.gmra.mrb[72].mxu0 %vm4840_vm1, %v21118_v11  ;;  %v5866_v60 = vsel %vm4844_vm0, %v4252_v22, 0 }
 0x2c4   :  { %v17548_v15 = vrot.slane %v17540_v5, %v19603_v6  ;;  %v17541_v0 = vcombine.low %v10871_v49, %v10873_v55  ;;  %13092 = vmatpush1.bf16.msra.mxu0 %v5842_v50  ;;  %13123 = vmatprep.mubr.bf16.mxu0 %v19553_v3  ;;  %v127_v5 = vld [vmem:[#allocation2 + $0x2b8] sm:$0xff] }
 0x2c5   :  { %19222 = vmatmul.mubr.msk.bf16.vlgmr.msra.gmra.mrb[72].mxu1 %vm4840_vm1, %v21118_v11  ;;  %19227 = vmatprep.subr.msk.bf16.mxu0 %vm4844_vm0, %v4243_v8  ;;  %v21478_v8 = vld [vmem:[#allocation4 + $0xe8] sm:$0xff] }
 0x2c6   :  { %v17555_v7 = vrot.slane %v17541_v0, %v19603_v6  ;;  %v10911_v9 = vpop.f32.mrb[224].mxu0  ;;  %13133 = vmatpush1.bf16.msra.mxu1 %v5848_v14  ;;  %13164 = vmatprep.mubr.bf16.mxu1 %v19553_v3  ;;  %v21487_v0 = vld [vmem:[%s22647_s0] sm:$0x1] }
 0x2c7   :  { %v10912_v48 = vadd.f32 %v10911_v9, %v1179_v62  ;;  %v10913_v26 = vpop.f32.mrb[225].mxu0  ;;  %19229 = vmatprep.subr.msk.bf16.mxu1 %vm4844_vm0, %v4244_v28  ;;  %v4277_v62 = vcombine.high %v4269_v51, %v4269_v51 }
 0x2c8   :  { %v17556_v30 = vcombine.low %v17548_v15, %v17555_v7  ;;  %v10914_v18 = vadd.f32 %v10913_v26, %v1183_v16  ;;  %v10915_v32 = vpop.f32.mrb[226].mxu0  ;;  %v10952_v20 = vpop.f32.mrb[224].mxu1  ;;  %v1211_v16 = vrot.slane %v21478_v8, %v19934_v53  ;;  %v4279_v7 = vcombine.high %v127_v5, %v127_v5 }
 0x2c9   :  { %v10953_v24 = vadd.f32 %v10952_v20, %v1187_v21  ;;  %v10916_v19 = vpop.f32.mrb[227].mxu0  ;;  %v10954_v25 = vpop.f32.mrb[225].mxu1  ;;  %v5872_v21 = vsel %vm4844_vm0, %v4259_v27, 0  ;;  %v1219_v26 = vrot.slane %v21478_v8, %v19944_v59  ;;  %v4286_v27 = vrot.slane %v127_v5, %v19603_v6 }
 0x2ca   :  { %18820 = vst [vmem:[%s22650_s3 + $0x1b8] sm:$0xff] %v17556_v30  ;;  %v17557_v40 = vcombine.low %v10912_v48, %v10914_v18  ;;  %v10955_v41 = vadd.f32 %v10954_v25, %v1191_v13  ;;  %v10956_v38 = vpop.f32.mrb[226].mxu1  ;;  %v1215_v48 = vrot.slane %v21478_v8, %v19940_v56  ;;  %v1223_v32 = vrot.slane %v21478_v8, %v19947_v61 }
 0x2cb   :  { %v10957_v33 = vpop.f32.mrb[227].mxu1  ;;  %19224 = vmatmul.mubr.msk.bf16.vlgmr.msra.gmra.mrb[76].mxu0 %vm4840_vm1, %v21118_v11 }
 0x2cc   :  { %v17565_v44 = vrot.slane %v17557_v40, %v19603_v6  ;;  %v17558_v4 = vcombine.low %v10953_v24, %v10955_v41  ;;  %13174 = vmatpush1.bf16.msra.mxu0 %v5854_v37  ;;  %13205 = vmatprep.mubr.bf16.mxu0 %v19553_v3  ;;  %v4293_v24 = vrot.slane %v4279_v7, %v19603_v6  ;;  %v128_v40 = vld [vmem:[#allocation2 + $0x2c0] sm:$0xff] }
 0x2cd   :  { %19226 = vmatmul.mubr.msk.bf16.vlgmr.msra.gmra.mrb[76].mxu1 %vm4840_vm1, %v21118_v11  ;;  %19231 = vmatprep.subr.msk.bf16.mxu0 %vm4844_vm0, %v4260_v31  ;;  %v4276_v11 = vrot.slane %v4262_v39, %v19603_v6 }
 0x2ce   :  { %v17572_v57 = vrot.slane %v17558_v4, %v19603_v6  ;;  %v10993_v45 = vpop.f32.mrb[228].mxu0  ;;  %13215 = vmatpush1.bf16.msra.mxu1 %v5860_v34  ;;  %13246 = vmatprep.mubr.bf16.mxu1 %v19553_v3  ;;  %v4294_v34 = vcombine.high %v4286_v27, %v4286_v27 }
 0x2cf   :  { %v10994_v63 = vadd.f32 %v10993_v45, %v1195_v43  ;;  %v10995_v47 = vpop.f32.mrb[229].mxu0  ;;  %19233 = vmatprep.subr.msk.bf16.mxu1 %vm4844_vm0, %v4261_v46  ;;  %v4278_v22 = vcombine.high %v4276_v11, %v4276_v11  ;;  %v5878_v43 = vsel %vm4844_vm0, %v4269_v51, 0  ;;  %v4296_v45 = vcombine.high %v128_v40, %v128_v40 }
 0x2d0   :  { %v17573_v49 = vcombine.low %v17565_v44, %v17572_v57  ;;  %v10996_v1 = vadd.f32 %v10995_v47, %v1199_v52  ;;  %v10997_v54 = vpop.f32.mrb[230].mxu0  ;;  %v11034_v50 = vpop.f32.mrb[228].mxu1  ;;  %v1227_v52 = vrot.slane %v21478_v8, %v19968_v12  ;;  %v4295_v57 = vcombine.high %v4293_v24, %v4293_v24 }
 0x2d1   :  { %v11035_v55 = vadd.f32 %v11034_v50, %v1203_v42  ;;  %v10998_v58 = vpop.f32.mrb[231].mxu0  ;;  %v11036_v10 = vpop.f32.mrb[229].mxu1  ;;  %v5884_v42 = vsel %vm4844_vm0, %v4276_v11, 0  ;;  %v1235_v47 = vrot.slane %v21478_v8, %v19976_v23  ;;  %v4303_v11 = vrot.slane %v128_v40, %v19603_v6 }
 0x2d2   :  { %18821 = vst [vmem:[%s22650_s3 + $0x1c0] sm:$0xff] %v17573_v49  ;;  %v17574_v14 = vcombine.low %v10994_v63, %v10996_v1  ;;  %v11037_v28 = vadd.f32 %v11036_v10, %v1207_v35  ;;  %v11038_v2 = vpop.f32.mrb[230].mxu1  ;;  %v1231_v63 = vrot.slane %v21478_v8, %v19972_v17  ;;  %v1239_v54 = vrot.slane %v21478_v8, %v19979_v29 }
 0x2d3   :  { %v11039_v15 = vpop.f32.mrb[231].mxu1  ;;  %19228 = vmatmul.mubr.msk.bf16.vlgmr.msra.gmra.mrb[80].mxu0 %vm4840_vm1, %v21487_v0  ;;  %v5890_v8 = vsel %vm4844_vm0, %v4286_v27, 0 }
 0x2d4   :  { %v17582_v9 = vrot.slane %v17574_v14, %v19603_v6  ;;  %v17575_v13 = vcombine.low %v11035_v55, %v11037_v28  ;;  %13256 = vmatpush1.bf16.msra.mxu0 %v5866_v60  ;;  %13287 = vmatprep.mubr.bf16.mxu0 %v19553_v3  ;;  %v4310_v55 = vrot.slane %v4296_v45, %v19603_v6  ;;  %v21535_v14 = vld [vmem:[#allocation4 + $0xf0] sm:$0xff]  ;;  %v129_v28 = vld [vmem:[#allocation2 + $0x2c8] sm:$0xff] }
 0x2d5   :  { %19230 = vmatmul.mubr.msk.bf16.vlgmr.msra.gmra.mrb[80].mxu1 %vm4840_vm1, %v21487_v0  ;;  %19235 = vmatprep.subr.msk.bf16.mxu0 %vm4844_vm0, %v4277_v62 }
 0x2d6   :  { %v17589_v30 = vrot.slane %v17575_v13, %v19603_v6  ;;  %v11075_v18 = vpop.f32.mrb[232].mxu0  ;;  %13297 = vmatpush1.bf16.msra.mxu1 %v5872_v21  ;;  %13328 = vmatprep.mubr.bf16.mxu1 %v19553_v3  ;;  %v4311_v21 = vcombine.high %v4303_v11, %v4303_v11 }
 0x2d7   :  { %v11076_v20 = vadd.f32 %v11075_v18, %v1211_v16  ;;  %v11077_v36 = vpop.f32.mrb[233].mxu0  ;;  %19237 = vmatprep.subr.msk.bf16.mxu1 %vm4844_vm0, %v4278_v22  ;;  %v4313_v18 = vcombine.high %v129_v28, %v129_v28 }
 0x2d8   :  { %v17590_v19 = vcombine.low %v17582_v9, %v17589_v30  ;;  %v11078_v25 = vadd.f32 %v11077_v36, %v1215_v48  ;;  %v11079_v37 = vpop.f32.mrb[234].mxu0  ;;  %v11116_v31 = vpop.f32.mrb[232].mxu1  ;;  %v1243_v48 = vrot.slane %v21535_v14, %v19934_v53  ;;  %v4312_v30 = vcombine.high %v4310_v55, %v4310_v55 }
 0x2d9   :  { %v11117_v41 = vadd.f32 %v11116_v31, %v1219_v26  ;;  %v11080_v38 = vpop.f32.mrb[235].mxu0  ;;  %v11118_v33 = vpop.f32.mrb[233].mxu1  ;;  %v5896_v26 = vsel %vm4844_vm0, %v4293_v24, 0  ;;  %v1251_v36 = vrot.slane %v21535_v14, %v19944_v59  ;;  %v4320_v24 = vrot.slane %v129_v28, %v19603_v6 }
 0x2da   :  { %18822 = vst [vmem:[%s22650_s3 + $0x1c8] sm:$0xff] %v17590_v19  ;;  %v17591_v46 = vcombine.low %v11076_v20, %v11078_v25  ;;  %v11119_v39 = vadd.f32 %v11118_v33, %v1223_v32  ;;  %v11120_v44 = vpop.f32.mrb[234].mxu1  ;;  %v1247_v20 = vrot.slane %v21535_v14, %v19940_v56  ;;  %v1255_v37 = vrot.slane %v21535_v14, %v19947_v61 }
 0x2db   :  { %v11121_v4 = vpop.f32.mrb[235].mxu1  ;;  %19232 = vmatmul.mubr.msk.bf16.vlgmr.msra.gmra.mrb[84].mxu0 %vm4840_vm1, %v21487_v0 }
 0x2dc   :  { %v17599_v51 = vrot.slane %v17591_v46, %v19603_v6  ;;  %v17592_v35 = vcombine.low %v11117_v41, %v11119_v39  ;;  %13338 = vmatpush1.bf16.msra.mxu0 %v5878_v43  ;;  %13369 = vmatprep.mubr.bf16.mxu0 %v19553_v3  ;;  %v4327_v41 = vrot.slane %v4313_v18, %v19603_v6  ;;  %v130_v46 = vld [vmem:[#allocation2 + $0x2d0] sm:$0xff] }
 0x2dd   :  { %19234 = vmatmul.mubr.msk.bf16.vlgmr.msra.gmra.mrb[84].mxu1 %vm4840_vm1, %v21487_v0  ;;  %19239 = vmatprep.subr.msk.bf16.mxu0 %vm4844_vm0, %v4294_v34 }
 0x2de   :  { %v17606_v49 = vrot.slane %v17592_v35, %v19603_v6  ;;  %v11157_v1 = vpop.f32.mrb[236].mxu0  ;;  %13379 = vmatpush1.bf16.msra.mxu1 %v5884_v42  ;;  %13410 = vmatprep.mubr.bf16.mxu1 %v19553_v3  ;;  %v4328_v42 = vcombine.high %v4320_v24, %v4320_v24 }
 0x2df   :  { %v11158_v50 = vadd.f32 %v11157_v1, %v1227_v52  ;;  %v11159_v5 = vpop.f32.mrb[237].mxu0  ;;  %19241 = vmatprep.subr.msk.bf16.mxu1 %vm4844_vm0, %v4295_v57  ;;  %v5902_v52 = vsel %vm4844_vm0, %v4303_v11, 0  ;;  %v4330_v1 = vcombine.high %v130_v46, %v130_v46 }
 0x2e0   :  { %v17607_v58 = vcombine.low %v17599_v51, %v17606_v49  ;;  %v11160_v10 = vadd.f32 %v11159_v5, %v1231_v63  ;;  %v11161_v60 = vpop.f32.mrb[238].mxu0  ;;  %v11198_v62 = vpop.f32.mrb[236].mxu1  ;;  %v1259_v63 = vrot.slane %v21535_v14, %v19968_v12  ;;  %v4329_v49 = vcombine.high %v4327_v41, %v4327_v41 }
 0x2e1   :  { %v11199_v2 = vadd.f32 %v11198_v62, %v1235_v47  ;;  %v11162_v15 = vpop.f32.mrb[239].mxu0  ;;  %v11200_v16 = vpop.f32.mrb[237].mxu1  ;;  %v5908_v47 = vsel %vm4844_vm0, %v4310_v55, 0  ;;  %v1267_v5 = vrot.slane %v21535_v14, %v19976_v23  ;;  %v4337_v55 = vrot.slane %v130_v46, %v19603_v6 }
 0x2e2   :  { %18823 = vst [vmem:[%s22650_s3 + $0x1d0] sm:$0xff] %v17607_v58  ;;  %v17608_v22 = vcombine.low %v11158_v50, %v11160_v10  ;;  %v11201_v7 = vadd.f32 %v11200_v16, %v1239_v54  ;;  %v11202_v9 = vpop.f32.mrb[238].mxu1  ;;  %v1263_v50 = vrot.slane %v21535_v14, %v19972_v17  ;;  %v1271_v60 = vrot.slane %v21535_v14, %v19979_v29 }
 0x2e3   :  { %v11203_v13 = vpop.f32.mrb[239].mxu1  ;;  %19236 = vmatmul.mubr.msk.bf16.vlgmr.msra.gmra.mrb[88].mxu0 %vm4840_vm1, %v21487_v0  ;;  %v5914_v14 = vsel %vm4844_vm0, %v4320_v24, 0 }
 0x2e4   :  { %v17616_v27 = vrot.slane %v17608_v22, %v19603_v6  ;;  %v17609_v32 = vcombine.low %v11199_v2, %v11201_v7  ;;  %13420 = vmatpush1.bf16.msra.mxu0 %v5890_v8  ;;  %13451 = vmatprep.mubr.bf16.mxu0 %v19553_v3  ;;  %v4344_v2 = vrot.slane %v4330_v1, %v19603_v6  ;;  %v21587_v22 = vld [vmem:[#allocation4 + $0xf8] sm:$0xff] }
 0x2e5   :  { %19238 = vmatmul.mubr.msk.bf16.vlgmr.msra.gmra.mrb[88].mxu1 %vm4840_vm1, %v21487_v0  ;;  %19243 = vmatprep.subr.msk.bf16.mxu0 %vm4844_vm0, %v4311_v21  ;;  %v131_v7 = vld [vmem:[#allocation2 + $0x2d8] sm:$0xff] }
 0x2e6   :  { %v17623_v19 = vrot.slane %v17609_v32, %v19603_v6  ;;  %v11239_v25 = vpop.f32.mrb[240].mxu0  ;;  %13461 = vmatpush1.bf16.msra.mxu1 %v5896_v26  ;;  %13492 = vmatprep.mubr.bf16.mxu1 %v19553_v3  ;;  %v4345_v26 = vcombine.high %v4337_v55, %v4337_v55 }
 0x2e7   :  { %v11240_v31 = vadd.f32 %v11239_v25, %v1243_v48  ;;  %v11241_v40 = vpop.f32.mrb[241].mxu0  ;;  %19245 = vmatprep.subr.msk.bf16.mxu1 %vm4844_vm0, %v4312_v30  ;;  %v4347_v25 = vcombine.high %v131_v7, %v131_v7 }
 0x2e8   :  { %v17624_v38 = vcombine.low %v17616_v27, %v17623_v19  ;;  %v11242_v33 = vadd.f32 %v11241_v40, %v1247_v20  ;;  %v11243_v43 = vpop.f32.mrb[242].mxu0  ;;  %v11280_v34 = vpop.f32.mrb[240].mxu1  ;;  %v1275_v20 = vrot.slane %v21587_v22, %v19934_v53  ;;  %v4346_v19 = vcombine.high %v4344_v2, %v4344_v2 }
 0x2e9   :  { %v11281_v39 = vadd.f32 %v11280_v34, %v1251_v36  ;;  %v11244_v44 = vpop.f32.mrb[243].mxu0  ;;  %v11282_v4 = vpop.f32.mrb[241].mxu1  ;;  %v5920_v36 = vsel %vm4844_vm0, %v4327_v41, 0  ;;  %v1283_v40 = vrot.slane %v21587_v22, %v19944_v59  ;;  %v4354_v41 = vrot.slane %v131_v7, %v19603_v6 }
 0x2ea   :  { %18824 = vst [vmem:[%s22650_s3 + $0x1d8] sm:$0xff] %v17624_v38  ;;  %v17625_v57 = vcombine.low %v11240_v31, %v11242_v33  ;;  %v11283_v45 = vadd.f32 %v11282_v4, %v1255_v37  ;;  %v11284_v51 = vpop.f32.mrb[242].mxu1  ;;  %v1279_v31 = vrot.slane %v21587_v22, %v19940_v56  ;;  %v1287_v43 = vrot.slane %v21587_v22, %v19947_v61 }
 0x2eb   :  { %v11285_v35 = vpop.f32.mrb[243].mxu1  ;;  %19240 = vmatmul.mubr.msk.bf16.vlgmr.msra.gmra.mrb[92].mxu0 %vm4840_vm1, %v21487_v0 }
 0x2ec   :  { %v17633_v11 = vrot.slane %v17625_v57, %v19603_v6  ;;  %v17626_v54 = vcombine.low %v11281_v39, %v11283_v45  ;;  %13502 = vmatpush1.bf16.msra.mxu0 %v5902_v52  ;;  %13533 = vmatprep.mubr.bf16.mxu0 %v19553_v3  ;;  %v4361_v39 = vrot.slane %v4347_v25, %v19603_v6  ;;  %v132_v57 = vld [vmem:[#allocation2 + $0x2e0] sm:$0xff] }
 0x2ed   :  { %19242 = vmatmul.mubr.msk.bf16.vlgmr.msra.gmra.mrb[92].mxu1 %vm4840_vm1, %v21487_v0  ;;  %19247 = vmatprep.subr.msk.bf16.mxu0 %vm4844_vm0, %v4328_v42 }
 0x2ee   :  { %v17640_v58 = vrot.slane %v17626_v54, %v19603_v6  ;;  %v11321_v10 = vpop.f32.mrb[244].mxu0  ;;  %13543 = vmatpush1.bf16.msra.mxu1 %v5908_v47  ;;  %13574 = vmatprep.mubr.bf16.mxu1 %v19553_v3  ;;  %v4362_v47 = vcombine.high %v4354_v41, %v4354_v41 }
 0x2ef   :  { %v11322_v62 = vadd.f32 %v11321_v10, %v1259_v63  ;;  %v11323_v28 = vpop.f32.mrb[245].mxu0  ;;  %19249 = vmatprep.subr.msk.bf16.mxu1 %vm4844_vm0, %v4329_v49  ;;  %v5926_v63 = vsel %vm4844_vm0, %v4337_v55, 0  ;;  %v4364_v10 = vcombine.high %v132_v57, %v132_v57 }
 0x2f0   :  { %v17641_v15 = vcombine.low %v17633_v11, %v17640_v58  ;;  %v11324_v16 = vadd.f32 %v11323_v28, %v1263_v50  ;;  %v11325_v8 = vpop.f32.mrb[246].mxu0  ;;  %v11362_v21 = vpop.f32.mrb[244].mxu1  ;;  %v1291_v50 = vrot.slane %v21587_v22, %v19968_v12  ;;  %v4363_v58 = vcombine.high %v4361_v39, %v4361_v39 }
 0x2f1   :  { %v11363_v9 = vadd.f32 %v11362_v21, %v1267_v5  ;;  %v11326_v13 = vpop.f32.mrb[247].mxu0  ;;  %v11364_v48 = vpop.f32.mrb[245].mxu1  ;;  %v5932_v5 = vsel %vm4844_vm0, %v4344_v2, 0  ;;  %v1299_v28 = vrot.slane %v21587_v22, %v19976_v23  ;;  %v4371_v2 = vrot.slane %v132_v57, %v19603_v6 }
 0x2f2   :  { %18825 = vst [vmem:[%s22650_s3 + $0x1e0] sm:$0xff] %v17641_v15  ;;  %v17642_v30 = vcombine.low %v11322_v62, %v11324_v16  ;;  %v11365_v18 = vadd.f32 %v11364_v48, %v1271_v60  ;;  %v11366_v27 = vpop.f32.mrb[246].mxu1  ;;  %v1295_v62 = vrot.slane %v21587_v22, %v19972_v17  ;;  %v1303_v8 = vrot.slane %v21587_v22, %v19979_v29 }
 0x2f3   :  { %v11367_v32 = vpop.f32.mrb[247].mxu1  ;;  %19244 = vmatmul.mubr.msk.bf16.vlgmr.msra.gmra.mrb[96].mxu0 %vm4840_vm1, %v21487_v0  ;;  %v5938_v22 = vsel %vm4844_vm0, %v4354_v41, 0 }
 0x2f4   :  { %v17650_v24 = vrot.slane %v17642_v30, %v19603_v6  ;;  %v17643_v37 = vcombine.low %v11363_v9, %v11365_v18  ;;  %13584 = vmatpush1.bf16.msra.mxu0 %v5914_v14  ;;  %13615 = vmatprep.mubr.bf16.mxu0 %v19553_v3  ;;  %v4378_v9 = vrot.slane %v4364_v10, %v19603_v6  ;;  %v21639_v30 = vld [vmem:[#allocation4 + $0x100] sm:$0xff]  ;;  %v133_v18 = vld [vmem:[#allocation2 + $0x2e8] sm:$0xff] }
 0x2f5   :  { %19246 = vmatmul.mubr.msk.bf16.vlgmr.msra.gmra.mrb[96].mxu1 %vm4840_vm1, %v21487_v0  ;;  %19251 = vmatprep.subr.msk.bf16.mxu0 %vm4844_vm0, %v4345_v26 }
 0x2f6   :  { %v17657_v38 = vrot.slane %v17643_v37, %v19603_v6  ;;  %v11403_v33 = vpop.f32.mrb[248].mxu0  ;;  %13625 = vmatpush1.bf16.msra.mxu1 %v5920_v36  ;;  %13656 = vmatprep.mubr.bf16.mxu1 %v19553_v3  ;;  %v4379_v36 = vcombine.high %v4371_v2, %v4371_v2 }
 0x2f7   :  { %v11404_v34 = vadd.f32 %v11403_v33, %v1275_v20  ;;  %v11405_v46 = vpop.f32.mrb[249].mxu0  ;;  %19253 = vmatprep.subr.msk.bf16.mxu1 %vm4844_vm0, %v4346_v19  ;;  %v4381_v33 = vcombine.high %v133_v18, %v133_v18 }
 0x2f8   :  { %v17658_v44 = vcombine.low %v17650_v24, %v17657_v38  ;;  %v11406_v4 = vadd.f32 %v11405_v46, %v1279_v31  ;;  %v11407_v52 = vpop.f32.mrb[250].mxu0  ;;  %v11444_v42 = vpop.f32.mrb[248].mxu1  ;;  %v1307_v31 = vrot.slane %v21639_v30, %v19934_v53  ;;  %v4380_v38 = vcombine.high %v4378_v9, %v4378_v9 }
 0x2f9   :  { %v11445_v45 = vadd.f32 %v11444_v42, %v1283_v40  ;;  %v11408_v51 = vpop.f32.mrb[251].mxu0  ;;  %v11446_v35 = vpop.f32.mrb[249].mxu1  ;;  %v5944_v40 = vsel %vm4844_vm0, %v4361_v39, 0  ;;  %v1315_v46 = vrot.slane %v21639_v30, %v19944_v59  ;;  %v4388_v39 = vrot.slane %v133_v18, %v19603_v6 }
 0x2fa   :  { %18826 = vst [vmem:[%s22650_s3 + $0x1e8] sm:$0xff] %v17658_v44  ;;  %v17659_v49 = vcombine.low %v11404_v34, %v11406_v4  ;;  %v11447_v1 = vadd.f32 %v11446_v35, %v1287_v43  ;;  %v11448_v11 = vpop.f32.mrb[250].mxu1  ;;  %v1311_v34 = vrot.slane %v21639_v30, %v19940_v56  ;;  %v1319_v52 = vrot.slane %v21639_v30, %v19947_v61 }
 0x2fb   :  { %v11449_v54 = vpop.f32.mrb[251].mxu1  ;;  %19248 = vmatmul.mubr.msk.bf16.vlgmr.msra.gmra.mrb[100].mxu0 %vm4840_vm1, %v21487_v0 }
 0x2fc   :  { %v17667_v55 = vrot.slane %v17659_v49, %v19603_v6  ;;  %v17660_v60 = vcombine.low %v11445_v45, %v11447_v1  ;;  %13666 = vmatpush1.bf16.msra.mxu0 %v5926_v63  ;;  %13697 = vmatprep.mubr.bf16.mxu0 %v19553_v3  ;;  %v4395_v45 = vrot.slane %v4381_v33, %v19603_v6  ;;  %v134_v49 = vld [vmem:[#allocation2 + $0x2f0] sm:$0xff] }
 0x2fd   :  { %19250 = vmatmul.mubr.msk.bf16.vlgmr.msra.gmra.mrb[100].mxu1 %vm4840_vm1, %v21487_v0  ;;  %19255 = vmatprep.subr.msk.bf16.mxu0 %vm4844_vm0, %v4362_v47 }
 0x2fe   :  { %v17674_v15 = vrot.slane %v17660_v60, %v19603_v6  ;;  %v11485_v16 = vpop.f32.mrb[252].mxu0  ;;  %13707 = vmatpush1.bf16.msra.mxu1 %v5932_v5  ;;  %13738 = vmatprep.mubr.bf16.mxu1 %v19553_v3  ;;  %v4396_v5 = vcombine.high %v4388_v39, %v4388_v39 }
 0x2ff   :  { %v11486_v21 = vadd.f32 %v11485_v16, %v1291_v50  ;;  %v11487_v7 = vpop.f32.mrb[253].mxu0  ;;  %19257 = vmatprep.subr.msk.bf16.mxu1 %vm4844_vm0, %v4363_v58  ;;  %v5950_v50 = vsel %vm4844_vm0, %v4371_v2, 0  ;;  %v4398_v16 = vcombine.high %v134_v49, %v134_v49 }
 0x300   :  { %v17675_v13 = vcombine.low %v17667_v55, %v17674_v15  ;;  %v11488_v48 = vadd.f32 %v11487_v7, %v1295_v62  ;;  %v11489_v14 = vpop.f32.mrb[254].mxu0  ;;  %v11526_v26 = vpop.f32.mrb[252].mxu1  ;;  %v1323_v62 = vrot.slane %v21639_v30, %v19968_v12  ;;  %v4397_v15 = vcombine.high %v4395_v45, %v4395_v45 }
 0x301   :  { %v11527_v27 = vadd.f32 %v11526_v26, %v1299_v28  ;;  %v11490_v32 = vpop.f32.mrb[255].mxu0  ;;  %v11528_v20 = vpop.f32.mrb[253].mxu1  ;;  %v5956_v28 = vsel %vm4844_vm0, %v4378_v9, 0  ;;  %v1331_v7 = vrot.slane %v21639_v30, %v19976_v23  ;;  %v4405_v9 = vrot.slane %v134_v49, %v19603_v6 }
 0x302   :  { %18827 = vst [vmem:[%s22650_s3 + $0x1f0] sm:$0xff] %v17675_v13  ;;  %v17676_v19 = vcombine.low %v11486_v21, %v11488_v48  ;;  %v11529_v25 = vadd.f32 %v11528_v20, %v1303_v8  ;;  %v11530_v24 = vpop.f32.mrb[254].mxu1  ;;  %v1327_v21 = vrot.slane %v21639_v30, %v19972_v17  ;;  %v1335_v14 = vrot.slane %v21639_v30, %v19979_v29 }
 0x303   :  { %v11531_v37 = vpop.f32.mrb[255].mxu1  ;;  %19252 = vmatmul.mubr.msk.bf16.vlgmr.msra.gmra.mrb[104].mxu0 %vm4840_vm1, %v21487_v0  ;;  %v5962_v30 = vsel %vm4844_vm0, %v4388_v39, 0 }
 0x304   :  { %v17684_v41 = vrot.slane %v17676_v19, %v19603_v6  ;;  %v17677_v43 = vcombine.low %v11527_v27, %v11529_v25  ;;  %13748 = vmatpush1.bf16.msra.mxu0 %v5938_v22  ;;  %13779 = vmatprep.mubr.bf16.mxu0 %v19553_v3  ;;  %v4412_v27 = vrot.slane %v4398_v16, %v19603_v6  ;;  %v21691_v19 = vld [vmem:[#allocation4 + $0x108] sm:$0xff]  ;;  %v135_v25 = vld [vmem:[#allocation2 + $0x2f8] sm:$0xff] }
 0x305   :  { %19254 = vmatmul.mubr.msk.bf16.vlgmr.msra.gmra.mrb[104].mxu1 %vm4840_vm1, %v21487_v0  ;;  %19259 = vmatprep.subr.msk.bf16.mxu0 %vm4844_vm0, %v4379_v36 }
 0x306   :  { %v17691_v44 = vrot.slane %v17677_v43, %v19603_v6  ;;  %v11567_v4 = vpop.f32.mrb[0].mxu0  ;;  %13789 = vmatpush1.bf16.msra.mxu1 %v5944_v40  ;;  %13820 = vmatprep.mubr.bf16.mxu1 %v19553_v3  ;;  %v4413_v40 = vcombine.high %v4405_v9, %v4405_v9 }
 0x307   :  { %v11568_v42 = vadd.f32 %v11567_v4, %v1307_v31  ;;  %v11569_v57 = vpop.f32.mrb[1].mxu0  ;;  %19261 = vmatprep.subr.msk.bf16.mxu1 %vm4844_vm0, %v4380_v38  ;;  %v4415_v4 = vcombine.high %v135_v25, %v135_v25 }
 0x308   :  { %v17692_v51 = vcombine.low %v17684_v41, %v17691_v44  ;;  %v11570_v35 = vadd.f32 %v11569_v57, %v1311_v34  ;;  %v11571_v63 = vpop.f32.mrb[2].mxu0  ;;  %v11608_v47 = vpop.f32.mrb[0].mxu1  ;;  %v1339_v34 = vrot.slane %v21691_v19, %v19934_v53  ;;  %v4414_v44 = vcombine.high %v4412_v27, %v4412_v27 }
 0x309   :  { %v11609_v1 = vadd.f32 %v11608_v47, %v1315_v46  ;;  %v11572_v11 = vpop.f32.mrb[3].mxu0  ;;  %v11610_v54 = vpop.f32.mrb[1].mxu1  ;;  %v5968_v46 = vsel %vm4844_vm0, %v4395_v45, 0  ;;  %v1347_v57 = vrot.slane %v21691_v19, %v19944_v59  ;;  %v4422_v45 = vrot.slane %v135_v25, %v19603_v6 }
 0x30a   :  { %18828 = vst [vmem:[%s22650_s3 + $0x1f8] sm:$0xff] %v17692_v51  ;;  %v17693_v58 = vcombine.low %v11568_v42, %v11570_v35  ;;  %v11611_v10 = vadd.f32 %v11610_v54, %v1319_v52  ;;  %v11612_v55 = vpop.f32.mrb[2].mxu1  ;;  %v1343_v42 = vrot.slane %v21691_v19, %v19940_v56  ;;  %v1351_v63 = vrot.slane %v21691_v19, %v19947_v61 }
 0x30b   :  { %v11613_v60 = vpop.f32.mrb[3].mxu1  ;;  %19256 = vmatmul.mubr.msk.bf16.vlgmr.msra.gmra.mrb[108].mxu0 %vm4840_vm1, %v21487_v0 }
 0x30c   :  { %v17701_v2 = vrot.slane %v17693_v58, %v19603_v6  ;;  %v17694_v8 = vcombine.low %v11609_v1, %v11611_v10  ;;  %13830 = vmatpush1.bf16.msra.mxu0 %v5950_v50  ;;  %13861 = vmatprep.mubr.bf16.mxu0 %v19553_v3  ;;  %v4429_v1 = vrot.slane %v4415_v4, %v19603_v6  ;;  %v136_v58 = vld [vmem:[#allocation2 + $0x300] sm:$0xff] }
 0x30d   :  { %19258 = vmatmul.mubr.msk.bf16.vlgmr.msra.gmra.mrb[108].mxu1 %vm4840_vm1, %v21487_v0  ;;  %19263 = vmatprep.subr.msk.bf16.mxu0 %vm4844_vm0, %v4396_v5 }
 0x30e   :  { %v17708_v13 = vrot.slane %v17694_v8, %v19603_v6  ;;  %v11649_v48 = vpop.f32.mrb[4].mxu0  ;;  %13871 = vmatpush1.bf16.msra.mxu1 %v5956_v28  ;;  %13902 = vmatprep.mubr.bf16.mxu1 %v19553_v3  ;;  %v4430_v28 = vcombine.high %v4422_v45, %v4422_v45 }
 0x30f   :  { %v11650_v26 = vadd.f32 %v11649_v48, %v1323_v62  ;;  %v11651_v18 = vpop.f32.mrb[5].mxu0  ;;  %19265 = vmatprep.subr.msk.bf16.mxu1 %vm4844_vm0, %v4397_v15  ;;  %v5974_v62 = vsel %vm4844_vm0, %v4405_v9, 0  ;;  %v4432_v48 = vcombine.high %v136_v58, %v136_v58 }
 0x310   :  { %v17709_v32 = vcombine.low %v17701_v2, %v17708_v13  ;;  %v11652_v20 = vadd.f32 %v11651_v18, %v1327_v21  ;;  %v11653_v22 = vpop.f32.mrb[6].mxu0  ;;  %v11690_v36 = vpop.f32.mrb[4].mxu1  ;;  %v1355_v21 = vrot.slane %v21691_v19, %v19968_v12  ;;  %v4431_v13 = vcombine.high %v4429_v1, %v4429_v1 }
 0x311   :  { %v11691_v24 = vadd.f32 %v11690_v36, %v1331_v7  ;;  %v11654_v37 = vpop.f32.mrb[7].mxu0  ;;  %v11692_v31 = vpop.f32.mrb[5].mxu1  ;;  %v5980_v7 = vsel %vm4844_vm0, %v4412_v27, 0  ;;  %v1363_v18 = vrot.slane %v21691_v19, %v19976_v23  ;;  %v4439_v27 = vrot.slane %v136_v58, %v19603_v6 }
 0x312   :  { %18829 = vst [vmem:[%s22650_s3 + $0x200] sm:$0xff] %v17709_v32  ;;  %v17710_v38 = vcombine.low %v11650_v26, %v11652_v20  ;;  %v11693_v33 = vadd.f32 %v11692_v31, %v1335_v14  ;;  %v11694_v41 = vpop.f32.mrb[6].mxu1  ;;  %v1359_v26 = vrot.slane %v21691_v19, %v19972_v17  ;;  %v1367_v22 = vrot.slane %v21691_v19, %v19979_v29 }
 0x313   :  { %v11695_v43 = vpop.f32.mrb[7].mxu1  ;;  %19260 = vmatmul.mubr.msk.bf16.vlgmr.msra.gmra.mrb[112].mxu0 %vm4840_vm1, %v21487_v0  ;;  %v5986_v19 = vsel %vm4844_vm0, %v4422_v45, 0 }
 0x314   :  { %v17718_v39 = vrot.slane %v17710_v38, %v19603_v6  ;;  %v17711_v52 = vcombine.low %v11691_v24, %v11693_v33  ;;  %13912 = vmatpush1.bf16.msra.mxu0 %v5962_v30  ;;  %13943 = vmatprep.mubr.bf16.mxu0 %v19553_v3  ;;  %v4446_v24 = vrot.slane %v4432_v48, %v19603_v6  ;;  %v21743_v38 = vld [vmem:[#allocation4 + $0x110] sm:$0xff]  ;;  %v137_v33 = vld [vmem:[#allocation2 + $0x308] sm:$0xff] }
 0x315   :  { %19262 = vmatmul.mubr.msk.bf16.vlgmr.msra.gmra.mrb[112].mxu1 %vm4840_vm1, %v21487_v0  ;;  %19267 = vmatprep.subr.msk.bf16.mxu0 %vm4844_vm0, %v4413_v40 }
 0x316   :  { %v17725_v51 = vrot.slane %v17711_v52, %v19603_v6  ;;  %v11731_v35 = vpop.f32.mrb[8].mxu0  ;;  %13953 = vmatpush1.bf16.msra.mxu1 %v5968_v46  ;;  %13984 = vmatprep.mubr.bf16.mxu1 %v19553_v3  ;;  %v4447_v46 = vcombine.high %v4439_v27, %v4439_v27 }
 0x317   :  { %v11732_v47 = vadd.f32 %v11731_v35, %v1339_v34  ;;  %v11733_v49 = vpop.f32.mrb[9].mxu0  ;;  %19269 = vmatprep.subr.msk.bf16.mxu1 %vm4844_vm0, %v4414_v44  ;;  %v4449_v35 = vcombine.high %v137_v33, %v137_v33 }
 0x318   :  { %v17726_v11 = vcombine.low %v17718_v39, %v17725_v51  ;;  %v11734_v54 = vadd.f32 %v11733_v49, %v1343_v42  ;;  %v11735_v50 = vpop.f32.mrb[10].mxu0  ;;  %v11772_v5 = vpop.f32.mrb[8].mxu1  ;;  %v1371_v42 = vrot.slane %v21743_v38, %v19934_v53  ;;  %v4448_v51 = vcombine.high %v4446_v24, %v4446_v24 }
 0x319   :  { %v11773_v10 = vadd.f32 %v11772_v5, %v1347_v57  ;;  %v11736_v55 = vpop.f32.mrb[11].mxu0  ;;  %v11774_v60 = vpop.f32.mrb[9].mxu1  ;;  %v5992_v57 = vsel %vm4844_vm0, %v4429_v1, 0  ;;  %v1379_v49 = vrot.slane %v21743_v38, %v19944_v59  ;;  %v4456_v1 = vrot.slane %v137_v33, %v19603_v6 }
 0x31a   :  { %18830 = vst [vmem:[%s22650_s3 + $0x208] sm:$0xff] %v17726_v11  ;;  %v17727_v15 = vcombine.low %v11732_v47, %v11734_v54  ;;  %v11775_v16 = vadd.f32 %v11774_v60, %v1351_v63  ;;  %v11776_v2 = vpop.f32.mrb[10].mxu1  ;;  %v1375_v47 = vrot.slane %v21743_v38, %v19940_v56  ;;  %v1383_v50 = vrot.slane %v21743_v38, %v19947_v61 }
 0x31b   :  { %v11777_v8 = vpop.f32.mrb[11].mxu1  ;;  %19264 = vmatmul.mubr.msk.bf16.vlgmr.msra.gmra.mrb[116].mxu0 %vm4840_vm1, %v21487_v0 }
 0x31c   :  { %v17735_v9 = vrot.slane %v17727_v15, %v19603_v6  ;;  %v17728_v14 = vcombine.low %v11773_v10, %v11775_v16  ;;  %13994 = vmatpush1.bf16.msra.mxu0 %v5974_v62  ;;  %14025 = vmatprep.mubr.bf16.mxu0 %v19553_v3  ;;  %v4463_v10 = vrot.slane %v4449_v35, %v19603_v6  ;;  %v138_v15 = vld [vmem:[#allocation2 + $0x310] sm:$0xff] }
 0x31d   :  { %19266 = vmatmul.mubr.msk.bf16.vlgmr.msra.gmra.mrb[116].mxu1 %vm4840_vm1, %v21487_v0  ;;  %19271 = vmatprep.subr.msk.bf16.mxu0 %vm4844_vm0, %v4430_v28 }
 0x31e   :  { %v17742_v32 = vrot.slane %v17728_v14, %v19603_v6  ;;  %v11813_v20 = vpop.f32.mrb[12].mxu0  ;;  %14035 = vmatpush1.bf16.msra.mxu1 %v5980_v7  ;;  %14066 = vmatprep.mubr.bf16.mxu1 %v19553_v3  ;;  %v4464_v7 = vcombine.high %v4456_v1, %v4456_v1 }
 0x31f   :  { %v11814_v36 = vadd.f32 %v11813_v20, %v1355_v21  ;;  %v11815_v25 = vpop.f32.mrb[13].mxu0  ;;  %19273 = vmatprep.subr.msk.bf16.mxu1 %vm4844_vm0, %v4431_v13  ;;  %v5998_v21 = vsel %vm4844_vm0, %v4439_v27, 0  ;;  %v4466_v20 = vcombine.high %v138_v15, %v138_v15 }
 0x320   :  { %v17743_v37 = vcombine.low %v17735_v9, %v17742_v32  ;;  %v11816_v31 = vadd.f32 %v11815_v25, %v1359_v26  ;;  %v11817_v30 = vpop.f32.mrb[14].mxu0  ;;  %v11854_v40 = vpop.f32.mrb[12].mxu1  ;;  %v1387_v26 = vrot.slane %v21743_v38, %v19968_v12  ;;  %v4465_v32 = vcombine.high %v4463_v10, %v4463_v10 }
 0x321   :  { %v11855_v41 = vadd.f32 %v11854_v40, %v1363_v18  ;;  %v11818_v43 = vpop.f32.mrb[15].mxu0  ;;  %v11856_v34 = vpop.f32.mrb[13].mxu1  ;;  %v6004_v18 = vsel %vm4844_vm0, %v4446_v24, 0  ;;  %v1395_v25 = vrot.slane %v21743_v38, %v19976_v23  ;;  %v4473_v24 = vrot.slane %v138_v15, %v19603_v6 }
 0x322   :  { %18831 = vst [vmem:[%s22650_s3 + $0x210] sm:$0xff] %v17743_v37  ;;  %v17744_v44 = vcombine.low %v11814_v36, %v11816_v31  ;;  %v11857_v4 = vadd.f32 %v11856_v34, %v1367_v22  ;;  %v11858_v39 = vpop.f32.mrb[14].mxu1  ;;  %v1391_v36 = vrot.slane %v21743_v38, %v19972_v17  ;;  %v1399_v30 = vrot.slane %v21743_v38, %v19979_v29 }
 0x323   :  { %v11859_v52 = vpop.f32.mrb[15].mxu1  ;;  %19268 = vmatmul.mubr.msk.bf16.vlgmr.msra.gmra.mrb[120].mxu0 %vm4840_vm1, %v21487_v0  ;;  %v6010_v38 = vsel %vm4844_vm0, %v4456_v1, 0 }
 0x324   :  { %v17752_v45 = vrot.slane %v17744_v44, %v19603_v6  ;;  %v17745_v63 = vcombine.low %v11855_v41, %v11857_v4  ;;  %14076 = vmatpush1.bf16.msra.mxu0 %v5986_v19  ;;  %14107 = vmatprep.mubr.bf16.mxu0 %v19553_v3  ;;  %v4480_v41 = vrot.slane %v4466_v20, %v19603_v6  ;;  %v21795_v44 = vld [vmem:[#allocation4 + $0x118] sm:$0xff] }
 0x325   :  { %19270 = vmatmul.mubr.msk.bf16.vlgmr.msra.gmra.mrb[120].mxu1 %vm4840_vm1, %v21487_v0  ;;  %19275 = vmatprep.subr.msk.bf16.mxu0 %vm4844_vm0, %v4447_v46  ;;  %v139_v4 = vld [vmem:[#allocation2 + $0x318] sm:$0xff] }
 0x326   :  { %v17759_v11 = vrot.slane %v17745_v63, %v19603_v6  ;;  %v11895_v54 = vpop.f32.mrb[16].mxu0  ;;  %14117 = vmatpush1.bf16.msra.mxu1 %v5992_v57  ;;  %14148 = vmatprep.mubr.bf16.mxu1 %v19553_v3  ;;  %v4481_v57 = vcombine.high %v4473_v24, %v4473_v24 }
 0x327   :  { %v11896_v5 = vadd.f32 %v11895_v54, %v1371_v42  ;;  %v11897_v58 = vpop.f32.mrb[17].mxu0  ;;  %19277 = vmatprep.subr.msk.bf16.mxu1 %vm4844_vm0, %v4448_v51  ;;  %v4483_v54 = vcombine.high %v139_v4, %v139_v4 }
 0x328   :  { %v17760_v55 = vcombine.low %v17752_v45, %v17759_v11  ;;  %v11898_v60 = vadd.f32 %v11897_v58, %v1375_v47  ;;  %v11899_v62 = vpop.f32.mrb[18].mxu0  ;;  %v11936_v28 = vpop.f32.mrb[16].mxu1  ;;  %v1403_v47 = vrot.slane %v21795_v44, %v19934_v53  ;;  %v4482_v11 = vcombine.high %v4480_v41, %v4480_v41 }
 0x329   :  { %v11937_v16 = vadd.f32 %v11936_v28, %v1379_v49  ;;  %v11900_v2 = vpop.f32.mrb[19].mxu0  ;;  %v11938_v8 = vpop.f32.mrb[17].mxu1  ;;  %v6016_v49 = vsel %vm4844_vm0, %v4463_v10, 0  ;;  %v1411_v58 = vrot.slane %v21795_v44, %v19944_v59  ;;  %v4490_v10 = vrot.slane %v139_v4, %v19603_v6 }
 0x32a   :  { %18832 = vst [vmem:[%s22650_s3 + $0x218] sm:$0xff] %v17760_v55  ;;  %v17761_v13 = vcombine.low %v11896_v5, %v11898_v60  ;;  %v11939_v48 = vadd.f32 %v11938_v8, %v1383_v50  ;;  %v11940_v9 = vpop.f32.mrb[18].mxu1  ;;  %v1407_v5 = vrot.slane %v21795_v44, %v19940_v56  ;;  %v1415_v62 = vrot.slane %v21795_v44, %v19947_v61 }
 0x32b   :  { %v11941_v14 = vpop.f32.mrb[19].mxu1  ;;  %19272 = vmatmul.mubr.msk.bf16.vlgmr.msra.gmra.mrb[124].mxu0 %vm4840_vm1, %v21487_v0 }
 0x32c   :  { %v17769_v27 = vrot.slane %v17761_v13, %v19603_v6  ;;  %v17762_v22 = vcombine.low %v11937_v16, %v11939_v48  ;;  %14158 = vmatpush1.bf16.msra.mxu0 %v5998_v21  ;;  %14189 = vmatprep.mubr.bf16.mxu0 %v19553_v3  ;;  %v4497_v16 = vrot.slane %v4483_v54, %v19603_v6  ;;  %v140_v13 = vld [vmem:[#allocation2 + $0x320] sm:$0xff] }
 0x32d   :  { %19274 = vmatmul.mubr.msk.bf16.vlgmr.msra.gmra.mrb[124].mxu1 %vm4840_vm1, %v21487_v0  ;;  %19279 = vmatprep.subr.msk.bf16.mxu0 %vm4844_vm0, %v4464_v7 }
 0x32e   :  { %v17776_v37 = vrot.slane %v17762_v22, %v19603_v6  ;;  %v11977_v31 = vpop.f32.mrb[20].mxu0  ;;  %14199 = vmatpush1.bf16.msra.mxu1 %v6004_v18  ;;  %14230 = vmatprep.mubr.bf16.mxu1 %v19553_v3  ;;  %v4498_v18 = vcombine.high %v4490_v10, %v4490_v10 }
 0x32f   :  { %v11978_v40 = vadd.f32 %v11977_v31, %v1387_v26  ;;  %v11979_v33 = vpop.f32.mrb[21].mxu0  ;;  %19281 = vmatprep.subr.msk.bf16.mxu1 %vm4844_vm0, %v4465_v32  ;;  %v6022_v26 = vsel %vm4844_vm0, %v4473_v24, 0  ;;  %v4500_v31 = vcombine.high %v140_v13, %v140_v13 }
 0x330   :  { %v17777_v43 = vcombine.low %v17769_v27, %v17776_v37  ;;  %v11980_v34 = vadd.f32 %v11979_v33, %v1391_v36  ;;  %v11981_v19 = vpop.f32.mrb[22].mxu0  ;;  %v12018_v46 = vpop.f32.mrb[20].mxu1  ;;  %v1419_v36 = vrot.slane %v21795_v44, %v19968_v12  ;;  %v4499_v37 = vcombine.high %v4497_v16, %v4497_v16 }
 0x331   :  { %v12019_v39 = vadd.f32 %v12018_v46, %v1395_v25  ;;  %v11982_v52 = vpop.f32.mrb[23].mxu0  ;;  %v12020_v42 = vpop.f32.mrb[21].mxu1  ;;  %v6028_v25 = vsel %vm4844_vm0, %v4480_v41, 0  ;;  %v1427_v33 = vrot.slane %v21795_v44, %v19976_v23  ;;  %v4507_v41 = vrot.slane %v140_v13, %v19603_v6 }
 0x332   :  { %18833 = vst [vmem:[%s22650_s3 + $0x220] sm:$0xff] %v17777_v43  ;;  %v17778_v51 = vcombine.low %v11978_v40, %v11980_v34  ;;  %v12021_v35 = vadd.f32 %v12020_v42, %v1399_v30  ;;  %v12022_v45 = vpop.f32.mrb[22].mxu1  ;;  %v1423_v40 = vrot.slane %v21795_v44, %v19972_v17  ;;  %v1431_v19 = vrot.slane %v21795_v44, %v19979_v29 }
 0x333   :  { %v12023_v63 = vpop.f32.mrb[23].mxu1  ;;  %19276 = vmatmul.mubr.msk.bf16.vlgmr.msra.gmra.mrb[128].mxu0 %vm4840_vm1, %v21487_v0  ;;  %v6034_v44 = vsel %vm4844_vm0, %v4490_v10, 0 }
 0x334   :  { %v17786_v1 = vrot.slane %v17778_v51, %v19603_v6  ;;  %v17779_v50 = vcombine.low %v12019_v39, %v12021_v35  ;;  %14240 = vmatpush1.bf16.msra.mxu0 %v6010_v38  ;;  %14271 = vmatprep.mubr.bf16.mxu0 %v19553_v3  ;;  %v141_v51 = vld [vmem:[#allocation2 + $0x328] sm:$0xff] }
 0x335   :  { %19278 = vmatmul.mubr.msk.bf16.vlgmr.msra.gmra.mrb[128].mxu1 %vm4840_vm1, %v21487_v0  ;;  %19283 = vmatprep.subr.msk.bf16.mxu0 %vm4844_vm0, %v4481_v57  ;;  %v21847_v57 = vld [vmem:[#allocation4 + $0x120] sm:$0xff] }
 0x336   :  { %v17793_v55 = vrot.slane %v17779_v50, %v19603_v6  ;;  %v12059_v60 = vpop.f32.mrb[24].mxu0  ;;  %14281 = vmatpush1.bf16.msra.mxu1 %v6016_v49  ;;  %14312 = vmatprep.mubr.bf16.mxu1 %v19553_v3  ;;  %v21856_v50 = vld [vmem:[%s22647_s0] sm:$0x1] }
 0x337   :  { %v12060_v28 = vadd.f32 %v12059_v60, %v1403_v47  ;;  %v12061_v15 = vpop.f32.mrb[25].mxu0  ;;  %19285 = vmatprep.subr.msk.bf16.mxu1 %vm4844_vm0, %v4482_v11  ;;  %v4515_v47 = vcombine.high %v4507_v41, %v4507_v41 }
 0x338   :  { %v17794_v2 = vcombine.low %v17786_v1, %v17793_v55  ;;  %v12062_v8 = vadd.f32 %v12061_v15, %v1407_v5  ;;  %v12063_v21 = vpop.f32.mrb[26].mxu0  ;;  %v12100_v7 = vpop.f32.mrb[24].mxu1  ;;  %v1435_v5 = vrot.slane %v21847_v57, %v19934_v53  ;;  %v4517_v55 = vcombine.high %v141_v51, %v141_v51 }
 0x339   :  { %v12101_v48 = vadd.f32 %v12100_v7, %v1411_v58  ;;  %v12064_v9 = vpop.f32.mrb[27].mxu0  ;;  %v12102_v14 = vpop.f32.mrb[25].mxu1  ;;  %v6040_v58 = vsel %vm4844_vm0, %v4497_v16, 0  ;;  %v1443_v15 = vrot.slane %v21847_v57, %v19944_v59  ;;  %v4524_v16 = vrot.slane %v141_v51, %v19603_v6 }
 0x33a   :  { %18834 = vst [vmem:[%s22650_s3 + $0x228] sm:$0xff] %v17794_v2  ;;  %v17795_v32 = vcombine.low %v12060_v28, %v12062_v8  ;;  %v12103_v20 = vadd.f32 %v12102_v14, %v1415_v62  ;;  %v12104_v27 = vpop.f32.mrb[26].mxu1  ;;  %v1439_v28 = vrot.slane %v21847_v57, %v19940_v56  ;;  %v1447_v21 = vrot.slane %v21847_v57, %v19947_v61 }
 0x33b   :  { %v12105_v22 = vpop.f32.mrb[27].mxu1  ;;  %19280 = vmatmul.mubr.msk.bf16.vlgmr.msra.gmra.mrb[132].mxu0 %vm4840_vm1, %v21487_v0 }
 0x33c   :  { %v17803_v24 = vrot.slane %v17795_v32, %v19603_v6  ;;  %v17796_v30 = vcombine.low %v12101_v48, %v12103_v20  ;;  %14322 = vmatpush1.bf16.msra.mxu0 %v6022_v26  ;;  %14353 = vmatprep.mubr.bf16.mxu0 %v19553_v3  ;;  %v4531_v48 = vrot.slane %v4517_v55, %v19603_v6  ;;  %v142_v32 = vld [vmem:[#allocation2 + $0x330] sm:$0xff] }
 0x33d   :  { %19282 = vmatmul.mubr.msk.bf16.vlgmr.msra.gmra.mrb[132].mxu1 %vm4840_vm1, %v21487_v0  ;;  %19287 = vmatprep.subr.msk.bf16.mxu0 %vm4844_vm0, %v4498_v18  ;;  %v4514_v0 = vrot.slane %v4500_v31, %v19603_v6 }
 0x33e   :  { %v17810_v43 = vrot.slane %v17796_v30, %v19603_v6  ;;  %v12141_v34 = vpop.f32.mrb[28].mxu0  ;;  %14363 = vmatpush1.bf16.msra.mxu1 %v6028_v25  ;;  %14394 = vmatprep.mubr.bf16.mxu1 %v19553_v3  ;;  %v4532_v25 = vcombine.high %v4524_v16, %v4524_v16 }
 0x33f   :  { %v12142_v46 = vadd.f32 %v12141_v34, %v1419_v36  ;;  %v12143_v4 = vpop.f32.mrb[29].mxu0  ;;  %19289 = vmatprep.subr.msk.bf16.mxu1 %vm4844_vm0, %v4499_v37  ;;  %v4516_v10 = vcombine.high %v4514_v0, %v4514_v0  ;;  %v6046_v36 = vsel %vm4844_vm0, %v4507_v41, 0  ;;  %v4534_v34 = vcombine.high %v142_v32, %v142_v32 }
 0x340   :  { %v17811_v39 = vcombine.low %v17803_v24, %v17810_v43  ;;  %v12144_v52 = vadd.f32 %v12143_v4, %v1423_v40  ;;  %v12145_v42 = vpop.f32.mrb[30].mxu0  ;;  %v12182_v38 = vpop.f32.mrb[28].mxu1  ;;  %v1451_v40 = vrot.slane %v21847_v57, %v19968_v12  ;;  %v4533_v43 = vcombine.high %v4531_v48, %v4531_v48 }
 0x341   :  { %v12183_v35 = vadd.f32 %v12182_v38, %v1427_v33  ;;  %v12146_v45 = vpop.f32.mrb[31].mxu0  ;;  %v12184_v63 = vpop.f32.mrb[29].mxu1  ;;  %v6052_v33 = vsel %vm4844_vm0, %v4514_v0, 0  ;;  %v1459_v4 = vrot.slane %v21847_v57, %v19976_v23  ;;  %v4541_v0 = vrot.slane %v142_v32, %v19603_v6 }
 0x342   :  { %18835 = vst [vmem:[%s22650_s3 + $0x230] sm:$0xff] %v17811_v39  ;;  %v17812_v49 = vcombine.low %v12142_v46, %v12144_v52  ;;  %v12185_v11 = vadd.f32 %v12184_v63, %v1431_v19  ;;  %v12186_v54 = vpop.f32.mrb[30].mxu1  ;;  %v1455_v46 = vrot.slane %v21847_v57, %v19972_v17  ;;  %v1463_v42 = vrot.slane %v21847_v57, %v19979_v29 }
 0x343   :  { %v12187_v1 = vpop.f32.mrb[31].mxu1  ;;  %19284 = vmatmul.mubr.msk.bf16.vlgmr.msra.gmra.mrb[136].mxu0 %vm4840_vm1, %v21856_v50  ;;  %v6058_v57 = vsel %vm4844_vm0, %v4524_v16, 0 }
 0x344   :  { %v17820_v60 = vrot.slane %v17812_v49, %v19603_v6  ;;  %v17813_v62 = vcombine.low %v12183_v35, %v12185_v11  ;;  %14404 = vmatpush1.bf16.msra.mxu0 %v6034_v44  ;;  %14435 = vmatprep.mubr.bf16.mxu0 %v19553_v3  ;;  %v4548_v35 = vrot.slane %v4534_v34, %v19603_v6  ;;  %v21904_v49 = vld [vmem:[#allocation4 + $0x128] sm:$0xff]  ;;  %v143_v11 = vld [vmem:[#allocation2 + $0x338] sm:$0xff] }
 0x345   :  { %19286 = vmatmul.mubr.msk.bf16.vlgmr.msra.gmra.mrb[136].mxu1 %vm4840_vm1, %v21856_v50  ;;  %19291 = vmatprep.subr.msk.bf16.mxu0 %vm4844_vm0, %v4515_v47 }
 0x346   :  { %v17827_v2 = vrot.slane %v17813_v62, %v19603_v6  ;;  %v12223_v8 = vpop.f32.mrb[32].mxu0  ;;  %14445 = vmatpush1.bf16.msra.mxu1 %v6040_v58  ;;  %14476 = vmatprep.mubr.bf16.mxu1 %v19553_v3  ;;  %v4549_v58 = vcombine.high %v4541_v0, %v4541_v0 }
 0x347   :  { %v12224_v7 = vadd.f32 %v12223_v8, %v1435_v5  ;;  %v12225_v13 = vpop.f32.mrb[33].mxu0  ;;  %19293 = vmatprep.subr.msk.bf16.mxu1 %vm4844_vm0, %v4516_v10  ;;  %v4551_v8 = vcombine.high %v143_v11, %v143_v11 }
 0x348   :  { %v17828_v9 = vcombine.low %v17820_v60, %v17827_v2  ;;  %v12226_v14 = vadd.f32 %v12225_v13, %v1439_v28  ;;  %v12227_v26 = vpop.f32.mrb[34].mxu0  ;;  %v12264_v18 = vpop.f32.mrb[32].mxu1  ;;  %v1467_v28 = vrot.slane %v21904_v49, %v19934_v53  ;;  %v4550_v2 = vcombine.high %v4548_v35, %v4548_v35 }
 0x349   :  { %v12265_v20 = vadd.f32 %v12264_v18, %v1443_v15  ;;  %v12228_v27 = vpop.f32.mrb[35].mxu0  ;;  %v12266_v22 = vpop.f32.mrb[33].mxu1  ;;  %v6064_v15 = vsel %vm4844_vm0, %v4531_v48, 0  ;;  %v1475_v13 = vrot.slane %v21904_v49, %v19944_v59  ;;  %v4558_v48 = vrot.slane %v143_v11, %v19603_v6 }
 0x34a   :  { %18836 = vst [vmem:[%s22650_s3 + $0x238] sm:$0xff] %v17828_v9  ;;  %v17829_v37 = vcombine.low %v12224_v7, %v12226_v14  ;;  %v12267_v31 = vadd.f32 %v12266_v22, %v1447_v21  ;;  %v12268_v24 = vpop.f32.mrb[34].mxu1  ;;  %v1471_v7 = vrot.slane %v21904_v49, %v19940_v56  ;;  %v1479_v26 = vrot.slane %v21904_v49, %v19947_v61 }
 0x34b   :  { %v12269_v30 = vpop.f32.mrb[35].mxu1  ;;  %19288 = vmatmul.mubr.msk.bf16.vlgmr.msra.gmra.mrb[140].mxu0 %vm4840_vm1, %v21856_v50 }
 0x34c   :  { %v17837_v41 = vrot.slane %v17829_v37, %v19603_v6  ;;  %v17830_v19 = vcombine.low %v12265_v20, %v12267_v31  ;;  %14486 = vmatpush1.bf16.msra.mxu0 %v6046_v36  ;;  %14517 = vmatprep.mubr.bf16.mxu0 %v19553_v3  ;;  %v4565_v20 = vrot.slane %v4551_v8, %v19603_v6  ;;  %v144_v37 = vld [vmem:[#allocation2 + $0x340] sm:$0xff] }
 0x34d   :  { %19290 = vmatmul.mubr.msk.bf16.vlgmr.msra.gmra.mrb[140].mxu1 %vm4840_vm1, %v21856_v50  ;;  %19295 = vmatprep.subr.msk.bf16.mxu0 %vm4844_vm0, %v4532_v25 }
 0x34e   :  { %v17844_v39 = vrot.slane %v17830_v19, %v19603_v6  ;;  %v12305_v52 = vpop.f32.mrb[36].mxu0  ;;  %14527 = vmatpush1.bf16.msra.mxu1 %v6052_v33  ;;  %14558 = vmatprep.mubr.bf16.mxu1 %v19553_v3  ;;  %v4566_v33 = vcombine.high %v4558_v48, %v4558_v48 }
 0x34f   :  { %v12306_v38 = vadd.f32 %v12305_v52, %v1451_v40  ;;  %v12307_v51 = vpop.f32.mrb[37].mxu0  ;;  %19297 = vmatprep.subr.msk.bf16.mxu1 %vm4844_vm0, %v4533_v43  ;;  %v6070_v40 = vsel %vm4844_vm0, %v4541_v0, 0  ;;  %v4568_v52 = vcombine.high %v144_v37, %v144_v37 }
 0x350   :  { %v17845_v45 = vcombine.low %v17837_v41, %v17844_v39  ;;  %v12308_v63 = vadd.f32 %v12307_v51, %v1455_v46  ;;  %v12309_v44 = vpop.f32.mrb[38].mxu0  ;;  %v12346_v47 = vpop.f32.mrb[36].mxu1  ;;  %v1483_v46 = vrot.slane %v21904_v49, %v19968_v12  ;;  %v4567_v39 = vcombine.high %v4565_v20, %v4565_v20 }
 0x351   :  { %v12347_v54 = vadd.f32 %v12346_v47, %v1459_v4  ;;  %v12310_v1 = vpop.f32.mrb[39].mxu0  ;;  %v12348_v5 = vpop.f32.mrb[37].mxu1  ;;  %v6076_v4 = vsel %vm4844_vm0, %v4548_v35, 0  ;;  %v1491_v51 = vrot.slane %v21904_v49, %v19976_v23  ;;  %v4575_v35 = vrot.slane %v144_v37, %v19603_v6 }
 0x352   :  { %18837 = vst [vmem:[%s22650_s3 + $0x240] sm:$0xff] %v17845_v45  ;;  %v17846_v10 = vcombine.low %v12306_v38, %v12308_v63  ;;  %v12349_v55 = vadd.f32 %v12348_v5, %v1463_v42  ;;  %v12350_v60 = vpop.f32.mrb[38].mxu1  ;;  %v1487_v38 = vrot.slane %v21904_v49, %v19972_v17  ;;  %v1495_v44 = vrot.slane %v21904_v49, %v19979_v29 }
 0x353   :  { %v12351_v62 = vpop.f32.mrb[39].mxu1  ;;  %19292 = vmatmul.mubr.msk.bf16.vlgmr.msra.gmra.mrb[144].mxu0 %vm4840_vm1, %v21856_v50  ;;  %v6082_v49 = vsel %vm4844_vm0, %v4558_v48, 0 }
 0x354   :  { %v17854_v16 = vrot.slane %v17846_v10, %v19603_v6  ;;  %v17847_v21 = vcombine.low %v12347_v54, %v12349_v55  ;;  %14568 = vmatpush1.bf16.msra.mxu0 %v6058_v57  ;;  %14599 = vmatprep.mubr.bf16.mxu0 %v19553_v3  ;;  %v4582_v54 = vrot.slane %v4568_v52, %v19603_v6  ;;  %v21956_v10 = vld [vmem:[#allocation4 + $0x130] sm:$0xff]  ;;  %v145_v55 = vld [vmem:[#allocation2 + $0x348] sm:$0xff] }
 0x355   :  { %19294 = vmatmul.mubr.msk.bf16.vlgmr.msra.gmra.mrb[144].mxu1 %vm4840_vm1, %v21856_v50  ;;  %19299 = vmatprep.subr.msk.bf16.mxu0 %vm4844_vm0, %v4549_v58 }
 0x356   :  { %v17861_v9 = vrot.slane %v17847_v21, %v19603_v6  ;;  %v12387_v14 = vpop.f32.mrb[40].mxu0  ;;  %14609 = vmatpush1.bf16.msra.mxu1 %v6064_v15  ;;  %14640 = vmatprep.mubr.bf16.mxu1 %v19553_v3  ;;  %v4583_v15 = vcombine.high %v4575_v35, %v4575_v35 }
 0x357   :  { %v12388_v18 = vadd.f32 %v12387_v14, %v1467_v28  ;;  %v12389_v32 = vpop.f32.mrb[41].mxu0  ;;  %19301 = vmatprep.subr.msk.bf16.mxu1 %vm4844_vm0, %v4550_v2  ;;  %v4585_v14 = vcombine.high %v145_v55, %v145_v55 }
 0x358   :  { %v17862_v27 = vcombine.low %v17854_v16, %v17861_v9  ;;  %v12390_v22 = vadd.f32 %v12389_v32, %v1471_v7  ;;  %v12391_v36 = vpop.f32.mrb[42].mxu0  ;;  %v12428_v25 = vpop.f32.mrb[40].mxu1  ;;  %v1499_v7 = vrot.slane %v21956_v10, %v19934_v53  ;;  %v4584_v9 = vcombine.high %v4582_v54, %v4582_v54 }
 0x359   :  { %v12429_v31 = vadd.f32 %v12428_v25, %v1475_v13  ;;  %v12392_v24 = vpop.f32.mrb[43].mxu0  ;;  %v12430_v30 = vpop.f32.mrb[41].mxu1  ;;  %v6088_v13 = vsel %vm4844_vm0, %v4565_v20, 0  ;;  %v1507_v32 = vrot.slane %v21956_v10, %v19944_v59  ;;  %v4592_v20 = vrot.slane %v145_v55, %v19603_v6 }
 0x35a   :  { %18838 = vst [vmem:[%s22650_s3 + $0x248] sm:$0xff] %v17862_v27  ;;  %v17863_v43 = vcombine.low %v12388_v18, %v12390_v22  ;;  %v12431_v34 = vadd.f32 %v12430_v30, %v1479_v26  ;;  %v12432_v41 = vpop.f32.mrb[42].mxu1  ;;  %v1503_v18 = vrot.slane %v21956_v10, %v19940_v56  ;;  %v1511_v36 = vrot.slane %v21956_v10, %v19947_v61 }
 0x35b   :  { %v12433_v19 = vpop.f32.mrb[43].mxu1  ;;  %19296 = vmatmul.mubr.msk.bf16.vlgmr.msra.gmra.mrb[148].mxu0 %vm4840_vm1, %v21856_v50 }
 0x35c   :  { %v17871_v0 = vrot.slane %v17863_v43, %v19603_v6  ;;  %v17864_v42 = vcombine.low %v12429_v31, %v12431_v34  ;;  %14650 = vmatpush1.bf16.msra.mxu0 %v6070_v40  ;;  %14681 = vmatprep.mubr.bf16.mxu0 %v19553_v3  ;;  %v4599_v31 = vrot.slane %v4585_v14, %v19603_v6  ;;  %v146_v43 = vld [vmem:[#allocation2 + $0x350] sm:$0xff] }
 0x35d   :  { %19298 = vmatmul.mubr.msk.bf16.vlgmr.msra.gmra.mrb[148].mxu1 %vm4840_vm1, %v21856_v50  ;;  %19303 = vmatprep.subr.msk.bf16.mxu0 %vm4844_vm0, %v4566_v33 }
 0x35e   :  { %v17878_v45 = vrot.slane %v17864_v42, %v19603_v6  ;;  %v12469_v63 = vpop.f32.mrb[44].mxu0  ;;  %14691 = vmatpush1.bf16.msra.mxu1 %v6076_v4  ;;  %14722 = vmatprep.mubr.bf16.mxu1 %v19553_v3  ;;  %v4600_v4 = vcombine.high %v4592_v20, %v4592_v20 }
 0x35f   :  { %v12470_v47 = vadd.f32 %v12469_v63, %v1483_v46  ;;  %v12471_v11 = vpop.f32.mrb[45].mxu0  ;;  %19305 = vmatprep.subr.msk.bf16.mxu1 %vm4844_vm0, %v4567_v39  ;;  %v6094_v46 = vsel %vm4844_vm0, %v4575_v35, 0  ;;  %v4602_v63 = vcombine.high %v146_v43, %v146_v43 }
 0x360   :  { %v17879_v1 = vcombine.low %v17871_v0, %v17878_v45  ;;  %v12472_v5 = vadd.f32 %v12471_v11, %v1487_v38  ;;  %v12473_v57 = vpop.f32.mrb[46].mxu0  ;;  %v12510_v58 = vpop.f32.mrb[44].mxu1  ;;  %v1515_v38 = vrot.slane %v21956_v10, %v19968_v12  ;;  %v4601_v45 = vcombine.high %v4599_v31, %v4599_v31 }
 0x361   :  { %v12511_v60 = vadd.f32 %v12510_v58, %v1491_v51  ;;  %v12474_v62 = vpop.f32.mrb[47].mxu0  ;;  %v12512_v28 = vpop.f32.mrb[45].mxu1  ;;  %v6100_v51 = vsel %vm4844_vm0, %v4582_v54, 0  ;;  %v1523_v11 = vrot.slane %v21956_v10, %v19976_v23  ;;  %v4609_v54 = vrot.slane %v146_v43, %v19603_v6 }
 0x362   :  { %18839 = vst [vmem:[%s22650_s3 + $0x250] sm:$0xff] %v17879_v1  ;;  %v17880_v2 = vcombine.low %v12470_v47, %v12472_v5  ;;  %v12513_v8 = vadd.f32 %v12512_v28, %v1495_v44  ;;  %v12514_v16 = vpop.f32.mrb[46].mxu1  ;;  %v1519_v47 = vrot.slane %v21956_v10, %v19972_v17  ;;  %v1527_v57 = vrot.slane %v21956_v10, %v19979_v29 }
 0x363   :  { %v12515_v21 = vpop.f32.mrb[47].mxu1  ;;  %19300 = vmatmul.mubr.msk.bf16.vlgmr.msra.gmra.mrb[152].mxu0 %vm4840_vm1, %v21856_v50  ;;  %v6106_v10 = vsel %vm4844_vm0, %v4592_v20, 0 }
 0x364   :  { %v17888_v48 = vrot.slane %v17880_v2, %v19603_v6  ;;  %v17881_v26 = vcombine.low %v12511_v60, %v12513_v8  ;;  %14732 = vmatpush1.bf16.msra.mxu0 %v6082_v49  ;;  %14763 = vmatprep.mubr.bf16.mxu0 %v19553_v3  ;;  %v4616_v60 = vrot.slane %v4602_v63, %v19603_v6  ;;  %v22008_v2 = vld [vmem:[#allocation4 + $0x138] sm:$0xff] }
 0x365   :  { %19302 = vmatmul.mubr.msk.bf16.vlgmr.msra.gmra.mrb[152].mxu1 %vm4840_vm1, %v21856_v50  ;;  %19307 = vmatprep.subr.msk.bf16.mxu0 %vm4844_vm0, %v4583_v15  ;;  %v147_v8 = vld [vmem:[#allocation2 + $0x358] sm:$0xff] }
 0x366   :  { %v17895_v27 = vrot.slane %v17881_v26, %v19603_v6  ;;  %v12551_v22 = vpop.f32.mrb[48].mxu0  ;;  %14773 = vmatpush1.bf16.msra.mxu1 %v6088_v13  ;;  %14804 = vmatprep.mubr.bf16.mxu1 %v19553_v3  ;;  %v4617_v13 = vcombine.high %v4609_v54, %v4609_v54 }
 0x367   :  { %v12552_v25 = vadd.f32 %v12551_v22, %v1499_v7  ;;  %v12553_v37 = vpop.f32.mrb[49].mxu0  ;;  %19309 = vmatprep.subr.msk.bf16.mxu1 %vm4844_vm0, %v4584_v9  ;;  %v4619_v22 = vcombine.high %v147_v8, %v147_v8 }
 0x368   :  { %v17896_v24 = vcombine.low %v17888_v48, %v17895_v27  ;;  %v12554_v30 = vadd.f32 %v12553_v37, %v1503_v18  ;;  %v12555_v40 = vpop.f32.mrb[50].mxu0  ;;  %v12592_v33 = vpop.f32.mrb[48].mxu1  ;;  %v1531_v18 = vrot.slane %v22008_v2, %v19934_v53  ;;  %v4618_v27 = vcombine.high %v4616_v60, %v4616_v60 }
 0x369   :  { %v12593_v34 = vadd.f32 %v12592_v33, %v1507_v32  ;;  %v12556_v41 = vpop.f32.mrb[51].mxu0  ;;  %v12594_v19 = vpop.f32.mrb[49].mxu1  ;;  %v6112_v32 = vsel %vm4844_vm0, %v4599_v31, 0  ;;  %v1539_v37 = vrot.slane %v22008_v2, %v19944_v59  ;;  %v4626_v31 = vrot.slane %v147_v8, %v19603_v6 }
 0x36a   :  { %18840 = vst [vmem:[%s22650_s3 + $0x258] sm:$0xff] %v17896_v24  ;;  %v17897_v39 = vcombine.low %v12552_v25, %v12554_v30  ;;  %v12595_v52 = vadd.f32 %v12594_v19, %v1511_v36  ;;  %v12596_v0 = vpop.f32.mrb[50].mxu1  ;;  %v1535_v25 = vrot.slane %v22008_v2, %v19940_v56  ;;  %v1543_v40 = vrot.slane %v22008_v2, %v19947_v61 }
 0x36b   :  { %v12597_v42 = vpop.f32.mrb[51].mxu1  ;;  %19304 = vmatmul.mubr.msk.bf16.vlgmr.msra.gmra.mrb[156].mxu0 %vm4840_vm1, %v21856_v50 }
 0x36c   :  { %v17905_v35 = vrot.slane %v17897_v39, %v19603_v6  ;;  %v17898_v44 = vcombine.low %v12593_v34, %v12595_v52  ;;  %14814 = vmatpush1.bf16.msra.mxu0 %v6094_v46  ;;  %14845 = vmatprep.mubr.bf16.mxu0 %v19553_v3  ;;  %v4633_v34 = vrot.slane %v4619_v22, %v19603_v6  ;;  %v148_v39 = vld [vmem:[#allocation2 + $0x360] sm:$0xff] }
 0x36d   :  { %19306 = vmatmul.mubr.msk.bf16.vlgmr.msra.gmra.mrb[156].mxu1 %vm4840_vm1, %v21856_v50  ;;  %19311 = vmatprep.subr.msk.bf16.mxu0 %vm4844_vm0, %v4600_v4 }
 0x36e   :  { %v17912_v1 = vrot.slane %v17898_v44, %v19603_v6  ;;  %v12633_v5 = vpop.f32.mrb[52].mxu0  ;;  %14855 = vmatpush1.bf16.msra.mxu1 %v6100_v51  ;;  %14886 = vmatprep.mubr.bf16.mxu1 %v19553_v3  ;;  %v4634_v51 = vcombine.high %v4626_v31, %v4626_v31 }
 0x36f   :  { %v12634_v58 = vadd.f32 %v12633_v5, %v1515_v38  ;;  %v12635_v55 = vpop.f32.mrb[53].mxu0  ;;  %19313 = vmatprep.subr.msk.bf16.mxu1 %vm4844_vm0, %v4601_v45  ;;  %v6118_v38 = vsel %vm4844_vm0, %v4609_v54, 0  ;;  %v4636_v5 = vcombine.high %v148_v39, %v148_v39 }
 0x370   :  { %v17913_v62 = vcombine.low %v17905_v35, %v17912_v1  ;;  %v12636_v28 = vadd.f32 %v12635_v55, %v1519_v47  ;;  %v12637_v49 = vpop.f32.mrb[54].mxu0  ;;  %v12674_v15 = vpop.f32.mrb[52].mxu1  ;;  %v1547_v47 = vrot.slane %v22008_v2, %v19968_v12  ;;  %v4635_v1 = vcombine.high %v4633_v34, %v4633_v34 }
 0x371   :  { %v12675_v16 = vadd.f32 %v12674_v15, %v1523_v11  ;;  %v12638_v21 = vpop.f32.mrb[55].mxu0  ;;  %v12676_v7 = vpop.f32.mrb[53].mxu1  ;;  %v6124_v11 = vsel %vm4844_vm0, %v4616_v60, 0  ;;  %v1555_v55 = vrot.slane %v22008_v2, %v19976_v23  ;;  %v4643_v60 = vrot.slane %v148_v39, %v19603_v6 }
 0x372   :  { %18841 = vst [vmem:[%s22650_s3 + $0x260] sm:$0xff] %v17913_v62  ;;  %v17914_v9 = vcombine.low %v12634_v58, %v12636_v28  ;;  %v12677_v14 = vadd.f32 %v12676_v7, %v1527_v57  ;;  %v12678_v48 = vpop.f32.mrb[54].mxu1  ;;  %v1551_v58 = vrot.slane %v22008_v2, %v19972_v17  ;;  %v1559_v49 = vrot.slane %v22008_v2, %v19979_v29 }
 0x373   :  { %v12679_v26 = vpop.f32.mrb[55].mxu1  ;;  %19308 = vmatmul.mubr.msk.bf16.vlgmr.msra.gmra.mrb[160].mxu0 %vm4840_vm1, %v21856_v50  ;;  %v6130_v2 = vsel %vm4844_vm0, %v4626_v31, 0 }
 0x374   :  { %v17922_v20 = vrot.slane %v17914_v9, %v19603_v6  ;;  %v17915_v36 = vcombine.low %v12675_v16, %v12677_v14  ;;  %14896 = vmatpush1.bf16.msra.mxu0 %v6106_v10  ;;  %14927 = vmatprep.mubr.bf16.mxu0 %v19553_v3  ;;  %v4650_v16 = vrot.slane %v4636_v5, %v19603_v6  ;;  %v22060_v9 = vld [vmem:[#allocation4 + $0x140] sm:$0xff]  ;;  %v149_v14 = vld [vmem:[#allocation2 + $0x368] sm:$0xff] }
 0x375   :  { %19310 = vmatmul.mubr.msk.bf16.vlgmr.msra.gmra.mrb[160].mxu1 %vm4840_vm1, %v21856_v50  ;;  %19315 = vmatprep.subr.msk.bf16.mxu0 %vm4844_vm0, %v4617_v13 }
 0x376   :  { %v17929_v24 = vrot.slane %v17915_v36, %v19603_v6  ;;  %v12715_v30 = vpop.f32.mrb[56].mxu0  ;;  %14937 = vmatpush1.bf16.msra.mxu1 %v6112_v32  ;;  %14968 = vmatprep.mubr.bf16.mxu1 %v19553_v3  ;;  %v4651_v32 = vcombine.high %v4643_v60, %v4643_v60 }
 0x377   :  { %v12716_v33 = vadd.f32 %v12715_v30, %v1531_v18  ;;  %v12717_v43 = vpop.f32.mrb[57].mxu0  ;;  %19317 = vmatprep.subr.msk.bf16.mxu1 %vm4844_vm0, %v4618_v27  ;;  %v4653_v30 = vcombine.high %v149_v14, %v149_v14 }
 0x378   :  { %v17930_v41 = vcombine.low %v17922_v20, %v17929_v24  ;;  %v12718_v19 = vadd.f32 %v12717_v43, %v1535_v25  ;;  %v12719_v46 = vpop.f32.mrb[58].mxu0  ;;  %v12756_v4 = vpop.f32.mrb[56].mxu1  ;;  %v1563_v25 = vrot.slane %v22060_v9, %v19934_v53  ;;  %v4652_v24 = vcombine.high %v4650_v16, %v4650_v16 }
 0x379   :  { %v12757_v52 = vadd.f32 %v12756_v4, %v1539_v37  ;;  %v12720_v0 = vpop.f32.mrb[59].mxu0  ;;  %v12758_v42 = vpop.f32.mrb[57].mxu1  ;;  %v6136_v37 = vsel %vm4844_vm0, %v4633_v34, 0  ;;  %v1571_v43 = vrot.slane %v22060_v9, %v19944_v59  ;;  %v4660_v34 = vrot.slane %v149_v14, %v19603_v6 }
 0x37a   :  { %18842 = vst [vmem:[%s22650_s3 + $0x268] sm:$0xff] %v17930_v41  ;;  %v17931_v45 = vcombine.low %v12716_v33, %v12718_v19  ;;  %v12759_v63 = vadd.f32 %v12758_v42, %v1543_v40  ;;  %v12760_v35 = vpop.f32.mrb[58].mxu1  ;;  %v1567_v33 = vrot.slane %v22060_v9, %v19940_v56  ;;  %v1575_v46 = vrot.slane %v22060_v9, %v19947_v61 }
 0x37b   :  { %v12761_v44 = vpop.f32.mrb[59].mxu1  ;;  %19312 = vmatmul.mubr.msk.bf16.vlgmr.msra.gmra.mrb[164].mxu0 %vm4840_vm1, %v21856_v50 }
 0x37c   :  { %v17939_v54 = vrot.slane %v17931_v45, %v19603_v6  ;;  %v17932_v57 = vcombine.low %v12757_v52, %v12759_v63  ;;  %14978 = vmatpush1.bf16.msra.mxu0 %v6118_v38  ;;  %15009 = vmatprep.mubr.bf16.mxu0 %v19553_v3  ;;  %v4667_v52 = vrot.slane %v4653_v30, %v19603_v6  ;;  %v150_v45 = vld [vmem:[#allocation2 + $0x370] sm:$0xff] }
 0x37d   :  { %19314 = vmatmul.mubr.msk.bf16.vlgmr.msra.gmra.mrb[164].mxu1 %vm4840_vm1, %v21856_v50  ;;  %19319 = vmatprep.subr.msk.bf16.mxu0 %vm4844_vm0, %v4634_v51 }
 0x37e   :  { %v17946_v62 = vrot.slane %v17932_v57, %v19603_v6  ;;  %v12797_v28 = vpop.f32.mrb[60].mxu0  ;;  %15019 = vmatpush1.bf16.msra.mxu1 %v6124_v11  ;;  %15050 = vmatprep.mubr.bf16.mxu1 %v19553_v3  ;;  %v4668_v11 = vcombine.high %v4660_v34, %v4660_v34 }
 0x37f   :  { %v12798_v15 = vadd.f32 %v12797_v28, %v1547_v47  ;;  %v12799_v8 = vpop.f32.mrb[61].mxu0  ;;  %19321 = vmatprep.subr.msk.bf16.mxu1 %vm4844_vm0, %v4635_v1  ;;  %v6142_v47 = vsel %vm4844_vm0, %v4643_v60, 0  ;;  %v4670_v28 = vcombine.high %v150_v45, %v150_v45 }
 0x380   :  { %v17947_v21 = vcombine.low %v17939_v54, %v17946_v62  ;;  %v12800_v7 = vadd.f32 %v12799_v8, %v1551_v58  ;;  %v12801_v10 = vpop.f32.mrb[62].mxu0  ;;  %v12838_v13 = vpop.f32.mrb[60].mxu1  ;;  %v1579_v58 = vrot.slane %v22060_v9, %v19968_v12  ;;  %v4669_v62 = vcombine.high %v4667_v52, %v4667_v52 }
 0x381   :  { %v12839_v48 = vadd.f32 %v12838_v13, %v1555_v55  ;;  %v12802_v26 = vpop.f32.mrb[63].mxu0  ;;  %v12840_v18 = vpop.f32.mrb[61].mxu1  ;;  %v6148_v55 = vsel %vm4844_vm0, %v4650_v16, 0  ;;  %v1587_v8 = vrot.slane %v22060_v9, %v19976_v23  ;;  %v4677_v16 = vrot.slane %v150_v45, %v19603_v6 }
 0x382   :  { %18843 = vst [vmem:[%s22650_s3 + $0x270] sm:$0xff] %v17947_v21  ;;  %v17948_v27 = vcombine.low %v12798_v15, %v12800_v7  ;;  %v12841_v22 = vadd.f32 %v12840_v18, %v1559_v49  ;;  %v12842_v20 = vpop.f32.mrb[62].mxu1  ;;  %v1583_v15 = vrot.slane %v22060_v9, %v19972_v17  ;;  %v1591_v10 = vrot.slane %v22060_v9, %v19979_v29 }
 0x383   :  { %v12843_v36 = vpop.f32.mrb[63].mxu1  ;;  %19316 = vmatmul.mubr.msk.bf16.vlgmr.msra.gmra.mrb[168].mxu0 %vm4840_vm1, %v21856_v50  ;;  %v6154_v9 = vsel %vm4844_vm0, %v4660_v34, 0 }
 0x384   :  { %v17956_v31 = vrot.slane %v17948_v27, %v19603_v6  ;;  %v17949_v40 = vcombine.low %v12839_v48, %v12841_v22  ;;  %15060 = vmatpush1.bf16.msra.mxu0 %v6130_v2  ;;  %15091 = vmatprep.mubr.bf16.mxu0 %v19553_v3  ;;  %v4684_v48 = vrot.slane %v4670_v28, %v19603_v6  ;;  %v22112_v27 = vld [vmem:[#allocation4 + $0x148] sm:$0xff]  ;;  %v151_v22 = vld [vmem:[#allocation2 + $0x378] sm:$0xff] }
 0x385   :  { %19318 = vmatmul.mubr.msk.bf16.vlgmr.msra.gmra.mrb[168].mxu1 %vm4840_vm1, %v21856_v50  ;;  %19323 = vmatprep.subr.msk.bf16.mxu0 %vm4844_vm0, %v4651_v32 }
 0x386   :  { %v17963_v41 = vrot.slane %v17949_v40, %v19603_v6  ;;  %v12879_v19 = vpop.f32.mrb[64].mxu0  ;;  %15101 = vmatpush1.bf16.msra.mxu1 %v6136_v37  ;;  %15132 = vmatprep.mubr.bf16.mxu1 %v19553_v3  ;;  %v4685_v37 = vcombine.high %v4677_v16, %v4677_v16 }
 0x387   :  { %v12880_v4 = vadd.f32 %v12879_v19, %v1563_v25  ;;  %v12881_v39 = vpop.f32.mrb[65].mxu0  ;;  %19325 = vmatprep.subr.msk.bf16.mxu1 %vm4844_vm0, %v4652_v24  ;;  %v4687_v19 = vcombine.high %v151_v22, %v151_v22 }
 0x388   :  { %v17964_v0 = vcombine.low %v17956_v31, %v17963_v41  ;;  %v12882_v42 = vadd.f32 %v12881_v39, %v1567_v33  ;;  %v12883_v38 = vpop.f32.mrb[66].mxu0  ;;  %v12920_v51 = vpop.f32.mrb[64].mxu1  ;;  %v1595_v33 = vrot.slane %v22112_v27, %v19934_v53  ;;  %v4686_v41 = vcombine.high %v4684_v48, %v4684_v48 }
 0x389   :  { %v12921_v63 = vadd.f32 %v12920_v51, %v1571_v43  ;;  %v12884_v35 = vpop.f32.mrb[67].mxu0  ;;  %v12922_v44 = vpop.f32.mrb[65].mxu1  ;;  %v6160_v43 = vsel %vm4844_vm0, %v4667_v52, 0  ;;  %v1603_v39 = vrot.slane %v22112_v27, %v19944_v59  ;;  %v4694_v52 = vrot.slane %v151_v22, %v19603_v6 }
 0x38a   :  { %18844 = vst [vmem:[%s22650_s3 + $0x278] sm:$0xff] %v17964_v0  ;;  %v17965_v1 = vcombine.low %v12880_v4, %v12882_v42  ;;  %v12923_v5 = vadd.f32 %v12922_v44, %v1575_v46  ;;  %v12924_v54 = vpop.f32.mrb[66].mxu1  ;;  %v1599_v4 = vrot.slane %v22112_v27, %v19940_v56  ;;  %v1607_v38 = vrot.slane %v22112_v27, %v19947_v61 }
 0x38b   :  { %v12925_v57 = vpop.f32.mrb[67].mxu1  ;;  %19320 = vmatmul.mubr.msk.bf16.vlgmr.msra.gmra.mrb[172].mxu0 %vm4840_vm1, %v21856_v50 }
 0x38c   :  { %v17973_v60 = vrot.slane %v17965_v1, %v19603_v6  ;;  %v17966_v49 = vcombine.low %v12921_v63, %v12923_v5  ;;  %15142 = vmatpush1.bf16.msra.mxu0 %v6142_v47  ;;  %15173 = vmatprep.mubr.bf16.mxu0 %v19553_v3  ;;  %v4701_v63 = vrot.slane %v4687_v19, %v19603_v6  ;;  %v152_v1 = vld [vmem:[#allocation2 + $0x380] sm:$0xff] }
 0x38d   :  { %19322 = vmatmul.mubr.msk.bf16.vlgmr.msra.gmra.mrb[172].mxu1 %vm4840_vm1, %v21856_v50  ;;  %19327 = vmatprep.subr.msk.bf16.mxu0 %vm4844_vm0, %v4668_v11 }
 0x38e   :  { %v17980_v21 = vrot.slane %v17966_v49, %v19603_v6  ;;  %v12961_v7 = vpop.f32.mrb[68].mxu0  ;;  %15183 = vmatpush1.bf16.msra.mxu1 %v6148_v55  ;;  %15214 = vmatprep.mubr.bf16.mxu1 %v19553_v3  ;;  %v4702_v55 = vcombine.high %v4694_v52, %v4694_v52 }
 0x38f   :  { %v12962_v13 = vadd.f32 %v12961_v7, %v1579_v58  ;;  %v12963_v14 = vpop.f32.mrb[69].mxu0  ;;  %19329 = vmatprep.subr.msk.bf16.mxu1 %vm4844_vm0, %v4669_v62  ;;  %v6166_v58 = vsel %vm4844_vm0, %v4677_v16, 0  ;;  %v4704_v7 = vcombine.high %v152_v1, %v152_v1 }
 0x390   :  { %v17981_v26 = vcombine.low %v17973_v60, %v17980_v21  ;;  %v12964_v18 = vadd.f32 %v12963_v14, %v1583_v15  ;;  %v12965_v2 = vpop.f32.mrb[70].mxu0  ;;  %v13002_v32 = vpop.f32.mrb[68].mxu1  ;;  %v1611_v15 = vrot.slane %v22112_v27, %v19968_v12  ;;  %v4703_v21 = vcombine.high %v4701_v63, %v4701_v63 }
 0x391   :  { %v13003_v20 = vadd.f32 %v13002_v32, %v1587_v8  ;;  %v12966_v36 = vpop.f32.mrb[71].mxu0  ;;  %v13004_v25 = vpop.f32.mrb[69].mxu1  ;;  %v6172_v8 = vsel %vm4844_vm0, %v4684_v48, 0  ;;  %v1619_v14 = vrot.slane %v22112_v27, %v19976_v23  ;;  %v4711_v48 = vrot.slane %v152_v1, %v19603_v6 }
 0x392   :  { %18845 = vst [vmem:[%s22650_s3 + $0x280] sm:$0xff] %v17981_v26  ;;  %v17982_v24 = vcombine.low %v12962_v13, %v12964_v18  ;;  %v13005_v30 = vadd.f32 %v13004_v25, %v1591_v10  ;;  %v13006_v31 = vpop.f32.mrb[70].mxu1  ;;  %v1615_v13 = vrot.slane %v22112_v27, %v19972_v17  ;;  %v1623_v2 = vrot.slane %v22112_v27, %v19979_v29 }
 0x393   :  { %v13007_v40 = vpop.f32.mrb[71].mxu1  ;;  %19324 = vmatmul.mubr.msk.bf16.vlgmr.msra.gmra.mrb[176].mxu0 %vm4840_vm1, %v21856_v50  ;;  %v6178_v27 = vsel %vm4844_vm0, %v4694_v52, 0 }
 0x394   :  { %v17990_v34 = vrot.slane %v17982_v24, %v19603_v6  ;;  %v17983_v46 = vcombine.low %v13003_v20, %v13005_v30  ;;  %15224 = vmatpush1.bf16.msra.mxu0 %v6154_v9  ;;  %15255 = vmatprep.mubr.bf16.mxu0 %v19553_v3  ;;  %v4718_v20 = vrot.slane %v4704_v7, %v19603_v6  ;;  %v22164_v24 = vld [vmem:[#allocation4 + $0x150] sm:$0xff]  ;;  %v153_v30 = vld [vmem:[#allocation2 + $0x388] sm:$0xff] }
 0x395   :  { %19326 = vmatmul.mubr.msk.bf16.vlgmr.msra.gmra.mrb[176].mxu1 %vm4840_vm1, %v21856_v50  ;;  %19331 = vmatprep.subr.msk.bf16.mxu0 %vm4844_vm0, %v4685_v37 }
 0x396   :  { %v17997_v0 = vrot.slane %v17983_v46, %v19603_v6  ;;  %v13043_v42 = vpop.f32.mrb[72].mxu0  ;;  %15265 = vmatpush1.bf16.msra.mxu1 %v6160_v43  ;;  %15296 = vmatprep.mubr.bf16.mxu1 %v19553_v3  ;;  %v4719_v43 = vcombine.high %v4711_v48, %v4711_v48 }
 0x397   :  { %v13044_v51 = vadd.f32 %v13043_v42, %v1595_v33  ;;  %v13045_v45 = vpop.f32.mrb[73].mxu0  ;;  %19333 = vmatprep.subr.msk.bf16.mxu1 %vm4844_vm0, %v4686_v41  ;;  %v4721_v42 = vcombine.high %v153_v30, %v153_v30 }
 0x398   :  { %v17998_v35 = vcombine.low %v17990_v34, %v17997_v0  ;;  %v13046_v44 = vadd.f32 %v13045_v45, %v1599_v4  ;;  %v13047_v47 = vpop.f32.mrb[74].mxu0  ;;  %v13084_v11 = vpop.f32.mrb[72].mxu1  ;;  %v1627_v4 = vrot.slane %v22164_v24, %v19934_v53  ;;  %v4720_v0 = vcombine.high %v4718_v20, %v4718_v20 }
 0x399   :  { %v13085_v5 = vadd.f32 %v13084_v11, %v1603_v39  ;;  %v13048_v54 = vpop.f32.mrb[75].mxu0  ;;  %v13086_v57 = vpop.f32.mrb[73].mxu1  ;;  %v6184_v39 = vsel %vm4844_vm0, %v4701_v63, 0  ;;  %v1635_v45 = vrot.slane %v22164_v24, %v19944_v59  ;;  %v4728_v63 = vrot.slane %v153_v30, %v19603_v6 }
 0x39a   :  { %18846 = vst [vmem:[%s22650_s3 + $0x288] sm:$0xff] %v17998_v35  ;;  %v17999_v62 = vcombine.low %v13044_v51, %v13046_v44  ;;  %v13087_v28 = vadd.f32 %v13086_v57, %v1607_v38  ;;  %v13088_v60 = vpop.f32.mrb[74].mxu1  ;;  %v1631_v51 = vrot.slane %v22164_v24, %v19940_v56  ;;  %v1639_v47 = vrot.slane %v22164_v24, %v19947_v61 }
 0x39b   :  { %v13089_v49 = vpop.f32.mrb[75].mxu1  ;;  %19328 = vmatmul.mubr.msk.bf16.vlgmr.msra.gmra.mrb[180].mxu0 %vm4840_vm1, %v21856_v50 }
 0x39c   :  { %v18007_v16 = vrot.slane %v17999_v62, %v19603_v6  ;;  %v18000_v10 = vcombine.low %v13085_v5, %v13087_v28  ;;  %15306 = vmatpush1.bf16.msra.mxu0 %v6166_v58  ;;  %15337 = vmatprep.mubr.bf16.mxu0 %v19553_v3  ;;  %v4735_v5 = vrot.slane %v4721_v42, %v19603_v6  ;;  %v154_v62 = vld [vmem:[#allocation2 + $0x390] sm:$0xff] }
 0x39d   :  { %19330 = vmatmul.mubr.msk.bf16.vlgmr.msra.gmra.mrb[180].mxu1 %vm4840_vm1, %v21856_v50  ;;  %19335 = vmatprep.subr.msk.bf16.mxu0 %vm4844_vm0, %v4702_v55 }
 0x39e   :  { %v18014_v26 = vrot.slane %v18000_v10, %v19603_v6  ;;  %v13125_v18 = vpop.f32.mrb[76].mxu0  ;;  %15347 = vmatpush1.bf16.msra.mxu1 %v6172_v8  ;;  %15378 = vmatprep.mubr.bf16.mxu1 %v19553_v3  ;;  %v4736_v8 = vcombine.high %v4728_v63, %v4728_v63 }
 0x39f   :  { %v13126_v32 = vadd.f32 %v13125_v18, %v1611_v15  ;;  %v13127_v22 = vpop.f32.mrb[77].mxu0  ;;  %19337 = vmatprep.subr.msk.bf16.mxu1 %vm4844_vm0, %v4703_v21  ;;  %v6190_v15 = vsel %vm4844_vm0, %v4711_v48, 0  ;;  %v4738_v18 = vcombine.high %v154_v62, %v154_v62 }
 0x3a0   :  { %v18015_v36 = vcombine.low %v18007_v16, %v18014_v26  ;;  %v13128_v25 = vadd.f32 %v13127_v22, %v1615_v13  ;;  %v13129_v9 = vpop.f32.mrb[78].mxu0  ;;  %v13166_v37 = vpop.f32.mrb[76].mxu1  ;;  %v1643_v13 = vrot.slane %v22164_v24, %v19968_v12  ;;  %v4737_v26 = vcombine.high %v4735_v5, %v4735_v5 }
 0x3a1   :  { %v13167_v31 = vadd.f32 %v13166_v37, %v1619_v14  ;;  %v13130_v40 = vpop.f32.mrb[79].mxu0  ;;  %v13168_v33 = vpop.f32.mrb[77].mxu1  ;;  %v6196_v14 = vsel %vm4844_vm0, %v4718_v20, 0  ;;  %v1651_v22 = vrot.slane %v22164_v24, %v19976_v23  ;;  %v4745_v20 = vrot.slane %v154_v62, %v19603_v6 }
 0x3a2   :  { %18847 = vst [vmem:[%s22650_s3 + $0x290] sm:$0xff] %v18015_v36  ;;  %v18016_v41 = vcombine.low %v13126_v32, %v13128_v25  ;;  %v13169_v19 = vadd.f32 %v13168_v33, %v1623_v2  ;;  %v13170_v34 = vpop.f32.mrb[78].mxu1  ;;  %v1647_v32 = vrot.slane %v22164_v24, %v19972_v17  ;;  %v1655_v9 = vrot.slane %v22164_v24, %v19979_v29 }
 0x3a3   :  { %v13171_v46 = vpop.f32.mrb[79].mxu1  ;;  %19332 = vmatmul.mubr.msk.bf16.vlgmr.msra.gmra.mrb[184].mxu0 %vm4840_vm1, %v21856_v50  ;;  %v6202_v24 = vsel %vm4844_vm0, %v4728_v63, 0 }
 0x3a4   :  { %v18024_v52 = vrot.slane %v18016_v41, %v19603_v6  ;;  %v18017_v38 = vcombine.low %v13167_v31, %v13169_v19  ;;  %15388 = vmatpush1.bf16.msra.mxu0 %v6178_v27  ;;  %15419 = vmatprep.mubr.bf16.mxu0 %v19553_v3  ;;  %v155_v41 = vld [vmem:[#allocation2 + $0x398] sm:$0xff] }
 0x3a5   :  { %19334 = vmatmul.mubr.msk.bf16.vlgmr.msra.gmra.mrb[184].mxu1 %vm4840_vm1, %v21856_v50  ;;  %19339 = vmatprep.subr.msk.bf16.mxu0 %vm4844_vm0, %v4719_v43  ;;  %v22216_v43 = vld [vmem:[#allocation4 + $0x158] sm:$0xff] }
 0x3a6   :  { %v18031_v35 = vrot.slane %v18017_v38, %v19603_v6  ;;  %v13207_v44 = vpop.f32.mrb[80].mxu0  ;;  %15429 = vmatpush1.bf16.msra.mxu1 %v6184_v39  ;;  %15460 = vmatprep.mubr.bf16.mxu1 %v19553_v3  ;;  %v22225_v38 = vld [vmem:[%s22647_s0] sm:$0x1] }
 0x3a7   :  { %v13208_v11 = vadd.f32 %v13207_v44, %v1627_v4  ;;  %v13209_v1 = vpop.f32.mrb[81].mxu0  ;;  %19341 = vmatprep.subr.msk.bf16.mxu1 %vm4844_vm0, %v4720_v0  ;;  %v4753_v4 = vcombine.high %v4745_v20, %v4745_v20 }
 0x3a8   :  { %v18032_v54 = vcombine.low %v18024_v52, %v18031_v35  ;;  %v13210_v57 = vadd.f32 %v13209_v1, %v1631_v51  ;;  %v13211_v58 = vpop.f32.mrb[82].mxu0  ;;  %v13248_v55 = vpop.f32.mrb[80].mxu1  ;;  %v1659_v51 = vrot.slane %v22216_v43, %v19934_v53  ;;  %v4755_v35 = vcombine.high %v155_v41, %v155_v41 }
 0x3a9   :  { %v13249_v28 = vadd.f32 %v13248_v55, %v1635_v45  ;;  %v13212_v60 = vpop.f32.mrb[83].mxu0  ;;  %v13250_v49 = vpop.f32.mrb[81].mxu1  ;;  %v6208_v45 = vsel %vm4844_vm0, %v4735_v5, 0  ;;  %v1667_v1 = vrot.slane %v22216_v43, %v19944_v59  ;;  %v4762_v5 = vrot.slane %v155_v41, %v19603_v6 }
 0x3aa   :  { %18848 = vst [vmem:[%s22650_s3 + $0x298] sm:$0xff] %v18032_v54  ;;  %v18033_v21 = vcombine.low %v13208_v11, %v13210_v57  ;;  %v13251_v7 = vadd.f32 %v13250_v49, %v1639_v47  ;;  %v13252_v16 = vpop.f32.mrb[82].mxu1  ;;  %v1663_v11 = vrot.slane %v22216_v43, %v19940_v56  ;;  %v1671_v58 = vrot.slane %v22216_v43, %v19947_v61 }
 0x3ab   :  { %v13253_v10 = vpop.f32.mrb[83].mxu1  ;;  %19336 = vmatmul.mubr.msk.bf16.vlgmr.msra.gmra.mrb[188].mxu0 %vm4840_vm1, %v21856_v50 }
 0x3ac   :  { %v18041_v48 = vrot.slane %v18033_v21, %v19603_v6  ;;  %v18034_v2 = vcombine.low %v13249_v28, %v13251_v7  ;;  %15470 = vmatpush1.bf16.msra.mxu0 %v6190_v15  ;;  %15501 = vmatprep.mubr.bf16.mxu0 %v19553_v3  ;;  %v4769_v28 = vrot.slane %v4755_v35, %v19603_v6  ;;  %v156_v21 = vld [vmem:[#allocation2 + $0x3a0] sm:$0xff] }
 0x3ad   :  { %19338 = vmatmul.mubr.msk.bf16.vlgmr.msra.gmra.mrb[188].mxu1 %vm4840_vm1, %v21856_v50  ;;  %19343 = vmatprep.subr.msk.bf16.mxu0 %vm4844_vm0, %v4736_v8  ;;  %v4752_v50 = vrot.slane %v4738_v18, %v19603_v6 }
 0x3ae   :  { %v18048_v36 = vrot.slane %v18034_v2, %v19603_v6  ;;  %v13289_v25 = vpop.f32.mrb[84].mxu0  ;;  %15511 = vmatpush1.bf16.msra.mxu1 %v6196_v14  ;;  %15542 = vmatprep.mubr.bf16.mxu1 %v19553_v3  ;;  %v4770_v14 = vcombine.high %v4762_v5, %v4762_v5 }
 0x3af   :  { %v13290_v37 = vadd.f32 %v13289_v25, %v1643_v13  ;;  %v13291_v30 = vpop.f32.mrb[85].mxu0  ;;  %19345 = vmatprep.subr.msk.bf16.mxu1 %vm4844_vm0, %v4737_v26  ;;  %v4754_v63 = vcombine.high %v4752_v50, %v4752_v50  ;;  %v6214_v13 = vsel %vm4844_vm0, %v4745_v20, 0  ;;  %v4772_v25 = vcombine.high %v156_v21, %v156_v21 }
 0x3b0   :  { %v18049_v31 = vcombine.low %v18041_v48, %v18048_v36  ;;  %v13292_v40 = vadd.f32 %v13291_v30, %v1647_v32  ;;  %v13293_v33 = vpop.f32.mrb[86].mxu0  ;;  %v13330_v27 = vpop.f32.mrb[84].mxu1  ;;  %v1675_v32 = vrot.slane %v22216_v43, %v19968_v12  ;;  %v4771_v36 = vcombine.high %v4769_v28, %v4769_v28 }
 0x3b1   :  { %v13331_v19 = vadd.f32 %v13330_v27, %v1651_v22  ;;  %v13294_v34 = vpop.f32.mrb[87].mxu0  ;;  %v13332_v46 = vpop.f32.mrb[85].mxu1  ;;  %v6220_v22 = vsel %vm4844_vm0, %v4752_v50, 0  ;;  %v1683_v30 = vrot.slane %v22216_v43, %v19976_v23  ;;  %v4779_v50 = vrot.slane %v156_v21, %v19603_v6 }
 0x3b2   :  { %18849 = vst [vmem:[%s22650_s3 + $0x2a0] sm:$0xff] %v18049_v31  ;;  %v18050_v39 = vcombine.low %v13290_v37, %v13292_v40  ;;  %v13333_v0 = vadd.f32 %v13332_v46, %v1655_v9  ;;  %v13334_v42 = vpop.f32.mrb[86].mxu1  ;;  %v1679_v37 = vrot.slane %v22216_v43, %v19972_v17  ;;  %v1687_v33 = vrot.slane %v22216_v43, %v19979_v29 }
 0x3b3   :  { %v13335_v52 = vpop.f32.mrb[87].mxu1  ;;  %19340 = vmatmul.mubr.msk.bf16.vlgmr.msra.gmra.mrb[192].mxu0 %vm4840_vm1, %v22225_v38  ;;  %v6226_v43 = vsel %vm4844_vm0, %v4762_v5, 0 }
 0x3b4   :  { %v18058_v44 = vrot.slane %v18050_v39, %v19603_v6  ;;  %v18051_v47 = vcombine.low %v13331_v19, %v13333_v0  ;;  %15552 = vmatpush1.bf16.msra.mxu0 %v6202_v24  ;;  %15583 = vmatprep.mubr.bf16.mxu0 %v19553_v3  ;;  %v4786_v19 = vrot.slane %v4772_v25, %v19603_v6  ;;  %v22273_v39 = vld [vmem:[#allocation4 + $0x160] sm:$0xff]  ;;  %v157_v0 = vld [vmem:[#allocation2 + $0x3a8] sm:$0xff] }
 0x3b5   :  { %19342 = vmatmul.mubr.msk.bf16.vlgmr.msra.gmra.mrb[192].mxu1 %vm4840_vm1, %v22225_v38  ;;  %19347 = vmatprep.subr.msk.bf16.mxu0 %vm4844_vm0, %v4753_v4 }
 0x3b6   :  { %v18065_v54 = vrot.slane %v18051_v47, %v19603_v6  ;;  %v13371_v57 = vpop.f32.mrb[88].mxu0  ;;  %15593 = vmatpush1.bf16.msra.mxu1 %v6208_v45  ;;  %15624 = vmatprep.mubr.bf16.mxu1 %v19553_v3  ;;  %v4787_v45 = vcombine.high %v4779_v50, %v4779_v50 }
 0x3b7   :  { %v13372_v55 = vadd.f32 %v13371_v57, %v1659_v51  ;;  %v13373_v62 = vpop.f32.mrb[89].mxu0  ;;  %19349 = vmatprep.subr.msk.bf16.mxu1 %vm4844_vm0, %v4754_v63  ;;  %v4789_v57 = vcombine.high %v157_v0, %v157_v0 }
 0x3b8   :  { %v18066_v60 = vcombine.low %v18058_v44, %v18065_v54  ;;  %v13374_v49 = vadd.f32 %v13373_v62, %v1663_v11  ;;  %v13375_v15 = vpop.f32.mrb[90].mxu0  ;;  %v13412_v8 = vpop.f32.mrb[88].mxu1  ;;  %v1691_v11 = vrot.slane %v22273_v39, %v19934_v53  ;;  %v4788_v54 = vcombine.high %v4786_v19, %v4786_v19 }
 0x3b9   :  { %v13413_v7 = vadd.f32 %v13412_v8, %v1667_v1  ;;  %v13376_v16 = vpop.f32.mrb[91].mxu0  ;;  %v13414_v10 = vpop.f32.mrb[89].mxu1  ;;  %v6232_v1 = vsel %vm4844_vm0, %v4769_v28, 0  ;;  %v1699_v62 = vrot.slane %v22273_v39, %v19944_v59  ;;  %v4796_v28 = vrot.slane %v157_v0, %v19603_v6 }
 0x3ba   :  { %18850 = vst [vmem:[%s22650_s3 + $0x2a8] sm:$0xff] %v18066_v60  ;;  %v18067_v26 = vcombine.low %v13372_v55, %v13374_v49  ;;  %v13415_v18 = vadd.f32 %v13414_v10, %v1671_v58  ;;  %v13416_v48 = vpop.f32.mrb[90].mxu1  ;;  %v1695_v55 = vrot.slane %v22273_v39, %v19940_v56  ;;  %v1703_v15 = vrot.slane %v22273_v39, %v19947_v61 }
 0x3bb   :  { %v13417_v2 = vpop.f32.mrb[91].mxu1  ;;  %19344 = vmatmul.mubr.msk.bf16.vlgmr.msra.gmra.mrb[196].mxu0 %vm4840_vm1, %v22225_v38 }
 0x3bc   :  { %v18075_v20 = vrot.slane %v18067_v26, %v19603_v6  ;;  %v18068_v9 = vcombine.low %v13413_v7, %v13415_v18  ;;  %15634 = vmatpush1.bf16.msra.mxu0 %v6214_v13  ;;  %15665 = vmatprep.mubr.bf16.mxu0 %v19553_v3  ;;  %v4803_v7 = vrot.slane %v4789_v57, %v19603_v6  ;;  %v158_v26 = vld [vmem:[#allocation2 + $0x3b0] sm:$0xff] }
 0x3bd   :  { %19346 = vmatmul.mubr.msk.bf16.vlgmr.msra.gmra.mrb[196].mxu1 %vm4840_vm1, %v22225_v38  ;;  %19351 = vmatprep.subr.msk.bf16.mxu0 %vm4844_vm0, %v4770_v14 }
 0x3be   :  { %v18082_v31 = vrot.slane %v18068_v9, %v19603_v6  ;;  %v13453_v40 = vpop.f32.mrb[92].mxu0  ;;  %15675 = vmatpush1.bf16.msra.mxu1 %v6220_v22  ;;  %15706 = vmatprep.mubr.bf16.mxu1 %v19553_v3  ;;  %v4804_v22 = vcombine.high %v4796_v28, %v4796_v28 }
 0x3bf   :  { %v13454_v27 = vadd.f32 %v13453_v40, %v1675_v32  ;;  %v13455_v41 = vpop.f32.mrb[93].mxu0  ;;  %19353 = vmatprep.subr.msk.bf16.mxu1 %vm4844_vm0, %v4771_v36  ;;  %v6238_v32 = vsel %vm4844_vm0, %v4779_v50, 0  ;;  %v4806_v40 = vcombine.high %v158_v26, %v158_v26 }
 0x3c0   :  { %v18083_v34 = vcombine.low %v18075_v20, %v18082_v31  ;;  %v13456_v46 = vadd.f32 %v13455_v41, %v1679_v37  ;;  %v13457_v24 = vpop.f32.mrb[94].mxu0  ;;  %v13494_v4 = vpop.f32.mrb[92].mxu1  ;;  %v1707_v37 = vrot.slane %v22273_v39, %v19968_v12  ;;  %v4805_v31 = vcombine.high %v4803_v7, %v4803_v7 }
 0x3c1   :  { %v13495_v42 = vadd.f32 %v13494_v4, %v1683_v30  ;;  %v13458_v52 = vpop.f32.mrb[95].mxu0  ;;  %v13496_v51 = vpop.f32.mrb[93].mxu1  ;;  %v6244_v30 = vsel %vm4844_vm0, %v4786_v19, 0  ;;  %v1715_v41 = vrot.slane %v22273_v39, %v19976_v23  ;;  %v4813_v19 = vrot.slane %v158_v26, %v19603_v6 }
 0x3c2   :  { %18851 = vst [vmem:[%s22650_s3 + $0x2b0] sm:$0xff] %v18083_v34  ;;  %v18084_v63 = vcombine.low %v13454_v27, %v13456_v46  ;;  %v13497_v35 = vadd.f32 %v13496_v51, %v1687_v33  ;;  %v13498_v44 = vpop.f32.mrb[94].mxu1  ;;  %v1711_v27 = vrot.slane %v22273_v39, %v19972_v17  ;;  %v1719_v24 = vrot.slane %v22273_v39, %v19979_v29 }
 0x3c3   :  { %v13499_v47 = vpop.f32.mrb[95].mxu1  ;;  %19348 = vmatmul.mubr.msk.bf16.vlgmr.msra.gmra.mrb[200].mxu0 %vm4840_vm1, %v22225_v38  ;;  %v6250_v39 = vsel %vm4844_vm0, %v4796_v28, 0 }
 0x3c4   :  { %v18092_v5 = vrot.slane %v18084_v63, %v19603_v6  ;;  %v18085_v58 = vcombine.low %v13495_v42, %v13497_v35  ;;  %15716 = vmatpush1.bf16.msra.mxu0 %v6226_v43  ;;  %15747 = vmatprep.mubr.bf16.mxu0 %v19553_v3  ;;  %v4820_v42 = vrot.slane %v4806_v40, %v19603_v6  ;;  %v22325_v63 = vld [vmem:[#allocation4 + $0x168] sm:$0xff]  ;;  %v159_v35 = vld [vmem:[#allocation2 + $0x3b8] sm:$0xff] }
 0x3c5   :  { %19350 = vmatmul.mubr.msk.bf16.vlgmr.msra.gmra.mrb[200].mxu1 %vm4840_vm1, %v22225_v38  ;;  %19355 = vmatprep.subr.msk.bf16.mxu0 %vm4844_vm0, %v4787_v45 }
 0x3c6   :  { %v18099_v60 = vrot.slane %v18085_v58, %v19603_v6  ;;  %v13535_v49 = vpop.f32.mrb[96].mxu0  ;;  %15757 = vmatpush1.bf16.msra.mxu1 %v6232_v1  ;;  %15788 = vmatprep.mubr.bf16.mxu1 %v19553_v3  ;;  %v4821_v1 = vcombine.high %v4813_v19, %v4813_v19 }
 0x3c7   :  { %v13536_v8 = vadd.f32 %v13535_v49, %v1691_v11  ;;  %v13537_v21 = vpop.f32.mrb[97].mxu0  ;;  %19357 = vmatprep.subr.msk.bf16.mxu1 %vm4844_vm0, %v4788_v54  ;;  %v4823_v49 = vcombine.high %v159_v35, %v159_v35 }
 0x3c8   :  { %v18100_v16 = vcombine.low %v18092_v5, %v18099_v60  ;;  %v13538_v10 = vadd.f32 %v13537_v21, %v1695_v55  ;;  %v13539_v13 = vpop.f32.mrb[98].mxu0  ;;  %v13576_v14 = vpop.f32.mrb[96].mxu1  ;;  %v1723_v55 = vrot.slane %v22325_v63, %v19934_v53  ;;  %v4822_v60 = vcombine.high %v4820_v42, %v4820_v42 }
 0x3c9   :  { %v13577_v18 = vadd.f32 %v13576_v14, %v1699_v62  ;;  %v13540_v48 = vpop.f32.mrb[99].mxu0  ;;  %v13578_v2 = vpop.f32.mrb[97].mxu1  ;;  %v6256_v62 = vsel %vm4844_vm0, %v4803_v7, 0  ;;  %v1731_v21 = vrot.slane %v22325_v63, %v19944_v59  ;;  %v4830_v7 = vrot.slane %v159_v35, %v19603_v6 }
 0x3ca   :  { %18852 = vst [vmem:[%s22650_s3 + $0x2b8] sm:$0xff] %v18100_v16  ;;  %v18101_v36 = vcombine.low %v13536_v8, %v13538_v10  ;;  %v13579_v25 = vadd.f32 %v13578_v2, %v1703_v15  ;;  %v13580_v20 = vpop.f32.mrb[98].mxu1  ;;  %v1727_v8 = vrot.slane %v22325_v63, %v19940_v56  ;;  %v1735_v13 = vrot.slane %v22325_v63, %v19947_v61 }
 0x3cb   :  { %v13581_v9 = vpop.f32.mrb[99].mxu1  ;;  %19352 = vmatmul.mubr.msk.bf16.vlgmr.msra.gmra.mrb[204].mxu0 %vm4840_vm1, %v22225_v38 }
 0x3cc   :  { %v18109_v50 = vrot.slane %v18101_v36, %v19603_v6  ;;  %v18102_v33 = vcombine.low %v13577_v18, %v13579_v25  ;;  %15798 = vmatpush1.bf16.msra.mxu0 %v6238_v32  ;;  %15829 = vmatprep.mubr.bf16.mxu0 %v19553_v3  ;;  %v4837_v18 = vrot.slane %v4823_v49, %v19603_v6  ;;  %v6262_v9 = vsel %vm4844_vm0, %v4813_v19, 0 }
 0x3cd   :  { %19354 = vmatmul.mubr.msk.bf16.vlgmr.msra.gmra.mrb[204].mxu1 %vm4840_vm1, %v22225_v38  ;;  %19359 = vmatprep.subr.msk.bf16.mxu0 %vm4844_vm0, %v4804_v22 }
 0x3ce   :  { %v18116_v34 = vrot.slane %v18102_v33, %v19603_v6  ;;  %v13617_v46 = vpop.f32.mrb[100].mxu0  ;;  %15839 = vmatpush1.bf16.msra.mxu1 %v6244_v30  ;;  %15870 = vmatprep.mubr.bf16.mxu1 %v19553_v3  ;;  %v1739_v33 = vrot.slane %v22325_v63, %v19968_v12 }
 0x3cf   :  { %v13618_v4 = vadd.f32 %v13617_v46, %v1707_v37  ;;  %v13619_v0 = vpop.f32.mrb[101].mxu0  ;;  %19361 = vmatprep.subr.msk.bf16.mxu1 %vm4844_vm0, %v4805_v31  ;;  %v4838_v37 = vcombine.high %v4830_v7, %v4830_v7  ;;  %v1743_v46 = vrot.slane %v22325_v63, %v19972_v17 }
 0x3d0   :  { %v18117_v52 = vcombine.low %v18109_v50, %v18116_v34  ;;  %v13620_v51 = vadd.f32 %v13619_v0, %v1711_v27  ;;  %v13621_v43 = vpop.f32.mrb[102].mxu0  ;;  %v13658_v45 = vpop.f32.mrb[100].mxu1  ;;  %v6268_v27 = vsel %vm4844_vm0, %v4820_v42, 0  ;;  %v1751_v42 = vrot.slane %v22325_v63, %v19979_v29 }
 0x3d1   :  { %v13659_v44 = vadd.f32 %v13658_v45, %v1715_v41  ;;  %v13622_v47 = vpop.f32.mrb[103].mxu0  ;;  %v13660_v11 = vpop.f32.mrb[101].mxu1  ;;  %v4839_v41 = vcombine.high %v4837_v18, %v4837_v18 }
 0x3d2   :  { %18853 = vst [vmem:[%s22650_s3 + $0x2c0] sm:$0xff] %v18117_v52  ;;  %v18118_v54 = vcombine.low %v13618_v4, %v13620_v51  ;;  %v13661_v57 = vadd.f32 %v13660_v11, %v1719_v24  ;;  %v13662_v5 = vpop.f32.mrb[102].mxu1  ;;  %v1747_v24 = vrot.slane %v22325_v63, %v19976_v23  ;;  %v206_v47 = vld [vmem:[#allocation4 + $0x170] sm:$0xff] }
 0x3d3   :  { %v13663_v58 = vpop.f32.mrb[103].mxu1  ;;  %19356 = vmatmul.mubr.msk.bf16.vlgmr.msra.gmra.mrb[208].mxu0 %vm4840_vm1, %v22225_v38 }
 0x3d4   :  { %v18126_v28 = vrot.slane %v18118_v54, %v19603_v6  ;;  %v18119_v15 = vcombine.low %v13659_v44, %v13661_v57  ;;  %15880 = vmatpush1.bf16.msra.mxu0 %v6250_v39  ;;  %15911 = vmatprep.mubr.bf16.mxu0 %v19553_v3  ;;  %v6274_v54 = vsel %vm4844_vm0, %v4830_v7, 0  ;;  %v1767_v7 = vrot.slane %v206_v47, %v19947_v61 }
 0x3d5   :  { %19358 = vmatmul.mubr.msk.bf16.vlgmr.msra.gmra.mrb[208].mxu1 %vm4840_vm1, %v22225_v38  ;;  %19363 = vmatprep.subr.msk.bf16.mxu0 %vm4844_vm0, %v4821_v1 }
 0x3d6   :  { %v18133_v16 = vrot.slane %v18119_v15, %v19603_v6  ;;  %v13699_v10 = vpop.f32.mrb[104].mxu0  ;;  %15921 = vmatpush1.bf16.msra.mxu1 %v6256_v62  ;;  %15952 = vmatprep.mubr.bf16.mxu1 %v19553_v3  ;;  %v6280_v62 = vsel %vm4844_vm0, %v4837_v18, 0  ;;  %v1763_v15 = vrot.slane %v206_v47, %v19944_v59 }
 0x3d7   :  { %v13700_v14 = vadd.f32 %v13699_v10, %v1723_v55  ;;  %v13701_v26 = vpop.f32.mrb[105].mxu0  ;;  %19365 = vmatprep.subr.msk.bf16.mxu1 %vm4844_vm0, %v4822_v60  ;;  %v1755_v55 = vrot.slane %v206_v47, %v19934_v53 }
 0x3d8   :  { %v18134_v48 = vcombine.low %v18126_v28, %v18133_v16  ;;  %v13702_v2 = vadd.f32 %v13701_v26, %v1727_v8  ;;  %v13703_v32 = vpop.f32.mrb[106].mxu0  ;;  %v13740_v22 = vpop.f32.mrb[104].mxu1  ;;  %v1759_v28 = vrot.slane %v206_v47, %v19940_v56 }
 0x3d9   :  { %v13741_v36 = vadd.f32 %v13740_v22, %v1731_v21  ;;  %v13704_v25 = vpop.f32.mrb[107].mxu0  ;;  %v13742_v20 = vpop.f32.mrb[105].mxu1 }
 0x3da   :  { %18854 = vst [vmem:[%s22650_s3 + $0x2c8] sm:$0xff] %v18134_v48  ;;  %v18135_v30 = vcombine.low %v13700_v14, %v13702_v2  ;;  %v13743_v31 = vadd.f32 %v13742_v20, %v1735_v13  ;;  %v13744_v40 = vpop.f32.mrb[106].mxu1 }
 0x3db   :  { %v13745_v50 = vpop.f32.mrb[107].mxu1  ;;  %19360 = vmatmul.mubr.msk.bf16.vlgmr.msra.gmra.mrb[212].mxu0 %vm4840_vm1, %v22225_v38 }
 0x3dc   :  { %v18143_v19 = vrot.slane %v18135_v30, %v19603_v6  ;;  %v18136_v34 = vcombine.low %v13741_v36, %v13743_v31  ;;  %15962 = vmatpush1.bf16.msra.mxu0 %v6262_v9  ;;  %15993 = vmatprep.mubr.bf16.mxu0 %v19553_v3  ;;  %v1775_v30 = vrot.slane %v206_v47, %v19972_v17 }
 0x3dd   :  { %19362 = vmatmul.mubr.msk.bf16.vlgmr.msra.gmra.mrb[212].mxu1 %vm4840_vm1, %v22225_v38  ;;  %19367 = vmatprep.subr.msk.bf16.mxu0 %vm4844_vm0, %v4838_v37  ;;  %v1779_v31 = vrot.slane %v206_v47, %v19976_v23 }
 0x3de   :  { %v18150_v4 = vrot.slane %v18136_v34, %v19603_v6  ;;  %v13781_v0 = vpop.f32.mrb[108].mxu0  ;;  %16003 = vmatpush1.bf16.msra.mxu1 %v6268_v27  ;;  %16034 = vmatprep.mubr.bf16.mxu1 %v19553_v3 }
 0x3df   :  { %v13782_v52 = vadd.f32 %v13781_v0, %v1739_v33  ;;  %v13783_v51 = vpop.f32.mrb[109].mxu0  ;;  %19369 = vmatprep.subr.msk.bf16.mxu1 %vm4844_vm0, %v4839_v41  ;;  %v1783_v33 = vrot.slane %v206_v47, %v19979_v29 }
 0x3e0   :  { %v18151_v43 = vcombine.low %v18143_v19, %v18150_v4  ;;  %v13784_v45 = vadd.f32 %v13783_v51, %v1743_v46  ;;  %v13785_v35 = vpop.f32.mrb[110].mxu0  ;;  %v13822_v44 = vpop.f32.mrb[108].mxu1  ;;  %v207_v4 = vld [vmem:[#allocation4 + $0x178] sm:$0xff] }
 0x3e1   :  { %v13823_v11 = vadd.f32 %v13822_v44, %v1747_v24  ;;  %v13786_v39 = vpop.f32.mrb[111].mxu0  ;;  %v13824_v1 = vpop.f32.mrb[109].mxu1  ;;  %v1787_v35 = vrot.slane %v207_v4, %v19934_v53 }
 0x3e2   :  { %18855 = vst [vmem:[%s22650_s3 + $0x2d0] sm:$0xff] %v18151_v43  ;;  %v18152_v63 = vcombine.low %v13782_v52, %v13784_v45  ;;  %v13825_v57 = vadd.f32 %v13824_v1, %v1751_v42  ;;  %v13826_v5 = vpop.f32.mrb[110].mxu1  ;;  %v1795_v39 = vrot.slane %v207_v4, %v19944_v59 }
 0x3e3   :  { %v13827_v58 = vpop.f32.mrb[111].mxu1  ;;  %19364 = vmatmul.mubr.msk.bf16.vlgmr.msra.gmra.mrb[216].mxu0 %vm4840_vm1, %v22225_v38 }
 0x3e4   :  { %v18160_v60 = vrot.slane %v18152_v63, %v19603_v6  ;;  %v18153_v49 = vcombine.low %v13823_v11, %v13825_v57  ;;  %16044 = vmatpush1.bf16.msra.mxu0 %v6274_v54  ;;  %16075 = vmatprep.mubr.bf16.mxu0 %v19553_v3  ;;  %v1791_v11 = vrot.slane %v207_v4, %v19940_v56 }
 0x3e5   :  { %19366 = vmatmul.mubr.msk.bf16.vlgmr.msra.gmra.mrb[216].mxu1 %vm4840_vm1, %v22225_v38  ;;  %v1799_v63 = vrot.slane %v207_v4, %v19947_v61 }
 0x3e6   :  { %v18167_v8 = vrot.slane %v18153_v49, %v19603_v6  ;;  %v13863_v21 = vpop.f32.mrb[112].mxu0  ;;  %16085 = vmatpush1.bf16.msra.mxu1 %v6280_v62  ;;  %16116 = vmatprep.mubr.bf16.mxu1 %v19553_v3  ;;  %v1771_v3 = vrot.slane %v206_v47, %v19968_v12 }
 0x3e7   :  { %v13864_v16 = vadd.f32 %v13863_v21, %v1755_v55  ;;  %v13865_v10 = vpop.f32.mrb[113].mxu0 }
 0x3e8   :  { %v18168_v13 = vcombine.low %v18160_v60, %v18167_v8  ;;  %v13866_v14 = vadd.f32 %v13865_v10, %v1759_v28  ;;  %v13867_v26 = vpop.f32.mrb[114].mxu0  ;;  %v13904_v18 = vpop.f32.mrb[112].mxu1  ;;  %v1803_v10 = vrot.slane %v207_v4, %v19968_v12 }
 0x3e9   :  { %v13905_v48 = vadd.f32 %v13904_v18, %v1763_v15  ;;  %v13868_v2 = vpop.f32.mrb[115].mxu0  ;;  %v13906_v32 = vpop.f32.mrb[113].mxu1  ;;  %v1807_v26 = vrot.slane %v207_v4, %v19972_v17  ;;  %v1811_v18 = vrot.slane %v207_v4, %v19976_v23 }
 0x3ea   :  { %18856 = vst [vmem:[%s22650_s3 + $0x2d8] sm:$0xff] %v18168_v13  ;;  %v18169_v22 = vcombine.low %v13864_v16, %v13866_v14  ;;  %v13907_v36 = vadd.f32 %v13906_v32, %v1767_v7  ;;  %v13908_v25 = vpop.f32.mrb[114].mxu1  ;;  %v1815_v32 = vrot.slane %v207_v4, %v19979_v29 }
 0x3eb   :  { %v13909_v20 = vpop.f32.mrb[115].mxu1  ;;  %19368 = vmatmul.mubr.msk.bf16.vlgmr.msra.gmra.mrb[220].mxu0 %vm4840_vm1, %v22225_v38 }
 0x3ec   :  { %v18177_v9 = vrot.slane %v18169_v22, %v19603_v6  ;;  %v18170_v37 = vcombine.low %v13905_v48, %v13907_v36 }
 0x3ed   :  { %19370 = vmatmul.mubr.msk.bf16.vlgmr.msra.gmra.mrb[220].mxu1 %vm4840_vm1, %v22225_v38 }
 0x3ee   :  { %v18184_v40 = vrot.slane %v18170_v37, %v19603_v6  ;;  %v13945_v50 = vpop.f32.mrb[116].mxu0  ;;  %v208_v37 = vld [vmem:[#allocation4 + $0x180] sm:$0xff] }
 0x3ef   :  { %v13946_v27 = vadd.f32 %v13945_v50, %v1771_v3  ;;  %v13947_v41 = vpop.f32.mrb[117].mxu0  ;;  %v1827_v4 = vrot.slane %v208_v37, %v19944_v59 }
 0x3f0   :  { %v18185_v19 = vcombine.low %v18177_v9, %v18184_v40  ;;  %v13948_v34 = vadd.f32 %v13947_v41, %v1775_v30  ;;  %v13949_v46 = vpop.f32.mrb[118].mxu0  ;;  %v13986_v24 = vpop.f32.mrb[116].mxu1 }
 0x3f1   :  { %v13987_v0 = vadd.f32 %v13986_v24, %v1779_v31  ;;  %v13950_v42 = vpop.f32.mrb[119].mxu0  ;;  %v13988_v52 = vpop.f32.mrb[117].mxu1  ;;  %v1823_v24 = vrot.slane %v208_v37, %v19940_v56 }
 0x3f2   :  { %18857 = vst [vmem:[%s22650_s3 + $0x2e0] sm:$0xff] %v18185_v19  ;;  %v18186_v38 = vcombine.low %v13946_v27, %v13948_v34  ;;  %v13989_v51 = vadd.f32 %v13988_v52, %v1783_v33  ;;  %v13990_v43 = vpop.f32.mrb[118].mxu1  ;;  %v1819_v19 = vrot.slane %v208_v37, %v19934_v53  ;;  %v1831_v52 = vrot.slane %v208_v37, %v19947_v61 }
 0x3f3   :  { %v13991_v45 = vpop.f32.mrb[119].mxu1 }
 0x3f4   :  { %v18194_v44 = vrot.slane %v18186_v38, %v19603_v6  ;;  %v18187_v47 = vcombine.low %v13987_v0, %v13989_v51 }
 0x3f6   :  { %v18201_v1 = vrot.slane %v18187_v47, %v19603_v6  ;;  %v14027_v54 = vpop.f32.mrb[120].mxu0 }
 0x3f7   :  { %v14028_v57 = vadd.f32 %v14027_v54, %v1787_v35  ;;  %v14029_v5 = vpop.f32.mrb[121].mxu0 }
 0x3f8   :  { %v18202_v58 = vcombine.low %v18194_v44, %v18201_v1  ;;  %v14030_v55 = vadd.f32 %v14029_v5, %v1791_v11  ;;  %v14031_v62 = vpop.f32.mrb[122].mxu0  ;;  %v14068_v60 = vpop.f32.mrb[120].mxu1  ;;  %v1835_v5 = vrot.slane %v208_v37, %v19968_v12 }
 0x3f9   :  { %v14069_v49 = vadd.f32 %v14068_v60, %v1795_v39  ;;  %v14032_v28 = vpop.f32.mrb[123].mxu0  ;;  %v14070_v15 = vpop.f32.mrb[121].mxu1  ;;  %v1839_v62 = vrot.slane %v208_v37, %v19972_v17  ;;  %v1843_v60 = vrot.slane %v208_v37, %v19976_v23 }
 0x3fa   :  { %18858 = vst [vmem:[%s22650_s3 + $0x2e8] sm:$0xff] %v18202_v58  ;;  %v18203_v8 = vcombine.low %v14028_v57, %v14030_v55  ;;  %v14071_v21 = vadd.f32 %v14070_v15, %v1799_v63  ;;  %v14072_v7 = vpop.f32.mrb[122].mxu1  ;;  %v1847_v15 = vrot.slane %v208_v37, %v19979_v29 }
 0x3fb   :  { %v14073_v16 = vpop.f32.mrb[123].mxu1 }
 0x3fc   :  { %v18211_v13 = vrot.slane %v18203_v8, %v19603_v6  ;;  %v18204_v14 = vcombine.low %v14069_v49, %v14071_v21 }
 0x3fe   :  { %v18218_v48 = vrot.slane %v18204_v14, %v19603_v6  ;;  %v14109_v2 = vpop.f32.mrb[124].mxu0  ;;  %v209_v14 = vld [vmem:[#allocation4 + $0x188] sm:$0xff] }
 0x3ff   :  { %v14110_v22 = vadd.f32 %v14109_v2, %v1803_v10  ;;  %v14111_v36 = vpop.f32.mrb[125].mxu0  ;;  %v1859_v37 = vrot.slane %v209_v14, %v19944_v59 }
 0x400   :  { %v18219_v25 = vcombine.low %v18211_v13, %v18218_v48  ;;  %v14112_v20 = vadd.f32 %v14111_v36, %v1807_v26  ;;  %v14113_v3 = vpop.f32.mrb[126].mxu0  ;;  %v14150_v9 = vpop.f32.mrb[124].mxu1 }
 0x401   :  { %v14151_v30 = vadd.f32 %v14150_v9, %v1811_v18  ;;  %v14114_v31 = vpop.f32.mrb[127].mxu0  ;;  %v14152_v40 = vpop.f32.mrb[125].mxu1  ;;  %v1855_v9 = vrot.slane %v209_v14, %v19940_v56 }
 0x402   :  { %18859 = vst [vmem:[%s22650_s3 + $0x2f0] sm:$0xff] %v18219_v25  ;;  %v18220_v50 = vcombine.low %v14110_v22, %v14112_v20  ;;  %v14153_v33 = vadd.f32 %v14152_v40, %v1815_v32  ;;  %v14154_v27 = vpop.f32.mrb[126].mxu1  ;;  %v1851_v25 = vrot.slane %v209_v14, %v19934_v53  ;;  %v1863_v40 = vrot.slane %v209_v14, %v19947_v61 }
 0x403   :  { %v14155_v41 = vpop.f32.mrb[127].mxu1 }
 0x404   :  { %v18228_v34 = vrot.slane %v18220_v50, %v19603_v6  ;;  %v18221_v46 = vcombine.low %v14151_v30, %v14153_v33 }
 0x406   :  { %v18235_v0 = vrot.slane %v18221_v46, %v19603_v6  ;;  %v14191_v42 = vpop.f32.mrb[128].mxu0 }
 0x407   :  { %v14192_v38 = vadd.f32 %v14191_v42, %v1819_v19  ;;  %v14193_v51 = vpop.f32.mrb[129].mxu0 }
 0x408   :  { %v18236_v43 = vcombine.low %v18228_v34, %v18235_v0  ;;  %v14194_v45 = vadd.f32 %v14193_v51, %v1823_v24  ;;  %v14195_v35 = vpop.f32.mrb[130].mxu0  ;;  %v14232_v44 = vpop.f32.mrb[128].mxu1  ;;  %v1867_v51 = vrot.slane %v209_v14, %v19968_v12 }
 0x409   :  { %v14233_v47 = vadd.f32 %v14232_v44, %v1827_v4  ;;  %v14196_v11 = vpop.f32.mrb[131].mxu0  ;;  %v14234_v39 = vpop.f32.mrb[129].mxu1  ;;  %v1871_v35 = vrot.slane %v209_v14, %v19972_v17  ;;  %v1875_v44 = vrot.slane %v209_v14, %v19976_v23 }
 0x40a   :  { %18860 = vst [vmem:[%s22650_s3 + $0x2f8] sm:$0xff] %v18236_v43  ;;  %v18237_v1 = vcombine.low %v14192_v38, %v14194_v45  ;;  %v14235_v54 = vadd.f32 %v14234_v39, %v1831_v52  ;;  %v14236_v63 = vpop.f32.mrb[130].mxu1  ;;  %v1879_v39 = vrot.slane %v209_v14, %v19979_v29 }
 0x40b   :  { %v14237_v57 = vpop.f32.mrb[131].mxu1 }
 0x40c   :  { %v18245_v58 = vrot.slane %v18237_v1, %v19603_v6  ;;  %v18238_v55 = vcombine.low %v14233_v47, %v14235_v54 }
 0x40e   :  { %v18252_v49 = vrot.slane %v18238_v55, %v19603_v6  ;;  %v14273_v28 = vpop.f32.mrb[132].mxu0  ;;  %v210_v55 = vld [vmem:[#allocation4 + $0x190] sm:$0xff] }
 0x40f   :  { %v14274_v8 = vadd.f32 %v14273_v28, %v1835_v5  ;;  %v14275_v21 = vpop.f32.mrb[133].mxu0  ;;  %v1891_v14 = vrot.slane %v210_v55, %v19944_v59 }
 0x410   :  { %v18253_v7 = vcombine.low %v18245_v58, %v18252_v49  ;;  %v14276_v16 = vadd.f32 %v14275_v21, %v1839_v62  ;;  %v14277_v10 = vpop.f32.mrb[134].mxu0  ;;  %v14314_v13 = vpop.f32.mrb[132].mxu1 }
 0x411   :  { %v14315_v26 = vadd.f32 %v14314_v13, %v1843_v60  ;;  %v14278_v18 = vpop.f32.mrb[135].mxu0  ;;  %v14316_v48 = vpop.f32.mrb[133].mxu1  ;;  %v1887_v13 = vrot.slane %v210_v55, %v19940_v56 }
 0x412   :  { %18861 = vst [vmem:[%s22650_s3 + $0x300] sm:$0xff] %v18253_v7  ;;  %v18254_v2 = vcombine.low %v14274_v8, %v14276_v16  ;;  %v14317_v32 = vadd.f32 %v14316_v48, %v1847_v15  ;;  %v14318_v22 = vpop.f32.mrb[134].mxu1  ;;  %v1883_v7 = vrot.slane %v210_v55, %v19934_v53  ;;  %v1895_v48 = vrot.slane %v210_v55, %v19947_v61 }
 0x413   :  { %v14319_v36 = vpop.f32.mrb[135].mxu1 }
 0x414   :  { %v18262_v20 = vrot.slane %v18254_v2, %v19603_v6  ;;  %v18255_v3 = vcombine.low %v14315_v26, %v14317_v32 }
 0x416   :  { %v18269_v30 = vrot.slane %v18255_v3, %v19603_v6  ;;  %v14355_v31 = vpop.f32.mrb[136].mxu0 }
 0x417   :  { %v14356_v50 = vadd.f32 %v14355_v31, %v1851_v25  ;;  %v14357_v33 = vpop.f32.mrb[137].mxu0 }
 0x418   :  { %v18270_v27 = vcombine.low %v18262_v20, %v18269_v30  ;;  %v14358_v41 = vadd.f32 %v14357_v33, %v1855_v9  ;;  %v14359_v19 = vpop.f32.mrb[138].mxu0  ;;  %v14396_v34 = vpop.f32.mrb[136].mxu1  ;;  %v1899_v33 = vrot.slane %v210_v55, %v19968_v12 }
 0x419   :  { %v14397_v46 = vadd.f32 %v14396_v34, %v1859_v37  ;;  %v14360_v24 = vpop.f32.mrb[139].mxu0  ;;  %v14398_v4 = vpop.f32.mrb[137].mxu1  ;;  %v1903_v19 = vrot.slane %v210_v55, %v19972_v17  ;;  %v1907_v34 = vrot.slane %v210_v55, %v19976_v23 }
 0x41a   :  { %18862 = vst [vmem:[%s22650_s3 + $0x308] sm:$0xff] %v18270_v27  ;;  %v18271_v0 = vcombine.low %v14356_v50, %v14358_v41  ;;  %v14399_v42 = vadd.f32 %v14398_v4, %v1863_v40  ;;  %v14400_v52 = vpop.f32.mrb[138].mxu1  ;;  %v1911_v4 = vrot.slane %v210_v55, %v19979_v29 }
 0x41b   :  { %v14401_v38 = vpop.f32.mrb[139].mxu1 }
 0x41c   :  { %v18279_v43 = vrot.slane %v18271_v0, %v19603_v6  ;;  %v18272_v45 = vcombine.low %v14397_v46, %v14399_v42 }
 0x41e   :  { %v18286_v47 = vrot.slane %v18272_v45, %v19603_v6  ;;  %v14437_v11 = vpop.f32.mrb[140].mxu0  ;;  %v211_v45 = vld [vmem:[#allocation4 + $0x198] sm:$0xff] }
 0x41f   :  { %v14438_v1 = vadd.f32 %v14437_v11, %v1867_v51  ;;  %v14439_v54 = vpop.f32.mrb[141].mxu0  ;;  %v1923_v55 = vrot.slane %v211_v45, %v19944_v59 }
 0x420   :  { %v18287_v63 = vcombine.low %v18279_v43, %v18286_v47  ;;  %v14440_v57 = vadd.f32 %v14439_v54, %v1871_v35  ;;  %v14441_v5 = vpop.f32.mrb[142].mxu0  ;;  %v14478_v58 = vpop.f32.mrb[140].mxu1 }
 0x421   :  { %v14479_v62 = vadd.f32 %v14478_v58, %v1875_v44  ;;  %v14442_v60 = vpop.f32.mrb[143].mxu0  ;;  %v14480_v49 = vpop.f32.mrb[141].mxu1  ;;  %v1919_v58 = vrot.slane %v211_v45, %v19940_v56 }
 0x422   :  { %18863 = vst [vmem:[%s22650_s3 + $0x310] sm:$0xff] %v18287_v63  ;;  %v18288_v28 = vcombine.low %v14438_v1, %v14440_v57  ;;  %v14481_v15 = vadd.f32 %v14480_v49, %v1879_v39  ;;  %v14482_v8 = vpop.f32.mrb[142].mxu1  ;;  %v1915_v63 = vrot.slane %v211_v45, %v19934_v53  ;;  %v1927_v49 = vrot.slane %v211_v45, %v19947_v61 }
 0x423   :  { %v14483_v21 = vpop.f32.mrb[143].mxu1 }
 0x424   :  { %v18296_v16 = vrot.slane %v18288_v28, %v19603_v6  ;;  %v18289_v10 = vcombine.low %v14479_v62, %v14481_v15 }
 0x426   :  { %v18303_v26 = vrot.slane %v18289_v10, %v19603_v6  ;;  %v14519_v18 = vpop.f32.mrb[144].mxu0 }
 0x427   :  { %v14520_v2 = vadd.f32 %v14519_v18, %v1883_v7  ;;  %v14521_v32 = vpop.f32.mrb[145].mxu0 }
 0x428   :  { %v18304_v22 = vcombine.low %v18296_v16, %v18303_v26  ;;  %v14522_v36 = vadd.f32 %v14521_v32, %v1887_v13  ;;  %v14523_v25 = vpop.f32.mrb[146].mxu0  ;;  %v14560_v20 = vpop.f32.mrb[144].mxu1  ;;  %v1931_v32 = vrot.slane %v211_v45, %v19968_v12 }
 0x429   :  { %v14561_v3 = vadd.f32 %v14560_v20, %v1891_v14  ;;  %v14524_v9 = vpop.f32.mrb[147].mxu0  ;;  %v14562_v37 = vpop.f32.mrb[145].mxu1  ;;  %v1935_v25 = vrot.slane %v211_v45, %v19972_v17  ;;  %v1939_v20 = vrot.slane %v211_v45, %v19976_v23 }
 0x42a   :  { %18864 = vst [vmem:[%s22650_s3 + $0x318] sm:$0xff] %v18304_v22  ;;  %v18305_v30 = vcombine.low %v14520_v2, %v14522_v36  ;;  %v14563_v31 = vadd.f32 %v14562_v37, %v1895_v48  ;;  %v14564_v40 = vpop.f32.mrb[146].mxu1  ;;  %v1943_v37 = vrot.slane %v211_v45, %v19979_v29 }
 0x42b   :  { %v14565_v50 = vpop.f32.mrb[147].mxu1 }
 0x42c   :  { %v18313_v27 = vrot.slane %v18305_v30, %v19603_v6  ;;  %v18306_v41 = vcombine.low %v14561_v3, %v14563_v31 }
 0x42e   :  { %v18320_v46 = vrot.slane %v18306_v41, %v19603_v6  ;;  %v14601_v24 = vpop.f32.mrb[148].mxu0  ;;  %v212_v41 = vld [vmem:[#allocation4 + $0x1a0] sm:$0xff] }
 0x42f   :  { %v14602_v0 = vadd.f32 %v14601_v24, %v1899_v33  ;;  %v14603_v42 = vpop.f32.mrb[149].mxu0  ;;  %v1955_v45 = vrot.slane %v212_v41, %v19944_v59 }
 0x430   :  { %v18321_v52 = vcombine.low %v18313_v27, %v18320_v46  ;;  %v14604_v38 = vadd.f32 %v14603_v42, %v1903_v19  ;;  %v14605_v51 = vpop.f32.mrb[150].mxu0  ;;  %v14642_v43 = vpop.f32.mrb[148].mxu1 }
 0x431   :  { %v14643_v35 = vadd.f32 %v14642_v43, %v1907_v34  ;;  %v14606_v44 = vpop.f32.mrb[151].mxu0  ;;  %v14644_v47 = vpop.f32.mrb[149].mxu1  ;;  %v1951_v43 = vrot.slane %v212_v41, %v19940_v56 }
 0x432   :  { %18865 = vst [vmem:[%s22650_s3 + $0x320] sm:$0xff] %v18321_v52  ;;  %v18322_v11 = vcombine.low %v14602_v0, %v14604_v38  ;;  %v14645_v39 = vadd.f32 %v14644_v47, %v1911_v4  ;;  %v14646_v1 = vpop.f32.mrb[150].mxu1  ;;  %v1947_v52 = vrot.slane %v212_v41, %v19934_v53  ;;  %v1959_v47 = vrot.slane %v212_v41, %v19947_v61 }
 0x433   :  { %v14647_v54 = vpop.f32.mrb[151].mxu1 }
 0x434   :  { %v18330_v57 = vrot.slane %v18322_v11, %v19603_v6  ;;  %v18323_v5 = vcombine.low %v14643_v35, %v14645_v39 }
 0x436   :  { %v18337_v62 = vrot.slane %v18323_v5, %v19603_v6  ;;  %v14683_v60 = vpop.f32.mrb[152].mxu0 }
 0x437   :  { %v14684_v28 = vadd.f32 %v14683_v60, %v1915_v63  ;;  %v14685_v15 = vpop.f32.mrb[153].mxu0 }
 0x438   :  { %v18338_v8 = vcombine.low %v18330_v57, %v18337_v62  ;;  %v14686_v21 = vadd.f32 %v14685_v15, %v1919_v58  ;;  %v14687_v7 = vpop.f32.mrb[154].mxu0  ;;  %v14724_v16 = vpop.f32.mrb[152].mxu1  ;;  %v1963_v15 = vrot.slane %v212_v41, %v19968_v12 }
 0x439   :  { %v14725_v10 = vadd.f32 %v14724_v16, %v1923_v55  ;;  %v14688_v13 = vpop.f32.mrb[155].mxu0  ;;  %v14726_v14 = vpop.f32.mrb[153].mxu1  ;;  %v1967_v7 = vrot.slane %v212_v41, %v19972_v17  ;;  %v1971_v16 = vrot.slane %v212_v41, %v19976_v23 }
 0x43a   :  { %18866 = vst [vmem:[%s22650_s3 + $0x328] sm:$0xff] %v18338_v8  ;;  %v18339_v26 = vcombine.low %v14684_v28, %v14686_v21  ;;  %v14727_v18 = vadd.f32 %v14726_v14, %v1927_v49  ;;  %v14728_v48 = vpop.f32.mrb[154].mxu1  ;;  %v1975_v14 = vrot.slane %v212_v41, %v19979_v29 }
 0x43b   :  { %v14729_v2 = vpop.f32.mrb[155].mxu1 }
 0x43c   :  { %v18347_v22 = vrot.slane %v18339_v26, %v19603_v6  ;;  %v18340_v36 = vcombine.low %v14725_v10, %v14727_v18 }
 0x43e   :  { %v18354_v3 = vrot.slane %v18340_v36, %v19603_v6  ;;  %v14765_v9 = vpop.f32.mrb[156].mxu0  ;;  %v213_v36 = vld [vmem:[#allocation4 + $0x1a8] sm:$0xff] }
 0x43f   :  { %v14766_v30 = vadd.f32 %v14765_v9, %v1931_v32  ;;  %v14767_v31 = vpop.f32.mrb[157].mxu0  ;;  %v1987_v41 = vrot.slane %v213_v36, %v19944_v59 }
 0x440   :  { %v18355_v40 = vcombine.low %v18347_v22, %v18354_v3  ;;  %v14768_v50 = vadd.f32 %v14767_v31, %v1935_v25  ;;  %v14769_v33 = vpop.f32.mrb[158].mxu0  ;;  %v14806_v27 = vpop.f32.mrb[156].mxu1 }
 0x441   :  { %v14807_v19 = vadd.f32 %v14806_v27, %v1939_v20  ;;  %v14770_v34 = vpop.f32.mrb[159].mxu0  ;;  %v14808_v46 = vpop.f32.mrb[157].mxu1  ;;  %v1983_v27 = vrot.slane %v213_v36, %v19940_v56 }
 0x442   :  { %18867 = vst [vmem:[%s22650_s3 + $0x330] sm:$0xff] %v18355_v40  ;;  %v18356_v24 = vcombine.low %v14766_v30, %v14768_v50  ;;  %v14809_v4 = vadd.f32 %v14808_v46, %v1943_v37  ;;  %v14810_v0 = vpop.f32.mrb[158].mxu1  ;;  %v1979_v40 = vrot.slane %v213_v36, %v19934_v53  ;;  %v1991_v46 = vrot.slane %v213_v36, %v19947_v61 }
 0x443   :  { %v14811_v42 = vpop.f32.mrb[159].mxu1 }
 0x444   :  { %v18364_v38 = vrot.slane %v18356_v24, %v19603_v6  ;;  %v18357_v51 = vcombine.low %v14807_v19, %v14809_v4 }
 0x446   :  { %v18371_v35 = vrot.slane %v18357_v51, %v19603_v6  ;;  %v14847_v44 = vpop.f32.mrb[160].mxu0 }
 0x447   :  { %v14848_v11 = vadd.f32 %v14847_v44, %v1947_v52  ;;  %v14849_v39 = vpop.f32.mrb[161].mxu0 }
 0x448   :  { %v18372_v1 = vcombine.low %v18364_v38, %v18371_v35  ;;  %v14850_v54 = vadd.f32 %v14849_v39, %v1951_v43  ;;  %v14851_v63 = vpop.f32.mrb[162].mxu0  ;;  %v14888_v57 = vpop.f32.mrb[160].mxu1  ;;  %v1995_v39 = vrot.slane %v213_v36, %v19968_v12 }
 0x449   :  { %v14889_v5 = vadd.f32 %v14888_v57, %v1955_v45  ;;  %v14852_v58 = vpop.f32.mrb[163].mxu0  ;;  %v14890_v55 = vpop.f32.mrb[161].mxu1  ;;  %v1999_v63 = vrot.slane %v213_v36, %v19972_v17  ;;  %v2003_v57 = vrot.slane %v213_v36, %v19976_v23 }
 0x44a   :  { %18868 = vst [vmem:[%s22650_s3 + $0x338] sm:$0xff] %v18372_v1  ;;  %v18373_v62 = vcombine.low %v14848_v11, %v14850_v54  ;;  %v14891_v60 = vadd.f32 %v14890_v55, %v1959_v47  ;;  %v14892_v49 = vpop.f32.mrb[162].mxu1  ;;  %v2007_v55 = vrot.slane %v213_v36, %v19979_v29 }
 0x44b   :  { %v14893_v28 = vpop.f32.mrb[163].mxu1 }
 0x44c   :  { %v18381_v8 = vrot.slane %v18373_v62, %v19603_v6  ;;  %v18374_v21 = vcombine.low %v14889_v5, %v14891_v60 }
 0x44e   :  { %v18388_v10 = vrot.slane %v18374_v21, %v19603_v6  ;;  %v14929_v13 = vpop.f32.mrb[164].mxu0  ;;  %v214_v21 = vld [vmem:[#allocation4 + $0x1b0] sm:$0xff] }
 0x44f   :  { %v14930_v26 = vadd.f32 %v14929_v13, %v1963_v15  ;;  %v14931_v18 = vpop.f32.mrb[165].mxu0  ;;  %v2019_v36 = vrot.slane %v214_v21, %v19944_v59 }
 0x450   :  { %v18389_v48 = vcombine.low %v18381_v8, %v18388_v10  ;;  %v14932_v2 = vadd.f32 %v14931_v18, %v1967_v7  ;;  %v14933_v32 = vpop.f32.mrb[166].mxu0  ;;  %v14970_v22 = vpop.f32.mrb[164].mxu1 }
 0x451   :  { %v14971_v25 = vadd.f32 %v14970_v22, %v1971_v16  ;;  %v14934_v20 = vpop.f32.mrb[167].mxu0  ;;  %v14972_v3 = vpop.f32.mrb[165].mxu1  ;;  %v2015_v22 = vrot.slane %v214_v21, %v19940_v56 }
 0x452   :  { %18869 = vst [vmem:[%s22650_s3 + $0x340] sm:$0xff] %v18389_v48  ;;  %v18390_v9 = vcombine.low %v14930_v26, %v14932_v2  ;;  %v14973_v37 = vadd.f32 %v14972_v3, %v1975_v14  ;;  %v14974_v30 = vpop.f32.mrb[166].mxu1  ;;  %v2011_v48 = vrot.slane %v214_v21, %v19934_v53  ;;  %v2023_v3 = vrot.slane %v214_v21, %v19947_v61 }
 0x453   :  { %v14975_v31 = vpop.f32.mrb[167].mxu1 }
 0x454   :  { %v18398_v50 = vrot.slane %v18390_v9, %v19603_v6  ;;  %v18391_v33 = vcombine.low %v14971_v25, %v14973_v37 }
 0x456   :  { %v18405_v19 = vrot.slane %v18391_v33, %v19603_v6  ;;  %v15011_v34 = vpop.f32.mrb[168].mxu0 }
 0x457   :  { %v15012_v24 = vadd.f32 %v15011_v34, %v1979_v40  ;;  %v15013_v4 = vpop.f32.mrb[169].mxu0 }
 0x458   :  { %v18406_v0 = vcombine.low %v18398_v50, %v18405_v19  ;;  %v15014_v42 = vadd.f32 %v15013_v4, %v1983_v27  ;;  %v15015_v52 = vpop.f32.mrb[170].mxu0  ;;  %v15052_v38 = vpop.f32.mrb[168].mxu1  ;;  %v2027_v4 = vrot.slane %v214_v21, %v19968_v12 }
 0x459   :  { %v15053_v51 = vadd.f32 %v15052_v38, %v1987_v41  ;;  %v15016_v43 = vpop.f32.mrb[171].mxu0  ;;  %v15054_v45 = vpop.f32.mrb[169].mxu1  ;;  %v2031_v52 = vrot.slane %v214_v21, %v19972_v17  ;;  %v2035_v38 = vrot.slane %v214_v21, %v19976_v23 }
 0x45a   :  { %18870 = vst [vmem:[%s22650_s3 + $0x348] sm:$0xff] %v18406_v0  ;;  %v18407_v35 = vcombine.low %v15012_v24, %v15014_v42  ;;  %v15055_v44 = vadd.f32 %v15054_v45, %v1991_v46  ;;  %v15056_v47 = vpop.f32.mrb[170].mxu1  ;;  %v2039_v45 = vrot.slane %v214_v21, %v19979_v29 }
 0x45b   :  { %v15057_v11 = vpop.f32.mrb[171].mxu1 }
 0x45c   :  { %v18415_v1 = vrot.slane %v18407_v35, %v19603_v6  ;;  %v18408_v54 = vcombine.low %v15053_v51, %v15055_v44 }
 0x45e   :  { %v18422_v5 = vrot.slane %v18408_v54, %v19603_v6  ;;  %v15093_v58 = vpop.f32.mrb[172].mxu0  ;;  %v215_v54 = vld [vmem:[#allocation4 + $0x1b8] sm:$0xff] }
 0x45f   :  { %v15094_v62 = vadd.f32 %v15093_v58, %v1995_v39  ;;  %v15095_v60 = vpop.f32.mrb[173].mxu0  ;;  %v2051_v21 = vrot.slane %v215_v54, %v19944_v59 }
 0x460   :  { %v18423_v49 = vcombine.low %v18415_v1, %v18422_v5  ;;  %v15096_v28 = vadd.f32 %v15095_v60, %v1999_v63  ;;  %v15097_v15 = vpop.f32.mrb[174].mxu0  ;;  %v15134_v8 = vpop.f32.mrb[172].mxu1 }
 0x461   :  { %v15135_v7 = vadd.f32 %v15134_v8, %v2003_v57  ;;  %v15098_v16 = vpop.f32.mrb[175].mxu0  ;;  %v15136_v10 = vpop.f32.mrb[173].mxu1  ;;  %v2047_v8 = vrot.slane %v215_v54, %v19940_v56 }
 0x462   :  { %18871 = vst [vmem:[%s22650_s3 + $0x350] sm:$0xff] %v18423_v49  ;;  %v18424_v13 = vcombine.low %v15094_v62, %v15096_v28  ;;  %v15137_v14 = vadd.f32 %v15136_v10, %v2007_v55  ;;  %v15138_v26 = vpop.f32.mrb[174].mxu1  ;;  %v2043_v49 = vrot.slane %v215_v54, %v19934_v53  ;;  %v2055_v10 = vrot.slane %v215_v54, %v19947_v61 }
 0x463   :  { %v15139_v18 = vpop.f32.mrb[175].mxu1 }
 0x464   :  { %v18432_v2 = vrot.slane %v18424_v13, %v19603_v6  ;;  %v18425_v32 = vcombine.low %v15135_v7, %v15137_v14 }
 0x466   :  { %v18439_v25 = vrot.slane %v18425_v32, %v19603_v6  ;;  %v15175_v20 = vpop.f32.mrb[176].mxu0 }
 0x467   :  { %v15176_v9 = vadd.f32 %v15175_v20, %v2011_v48  ;;  %v15177_v37 = vpop.f32.mrb[177].mxu0 }
 0x468   :  { %v18440_v30 = vcombine.low %v18432_v2, %v18439_v25  ;;  %v15178_v31 = vadd.f32 %v15177_v37, %v2015_v22  ;;  %v15179_v40 = vpop.f32.mrb[178].mxu0  ;;  %v15216_v50 = vpop.f32.mrb[176].mxu1  ;;  %v2059_v37 = vrot.slane %v215_v54, %v19968_v12 }
 0x469   :  { %v15217_v33 = vadd.f32 %v15216_v50, %v2019_v36  ;;  %v15180_v27 = vpop.f32.mrb[179].mxu0  ;;  %v15218_v41 = vpop.f32.mrb[177].mxu1  ;;  %v2063_v40 = vrot.slane %v215_v54, %v19972_v17  ;;  %v2067_v50 = vrot.slane %v215_v54, %v19976_v23 }
 0x46a   :  { %18872 = vst [vmem:[%s22650_s3 + $0x358] sm:$0xff] %v18440_v30  ;;  %v18441_v19 = vcombine.low %v15176_v9, %v15178_v31  ;;  %v15219_v34 = vadd.f32 %v15218_v41, %v2023_v3  ;;  %v15220_v46 = vpop.f32.mrb[178].mxu1  ;;  %v2071_v41 = vrot.slane %v215_v54, %v19979_v29 }
 0x46b   :  { %v15221_v24 = vpop.f32.mrb[179].mxu1 }
 0x46c   :  { %v18449_v0 = vrot.slane %v18441_v19, %v19603_v6  ;;  %v18442_v42 = vcombine.low %v15217_v33, %v15219_v34 }
 0x46e   :  { %v18456_v51 = vrot.slane %v18442_v42, %v19603_v6  ;;  %v15257_v43 = vpop.f32.mrb[180].mxu0  ;;  %v216_v42 = vld [vmem:[#allocation4 + $0x1c0] sm:$0xff] }
 0x46f   :  { %v15258_v35 = vadd.f32 %v15257_v43, %v2027_v4  ;;  %v15259_v44 = vpop.f32.mrb[181].mxu0  ;;  %v2083_v54 = vrot.slane %v216_v42, %v19944_v59 }
 0x470   :  { %v18457_v47 = vcombine.low %v18449_v0, %v18456_v51  ;;  %v15260_v11 = vadd.f32 %v15259_v44, %v2031_v52  ;;  %v15261_v39 = vpop.f32.mrb[182].mxu0  ;;  %v15298_v1 = vpop.f32.mrb[180].mxu1 }
 0x471   :  { %v15299_v63 = vadd.f32 %v15298_v1, %v2035_v38  ;;  %v15262_v57 = vpop.f32.mrb[183].mxu0  ;;  %v15300_v5 = vpop.f32.mrb[181].mxu1  ;;  %v2079_v1 = vrot.slane %v216_v42, %v19940_v56 }
 0x472   :  { %18873 = vst [vmem:[%s22650_s3 + $0x360] sm:$0xff] %v18457_v47  ;;  %v18458_v58 = vcombine.low %v15258_v35, %v15260_v11  ;;  %v15301_v55 = vadd.f32 %v15300_v5, %v2039_v45  ;;  %v15302_v62 = vpop.f32.mrb[182].mxu1  ;;  %v2075_v47 = vrot.slane %v216_v42, %v19934_v53  ;;  %v2087_v5 = vrot.slane %v216_v42, %v19947_v61 }
 0x473   :  { %v15303_v60 = vpop.f32.mrb[183].mxu1 }
 0x474   :  { %v18466_v28 = vrot.slane %v18458_v58, %v19603_v6  ;;  %v18459_v15 = vcombine.low %v15299_v63, %v15301_v55 }
 0x476   :  { %v18473_v7 = vrot.slane %v18459_v15, %v19603_v6  ;;  %v15339_v16 = vpop.f32.mrb[184].mxu0 }
 0x477   :  { %v15340_v13 = vadd.f32 %v15339_v16, %v2043_v49  ;;  %v15341_v14 = vpop.f32.mrb[185].mxu0 }
 0x478   :  { %v18474_v26 = vcombine.low %v18466_v28, %v18473_v7  ;;  %v15342_v18 = vadd.f32 %v15341_v14, %v2047_v8  ;;  %v15343_v48 = vpop.f32.mrb[186].mxu0  ;;  %v15380_v2 = vpop.f32.mrb[184].mxu1  ;;  %v2091_v14 = vrot.slane %v216_v42, %v19968_v12 }
 0x479   :  { %v15381_v32 = vadd.f32 %v15380_v2, %v2051_v21  ;;  %v15344_v22 = vpop.f32.mrb[187].mxu0  ;;  %v15382_v36 = vpop.f32.mrb[185].mxu1  ;;  %v2095_v48 = vrot.slane %v216_v42, %v19972_v17  ;;  %v2099_v2 = vrot.slane %v216_v42, %v19976_v23 }
 0x47a   :  { %18874 = vst [vmem:[%s22650_s3 + $0x368] sm:$0xff] %v18474_v26  ;;  %v18475_v25 = vcombine.low %v15340_v13, %v15342_v18  ;;  %v15383_v20 = vadd.f32 %v15382_v36, %v2055_v10  ;;  %v15384_v3 = vpop.f32.mrb[186].mxu1  ;;  %v2103_v36 = vrot.slane %v216_v42, %v19979_v29 }
 0x47b   :  { %v15385_v9 = vpop.f32.mrb[187].mxu1 }
 0x47c   :  { %v18483_v30 = vrot.slane %v18475_v25, %v19603_v6  ;;  %v18476_v31 = vcombine.low %v15381_v32, %v15383_v20 }
 0x47e   :  { %v18490_v33 = vrot.slane %v18476_v31, %v19603_v6  ;;  %v15421_v27 = vpop.f32.mrb[188].mxu0  ;;  %v217_v31 = vld [vmem:[#allocation4 + $0x1c8] sm:$0xff] }
 0x47f   :  { %v15422_v19 = vadd.f32 %v15421_v27, %v2059_v37  ;;  %v15423_v34 = vpop.f32.mrb[189].mxu0  ;;  %v2115_v42 = vrot.slane %v217_v31, %v19944_v59 }
 0x480   :  { %v18491_v46 = vcombine.low %v18483_v30, %v18490_v33  ;;  %v15424_v24 = vadd.f32 %v15423_v34, %v2063_v40  ;;  %v15425_v4 = vpop.f32.mrb[190].mxu0  ;;  %v15462_v0 = vpop.f32.mrb[188].mxu1 }
 0x481   :  { %v15463_v52 = vadd.f32 %v15462_v0, %v2067_v50  ;;  %v15426_v38 = vpop.f32.mrb[191].mxu0  ;;  %v15464_v51 = vpop.f32.mrb[189].mxu1  ;;  %v2111_v0 = vrot.slane %v217_v31, %v19940_v56 }
 0x482   :  { %18875 = vst [vmem:[%s22650_s3 + $0x370] sm:$0xff] %v18491_v46  ;;  %v18492_v43 = vcombine.low %v15422_v19, %v15424_v24  ;;  %v15465_v45 = vadd.f32 %v15464_v51, %v2071_v41  ;;  %v15466_v35 = vpop.f32.mrb[190].mxu1  ;;  %v2107_v46 = vrot.slane %v217_v31, %v19934_v53  ;;  %v2119_v51 = vrot.slane %v217_v31, %v19947_v61 }
 0x483   :  { %v15467_v44 = vpop.f32.mrb[191].mxu1 }
 0x484   :  { %v18500_v11 = vrot.slane %v18492_v43, %v19603_v6  ;;  %v18493_v39 = vcombine.low %v15463_v52, %v15465_v45 }
 0x486   :  { %v18507_v63 = vrot.slane %v18493_v39, %v19603_v6  ;;  %v15503_v57 = vpop.f32.mrb[192].mxu0 }
 0x487   :  { %v15504_v58 = vadd.f32 %v15503_v57, %v2075_v47  ;;  %v15505_v55 = vpop.f32.mrb[193].mxu0 }
 0x488   :  { %v18508_v62 = vcombine.low %v18500_v11, %v18507_v63  ;;  %v15506_v60 = vadd.f32 %v15505_v55, %v2079_v1  ;;  %v15507_v49 = vpop.f32.mrb[194].mxu0  ;;  %v15544_v28 = vpop.f32.mrb[192].mxu1  ;;  %v2123_v55 = vrot.slane %v217_v31, %v19968_v12 }
 0x489   :  { %v15545_v15 = vadd.f32 %v15544_v28, %v2083_v54  ;;  %v15508_v8 = vpop.f32.mrb[195].mxu0  ;;  %v15546_v21 = vpop.f32.mrb[193].mxu1  ;;  %v2127_v49 = vrot.slane %v217_v31, %v19972_v17  ;;  %v2131_v28 = vrot.slane %v217_v31, %v19976_v23 }
 0x48a   :  { %18876 = vst [vmem:[%s22650_s3 + $0x378] sm:$0xff] %v18508_v62  ;;  %v18509_v7 = vcombine.low %v15504_v58, %v15506_v60  ;;  %v15547_v16 = vadd.f32 %v15546_v21, %v2087_v5  ;;  %v15548_v10 = vpop.f32.mrb[194].mxu1  ;;  %v2135_v21 = vrot.slane %v217_v31, %v19979_v29 }
 0x48b   :  { %v15549_v13 = vpop.f32.mrb[195].mxu1 }
 0x48c   :  { %v18517_v26 = vrot.slane %v18509_v7, %v19603_v6  ;;  %v18510_v18 = vcombine.low %v15545_v15, %v15547_v16 }
 0x48e   :  { %v18524_v32 = vrot.slane %v18510_v18, %v19603_v6  ;;  %v15585_v22 = vpop.f32.mrb[196].mxu0  ;;  %v218_v18 = vld [vmem:[#allocation4 + $0x1d0] sm:$0xff] }
 0x48f   :  { %v15586_v25 = vadd.f32 %v15585_v22, %v2091_v14  ;;  %v15587_v20 = vpop.f32.mrb[197].mxu0  ;;  %v2147_v31 = vrot.slane %v218_v18, %v19944_v59 }
 0x490   :  { %v18525_v3 = vcombine.low %v18517_v26, %v18524_v32  ;;  %v15588_v9 = vadd.f32 %v15587_v20, %v2095_v48  ;;  %v15589_v37 = vpop.f32.mrb[198].mxu0  ;;  %v15626_v30 = vpop.f32.mrb[196].mxu1 }
 0x491   :  { %v15627_v40 = vadd.f32 %v15626_v30, %v2099_v2  ;;  %v15590_v50 = vpop.f32.mrb[199].mxu0  ;;  %v15628_v33 = vpop.f32.mrb[197].mxu1  ;;  %v2143_v30 = vrot.slane %v218_v18, %v19940_v56 }
 0x492   :  { %18877 = vst [vmem:[%s22650_s3 + $0x380] sm:$0xff] %v18525_v3  ;;  %v18526_v27 = vcombine.low %v15586_v25, %v15588_v9  ;;  %v15629_v41 = vadd.f32 %v15628_v33, %v2103_v36  ;;  %v15630_v19 = vpop.f32.mrb[198].mxu1  ;;  %v2139_v3 = vrot.slane %v218_v18, %v19934_v53  ;;  %v2151_v33 = vrot.slane %v218_v18, %v19947_v61 }
 0x493   :  { %v15631_v34 = vpop.f32.mrb[199].mxu1 }
 0x494   :  { %v18534_v24 = vrot.slane %v18526_v27, %v19603_v6  ;;  %v18527_v4 = vcombine.low %v15627_v40, %v15629_v41 }
 0x496   :  { %v18541_v52 = vrot.slane %v18527_v4, %v19603_v6  ;;  %v15667_v38 = vpop.f32.mrb[200].mxu0 }
 0x497   :  { %v15668_v43 = vadd.f32 %v15667_v38, %v2107_v46  ;;  %v15669_v45 = vpop.f32.mrb[201].mxu0 }
 0x498   :  { %v18542_v35 = vcombine.low %v18534_v24, %v18541_v52  ;;  %v15670_v44 = vadd.f32 %v15669_v45, %v2111_v0  ;;  %v15671_v47 = vpop.f32.mrb[202].mxu0  ;;  %v15708_v11 = vpop.f32.mrb[200].mxu1  ;;  %v2155_v45 = vrot.slane %v218_v18, %v19968_v12 }
 0x499   :  { %v15709_v39 = vadd.f32 %v15708_v11, %v2115_v42  ;;  %v15672_v1 = vpop.f32.mrb[203].mxu0  ;;  %v15710_v54 = vpop.f32.mrb[201].mxu1  ;;  %v2159_v47 = vrot.slane %v218_v18, %v19972_v17  ;;  %v2163_v11 = vrot.slane %v218_v18, %v19976_v23 }
 0x49a   :  { %18878 = vst [vmem:[%s22650_s3 + $0x388] sm:$0xff] %v18542_v35  ;;  %v18543_v63 = vcombine.low %v15668_v43, %v15670_v44  ;;  %v15711_v57 = vadd.f32 %v15710_v54, %v2119_v51  ;;  %v15712_v5 = vpop.f32.mrb[202].mxu1  ;;  %v2167_v54 = vrot.slane %v218_v18, %v19979_v29 }
 0x49b   :  { %v15713_v58 = vpop.f32.mrb[203].mxu1 }
 0x49c   :  { %v18551_v62 = vrot.slane %v18543_v63, %v19603_v6  ;;  %v18544_v60 = vcombine.low %v15709_v39, %v15711_v57 }
 0x49e   :  { %v18558_v15 = vrot.slane %v18544_v60, %v19603_v6  ;;  %v15749_v8 = vpop.f32.mrb[204].mxu0  ;;  %v219_v60 = vld [vmem:[#allocation4 + $0x1d8] sm:$0xff] }
 0x49f   :  { %v15750_v7 = vadd.f32 %v15749_v8, %v2123_v55  ;;  %v15751_v16 = vpop.f32.mrb[205].mxu0  ;;  %v2179_v18 = vrot.slane %v219_v60, %v19944_v59 }
 0x4a0   :  { %v18559_v10 = vcombine.low %v18551_v62, %v18558_v15  ;;  %v15752_v13 = vadd.f32 %v15751_v16, %v2127_v49  ;;  %v15753_v14 = vpop.f32.mrb[206].mxu0  ;;  %v15790_v26 = vpop.f32.mrb[204].mxu1 }
 0x4a1   :  { %v15791_v48 = vadd.f32 %v15790_v26, %v2131_v28  ;;  %v15754_v2 = vpop.f32.mrb[207].mxu0  ;;  %v15792_v32 = vpop.f32.mrb[205].mxu1  ;;  %v2175_v26 = vrot.slane %v219_v60, %v19940_v56 }
 0x4a2   :  { %18879 = vst [vmem:[%s22650_s3 + $0x390] sm:$0xff] %v18559_v10  ;;  %v18560_v22 = vcombine.low %v15750_v7, %v15752_v13  ;;  %v15793_v36 = vadd.f32 %v15792_v32, %v2135_v21  ;;  %v15794_v25 = vpop.f32.mrb[206].mxu1  ;;  %v2171_v10 = vrot.slane %v219_v60, %v19934_v53  ;;  %v2183_v32 = vrot.slane %v219_v60, %v19947_v61 }
 0x4a3   :  { %v15795_v20 = vpop.f32.mrb[207].mxu1 }
 0x4a4   :  { %v18568_v9 = vrot.slane %v18560_v22, %v19603_v6  ;;  %v18561_v37 = vcombine.low %v15791_v48, %v15793_v36 }
 0x4a6   :  { %v18575_v40 = vrot.slane %v18561_v37, %v19603_v6  ;;  %v15831_v50 = vpop.f32.mrb[208].mxu0 }
 0x4a7   :  { %v15832_v27 = vadd.f32 %v15831_v50, %v2139_v3  ;;  %v15833_v41 = vpop.f32.mrb[209].mxu0  ;;  %v2187_v50 = vrot.slane %v219_v60, %v19968_v12 }
 0x4a8   :  { %v18576_v19 = vcombine.low %v18568_v9, %v18575_v40  ;;  %v15834_v34 = vadd.f32 %v15833_v41, %v2143_v30  ;;  %v15835_v46 = vpop.f32.mrb[210].mxu0  ;;  %v15872_v24 = vpop.f32.mrb[208].mxu1  ;;  %v2195_v41 = vrot.slane %v219_v60, %v19976_v23 }
 0x4a9   :  { %v15873_v4 = vadd.f32 %v15872_v24, %v2147_v31  ;;  %v15836_v0 = vpop.f32.mrb[211].mxu0  ;;  %v15874_v42 = vpop.f32.mrb[209].mxu1  ;;  %v2199_v46 = vrot.slane %v219_v60, %v19979_v29 }
 0x4aa   :  { %18880 = vst [vmem:[%s22650_s3 + $0x398] sm:$0xff] %v18576_v19  ;;  %v18577_v52 = vcombine.low %v15832_v27, %v15834_v34  ;;  %v15875_v38 = vadd.f32 %v15874_v42, %v2151_v33  ;;  %v15876_v51 = vpop.f32.mrb[210].mxu1  ;;  %v2191_v27 = vrot.slane %v219_v60, %v19972_v17 }
 0x4ab   :  { %v15877_v43 = vpop.f32.mrb[211].mxu1 }
 0x4ac   :  { %v18585_v35 = vrot.slane %v18577_v52, %v19603_v6  ;;  %v18578_v44 = vcombine.low %v15873_v4, %v15875_v38 }
 0x4ae   :  { %v18592_v39 = vrot.slane %v18578_v44, %v19603_v6  ;;  %v15913_v1 = vpop.f32.mrb[212].mxu0 }
 0x4af   :  { %v15914_v63 = vadd.f32 %v15913_v1, %v2155_v45  ;;  %v15915_v57 = vpop.f32.mrb[213].mxu0 }
 0x4b0   :  { %v18593_v5 = vcombine.low %v18585_v35, %v18592_v39  ;;  %v15916_v58 = vadd.f32 %v15915_v57, %v2159_v47  ;;  %v15917_v55 = vpop.f32.mrb[214].mxu0  ;;  %v15954_v62 = vpop.f32.mrb[212].mxu1 }
 0x4b1   :  { %v15955_v49 = vadd.f32 %v15954_v62, %v2163_v11  ;;  %v15918_v28 = vpop.f32.mrb[215].mxu0  ;;  %v15956_v15 = vpop.f32.mrb[213].mxu1 }
 0x4b2   :  { %18881 = vst [vmem:[%s22650_s3 + $0x3a0] sm:$0xff] %v18593_v5  ;;  %v18594_v8 = vcombine.low %v15914_v63, %v15916_v58  ;;  %v15957_v21 = vadd.f32 %v15956_v15, %v2167_v54  ;;  %v15958_v7 = vpop.f32.mrb[214].mxu1 }
 0x4b3   :  { %v15959_v16 = vpop.f32.mrb[215].mxu1 }
 0x4b4   :  { %v18602_v13 = vrot.slane %v18594_v8, %v19603_v6  ;;  %v18595_v14 = vcombine.low %v15955_v49, %v15957_v21 }
 0x4b6   :  { %v18609_v48 = vrot.slane %v18595_v14, %v19603_v6  ;;  %v15995_v2 = vpop.f32.mrb[216].mxu0 }
 0x4b7   :  { %v15996_v22 = vadd.f32 %v15995_v2, %v2171_v10  ;;  %v15997_v36 = vpop.f32.mrb[217].mxu0 }
 0x4b8   :  { %v18610_v25 = vcombine.low %v18602_v13, %v18609_v48  ;;  %v15998_v20 = vadd.f32 %v15997_v36, %v2175_v26  ;;  %v15999_v3 = vpop.f32.mrb[218].mxu0  ;;  %v16036_v9 = vpop.f32.mrb[216].mxu1 }
 0x4b9   :  { %v16037_v37 = vadd.f32 %v16036_v9, %v2179_v18  ;;  %v16000_v53 = vpop.f32.mrb[219].mxu0  ;;  %v16038_v30 = vpop.f32.mrb[217].mxu1 }
 0x4ba   :  { %18882 = vst [vmem:[%s22650_s3 + $0x3a8] sm:$0xff] %v18610_v25  ;;  %v18611_v56 = vcombine.low %v15996_v22, %v15998_v20  ;;  %v16039_v59 = vadd.f32 %v16038_v30, %v2183_v32  ;;  %v16040_v31 = vpop.f32.mrb[218].mxu1 }
 0x4bb   :  { %v16041_v40 = vpop.f32.mrb[219].mxu1 }
 0x4bc   :  { %v18619_v61 = vrot.slane %v18611_v56, %v19603_v6  ;;  %v18612_v33 = vcombine.low %v16037_v37, %v16039_v59 }
 0x4be   :  { %v18626_v19 = vrot.slane %v18612_v33, %v19603_v6  ;;  %v16077_v34 = vpop.f32.mrb[220].mxu0 }
 0x4bf   :  { %v16078_v24 = vadd.f32 %v16077_v34, %v2187_v50  ;;  %v16079_v4 = vpop.f32.mrb[221].mxu0 }
 0x4c0   :  { %v18627_v0 = vcombine.low %v18619_v61, %v18626_v19  ;;  %v16080_v42 = vadd.f32 %v16079_v4, %v2191_v27  ;;  %v16081_v52 = vpop.f32.mrb[222].mxu0  ;;  %v16118_v38 = vpop.f32.mrb[220].mxu1 }
 0x4c1   :  { %v16119_v51 = vadd.f32 %v16118_v38, %v2195_v41  ;;  %v16082_v12 = vpop.f32.mrb[223].mxu0  ;;  %v16120_v43 = vpop.f32.mrb[221].mxu1 }
 0x4c2   :  { %18883 = vst [vmem:[%s22650_s3 + $0x3b0] sm:$0xff] %v18627_v0  ;;  %v18628_v17 = vcombine.low %v16078_v24, %v16080_v42  ;;  %v16121_v23 = vadd.f32 %v16120_v43, %v2199_v46  ;;  %v16122_v45 = vpop.f32.mrb[222].mxu1 }
 0x4c3   :  { %v16123_v35 = vpop.f32.mrb[223].mxu1 }
 0x4c4   :  { %v18636_v44 = vrot.slane %v18628_v17, %v19603_v6  ;;  %v18629_v29 = vcombine.low %v16119_v51, %v16121_v23 }
 0x4c6   :  { %v18643_v47 = vrot.slane %v18629_v29, %v19603_v6 }
 0x4c8   :  { %v18644_v11 = vcombine.low %v18636_v44, %v18643_v47 }
 0x4ca   :  { %18884 = vst [vmem:[%s22650_s3 + $0x3b8] sm:$0xff] %v18644_v11 }
 0x4cb   :  { %18889 = vsyncpa [#allocation3], 1 }
 0x4cc   :  { %18890 = vsyncpa [#allocation5], 1 }

// kernel: _forward_impl.9
= control target key start
LH: loop header
LB: loop body
LE: loop exit
PB: predicated region body
PF: predicated region fallthrough
CT: control target
= control target key end

     0   :  { %s1164_s24 = smov 0   ;;  %s1166_s25 = smov 0   ;;  %s1290_s0 = inlined_call_operand.vmem [shape: bf16[4,256,32], index: 0, kind: input, shape index: {}]   ;;  %s1291_s1 = inlined_call_operand.vmem [shape: bf16[4,32,256], index: 1, kind: input, shape index: {}]   ;;  %s1292_s2 = inlined_call_operand.vmem [shape: bf16[4,32,256], index: 2, kind: input, shape index: {}]   ;;  %s1293_s3 = inlined_call_operand.vmem [shape: f32[32,1], index: 3, kind: input, shape index: {}]   ;;  %s1294_s4 = inlined_call_operand.vmem [shape: f32[32,1], index: 4, kind: input, shape index: {}]   ;;  %s1295_s5 = inlined_call_operand.vmem [shape: f32[4,32,32], index: 5, kind: input, shape index: {}]   ;;  %s1296_s6 = inlined_call_operand.vmem [shape: f32[4,32,32], index: 6, kind: input, shape index: {}]   ;;  %s1297_s7 = inlined_call_operand.vmem [shape: f32[4,32,32], index: 7, kind: output, shape index: {}]  }
   0x1   :  { %s1168_s26 = smov 0  }
   0x2 LB: > { %s29_s27 = sadd.s32 1, %s1117_s25  ;;  %p927_p0 = scmp.ge.s32.totalorder %s1121_s26, 1  ;;  %s1121_s26 = sphi %s1168_s26, %s17_s26   ;;  %s1117_s25 = sphi %s1166_s25, %s1299_s25   ;;  %s1113_s24 = sphi %s1164_s24, %s1298_s24  }
   0x3   : > { %p31_p1 = scmp.ge.s32.totalorder %s29_s27, 4  ;;  %p306_p2 = scmp.lt.s32.totalorder %s1121_s26, 5 }
   0x5   : > { %s1301_s27 = smov (%p31_p1, %s29_s27), 0  ;;  %p307_p3 = pnand %p927_p0, %p306_p2 }
   0x6   : > { %p370_p4 = scmp.lt.s32.totalorder (!%p307_p3), %s1113_s24, 3  ;;  %v451_v0 = vld [vmem:[%s1293_s3 + $0x10] sm:$0xff] (!%p307_p3)  ;;  %v449_v1 = vld [vmem:[%s1293_s3] sm:$0xff] (!%p307_p3)  ;;  %v1123_v2 = vmov (!%p307_p3), 0   ;;  %v452_v3 = vld [vmem:[%s1293_s3 + $0x18] sm:$0xff] (!%p307_p3)  ;;  %vm775_vm0 = vcmask (!%p307_p3), 261120  }
   0x7   : > { %310 = sbr.rel (%p307_p3) target bundleno = 299 (0x12b), region = 48  ;;  %1054 = vset.pattern.permute.xlu1 (!%p307_p3), %v1123_v2  ;;  %1053 = vset.pattern.permute.xlu0 (!%p307_p3), %v1123_v2  ;;  %v450_v4 = vld [vmem:[%s1293_s3 + $0x8] sm:$0xff] (!%p307_p3)  ;;  %v650_v7 = vld [vmem:[%s1294_s4] sm:$0xff] (!%p307_p3)  ;;  %v653_v12 = vld [vmem:[%s1294_s4 + $0x18] sm:$0xff] (!%p307_p3) }
   0x8   : > { %465 = vperm.xlu1 (!%p307_p3), %1054, %v451_v0   ;;  %455 = vperm.xlu0 (!%p307_p3), %1053, %v449_v1   ;;  %v651_v6 = vld [vmem:[%s1294_s4 + $0x8] sm:$0xff] (!%p307_p3)  ;;  %v652_v13 = vld [vmem:[%s1294_s4 + $0x10] sm:$0xff] (!%p307_p3) }
   0xc   : > { %470 = vperm.xlu1 (!%p307_p3), %1054, %v452_v3   ;;  %460 = vperm.xlu0 (!%p307_p3), %1053, %v450_v4  }
   0xe   : > { %s1303_s24 = smov (!%p370_p4, %s1113_s24), 3 }
   0xf   : > { %s966_s13 = sshll.u32 %s1303_s24, 7  ;;  %s1223_s29 = sshll.u32 %s1303_s24, 5 }
  0x10   : > { %s1200_s16 = scalar_lea.vmem %s1290_s0, %s966_s13  ;;  %661 = vperm.xlu1 %1054, %v651_v6   ;;  %656 = vperm.xlu0 %1053, %v650_v7   ;;  %s1230_s9 = scalar_lea.vmem %s1291_s1, %s1223_s29 }
  0x11   : > { %v1055_v5 = vld [vmem:[%s1200_s16 + $0x40] sm:$0xff]   ;;  %v1057_v9 = vld [vmem:[%s1200_s16 + $0x48] sm:$0xff]   ;;  %v1059_v11 = vld [vmem:[%s1200_s16 + $0x50] sm:$0xff]   ;;  %s1237_s24 = scalar_lea.vmem %s1292_s2, %s1223_s29  ;;  %s1257_s14 = scalar_lea.vmem %s1295_s5, %s1223_s29 }
  0x12   : > { %v1056_v8 = vld [vmem:[%s1200_s16] sm:$0xff]   ;;  %972 = vmatprep.subr.bf16.mxu0 %v1055_v5  ;;  %1000 = vmatprep.subr.bf16.mxu1 %v1055_v5  ;;  %v1058_v10 = vld [vmem:[%s1200_s16 + $0x8] sm:$0xff]   ;;  %v1060_v14 = vld [vmem:[%s1200_s16 + $0x10] sm:$0xff]   ;;  %s1264_s17 = scalar_lea.vmem %s1296_s6, %s1223_s29  ;;  %s411_s20 = scalar_lea.vmem %s1297_s7, %s1223_s29 }
  0x13   : > { %973 = vmatpush3.bf16.msra.mxu0 %v1056_v8  ;;  %1001 = vmatpush3.bf16.msra.mxu1 %v1056_v8  ;;  %v1061_v15 = vld [vmem:[%s1200_s16 + $0x58] sm:$0xff]   ;;  %v1063_v17 = vld [vmem:[%s1200_s16 + $0x60] sm:$0xff]   ;;  %v1065_v19 = vld [vmem:[%s1200_s16 + $0x68] sm:$0xff]  }
  0x14   : > { %974 = vmatprep.subr.bf16.mxu0 %v1057_v9  ;;  %1002 = vmatprep.subr.bf16.mxu1 %v1057_v9  ;;  %v1062_v16 = vld [vmem:[%s1200_s16 + $0x18] sm:$0xff]   ;;  %v1064_v18 = vld [vmem:[%s1200_s16 + $0x20] sm:$0xff]   ;;  %v1066_v22 = vld [vmem:[%s1200_s16 + $0x28] sm:$0xff]  }
  0x15   : > { %671 = vperm.xlu1 %1054, %v653_v12   ;;  %666 = vperm.xlu0 %1053, %v652_v13   ;;  %v1073_v20 = vld [vmem:[%s1230_s9 + $0x4] ss:$8 sps:$4 sm:$0xff]   ;;  %v1067_v23 = vld [vmem:[%s1200_s16 + $0x70] sm:$0xff]   ;;  %v1069_v25 = vld [vmem:[%s1200_s16 + $0x78] sm:$0xff]  }
  0x16   : > { %v1076_v21 = vld [vmem:[%s1237_s24 + $0x4] ss:$8 sps:$4 sm:$0xff]   ;;  %621 = vmatprep.mubr.bf16.mxu0 %v1073_v20  ;;  %v1068_v24 = vld [vmem:[%s1200_s16 + $0x30] sm:$0xff]   ;;  %v1070_v26 = vld [vmem:[%s1200_s16 + $0x38] sm:$0xff]  }
  0x17   : > { %975 = vmatpush3.bf16.msra.mxu0 %v1058_v10  ;;  %1003 = vmatpush3.bf16.msra.mxu1 %v1058_v10  ;;  %v1071_v27 = vld [vmem:[%s1230_s9] ss:$8 sps:$4 sm:$0xff]   ;;  %v1077_v29 = vld [vmem:[%s1230_s9 + $0x14] ss:$8 sps:$4 sm:$0xff]   ;;  %v1081_v31 = vld [vmem:[%s1230_s9 + $0x10] ss:$8 sps:$4 sm:$0xff]  }
  0x18   : > { %976 = vmatprep.subr.bf16.mxu0 %v1059_v11  ;;  %1004 = vmatprep.subr.bf16.mxu1 %v1059_v11  ;;  %v1074_v28 = vld [vmem:[%s1237_s24] ss:$8 sps:$4 sm:$0xff]   ;;  %v1079_v30 = vld [vmem:[%s1237_s24 + $0x14] ss:$8 sps:$4 sm:$0xff]   ;;  %v1082_v32 = vld [vmem:[%s1237_s24 + $0x10] ss:$8 sps:$4 sm:$0xff]  }
  0x19   : > { %726 = vmatprep.mubr.bf16.mxu1 %v1076_v21  ;;  %v638_v45 = vld [vmem:[%s1257_s14] sm:$0xff]  ;;  %v639_v52 = vld [vmem:[%s1257_s14 + $0x8] sm:$0xff]  ;;  %v640_v8 = vld [vmem:[%s1257_s14 + $0x10] sm:$0xff] }
  0x1a   : > { %v743_v56 = vld [vmem:[%s1264_s17] sm:$0xff]  ;;  %v744_v0 = vld [vmem:[%s1264_s17 + $0x8] sm:$0xff]  ;;  %v745_v21 = vld [vmem:[%s1264_s17 + $0x10] sm:$0xff] }
  0x1b   : > { %977 = vmatpush3.bf16.msra.mxu0 %v1060_v14  ;;  %1005 = vmatpush3.bf16.msra.mxu1 %v1060_v14 }
  0x1c   : > { %978 = vmatprep.subr.bf16.mxu0 %v1061_v15  ;;  %1006 = vmatprep.subr.bf16.mxu1 %v1061_v15  ;;  %v641_v15 = vld [vmem:[%s1257_s14 + $0x18] sm:$0xff] }
  0x1f   : > { %979 = vmatpush3.bf16.msra.mxu0 %v1062_v16  ;;  %1007 = vmatpush3.bf16.msra.mxu1 %v1062_v16 }
  0x20   : > { %980 = vmatprep.subr.bf16.mxu0 %v1063_v17  ;;  %1008 = vmatprep.subr.bf16.mxu1 %v1063_v17 }
  0x23   : > { %981 = vmatpush3.bf16.msra.mxu0 %v1064_v18  ;;  %1009 = vmatpush3.bf16.msra.mxu1 %v1064_v18 }
  0x24   : > { %982 = vmatprep.subr.bf16.mxu0 %v1065_v19  ;;  %1010 = vmatprep.subr.bf16.mxu1 %v1065_v19 }
  0x27   : > { %983 = vmatpush3.bf16.msra.mxu0 %v1066_v22  ;;  %1011 = vmatpush3.bf16.msra.mxu1 %v1066_v22 }
  0x28   : > { %984 = vmatprep.subr.bf16.mxu0 %v1067_v23  ;;  %1012 = vmatprep.subr.bf16.mxu1 %v1067_v23 }
  0x2b   : > { %985 = vmatpush3.bf16.msra.mxu0 %v1068_v24  ;;  %1013 = vmatpush3.bf16.msra.mxu1 %v1068_v24 }
  0x2c   : > { %986 = vmatprep.subr.bf16.mxu0 %v1069_v25  ;;  %1014 = vmatprep.subr.bf16.mxu1 %v1069_v25  ;;  %v746_v25 = vld [vmem:[%s1264_s17 + $0x18] sm:$0xff] }
  0x2f   : > { %987 = vmatpush3.bf16.msra.mxu0 %v1070_v26  ;;  %1015 = vmatpush3.bf16.msra.mxu1 %v1070_v26 }
  0x32   : > { %622 = vmatmul.mubr.bf16.vlgmr.msra.gmra.mrb[0].mxu0 %v1071_v27  ;;  %727 = vmatmul.mubr.bf16.vlgmr.msra.gmra.mrb[0].mxu1 %v1074_v28 }
  0x33   : > { %629 = vmatprep.mubr.bf16.mxu0 %v1077_v29  ;;  %734 = vmatprep.mubr.bf16.mxu1 %v1079_v30 }
  0x3a   : > { %630 = vmatmul.mubr.bf16.gmra.mrb[4].mxu0 %v1081_v31  ;;  %735 = vmatmul.mubr.bf16.gmra.mrb[4].mxu1 %v1082_v32 }
  0x87   : > { %v456_v33 = vpop.permute.xlu0 %455  ;;  %v466_v34 = vpop.permute.xlu1 %465 }
  0x8b   : > { %v461_v35 = vpop.permute.xlu0 %460  ;;  %v471_v36 = vpop.permute.xlu1 %470 }
  0x8f   : > { %v657_v49 = vpop.permute.xlu0 %656  ;;  %v662_v57 = vpop.permute.xlu1 %661 }
  0x94   : > { %v667_v14 = vpop.permute.xlu0 %666  ;;  %v672_v20 = vpop.permute.xlu1 %671 }
 0x105   : > { %v988_v37 = vpop.f32.mrb[0].mxu0  ;;  %v1016_v38 = vpop.f32.mrb[0].mxu1 }
 0x106   : > { %v989_v39 = vpop.f32.mrb[1].mxu0  ;;  %v1017_v40 = vpop.f32.mrb[1].mxu1 }
 0x107   : > { %v990_v41 = vadd.f32 %v989_v39, %v988_v37  ;;  %v991_v42 = vpop.f32.mrb[2].mxu0  ;;  %v1018_v43 = vadd.f32 %v1017_v40, %v1016_v38  ;;  %v1019_v44 = vpop.f32.mrb[2].mxu1 }
 0x108   : > { %v992_v46 = vpop.f32.mrb[3].mxu0  ;;  %v1020_v47 = vpop.f32.mrb[3].mxu1 }
 0x109   : > { %v624_v48 = vadd.f32 %v990_v41, %v456_v33  ;;  %v993_v50 = vadd.f32 %v992_v46, %v991_v42  ;;  %v1021_v51 = vadd.f32 %v1020_v47, %v1019_v44  ;;  %v729_v53 = vadd.f32 %v1018_v43, %v657_v49 }
 0x10b   : > { %v642_v54 = vadd.f32 %v638_v45, %v624_v48  ;;  %v627_v55 = vadd.f32 %v993_v50, %v461_v35  ;;  %v732_v60 = vadd.f32 %v1021_v51, %v662_v57  ;;  %v747_v63 = vadd.f32 %v743_v56, %v729_v53 }
 0x10d   : > { %v751_v58 = vmul.f32 0.5, %v642_v54  ;;  %v643_v59 = vadd.f32 %v639_v52, %v627_v55  ;;  %v994_v61 = vpop.f32.mrb[4].mxu0  ;;  %v1022_v62 = vpop.f32.mrb[4].mxu1  ;;  %v748_v11 = vadd.f32 %v744_v0, %v732_v60 }
 0x10e   : > { %v995_v1 = vpop.f32.mrb[5].mxu0  ;;  %v1023_v2 = vpop.f32.mrb[5].mxu1 }
 0x10f   : > { %1083 = vtanh.f32 %v751_v58  ;;  %v752_v3 = vmul.f32 0.5, %v643_v59  ;;  %v996_v4 = vadd.f32 %v995_v1, %v994_v61  ;;  %v1024_v5 = vadd.f32 %v1023_v2, %v1022_v62  ;;  %v997_v6 = vpop.f32.mrb[6].mxu0  ;;  %v1025_v7 = vpop.f32.mrb[6].mxu1 }
 0x110   : > { %v998_v9 = vpop.f32.mrb[7].mxu0  ;;  %v1026_v10 = vpop.f32.mrb[7].mxu1 }
 0x111   : > { %1085 = vtanh.f32 %v752_v3  ;;  %v632_v12 = vadd.f32 %v996_v4, %v466_v34  ;;  %v999_v13 = vadd.f32 %v998_v9, %v997_v6  ;;  %v1027_v16 = vadd.f32 %v1026_v10, %v1025_v7 }
 0x112   : > { %1087 = vtanh.f32 %v747_v63  ;;  %v737_v18 = vadd.f32 %v1024_v5, %v667_v14 }
 0x113   : > { %v644_v17 = vadd.f32 %v640_v8, %v632_v12  ;;  %v635_v19 = vadd.f32 %v999_v13, %v471_v36  ;;  %1089 = vtanh.f32 %v748_v11  ;;  %v740_v24 = vadd.f32 %v1027_v16, %v672_v20 }
 0x114   : > { %v749_v26 = vadd.f32 %v745_v21, %v737_v18 }
 0x115   : > { %v753_v22 = vmul.f32 0.5, %v644_v17  ;;  %v645_v23 = vadd.f32 %v641_v15, %v635_v19  ;;  %v750_v29 = vadd.f32 %v746_v25, %v740_v24 }
 0x117   : > { %1091 = vtanh.f32 %v753_v22  ;;  %v754_v27 = vmul.f32 0.5, %v645_v23 }
 0x119   : > { %v1084_v28 = vpop.eup %1083  ;;  %1093 = vtanh.f32 %v754_v27 }
 0x11a   : > { %v759_v30 = vmul.f32 0.5, %v1084_v28  ;;  %1095 = vtanh.f32 %v749_v26 }
 0x11b   : > { %v1086_v31 = vpop.eup %1085  ;;  %1097 = vtanh.f32 %v750_v29 }
 0x11c   : > { %v763_v32 = vadd.f32 0.5, %v759_v30  ;;  %v760_v33 = vmul.f32 0.5, %v1086_v31  ;;  %v1088_v34 = vpop.eup %1087 }
 0x11d   : > { %v1090_v37 = vpop.eup %1089 }
 0x11e   : > { %v764_v35 = vadd.f32 0.5, %v760_v33  ;;  %v771_v36 = vmul.f32 %v1088_v34, %v763_v32 }
 0x120   : > { %776 = vst.msk [vmem:[%s411_s20] sm:$0xff] %vm775_vm0, %v771_v36  ;;  %v772_v38 = vmul.f32 %v1090_v37, %v764_v35 }
 0x121   : > { %v1092_v39 = vpop.eup %1091 }
 0x122   : > { %777 = vst.msk [vmem:[%s411_s20 + $0x8] sm:$0xff] %vm775_vm0, %v772_v38  ;;  %v761_v40 = vmul.f32 0.5, %v1092_v39 }
 0x123   : > { %v1094_v41 = vpop.eup %1093 }
 0x124   : > { %v765_v42 = vadd.f32 0.5, %v761_v40  ;;  %v762_v43 = vmul.f32 0.5, %v1094_v41  ;;  %v1096_v44 = vpop.eup %1095 }
 0x125   : > { %v1098_v47 = vpop.eup %1097 }
 0x126   : > { %v773_v45 = vmul.f32 %v1096_v44, %v765_v42  ;;  %v766_v46 = vadd.f32 0.5, %v762_v43 }
 0x128   : > { %778 = vst.msk [vmem:[%s411_s20 + $0x10] sm:$0xff] %vm775_vm0, %v773_v45  ;;  %v774_v48 = vmul.f32 %v1098_v47, %v766_v46 }
 0x12a   : > { %779 = vst.msk [vmem:[%s411_s20 + $0x18] sm:$0xff] %vm775_vm0, %v774_v48 }
 0x12b PF: > { %s17_s26 = sadd.s32 1, %s1121_s26   ;;  %s1298_s24 = smov %s1117_s25 }
 0x12c   : > { %p14_p5 = scmp.ge.s32.totalorder %s17_s26, 6   ;;  %s1299_s25 = smov %s1301_s27 }
 0x12e   :  { %16 = sbr.rel (!%p14_p5) target bundleno = 2 (0x2), region = 90 }

// kernel: _forward_impl.10
= control target key start
LH: loop header
LB: loop body
LE: loop exit
PB: predicated region body
PF: predicated region fallthrough
CT: control target
= control target key end

     0   :  { %s971_s24 = smov 0   ;;  %s973_s25 = smov 0   ;;  %s1048_s0 = inlined_call_operand.vmem [shape: bf16[4,128,128], index: 0, kind: input, shape index: {}]   ;;  %s1049_s1 = inlined_call_operand.vmem [shape: bf16[4,16,128], index: 1, kind: input, shape index: {}]   ;;  %s1050_s2 = inlined_call_operand.vmem [shape: bf16[4,16,128], index: 2, kind: input, shape index: {}]   ;;  %s1051_s3 = inlined_call_operand.vmem [shape: f32[16,1], index: 3, kind: input, shape index: {}]   ;;  %s1052_s4 = inlined_call_operand.vmem [shape: f32[16,1], index: 4, kind: input, shape index: {}]   ;;  %s1053_s5 = inlined_call_operand.vmem [shape: f32[4,16,128], index: 5, kind: input, shape index: {}]   ;;  %s1054_s6 = inlined_call_operand.vmem [shape: f32[4,16,128], index: 6, kind: input, shape index: {}]   ;;  %s1055_s7 = inlined_call_operand.vmem [shape: f32[4,16,128], index: 7, kind: output, shape index: {}]  }
   0x1   :  { %s975_s26 = smov 0  }
   0x2 LB: > { %s29_s27 = sadd.s32 1, %s922_s25  ;;  %p768_p0 = scmp.ge.s32.totalorder %s926_s26, 1  ;;  %s926_s26 = sphi %s975_s26, %s17_s26   ;;  %s922_s25 = sphi %s973_s25, %s1057_s25   ;;  %s918_s24 = sphi %s971_s24, %s1056_s24  }
   0x3   : > { %p31_p1 = scmp.ge.s32.totalorder %s29_s27, 4  ;;  %p306_p2 = scmp.lt.s32.totalorder %s926_s26, 5 }
   0x5   : > { %s1059_s27 = smov (%p31_p1, %s29_s27), 0  ;;  %p307_p3 = pnand %p768_p0, %p306_p2 }
   0x6   : > { %p370_p4 = scmp.lt.s32.totalorder (!%p307_p3), %s918_s24, 3  ;;  %v928_v0 = vmov (!%p307_p3), 0.0   ;;  %v431_v1 = vld [vmem:[%s1051_s3] sm:$0xff] (!%p307_p3)  ;;  %vm929_vm0 = vmmov (!%p307_p3), 0   ;;  %v930_v3 = vmov (!%p307_p3), 0   ;;  %v432_v4 = vld [vmem:[%s1051_s3 + $0x8] sm:$0xff] (!%p307_p3) }
   0x7   : > { %310 = sbr.rel (%p307_p3) target bundleno = 287 (0x11f), region = 48  ;;  %817 = vmatprep.subr.bf16.mxu0 (!%p307_p3), %v928_v0  ;;  %837 = vmatprep.subr.bf16.mxu1 (!%p307_p3), %v928_v0  ;;  %v544_v2 = vld [vmem:[%s1052_s4] sm:$0xff] (!%p307_p3)  ;;  %v545_v6 = vld [vmem:[%s1052_s4 + $0x8] sm:$0xff] (!%p307_p3) }
   0x8   : > { %833 = vmatprep.mubr.msk.bf16.mxu0 (!%p307_p3), %vm929_vm0, %v928_v0  ;;  %853 = vmatprep.mubr.msk.bf16.mxu1 (!%p307_p3), %vm929_vm0, %v928_v0 }
   0x9   : > { %884 = vset.pattern.permute.xlu0 (!%p307_p3), %v930_v3  ;;  %885 = vset.pattern.permute.xlu1 (!%p307_p3), %v930_v3 }
   0xa   : > { %435 = vperm.xlu0 (!%p307_p3), %884, %v431_v1   ;;  %548 = vperm.xlu1 (!%p307_p3), %885, %v544_v2  }
   0xe   : > { %s1061_s24 = smov (!%p370_p4, %s918_s24), 3  ;;  %440 = vperm.xlu0 %884, %v432_v4   ;;  %553 = vperm.xlu1 %885, %v545_v6  }
   0xf   : > { %s793_s9 = sshll.u32 %s1061_s24, 6  ;;  %s794_s17 = sshll.u32 %s1061_s24, 3 }
  0x10   : > { %s1001_s12 = scalar_lea.vmem %s1048_s0, %s793_s9  ;;  %s382_s20 = scalar_lea.vmem %s1049_s1, %s794_s17 }
  0x11   : > { %v886_v5 = vld [vmem:[%s1001_s12] sm:$0xff]   ;;  %v887_v7 = vld [vmem:[%s1001_s12 + $0x8] sm:$0xff]   ;;  %v888_v8 = vld [vmem:[%s1001_s12 + $0x10] sm:$0xff]   ;;  %s387_s23 = scalar_lea.vmem %s1050_s2, %s794_s17  ;;  %s1025_s28 = sshll.u32 %s1061_s24, 4 }
  0x12   : > { %818 = vmatpush3.bf16.msra.mxu0 %v886_v5  ;;  %838 = vmatpush3.bf16.msra.mxu1 %v886_v5  ;;  %v889_v9 = vld [vmem:[%s1001_s12 + $0x18] sm:$0xff]   ;;  %v890_v10 = vld [vmem:[%s1001_s12 + $0x20] sm:$0xff]   ;;  %v891_v11 = vld [vmem:[%s1001_s12 + $0x28] sm:$0xff]   ;;  %s395_s8 = scalar_lea.vmem %s1053_s5, %s1025_s28  ;;  %s403_s11 = scalar_lea.vmem %s1054_s6, %s1025_s28 }
  0x13   : > { %819 = vmatprep.subr.bf16.mxu0 %v928_v0  ;;  %839 = vmatprep.subr.bf16.mxu1 %v928_v0  ;;  %v892_v12 = vld [vmem:[%s1001_s12 + $0x30] sm:$0xff]   ;;  %v893_v13 = vld [vmem:[%s1001_s12 + $0x38] sm:$0xff]   ;;  %v894_v14 = vld [vmem:[%s382_s20] sm:$0xff]   ;;  %s411_s13 = scalar_lea.vmem %s1055_s7, %s1025_s28 }
  0x14   : > { %v895_v15 = vld [vmem:[%s387_s23] sm:$0xff]   ;;  %v539_v29 = vld [vmem:[%s395_s8 + $0x8] sm:$0xff] }
  0x15   : > { %v538_v21 = vld [vmem:[%s395_s8] sm:$0xff]  ;;  %v604_v31 = vld [vmem:[%s403_s11 + $0x8] sm:$0xff] }
  0x16   : > { %820 = vmatpush3.bf16.msra.mxu0 %v887_v7  ;;  %840 = vmatpush3.bf16.msra.mxu1 %v887_v7  ;;  %v603_v23 = vld [vmem:[%s403_s11] sm:$0xff] }
  0x17   : > { %821 = vmatprep.subr.bf16.mxu0 %v928_v0  ;;  %841 = vmatprep.subr.bf16.mxu1 %v928_v0 }
  0x1a   : > { %822 = vmatpush3.bf16.msra.mxu0 %v888_v8  ;;  %842 = vmatpush3.bf16.msra.mxu1 %v888_v8 }
  0x1b   : > { %823 = vmatprep.subr.bf16.mxu0 %v928_v0  ;;  %843 = vmatprep.subr.bf16.mxu1 %v928_v0 }
  0x1e   : > { %824 = vmatpush3.bf16.msra.mxu0 %v889_v9  ;;  %844 = vmatpush3.bf16.msra.mxu1 %v889_v9 }
  0x1f   : > { %825 = vmatprep.subr.bf16.mxu0 %v928_v0  ;;  %845 = vmatprep.subr.bf16.mxu1 %v928_v0 }
  0x22   : > { %826 = vmatpush3.bf16.msra.mxu0 %v890_v10  ;;  %846 = vmatpush3.bf16.msra.mxu1 %v890_v10 }
  0x23   : > { %827 = vmatprep.subr.bf16.mxu0 %v928_v0  ;;  %847 = vmatprep.subr.bf16.mxu1 %v928_v0 }
  0x26   : > { %828 = vmatpush3.bf16.msra.mxu0 %v891_v11  ;;  %848 = vmatpush3.bf16.msra.mxu1 %v891_v11 }
  0x27   : > { %829 = vmatprep.subr.bf16.mxu0 %v928_v0  ;;  %849 = vmatprep.subr.bf16.mxu1 %v928_v0 }
  0x2a   : > { %830 = vmatpush3.bf16.msra.mxu0 %v892_v12  ;;  %850 = vmatpush3.bf16.msra.mxu1 %v892_v12 }
  0x2b   : > { %831 = vmatprep.subr.bf16.mxu0 %v928_v0  ;;  %851 = vmatprep.subr.bf16.mxu1 %v928_v0 }
  0x2e   : > { %832 = vmatpush3.bf16.msra.mxu0 %v893_v13  ;;  %852 = vmatpush3.bf16.msra.mxu1 %v893_v13 }
  0x31   : > { %834 = vmatmul.mubr.bf16.vlgmr.msra.gmra.mrb[0].mxu0 %v894_v14  ;;  %854 = vmatmul.mubr.bf16.vlgmr.msra.gmra.mrb[0].mxu1 %v895_v15 }
  0x89   : > { %v436_v16 = vpop.permute.xlu0 %435  ;;  %v549_v17 = vpop.permute.xlu1 %548 }
  0x8d   : > { %v441_v18 = vpop.permute.xlu0 %440  ;;  %v554_v19 = vpop.permute.xlu1 %553 }
 0x104   : > { %v531_v20 = vpop.f32.mrb[0].mxu0  ;;  %v596_v22 = vpop.f32.mrb[0].mxu1 }
 0x105   : > { %v532_v24 = vadd.f32 %v531_v20, %v436_v16  ;;  %v835_v25 = vpop.f32.mrb[1].mxu0  ;;  %v597_v26 = vadd.f32 %v596_v22, %v549_v17  ;;  %v855_v27 = vpop.f32.mrb[1].mxu1 }
 0x106   : > { %v534_v28 = vpop.f32.mrb[2].mxu0  ;;  %v599_v30 = vpop.f32.mrb[2].mxu1 }
 0x107   : > { %v540_v32 = vadd.f32 %v538_v21, %v532_v24  ;;  %v535_v33 = vadd.f32 %v534_v28, %v441_v18  ;;  %v605_v34 = vadd.f32 %v603_v23, %v597_v26  ;;  %v836_v35 = vpop.f32.mrb[3].mxu0  ;;  %v600_v36 = vadd.f32 %v599_v30, %v554_v19  ;;  %v856_v37 = vpop.f32.mrb[3].mxu1 }
 0x109   : > { %v607_v38 = vmul.f32 0.5, %v540_v32  ;;  %v541_v39 = vadd.f32 %v539_v29, %v535_v33  ;;  %v606_v40 = vadd.f32 %v604_v31, %v600_v36 }
 0x10b   : > { %896 = vtanh.f32 %v607_v38  ;;  %v608_v41 = vmul.f32 0.5, %v541_v39 }
 0x10d   : > { %898 = vtanh.f32 %v608_v41 }
 0x10e   : > { %900 = vtanh.f32 %v605_v34 }
 0x10f   : > { %902 = vtanh.f32 %v606_v40 }
 0x115   : > { %v897_v42 = vpop.eup %896 }
 0x116   : > { %v611_v43 = vmul.f32 0.5, %v897_v42 }
 0x117   : > { %v899_v44 = vpop.eup %898 }
 0x118   : > { %v613_v45 = vadd.f32 0.5, %v611_v43  ;;  %v612_v46 = vmul.f32 0.5, %v899_v44  ;;  %v901_v47 = vpop.eup %900 }
 0x119   : > { %v903_v50 = vpop.eup %902 }
 0x11a   : > { %v614_v48 = vadd.f32 0.5, %v612_v46  ;;  %v617_v49 = vmul.f32 %v901_v47, %v613_v45 }
 0x11c   : > { %619 = vst [vmem:[%s411_s13] sm:$0xff] %v617_v49  ;;  %v618_v51 = vmul.f32 %v903_v50, %v614_v48 }
 0x11e   : > { %620 = vst [vmem:[%s411_s13 + $0x8] sm:$0xff] %v618_v51 }
 0x11f PF: > { %s17_s26 = sadd.s32 1, %s926_s26   ;;  %s1056_s24 = smov %s922_s25 }
 0x120   : > { %p14_p5 = scmp.ge.s32.totalorder %s17_s26, 6   ;;  %s1057_s25 = smov %s1059_s27 }
 0x122   :  { %16 = sbr.rel (!%p14_p5) target bundleno = 2 (0x2), region = 90 }

// kernel: _forward_impl.11
= control target key start
LH: loop header
LB: loop body
LE: loop exit
PB: predicated region body
PF: predicated region fallthrough
CT: control target
= control target key end

     0   :  { %s1069_s24 = smov 0   ;;  %s1071_s25 = smov 0   ;;  %s1134_s0 = inlined_call_operand.vmem [shape: bf16[4,64,512], index: 0, kind: input, shape index: {}]   ;;  %s1135_s1 = inlined_call_operand.vmem [shape: bf16[4,8,64], index: 1, kind: input, shape index: {}]   ;;  %s1136_s2 = inlined_call_operand.vmem [shape: bf16[4,8,64], index: 2, kind: input, shape index: {}]   ;;  %s1137_s3 = inlined_call_operand.vmem [shape: f32[8,1], index: 3, kind: input, shape index: {}]   ;;  %s1138_s4 = inlined_call_operand.vmem [shape: f32[8,1], index: 4, kind: input, shape index: {}]   ;;  %s1139_s5 = inlined_call_operand.vmem [shape: f32[4,8,512], index: 5, kind: input, shape index: {}]   ;;  %s1140_s6 = inlined_call_operand.vmem [shape: f32[4,8,512], index: 6, kind: input, shape index: {}]   ;;  %s1141_s7 = inlined_call_operand.vmem [shape: f32[4,8,512], index: 7, kind: output, shape index: {}]  }
   0x1   :  { %s1073_s26 = smov 0  }
   0x2 LB: > { %s29_s27 = sadd.s32 1, %s1022_s25  ;;  %p901_p0 = scmp.ge.s32.totalorder %s1026_s26, 1  ;;  %s1026_s26 = sphi %s1073_s26, %s17_s26   ;;  %s1022_s25 = sphi %s1071_s25, %s1143_s25   ;;  %s1018_s24 = sphi %s1069_s24, %s1142_s24  }
   0x3   : > { %p31_p1 = scmp.ge.s32.totalorder %s29_s27, 4  ;;  %p310_p2 = scmp.lt.s32.totalorder %s1026_s26, 5 }
   0x5   : > { %s1145_s27 = smov (%p31_p1, %s29_s27), 0  ;;  %p311_p3 = pnand %p901_p0, %p310_p2 }
   0x6   : > { %p377_p4 = scmp.lt.s32.totalorder (!%p311_p3), %s1018_s24, 3  ;;  %v442_v0 = vld [vmem:[%s1137_s3] sm:$0xff] (!%p311_p3)  ;;  %v1028_v1 = vmov (!%p311_p3), 0   ;;  %vm528_vm0 = vcmask (!%p311_p3), 523264  }
   0x7   : > { %314 = sbr.rel (%p311_p3) target bundleno = 283 (0x11b), region = 48  ;;  %564 = vmatprep.mubr.bf16.mxu0 (!%p311_p3), %v1028_v1  ;;  %605 = vmatprep.mubr.bf16.mxu1 (!%p311_p3), %v1028_v1  ;;  %v623_v2 = vld [vmem:[%s1138_s4] sm:$0xff] (!%p311_p3) }
   0x8   : > { %963 = vset.pattern.permute.xlu0 (!%p311_p3), %v1028_v1 }
   0x9   : > { %445 = vperm.xlu0 (!%p311_p3), %963, %v442_v0  }
   0xd   : > { %626 = vperm.xlu0 (!%p311_p3), %963, %v623_v2  }
   0xe   : > { %s1147_s24 = smov (!%p377_p4, %s1018_s24), 3 }
   0xf   : > { %s934_s30 = sshll.u32 %s1147_s24, 7  ;;  %s904_s13 = sshll.u32 %s1147_s24, 2 }
  0x10   : > { %s384_s12 = scalar_lea.vmem %s1134_s0, %s934_s30  ;;  %s389_s16 = scalar_lea.vmem %s1135_s1, %s904_s13 }
  0x11   : > { %v964_v3 = vld [vmem:[%s384_s12 + $0x4] ss:$16 sps:$4 sm:$0xff]   ;;  %v966_v4 = vld [vmem:[%s384_s12 + $0xc] ss:$16 sps:$4 sm:$0xff]   ;;  %v968_v5 = vld [vmem:[%s384_s12] ss:$16 sps:$4 sm:$0xff]   ;;  %s393_s19 = scalar_lea.vmem %s1136_s2, %s904_s13 }
  0x12   : > { %532 = vmatprep.subr.bf16.mxu0 %v964_v3  ;;  %v969_v6 = vld [vmem:[%s384_s12 + $0x8] ss:$16 sps:$4 sm:$0xff]   ;;  %573 = vmatprep.subr.bf16.mxu1 %v966_v4  ;;  %v970_v7 = vld [vmem:[%s384_s12 + $0x24] ss:$16 sps:$4 sm:$0xff]   ;;  %v972_v8 = vld [vmem:[%s384_s12 + $0x2c] ss:$16 sps:$4 sm:$0xff]  }
  0x13   : > { %533 = vmatpush1.bf16.msra.mxu0 %v968_v5  ;;  %574 = vmatpush1.bf16.msra.mxu1 %v969_v6  ;;  %v974_v9 = vld [vmem:[%s384_s12 + $0x20] ss:$16 sps:$4 sm:$0xff]   ;;  %v975_v10 = vld [vmem:[%s384_s12 + $0x28] ss:$16 sps:$4 sm:$0xff]   ;;  %v976_v11 = vld [vmem:[%s384_s12 + $0x44] ss:$16 sps:$4 sm:$0xff]  }
  0x14   : > { %534 = vmatprep.subr.bf16.mxu0 %v970_v7  ;;  %575 = vmatprep.subr.bf16.mxu1 %v972_v8  ;;  %v978_v12 = vld [vmem:[%s384_s12 + $0x4c] ss:$16 sps:$4 sm:$0xff]   ;;  %v980_v13 = vld [vmem:[%s384_s12 + $0x40] ss:$16 sps:$4 sm:$0xff]   ;;  %v981_v14 = vld [vmem:[%s384_s12 + $0x48] ss:$16 sps:$4 sm:$0xff]  }
  0x15   : > { %v982_v15 = vld [vmem:[%s384_s12 + $0x64] ss:$16 sps:$4 sm:$0xff]   ;;  %v984_v16 = vld [vmem:[%s384_s12 + $0x6c] ss:$16 sps:$4 sm:$0xff]   ;;  %v986_v17 = vld [vmem:[%s384_s12 + $0x60] ss:$16 sps:$4 sm:$0xff]  }
  0x16   : > { %v987_v18 = vld [vmem:[%s384_s12 + $0x68] ss:$16 sps:$4 sm:$0xff]   ;;  %v441_v19 = vld [vmem:[%s389_s16] sm:$0xf]  ;;  %s1111_s20 = sshll.u32 %s1147_s24, 5 }
  0x17   : > { %535 = vmatpush1.bf16.msra.mxu0 %v974_v9  ;;  %576 = vmatpush1.bf16.msra.mxu1 %v975_v10  ;;  %v622_v20 = vld [vmem:[%s393_s19] sm:$0xf]  ;;  %s402_s23 = scalar_lea.vmem %s1139_s5, %s1111_s20  ;;  %s412_s29 = scalar_lea.vmem %s1140_s6, %s1111_s20 }
  0x18   : > { %536 = vmatprep.subr.bf16.mxu0 %v976_v11  ;;  %577 = vmatprep.subr.bf16.mxu1 %v978_v12  ;;  %v614_v28 = vld [vmem:[%s402_s23] sm:$0xff]  ;;  %v616_v32 = vld [vmem:[%s402_s23 + $0x10] sm:$0xff]  ;;  %v615_v35 = vld [vmem:[%s402_s23 + $0x8] sm:$0xff]  ;;  %s422_s9 = scalar_lea.vmem %s1141_s7, %s1111_s20 }
  0x19   : > { %v617_v38 = vld [vmem:[%s402_s23 + $0x18] sm:$0xff]  ;;  %v714_v48 = vld [vmem:[%s412_s29] sm:$0xff]  ;;  %v716_v50 = vld [vmem:[%s412_s29 + $0x10] sm:$0xff] }
  0x1a   : > { %v715_v54 = vld [vmem:[%s412_s29 + $0x8] sm:$0xff]  ;;  %v717_v56 = vld [vmem:[%s412_s29 + $0x18] sm:$0xff] }
  0x1b   : > { %537 = vmatpush1.bf16.msra.mxu0 %v980_v13  ;;  %578 = vmatpush1.bf16.msra.mxu1 %v981_v14 }
  0x1c   : > { %538 = vmatprep.subr.bf16.mxu0 %v982_v15  ;;  %579 = vmatprep.subr.bf16.mxu1 %v984_v16 }
  0x1f   : > { %539 = vmatpush1.bf16.msra.mxu0 %v986_v17  ;;  %580 = vmatpush1.bf16.msra.mxu1 %v987_v18 }
  0x20   : > { %632 = vmatprep.subr.bf16.mxu0 %v964_v3  ;;  %673 = vmatprep.subr.bf16.mxu1 %v966_v4 }
  0x22   : > { %928 = vmatmul.mubr.msk.bf16.vlgmr.msra.gmra.mrb[0].mxu0 %vm528_vm0, %v441_v19  ;;  %929 = vmatmul.mubr.msk.bf16.vlgmr.msra.gmra.mrb[0].mxu1 %vm528_vm0, %v441_v19 }
  0x23   : > { %633 = vmatpush1.bf16.msra.mxu0 %v968_v5  ;;  %674 = vmatpush1.bf16.msra.mxu1 %v969_v6 }
  0x24   : > { %634 = vmatprep.subr.bf16.mxu0 %v970_v7  ;;  %675 = vmatprep.subr.bf16.mxu1 %v972_v8 }
  0x25   : > { %664 = vmatprep.mubr.bf16.mxu0 %v1028_v1  ;;  %705 = vmatprep.mubr.bf16.mxu1 %v1028_v1 }
  0x27   : > { %635 = vmatpush1.bf16.msra.mxu0 %v974_v9  ;;  %676 = vmatpush1.bf16.msra.mxu1 %v975_v10 }
  0x28   : > { %636 = vmatprep.subr.bf16.mxu0 %v976_v11  ;;  %677 = vmatprep.subr.bf16.mxu1 %v978_v12 }
  0x2b   : > { %637 = vmatpush1.bf16.msra.mxu0 %v980_v13  ;;  %678 = vmatpush1.bf16.msra.mxu1 %v981_v14 }
  0x2c   : > { %638 = vmatprep.subr.bf16.mxu0 %v982_v15  ;;  %679 = vmatprep.subr.bf16.mxu1 %v984_v16 }
  0x2f   : > { %639 = vmatpush1.bf16.msra.mxu0 %v986_v17  ;;  %680 = vmatpush1.bf16.msra.mxu1 %v987_v18 }
  0x32   : > { %930 = vmatmul.mubr.msk.bf16.vlgmr.msra.gmra.mrb[4].mxu0 %vm528_vm0, %v622_v20  ;;  %931 = vmatmul.mubr.msk.bf16.vlgmr.msra.gmra.mrb[4].mxu1 %vm528_vm0, %v622_v20 }
  0x88   : > { %v446_v21 = vpop.permute.xlu0 %445 }
  0x8c   : > { %v627_v46 = vpop.permute.xlu0 %626 }
  0xf5   : > { %v566_v22 = vpop.f32.mrb[0].mxu0  ;;  %v607_v23 = vpop.f32.mrb[0].mxu1 }
  0xf6   : > { %v567_v24 = vadd.f32 %v566_v22, %v446_v21  ;;  %v568_v25 = vpop.f32.mrb[1].mxu0  ;;  %v609_v26 = vpop.f32.mrb[1].mxu1  ;;  %v608_v27 = vadd.f32 %v607_v23, %v446_v21 }
  0xf7   : > { %v570_v29 = vpop.f32.mrb[2].mxu0  ;;  %v611_v30 = vpop.f32.mrb[2].mxu1  ;;  %v569_v31 = vadd.f32 %v568_v25, %v446_v21  ;;  %v610_v36 = vadd.f32 %v609_v26, %v446_v21 }
  0xf8   : > { %v571_v33 = vpop.f32.mrb[3].mxu0  ;;  %v612_v34 = vpop.f32.mrb[3].mxu1  ;;  %v618_v37 = vadd.f32 %v614_v28, %v567_v24  ;;  %v620_v39 = vadd.f32 %v616_v32, %v608_v27 }
  0xf9   : > { %v619_v40 = vadd.f32 %v615_v35, %v569_v31  ;;  %v621_v41 = vadd.f32 %v617_v38, %v610_v36 }
  0xfa   : > { %v722_v42 = vmul.f32 0.5, %v618_v37  ;;  %v724_v43 = vmul.f32 0.5, %v620_v39 }
  0xfb   : > { %v723_v44 = vmul.f32 0.5, %v619_v40  ;;  %v725_v45 = vmul.f32 0.5, %v621_v41 }
  0xfc   : > { %988 = vtanh.f32 %v722_v42 }
  0xfd   : > { %990 = vtanh.f32 %v724_v43 }
  0xfe   : > { %992 = vtanh.f32 %v723_v44 }
  0xff   : > { %994 = vtanh.f32 %v725_v45 }
 0x105   : > { %v666_v47 = vpop.f32.mrb[4].mxu0  ;;  %v707_v49 = vpop.f32.mrb[4].mxu1 }
 0x106   : > { %v667_v51 = vadd.f32 %v666_v47, %v627_v46  ;;  %v708_v52 = vadd.f32 %v707_v49, %v627_v46  ;;  %v668_v53 = vpop.f32.mrb[5].mxu0  ;;  %v709_v55 = vpop.f32.mrb[5].mxu1 }
 0x107   : > { %v669_v57 = vadd.f32 %v668_v53, %v627_v46  ;;  %v710_v58 = vadd.f32 %v709_v55, %v627_v46  ;;  %v670_v59 = vpop.f32.mrb[6].mxu0  ;;  %v711_v60 = vpop.f32.mrb[6].mxu1 }
 0x108   : > { %v718_v61 = vadd.f32 %v714_v48, %v667_v51  ;;  %v720_v62 = vadd.f32 %v716_v50, %v708_v52  ;;  %v671_v63 = vpop.f32.mrb[7].mxu0  ;;  %v712_v0 = vpop.f32.mrb[7].mxu1 }
 0x109   : > { %v719_v1 = vadd.f32 %v715_v54, %v669_v57  ;;  %v721_v2 = vadd.f32 %v717_v56, %v710_v58  ;;  %v989_v3 = vpop.eup %988 }
 0x10a   : > { %996 = vtanh.f32 %v718_v61  ;;  %v991_v4 = vpop.eup %990  ;;  %v730_v7 = vmul.f32 0.5, %v989_v3 }
 0x10b   : > { %998 = vtanh.f32 %v720_v62  ;;  %v993_v5 = vpop.eup %992  ;;  %v732_v8 = vmul.f32 0.5, %v991_v4 }
 0x10c   : > { %1000 = vtanh.f32 %v719_v1  ;;  %v995_v6 = vpop.eup %994  ;;  %v731_v9 = vmul.f32 0.5, %v993_v5  ;;  %v734_v11 = vadd.f32 0.5, %v730_v7 }
 0x10d   : > { %1002 = vtanh.f32 %v721_v2  ;;  %v733_v10 = vmul.f32 0.5, %v995_v6  ;;  %v736_v13 = vadd.f32 0.5, %v732_v8 }
 0x10e   : > { %v735_v15 = vadd.f32 0.5, %v731_v9 }
 0x10f   : > { %v737_v18 = vadd.f32 0.5, %v733_v10 }
 0x114   : > { %v997_v12 = vpop.eup %996 }
 0x115   : > { %v999_v14 = vpop.eup %998  ;;  %v742_v16 = vmul.f32 %v997_v12, %v734_v11 }
 0x116   : > { %v1001_v17 = vpop.eup %1000  ;;  %v744_v19 = vmul.f32 %v999_v14, %v736_v13 }
 0x117   : > { %v1003_v20 = vpop.eup %1002  ;;  %746 = vst [vmem:[%s422_s9] sm:$0xff] %v742_v16  ;;  %v743_v21 = vmul.f32 %v1001_v17, %v735_v15 }
 0x118   : > { %748 = vst [vmem:[%s422_s9 + $0x10] sm:$0xff] %v744_v19  ;;  %v745_v22 = vmul.f32 %v1003_v20, %v737_v18 }
 0x119   : > { %747 = vst [vmem:[%s422_s9 + $0x8] sm:$0xff] %v743_v21 }
 0x11a   : > { %749 = vst [vmem:[%s422_s9 + $0x18] sm:$0xff] %v745_v22 }
 0x11b PF: > { %s17_s26 = sadd.s32 1, %s1026_s26   ;;  %s1142_s24 = smov %s1022_s25 }
 0x11c   : > { %p14_p5 = scmp.ge.s32.totalorder %s17_s26, 6   ;;  %s1143_s25 = smov %s1145_s27 }
 0x11e   :  { %16 = sbr.rel (!%p14_p5) target bundleno = 2 (0x2), region = 90 }

// kernel: _forward_impl.12
= control target key start
LH: loop header
LB: loop body
LE: loop exit
PB: predicated region body
PF: predicated region fallthrough
CT: control target
= control target key end

     0   :  { %s1913_s24 = smov 0   ;;  %s1915_s25 = smov 0   ;;  %s2285_s0 = inlined_call_operand.vmem [shape: bf16[4,32,2048], index: 0, kind: input, shape index: {}]   ;;  %s2286_s1 = inlined_call_operand.vmem [shape: bf16[4,4,32], index: 1, kind: input, shape index: {}]   ;;  %s2287_s2 = inlined_call_operand.vmem [shape: bf16[4,4,32], index: 2, kind: input, shape index: {}]   ;;  %s2288_s3 = inlined_call_operand.vmem [shape: f32[4,1], index: 3, kind: input, shape index: {}]   ;;  %s2289_s4 = inlined_call_operand.vmem [shape: f32[4,1], index: 4, kind: input, shape index: {}]   ;;  %s2290_s5 = inlined_call_operand.vmem [shape: f32[4,4,2048], index: 5, kind: input, shape index: {}]   ;;  %s2291_s6 = inlined_call_operand.vmem [shape: f32[4,4,2048], index: 6, kind: input, shape index: {}]   ;;  %s2292_s7 = inlined_call_operand.vmem [shape: f32[4,4,2048], index: 7, kind: output, shape index: {}]  }
   0x1   :  { %s1917_s26 = smov 0  }
   0x2 LB: > { %s29_s27 = sadd.s32 1, %s1866_s25  ;;  %p1677_p0 = scmp.ge.s32.totalorder %s1870_s26, 1  ;;  %s1870_s26 = sphi %s1917_s26, %s17_s26   ;;  %s1866_s25 = sphi %s1915_s25, %s2294_s25   ;;  %s1862_s24 = sphi %s1913_s24, %s2293_s24  }
   0x3   : > { %p31_p1 = scmp.ge.s32.totalorder %s29_s27, 4  ;;  %p310_p2 = scmp.lt.s32.totalorder %s1870_s26, 5 }
   0x5   : > { %s2296_s27 = smov (%p31_p1, %s29_s27), 0  ;;  %p311_p3 = pnand %p1677_p0, %p310_p2 }
   0x6   : > { %p377_p4 = scmp.lt.s32.totalorder (!%p311_p3), %s1862_s24, 3  ;;  %v458_v0 = vld [vmem:[%s2288_s3] sm:$0xf] (!%p311_p3)  ;;  %v1872_v1 = vmov (!%p311_p3), 0   ;;  %vm624_vm0 = vcmask (!%p311_p3), 261120  }
   0x7   : > { %314 = sbr.rel (%p311_p3) target bundleno = 320 (0x140), region = 48  ;;  %660 = vmatprep.mubr.bf16.mxu0 (!%p311_p3), %v1872_v1  ;;  %701 = vmatprep.mubr.bf16.mxu1 (!%p311_p3), %v1872_v1  ;;  %v1005_v2 = vld [vmem:[%s2289_s4] sm:$0xf] (!%p311_p3) }
   0x8   : > { %1767 = vset.pattern.permute.xlu0 (!%p311_p3), %v1872_v1 }
   0x9   : > { %461 = vperm.xlu0 (!%p311_p3), %1767, %v458_v0  }
   0xd   : > { %1008 = vperm.xlu0 (!%p311_p3), %1767, %v1005_v2  }
   0xe   : > { %s2298_s24 = smov (!%p377_p4, %s1862_s24), 3 }
   0xf   : > { %s1738_s30 = sshll.u32 %s2298_s24, 8  ;;  %s1680_s13 = sshll.u32 %s2298_s24, 1 }
  0x10   : > { %s1946_s12 = scalar_lea.vmem %s2285_s0, %s1738_s30  ;;  %s389_s16 = scalar_lea.vmem %s2286_s1, %s1680_s13 }
  0x11   : > { %v425_v3 = vld [vmem:[%s1946_s12] sm:$0xff]  ;;  %v426_v5 = vld [vmem:[%s1946_s12 + $0x8] sm:$0xff]  ;;  %v427_v17 = vld [vmem:[%s1946_s12 + $0x10] sm:$0xff]  ;;  %s393_s19 = scalar_lea.vmem %s2287_s2, %s1680_s13  ;;  %s2136_s20 = sshll.u32 %s2298_s24, 6 }
  0x12   : > { %v433_v4 = vld [vmem:[%s1946_s12 + $0x40] sm:$0xff]  ;;  %v434_v7 = vld [vmem:[%s1946_s12 + $0x48] sm:$0xff]  ;;  %v435_v18 = vld [vmem:[%s1946_s12 + $0x50] sm:$0xff]  ;;  %s2144_s23 = scalar_lea.vmem %s2290_s5, %s2136_s20  ;;  %s2164_s29 = scalar_lea.vmem %s2291_s6, %s2136_s20 }
  0x13   : > { %v1951_v6 = vcombine.high %v425_v3, %v433_v4  ;;  %v1954_v8 = vcombine.low %v425_v3, %v433_v4  ;;  %v441_v9 = vld [vmem:[%s1946_s12 + $0x80] sm:$0xff]  ;;  %v1958_v11 = vcombine.high %v426_v5, %v434_v7  ;;  %v1960_v12 = vcombine.low %v426_v5, %v434_v7  ;;  %v442_v14 = vld [vmem:[%s1946_s12 + $0x88] sm:$0xff]  ;;  %v428_v19 = vld [vmem:[%s1946_s12 + $0x18] sm:$0xff]  ;;  %s2251_s9 = scalar_lea.vmem %s2292_s7, %s2136_s20 }
  0x14   : > { %v449_v10 = vld [vmem:[%s1946_s12 + $0xc0] sm:$0xff]  ;;  %v450_v15 = vld [vmem:[%s1946_s12 + $0xc8] sm:$0xff]  ;;  %v436_v21 = vld [vmem:[%s1946_s12 + $0x58] sm:$0xff]  ;;  %v1987_v23 = vcombine.high %v427_v17, %v435_v18  ;;  %v1999_v30 = vcombine.low %v427_v17, %v435_v18 }
  0x15   : > { %v1962_v13 = vcombine.high %v441_v9, %v449_v10  ;;  %628 = vmatprep.subr.bf16.mxu0 %v1951_v6  ;;  %v1968_v16 = vcombine.high %v442_v14, %v450_v15  ;;  %669 = vmatprep.subr.bf16.mxu1 %v1958_v11  ;;  %v1975_v20 = vcombine.low %v441_v9, %v449_v10  ;;  %v443_v25 = vld [vmem:[%s1946_s12 + $0x90] sm:$0xff]  ;;  %v444_v27 = vld [vmem:[%s1946_s12 + $0x98] sm:$0xff]  ;;  %v1997_v29 = vld [vmem:[%s389_s16] sm:$0x3] }
  0x16   : > { %629 = vmatpush1.bf16.msra.mxu0 %v1954_v8  ;;  %670 = vmatpush1.bf16.msra.mxu1 %v1960_v12  ;;  %v1980_v22 = vcombine.low %v442_v14, %v450_v15  ;;  %v1990_v24 = vcombine.high %v428_v19, %v436_v21  ;;  %v451_v26 = vld [vmem:[%s1946_s12 + $0xd0] sm:$0xff]  ;;  %v452_v28 = vld [vmem:[%s1946_s12 + $0xd8] sm:$0xff]  ;;  %v2003_v31 = vcombine.low %v428_v19, %v436_v21  ;;  %v429_v34 = vld [vmem:[%s1946_s12 + $0x20] sm:$0xff] }
  0x17   : > { %630 = vmatprep.subr.bf16.mxu0 %v1962_v13  ;;  %671 = vmatprep.subr.bf16.mxu1 %v1968_v16  ;;  %v2005_v32 = vcombine.high %v443_v25, %v451_v26  ;;  %v2008_v33 = vcombine.high %v444_v27, %v452_v28  ;;  %v437_v35 = vld [vmem:[%s1946_s12 + $0x60] sm:$0xff]  ;;  %v430_v36 = vld [vmem:[%s1946_s12 + $0x28] sm:$0xff]  ;;  %v2019_v38 = vcombine.low %v443_v25, %v451_v26  ;;  %v431_v50 = vld [vmem:[%s1946_s12 + $0x30] sm:$0xff] }
  0x18   : > { %v438_v37 = vld [vmem:[%s1946_s12 + $0x68] sm:$0xff]  ;;  %v2023_v39 = vcombine.low %v444_v27, %v452_v28  ;;  %v2025_v40 = vcombine.high %v429_v34, %v437_v35  ;;  %v445_v42 = vld [vmem:[%s1946_s12 + $0xa0] sm:$0xff]  ;;  %v2037_v46 = vcombine.low %v429_v34, %v437_v35  ;;  %v439_v51 = vld [vmem:[%s1946_s12 + $0x70] sm:$0xff] }
  0x19   : > { %v2029_v41 = vcombine.high %v430_v36, %v438_v37  ;;  %v453_v43 = vld [vmem:[%s1946_s12 + $0xe0] sm:$0xff]  ;;  %v446_v44 = vld [vmem:[%s1946_s12 + $0xa8] sm:$0xff]  ;;  %v2041_v47 = vcombine.low %v430_v36, %v438_v37  ;;  %v432_v52 = vld [vmem:[%s1946_s12 + $0x38] sm:$0xff]  ;;  %v2063_v56 = vcombine.high %v431_v50, %v439_v51  ;;  %v1700_v62 = vcombine.low %v431_v50, %v439_v51 }
  0x1a   : > { %631 = vmatpush1.bf16.msra.mxu0 %v1975_v20  ;;  %672 = vmatpush1.bf16.msra.mxu1 %v1980_v22  ;;  %v454_v45 = vld [vmem:[%s1946_s12 + $0xe8] sm:$0xff]  ;;  %v2043_v48 = vcombine.high %v445_v42, %v453_v43  ;;  %v440_v53 = vld [vmem:[%s1946_s12 + $0x78] sm:$0xff]  ;;  %v2057_v54 = vcombine.low %v445_v42, %v453_v43  ;;  %v447_v58 = vld [vmem:[%s1946_s12 + $0xb0] sm:$0xff] }
  0x1b   : > { %710 = vmatprep.subr.bf16.mxu0 %v1987_v23  ;;  %751 = vmatprep.subr.bf16.mxu1 %v1990_v24  ;;  %v2046_v49 = vcombine.high %v446_v44, %v454_v45  ;;  %v2061_v55 = vcombine.low %v446_v44, %v454_v45  ;;  %v2067_v57 = vcombine.high %v432_v52, %v440_v53  ;;  %v455_v59 = vld [vmem:[%s1946_s12 + $0xf0] sm:$0xff]  ;;  %v448_v60 = vld [vmem:[%s1946_s12 + $0xb8] sm:$0xff]  ;;  %v1004_v5 = vld [vmem:[%s393_s19] sm:$0x3] }
  0x1c   : > { %v456_v61 = vld [vmem:[%s1946_s12 + $0xf8] sm:$0xff]  ;;  %v1702_v63 = vcombine.low %v432_v52, %v440_v53  ;;  %v1717_v0 = vcombine.high %v447_v58, %v455_v59  ;;  %v1716_v3 = vcombine.low %v447_v58, %v455_v59  ;;  %v956_v19 = vld [vmem:[%s2144_s23] sm:$0xff] }
  0x1d   : > { %1720 = vmatmul.mubr.msk.bf16.vlgmr.msra.gmra.mrb[0].mxu0 %vm624_vm0, %v1997_v29  ;;  %1721 = vmatmul.mubr.msk.bf16.vlgmr.msra.gmra.mrb[0].mxu1 %vm624_vm0, %v1997_v29  ;;  %v1719_v2 = vcombine.high %v448_v60, %v456_v61  ;;  %v1718_v4 = vcombine.low %v448_v60, %v456_v61  ;;  %v972_v26 = vcombine.high %v956_v19, %v956_v19  ;;  %v959_v45 = vld [vmem:[%s2144_s23 + $0x18] sm:$0xff]  ;;  %v961_v60 = vld [vmem:[%s2144_s23 + $0x28] sm:$0xff]  ;;  %v2173_v61 = vld [vmem:[%s2144_s23 + $0x30] sm:$0xff] }
  0x1e   : > { %711 = vmatpush1.bf16.msra.mxu0 %v1999_v30  ;;  %752 = vmatpush1.bf16.msra.mxu1 %v2003_v31  ;;  %v975_v53 = vcombine.high %v959_v45, %v959_v45 }
  0x1f   : > { %712 = vmatprep.subr.bf16.mxu0 %v2005_v32  ;;  %753 = vmatprep.subr.bf16.mxu1 %v2008_v33 }
  0x20   : > { %742 = vmatprep.mubr.bf16.mxu0 %v1872_v1  ;;  %783 = vmatprep.mubr.bf16.mxu1 %v1872_v1 }
  0x22   : > { %713 = vmatpush1.bf16.msra.mxu0 %v2019_v38  ;;  %754 = vmatpush1.bf16.msra.mxu1 %v2023_v39 }
  0x23   : > { %792 = vmatprep.subr.bf16.mxu0 %v2025_v40  ;;  %833 = vmatprep.subr.bf16.mxu1 %v2029_v41 }
  0x25   : > { %1722 = vmatmul.mubr.msk.bf16.vlgmr.msra.gmra.mrb[4].mxu0 %vm624_vm0, %v1997_v29  ;;  %1723 = vmatmul.mubr.msk.bf16.vlgmr.msra.gmra.mrb[4].mxu1 %vm624_vm0, %v1997_v29 }
  0x26   : > { %793 = vmatpush1.bf16.msra.mxu0 %v2037_v46  ;;  %834 = vmatpush1.bf16.msra.mxu1 %v2041_v47 }
  0x27   : > { %794 = vmatprep.subr.bf16.mxu0 %v2043_v48  ;;  %835 = vmatprep.subr.bf16.mxu1 %v2046_v49 }
  0x28   : > { %824 = vmatprep.mubr.bf16.mxu0 %v1872_v1  ;;  %865 = vmatprep.mubr.bf16.mxu1 %v1872_v1 }
  0x2a   : > { %795 = vmatpush1.bf16.msra.mxu0 %v2057_v54  ;;  %836 = vmatpush1.bf16.msra.mxu1 %v2061_v55 }
  0x2b   : > { %874 = vmatprep.subr.bf16.mxu0 %v2063_v56  ;;  %915 = vmatprep.subr.bf16.mxu1 %v2067_v57 }
  0x2d   : > { %1724 = vmatmul.mubr.msk.bf16.vlgmr.msra.gmra.mrb[8].mxu0 %vm624_vm0, %v1997_v29  ;;  %1725 = vmatmul.mubr.msk.bf16.vlgmr.msra.gmra.mrb[8].mxu1 %vm624_vm0, %v1997_v29 }
  0x2e   : > { %875 = vmatpush1.bf16.msra.mxu0 %v1700_v62  ;;  %916 = vmatpush1.bf16.msra.mxu1 %v1702_v63 }
  0x2f   : > { %876 = vmatprep.subr.bf16.mxu0 %v1717_v0  ;;  %917 = vmatprep.subr.bf16.mxu1 %v1719_v2 }
  0x30   : > { %906 = vmatprep.mubr.bf16.mxu0 %v1872_v1  ;;  %947 = vmatprep.mubr.bf16.mxu1 %v1872_v1 }
  0x32   : > { %877 = vmatpush1.bf16.msra.mxu0 %v1716_v3  ;;  %918 = vmatpush1.bf16.msra.mxu1 %v1718_v4 }
  0x33   : > { %1014 = vmatprep.subr.bf16.mxu0 %v1951_v6  ;;  %1055 = vmatprep.subr.bf16.mxu1 %v1958_v11 }
  0x35   : > { %1726 = vmatmul.mubr.msk.bf16.vlgmr.msra.gmra.mrb[12].mxu0 %vm624_vm0, %v1997_v29  ;;  %1727 = vmatmul.mubr.msk.bf16.vlgmr.msra.gmra.mrb[12].mxu1 %vm624_vm0, %v1997_v29 }
  0x36   : > { %1015 = vmatpush1.bf16.msra.mxu0 %v1954_v8  ;;  %1056 = vmatpush1.bf16.msra.mxu1 %v1960_v12 }
  0x37   : > { %1016 = vmatprep.subr.bf16.mxu0 %v1962_v13  ;;  %1057 = vmatprep.subr.bf16.mxu1 %v1968_v16 }
  0x38   : > { %1046 = vmatprep.mubr.bf16.mxu0 %v1872_v1  ;;  %1087 = vmatprep.mubr.bf16.mxu1 %v1872_v1 }
  0x3a   : > { %1017 = vmatpush1.bf16.msra.mxu0 %v1975_v20  ;;  %1058 = vmatpush1.bf16.msra.mxu1 %v1980_v22 }
  0x3b   : > { %1096 = vmatprep.subr.bf16.mxu0 %v1987_v23  ;;  %1137 = vmatprep.subr.bf16.mxu1 %v1990_v24  ;;  %v957_v24 = vld [vmem:[%s2144_s23 + $0x8] sm:$0xff] }
  0x3c   : > { %v973_v29 = vcombine.high %v957_v24, %v957_v24 }
  0x3d   : > { %1728 = vmatmul.mubr.msk.bf16.vlgmr.msra.gmra.mrb[16].mxu0 %vm624_vm0, %v1004_v5  ;;  %1729 = vmatmul.mubr.msk.bf16.vlgmr.msra.gmra.mrb[16].mxu1 %vm624_vm0, %v1004_v5 }
  0x3e   : > { %1097 = vmatpush1.bf16.msra.mxu0 %v1999_v30  ;;  %1138 = vmatpush1.bf16.msra.mxu1 %v2003_v31 }
  0x3f   : > { %1098 = vmatprep.subr.bf16.mxu0 %v2005_v32  ;;  %1139 = vmatprep.subr.bf16.mxu1 %v2008_v33 }
  0x40   : > { %1128 = vmatprep.mubr.bf16.mxu0 %v1872_v1  ;;  %1169 = vmatprep.mubr.bf16.mxu1 %v1872_v1 }
  0x42   : > { %1099 = vmatpush1.bf16.msra.mxu0 %v2019_v38  ;;  %1140 = vmatpush1.bf16.msra.mxu1 %v2023_v39 }
  0x43   : > { %1178 = vmatprep.subr.bf16.mxu0 %v2025_v40  ;;  %1219 = vmatprep.subr.bf16.mxu1 %v2029_v41  ;;  %v958_v41 = vld [vmem:[%s2144_s23 + $0x10] sm:$0xff] }
  0x44   : > { %v974_v50 = vcombine.high %v958_v41, %v958_v41 }
  0x45   : > { %1730 = vmatmul.mubr.msk.bf16.vlgmr.msra.gmra.mrb[20].mxu0 %vm624_vm0, %v1004_v5  ;;  %1731 = vmatmul.mubr.msk.bf16.vlgmr.msra.gmra.mrb[20].mxu1 %vm624_vm0, %v1004_v5 }
  0x46   : > { %1179 = vmatpush1.bf16.msra.mxu0 %v2037_v46  ;;  %1220 = vmatpush1.bf16.msra.mxu1 %v2041_v47 }
  0x47   : > { %1180 = vmatprep.subr.bf16.mxu0 %v2043_v48  ;;  %1221 = vmatprep.subr.bf16.mxu1 %v2046_v49 }
  0x48   : > { %1210 = vmatprep.mubr.bf16.mxu0 %v1872_v1  ;;  %1251 = vmatprep.mubr.bf16.mxu1 %v1872_v1 }
  0x4a   : > { %1181 = vmatpush1.bf16.msra.mxu0 %v2057_v54  ;;  %1222 = vmatpush1.bf16.msra.mxu1 %v2061_v55 }
  0x4b   : > { %1260 = vmatprep.subr.bf16.mxu0 %v2063_v56  ;;  %1301 = vmatprep.subr.bf16.mxu1 %v2067_v57  ;;  %v960_v56 = vld [vmem:[%s2144_s23 + $0x20] sm:$0xff] }
  0x4d   : > { %1732 = vmatmul.mubr.msk.bf16.vlgmr.msra.gmra.mrb[24].mxu0 %vm624_vm0, %v1004_v5  ;;  %1733 = vmatmul.mubr.msk.bf16.vlgmr.msra.gmra.mrb[24].mxu1 %vm624_vm0, %v1004_v5 }
  0x4e   : > { %1261 = vmatpush1.bf16.msra.mxu0 %v1700_v62  ;;  %1302 = vmatpush1.bf16.msra.mxu1 %v1702_v63 }
  0x4f   : > { %1262 = vmatprep.subr.bf16.mxu0 %v1717_v0  ;;  %1303 = vmatprep.subr.bf16.mxu1 %v1719_v2  ;;  %v2178_v2 = vld [vmem:[%s2144_s23 + $0x38] sm:$0xff] }
  0x50   : > { %1292 = vmatprep.mubr.bf16.mxu0 %v1872_v1  ;;  %1333 = vmatprep.mubr.bf16.mxu1 %v1872_v1 }
  0x52   : > { %1263 = vmatpush1.bf16.msra.mxu0 %v1716_v3  ;;  %1304 = vmatpush1.bf16.msra.mxu1 %v1718_v4 }
  0x55   : > { %1734 = vmatmul.mubr.msk.bf16.vlgmr.msra.gmra.mrb[28].mxu0 %vm624_vm0, %v1004_v5  ;;  %1735 = vmatmul.mubr.msk.bf16.vlgmr.msra.gmra.mrb[28].mxu1 %vm624_vm0, %v1004_v5  ;;  %v1342_v5 = vld [vmem:[%s2164_s29] sm:$0xff] }
  0x88   : > { %v2138_v14 = vpop.permute.xlu0 %461 }
  0xf0   : > { %v662_v6 = vpop.f32.mrb[0].mxu0  ;;  %v703_v7 = vpop.f32.mrb[0].mxu1 }
  0xf1   : > { %v664_v8 = vpop.f32.mrb[1].mxu0  ;;  %v705_v9 = vpop.f32.mrb[1].mxu1  ;;  %v663_v23 = vadd.f32 %v662_v6, %v2138_v14  ;;  %v704_v27 = vadd.f32 %v703_v7, %v2138_v14  ;;  %v976_v7 = vcombine.high %v960_v56, %v960_v56 }
  0xf2   : > { %v666_v10 = vpop.f32.mrb[2].mxu0  ;;  %v707_v11 = vpop.f32.mrb[2].mxu1  ;;  %v665_v25 = vadd.f32 %v664_v8, %v2138_v14  ;;  %v706_v28 = vadd.f32 %v705_v9, %v2138_v14  ;;  %v1343_v9 = vld [vmem:[%s2164_s29 + $0x8] sm:$0xff] }
  0xf3   : > { %v667_v12 = vpop.f32.mrb[3].mxu0  ;;  %v708_v13 = vpop.f32.mrb[3].mxu1  ;;  %v988_v31 = vadd.f32 %v956_v19, %v663_v23  ;;  %v990_v37 = vadd.f32 %v957_v24, %v704_v27  ;;  %v2183_v10 = vld [vmem:[%s2164_s29 + $0x10] sm:$0xff]  ;;  %v979_v19 = vcombine.high %v2178_v2, %v2178_v2 }
  0xf4   : > { %v989_v34 = vadd.f32 %v972_v26, %v665_v25  ;;  %v991_v40 = vadd.f32 %v973_v29, %v706_v28  ;;  %v977_v13 = vcombine.high %v961_v60, %v961_v60  ;;  %v1359_v25 = vcombine.high %v1343_v9, %v1343_v9 }
  0xf5   : > { %v1390_v43 = vmul.f32 0.5, %v988_v31  ;;  %v1392_v48 = vmul.f32 0.5, %v990_v37  ;;  %v1360_v26 = vcombine.high %v2183_v10, %v2183_v10 }
  0xf6   : > { %v1391_v46 = vmul.f32 0.5, %v989_v34  ;;  %v1393_v51 = vmul.f32 0.5, %v991_v40 }
  0xf7   : > { %1784 = vtanh.f32 %v1390_v43 }
  0xf8   : > { %v744_v1 = vpop.f32.mrb[4].mxu0  ;;  %v785_v15 = vpop.f32.mrb[4].mxu1  ;;  %1786 = vtanh.f32 %v1391_v46 }
  0xf9   : > { %v746_v16 = vpop.f32.mrb[5].mxu0  ;;  %v787_v17 = vpop.f32.mrb[5].mxu1  ;;  %v745_v44 = vadd.f32 %v744_v1, %v2138_v14  ;;  %v786_v47 = vadd.f32 %v785_v15, %v2138_v14  ;;  %1788 = vtanh.f32 %v1392_v48  ;;  %v978_v1 = vcombine.high %v2173_v61, %v2173_v61  ;;  %v2189_v15 = vld [vmem:[%s2164_s29 + $0x18] sm:$0xff] }
  0xfa   : > { %v748_v18 = vpop.f32.mrb[6].mxu0  ;;  %v789_v20 = vpop.f32.mrb[6].mxu1  ;;  %v747_v49 = vadd.f32 %v746_v16, %v2138_v14  ;;  %v788_v52 = vadd.f32 %v787_v17, %v2138_v14  ;;  %1790 = vtanh.f32 %v1393_v51  ;;  %v2192_v16 = vld [vmem:[%s2164_s29 + $0x20] sm:$0xff] }
  0xfb   : > { %v749_v21 = vpop.f32.mrb[7].mxu0  ;;  %v790_v22 = vpop.f32.mrb[7].mxu1  ;;  %v992_v55 = vadd.f32 %v958_v41, %v745_v44  ;;  %v994_v59 = vadd.f32 %v959_v45, %v786_v47  ;;  %v1362_v31 = vcombine.high %v2192_v16, %v2192_v16 }
  0xfc   : > { %v993_v0 = vadd.f32 %v974_v50, %v747_v49  ;;  %v995_v6 = vadd.f32 %v975_v53, %v788_v52  ;;  %v2197_v20 = vpop.permute.xlu0 %1008  ;;  %v1358_v21 = vcombine.high %v1342_v5, %v1342_v5  ;;  %v2200_v22 = vld [vmem:[%s2164_s29 + $0x28] sm:$0xff] }
  0xfd   : > { %v1394_v11 = vmul.f32 0.5, %v992_v55  ;;  %v1396_v17 = vmul.f32 0.5, %v994_v59  ;;  %v1363_v37 = vcombine.high %v2200_v22, %v2200_v22 }
  0xfe   : > { %v1395_v23 = vmul.f32 0.5, %v993_v0  ;;  %v1397_v27 = vmul.f32 0.5, %v995_v6 }
  0xff   : > { %1792 = vtanh.f32 %v1394_v11 }
 0x100   : > { %v826_v30 = vpop.f32.mrb[8].mxu0  ;;  %v867_v32 = vpop.f32.mrb[8].mxu1  ;;  %1794 = vtanh.f32 %v1396_v17 }
 0x101   : > { %v828_v33 = vpop.f32.mrb[9].mxu0  ;;  %v869_v35 = vpop.f32.mrb[9].mxu1  ;;  %v827_v12 = vadd.f32 %v826_v30, %v2138_v14  ;;  %v868_v18 = vadd.f32 %v867_v32, %v2138_v14  ;;  %v1361_v30 = vcombine.high %v2189_v15, %v2189_v15  ;;  %1796 = vtanh.f32 %v1395_v23 }
 0x102   : > { %v830_v36 = vpop.f32.mrb[10].mxu0  ;;  %v871_v38 = vpop.f32.mrb[10].mxu1  ;;  %v829_v24 = vadd.f32 %v828_v33, %v2138_v14  ;;  %v870_v28 = vadd.f32 %v869_v35, %v2138_v14  ;;  %1798 = vtanh.f32 %v1397_v27 }
 0x103   : > { %v831_v39 = vpop.f32.mrb[11].mxu0  ;;  %v872_v42 = vpop.f32.mrb[11].mxu1  ;;  %v996_v32 = vadd.f32 %v960_v56, %v827_v12  ;;  %v998_v38 = vadd.f32 %v961_v60, %v868_v18 }
 0x104   : > { %v1785_v42 = vpop.eup %1784  ;;  %v997_v43 = vadd.f32 %v976_v7, %v829_v24  ;;  %v999_v49 = vadd.f32 %v977_v13, %v870_v28 }
 0x105   : > { %v1787_v48 = vpop.eup %1786  ;;  %v1398_v55 = vmul.f32 0.5, %v996_v32  ;;  %v1400_v0 = vmul.f32 0.5, %v998_v38 }
 0x106   : > { %v1789_v53 = vpop.eup %1788 }
 0x107   : > { %v1791_v60 = vpop.eup %1790  ;;  %v1424_v7 = vmul.f32 0.5, %v1789_v53 }
 0x108   : > { %v2158_v54 = vpop.f32.mrb[12].mxu0  ;;  %v2167_v57 = vpop.f32.mrb[12].mxu1  ;;  %v1425_v11 = vmul.f32 0.5, %v1791_v60 }
 0x109   : > { %v2169_v58 = vpop.f32.mrb[13].mxu0  ;;  %v2175_v62 = vpop.f32.mrb[13].mxu1  ;;  %v909_v56 = vadd.f32 %v2158_v54, %v2138_v14 }
 0x10a   : > { %v912_v63 = vpop.f32.mrb[14].mxu0  ;;  %v953_v3 = vpop.f32.mrb[14].mxu1  ;;  %v911_v6 = vadd.f32 %v2169_v58, %v2138_v14  ;;  %v952_v54 = vadd.f32 %v2175_v62, %v2138_v14 }
 0x10b   : > { %v913_v4 = vpop.f32.mrb[15].mxu0  ;;  %v954_v8 = vpop.f32.mrb[15].mxu1  ;;  %v1422_v63 = vmul.f32 0.5, %v1785_v42  ;;  %v950_v3 = vadd.f32 %v2167_v57, %v2138_v14  ;;  %v1000_v12 = vadd.f32 %v2173_v61, %v909_v56  ;;  %v1440_v42 = vadd.f32 0.5, %v1424_v7 }
 0x10c   : > { %v1423_v4 = vmul.f32 0.5, %v1787_v48  ;;  %v1401_v8 = vmul.f32 0.5, %v999_v49  ;;  %v1793_v14 = vpop.eup %1792  ;;  %v1001_v62 = vadd.f32 %v978_v1, %v911_v6 }
 0x10d   : > { %v1002_v18 = vadd.f32 %v2178_v2, %v950_v3  ;;  %v1795_v32 = vpop.eup %1794  ;;  %v1438_v38 = vadd.f32 0.5, %v1422_v63 }
 0x10e   : > { %v1797_v1 = vpop.eup %1796 }
 0x10f   : > { %v1404_v2 = vmul.f32 0.5, %v1002_v18 }
 0x110   : > { %v1048_v29 = vpop.f32.mrb[16].mxu0  ;;  %v1089_v36 = vpop.f32.mrb[16].mxu1 }
 0x111   : > { %v1049_v34 = vadd.f32 %v1048_v29, %v2197_v20  ;;  %v1050_v33 = vpop.f32.mrb[17].mxu0  ;;  %v1090_v35 = vadd.f32 %v1089_v36, %v2197_v20  ;;  %v1091_v40 = vpop.f32.mrb[17].mxu1 }
 0x112   : > { %v1051_v39 = vadd.f32 %v1050_v33, %v2197_v20  ;;  %v1052_v41 = vpop.f32.mrb[18].mxu0  ;;  %v1092_v45 = vadd.f32 %v1091_v40, %v2197_v20  ;;  %v1093_v46 = vpop.f32.mrb[18].mxu1 }
 0x113   : > { %v1374_v44 = vadd.f32 %v1342_v5, %v1049_v34  ;;  %v1053_v47 = vpop.f32.mrb[19].mxu0  ;;  %v1376_v50 = vadd.f32 %v1343_v9, %v1090_v35  ;;  %v1094_v52 = vpop.f32.mrb[19].mxu1  ;;  %v1399_v5 = vmul.f32 0.5, %v997_v43  ;;  %v1003_v34 = vadd.f32 %v979_v19, %v952_v54 }
 0x114   : > { %v1375_v51 = vadd.f32 %v1358_v21, %v1051_v39  ;;  %v1377_v59 = vadd.f32 %v1359_v25, %v1092_v45  ;;  %v1402_v35 = vmul.f32 0.5, %v1000_v12  ;;  %v1799_v40 = vpop.eup %1798  ;;  %v1439_v41 = vadd.f32 0.5, %v1423_v4 }
 0x115   : > { %1800 = vtanh.f32 %v1374_v44  ;;  %v1441_v43 = vadd.f32 0.5, %v1425_v11  ;;  %v1426_v44 = vmul.f32 0.5, %v1793_v14  ;;  %v1403_v45 = vmul.f32 0.5, %v1001_v62 }
 0x116   : > { %1802 = vtanh.f32 %v1376_v50  ;;  %v1405_v46 = vmul.f32 0.5, %v1003_v34 }
 0x117   : > { %1804 = vtanh.f32 %v1375_v51 }
 0x118   : > { %1806 = vtanh.f32 %v1377_v59  ;;  %v1130_v9 = vpop.f32.mrb[20].mxu0  ;;  %v1171_v13 = vpop.f32.mrb[20].mxu1 }
 0x119   : > { %1808 = vtanh.f32 %v1398_v55  ;;  %v1131_v57 = vadd.f32 %v1130_v9, %v2197_v20  ;;  %v1132_v17 = vpop.f32.mrb[21].mxu0  ;;  %v1172_v58 = vadd.f32 %v1171_v13, %v2197_v20  ;;  %v1173_v23 = vpop.f32.mrb[21].mxu1  ;;  %v1429_v13 = vmul.f32 0.5, %v1799_v40 }
 0x11a   : > { %1810 = vtanh.f32 %v1400_v0  ;;  %v1133_v21 = vadd.f32 %v1132_v17, %v2197_v20  ;;  %v1134_v24 = vpop.f32.mrb[22].mxu0  ;;  %v1174_v27 = vadd.f32 %v1173_v23, %v2197_v20  ;;  %v1175_v28 = vpop.f32.mrb[22].mxu1  ;;  %v1442_v23 = vadd.f32 0.5, %v1426_v44 }
 0x11b   : > { %1812 = vtanh.f32 %v1399_v5  ;;  %v1378_v25 = vadd.f32 %v2183_v10, %v1131_v57  ;;  %v1135_v29 = vpop.f32.mrb[23].mxu0  ;;  %v1380_v36 = vadd.f32 %v2189_v15, %v1172_v58  ;;  %v1176_v61 = vpop.f32.mrb[23].mxu1  ;;  %v1427_v15 = vmul.f32 0.5, %v1797_v1  ;;  %v1348_v58 = vld [vmem:[%s2164_s29 + $0x30] sm:$0xff]  ;;  %v1349_v24 = vld [vmem:[%s2164_s29 + $0x38] sm:$0xff] }
 0x11c   : > { %1814 = vtanh.f32 %v1401_v8  ;;  %v1379_v33 = vadd.f32 %v1360_v26, %v1133_v21  ;;  %v1381_v39 = vadd.f32 %v1361_v30, %v1174_v27  ;;  %v1428_v26 = vmul.f32 0.5, %v1795_v32 }
 0x11d   : > { %1816 = vtanh.f32 %v1378_v25  ;;  %v1364_v28 = vcombine.high %v1348_v58, %v1348_v58  ;;  %v1445_v32 = vadd.f32 0.5, %v1429_v13 }
 0x11e   : > { %1818 = vtanh.f32 %v1380_v36  ;;  %v1444_v62 = vadd.f32 0.5, %v1428_v26 }
 0x11f   : > { %v1801_v19 = vpop.eup %1800  ;;  %1820 = vtanh.f32 %v1379_v33  ;;  %v1365_v33 = vcombine.high %v1349_v24, %v1349_v24 }
 0x120   : > { %v1803_v10 = vpop.eup %1802  ;;  %v1470_v47 = vmul.f32 %v1801_v19, %v1438_v38  ;;  %1822 = vtanh.f32 %v1381_v39  ;;  %v1212_v48 = vpop.f32.mrb[24].mxu0 }
 0x121   : > { %v1805_v49 = vpop.eup %1804  ;;  %1824 = vtanh.f32 %v1402_v35  ;;  %v1472_v30 = vmul.f32 %v1803_v10, %v1440_v42  ;;  %v1213_v50 = vadd.f32 %v1212_v48, %v2197_v20  ;;  %v1253_v51 = vpop.f32.mrb[24].mxu1 }
 0x122   : > { %v1214_v52 = vpop.f32.mrb[25].mxu0  ;;  %v1807_v53 = vpop.eup %1806  ;;  %1826 = vtanh.f32 %v1404_v2  ;;  %v1471_v55 = vmul.f32 %v1805_v49, %v1439_v41  ;;  %v1254_v56 = vadd.f32 %v1253_v51, %v2197_v20 }
 0x123   : > { %v1215_v59 = vadd.f32 %v1214_v52, %v2197_v20  ;;  %v1255_v60 = vpop.f32.mrb[25].mxu1  ;;  %v1216_v63 = vpop.f32.mrb[26].mxu0  ;;  %1828 = vtanh.f32 %v1403_v45  ;;  %v1473_v3 = vmul.f32 %v1807_v53, %v1441_v43  ;;  %v1382_v4 = vadd.f32 %v2192_v16, %v1213_v50 }
 0x124   : > { %v1809_v0 = vpop.eup %1808  ;;  %v1256_v5 = vadd.f32 %v1255_v60, %v2197_v20  ;;  %v1257_v6 = vpop.f32.mrb[26].mxu1  ;;  %1830 = vtanh.f32 %v1405_v46  ;;  %v1502_v54 = vcombine.low %v1470_v47, %v1471_v55  ;;  %v1384_v9 = vadd.f32 %v2200_v22, %v1254_v56 }
 0x125   : > { %v1217_v7 = vpop.f32.mrb[27].mxu0  ;;  %v1811_v8 = vpop.eup %1810  ;;  %v1383_v11 = vadd.f32 %v1362_v31, %v1215_v59  ;;  %v1503_v17 = vcombine.low %v1472_v30, %v1473_v3  ;;  %1832 = vtanh.f32 %v1382_v4  ;;  %v1443_v31 = vadd.f32 0.5, %v1427_v15 }
 0x126   : > { %v1258_v12 = vpop.f32.mrb[27].mxu1  ;;  %v1813_v57 = vpop.eup %1812  ;;  %v1385_v18 = vadd.f32 %v1363_v37, %v1256_v5  ;;  %1518 = vst [vmem:[%s2251_s9] sm:$0xff] %v1502_v54  ;;  %1834 = vtanh.f32 %v1384_v9  ;;  %v1430_v1 = vmul.f32 0.5, %v1809_v0  ;;  %v1432_v2 = vmul.f32 0.5, %v1811_v8 }
 0x127   : > { %v1815_v21 = vpop.eup %1814  ;;  %1519 = vst [vmem:[%s2251_s9 + $0x8] sm:$0xff] %v1503_v17  ;;  %1836 = vtanh.f32 %v1383_v11  ;;  %v1431_v46 = vmul.f32 0.5, %v1813_v57 }
 0x128   : > { %v1817_v14 = vpop.eup %1816  ;;  %1838 = vtanh.f32 %v1385_v18  ;;  %v1294_v27 = vpop.f32.mrb[28].mxu0  ;;  %v1433_v50 = vmul.f32 0.5, %v1815_v21  ;;  %v1446_v55 = vadd.f32 0.5, %v1430_v1  ;;  %v1448_v56 = vadd.f32 0.5, %v1432_v2 }
 0x129   : > { %v1819_v16 = vpop.eup %1818  ;;  %v1474_v25 = vmul.f32 %v1817_v14, %v1442_v23  ;;  %v1295_v37 = vadd.f32 %v1294_v27, %v2197_v20  ;;  %v1335_v34 = vpop.f32.mrb[28].mxu1  ;;  %v1447_v60 = vadd.f32 0.5, %v1431_v46 }
 0x12a   : > { %v1821_v29 = vpop.eup %1820  ;;  %v1476_v22 = vmul.f32 %v1819_v16, %v1444_v62  ;;  %v1296_v36 = vpop.f32.mrb[29].mxu0  ;;  %v1336_v35 = vadd.f32 %v1335_v34, %v2197_v20  ;;  %v1449_v3 = vadd.f32 0.5, %v1433_v50 }
 0x12b   : > { %v1823_v61 = vpop.eup %1822  ;;  %v1475_v38 = vmul.f32 %v1821_v29, %v1443_v31  ;;  %v1297_v39 = vadd.f32 %v1296_v36, %v2197_v20  ;;  %v1337_v40 = vpop.f32.mrb[29].mxu1  ;;  %v1386_v43 = vadd.f32 %v1348_v58, %v1295_v37 }
 0x12c   : > { %v1298_v41 = vpop.f32.mrb[30].mxu0  ;;  %v1825_v42 = vpop.eup %1824  ;;  %v1477_v19 = vmul.f32 %v1823_v61, %v1445_v32  ;;  %v1338_v44 = vadd.f32 %v1337_v40, %v2197_v20  ;;  %v1388_v48 = vadd.f32 %v1349_v24, %v1336_v35 }
 0x12d   : > { %v1339_v45 = vpop.f32.mrb[30].mxu1  ;;  %v1299_v10 = vpop.f32.mrb[31].mxu0  ;;  %v1504_v47 = vcombine.low %v1474_v25, %v1475_v38  ;;  %v1387_v49 = vadd.f32 %v1364_v28, %v1297_v39  ;;  %1840 = vtanh.f32 %v1386_v43  ;;  %v1434_v6 = vmul.f32 0.5, %v1825_v42 }
 0x12e   : > { %v1827_v26 = vpop.eup %1826  ;;  %v1340_v15 = vpop.f32.mrb[31].mxu1  ;;  %v1505_v51 = vcombine.low %v1476_v22, %v1477_v19  ;;  %v1389_v52 = vadd.f32 %v1365_v33, %v1338_v44  ;;  %1842 = vtanh.f32 %v1388_v48 }
 0x12f   : > { %v1829_v30 = vpop.eup %1828  ;;  %1520 = vst [vmem:[%s2251_s9 + $0x10] sm:$0xff] %v1504_v47  ;;  %1844 = vtanh.f32 %v1387_v49  ;;  %v1436_v8 = vmul.f32 0.5, %v1827_v26  ;;  %v1450_v13 = vadd.f32 0.5, %v1434_v6 }
 0x130   : > { %v1831_v53 = vpop.eup %1830  ;;  %1521 = vst [vmem:[%s2251_s9 + $0x18] sm:$0xff] %v1505_v51  ;;  %1846 = vtanh.f32 %v1389_v52  ;;  %v1435_v9 = vmul.f32 0.5, %v1829_v30 }
 0x131   : > { %v1833_v20 = vpop.eup %1832  ;;  %v1437_v12 = vmul.f32 0.5, %v1831_v53  ;;  %v1452_v18 = vadd.f32 0.5, %v1436_v8 }
 0x132   : > { %v1835_v59 = vpop.eup %1834  ;;  %v1478_v63 = vmul.f32 %v1833_v20, %v1446_v55  ;;  %v1451_v21 = vadd.f32 0.5, %v1435_v9 }
 0x133   : > { %v1837_v0 = vpop.eup %1836  ;;  %v1480_v4 = vmul.f32 %v1835_v59, %v1448_v56  ;;  %v1453_v14 = vadd.f32 0.5, %v1437_v12 }
 0x134   : > { %v1839_v5 = vpop.eup %1838  ;;  %v1479_v7 = vmul.f32 %v1837_v0, %v1447_v60 }
 0x135   : > { %v1481_v54 = vmul.f32 %v1839_v5, %v1449_v3 }
 0x136   : > { %v1506_v11 = vcombine.low %v1478_v63, %v1479_v7 }
 0x137   : > { %v1507_v57 = vcombine.low %v1480_v4, %v1481_v54  ;;  %v1841_v17 = vpop.eup %1840 }
 0x138   : > { %1522 = vst [vmem:[%s2251_s9 + $0x20] sm:$0xff] %v1506_v11  ;;  %v1843_v58 = vpop.eup %1842  ;;  %v1482_v23 = vmul.f32 %v1841_v17, %v1450_v13 }
 0x139   : > { %1523 = vst [vmem:[%s2251_s9 + $0x28] sm:$0xff] %v1507_v57  ;;  %v1845_v24 = vpop.eup %1844  ;;  %v1484_v62 = vmul.f32 %v1843_v58, %v1452_v18 }
 0x13a   : > { %v1847_v16 = vpop.eup %1846  ;;  %v1483_v31 = vmul.f32 %v1845_v24, %v1451_v21 }
 0x13b   : > { %v1485_v25 = vmul.f32 %v1847_v16, %v1453_v14 }
 0x13c   : > { %v1508_v27 = vcombine.low %v1482_v23, %v1483_v31 }
 0x13d   : > { %v1509_v28 = vcombine.low %v1484_v62, %v1485_v25 }
 0x13e   : > { %1524 = vst [vmem:[%s2251_s9 + $0x30] sm:$0xff] %v1508_v27 }
 0x13f   : > { %1525 = vst [vmem:[%s2251_s9 + $0x38] sm:$0xff] %v1509_v28 }
 0x140 PF: > { %s17_s26 = sadd.s32 1, %s1870_s26   ;;  %s2293_s24 = smov %s1866_s25 }
 0x141   : > { %p14_p5 = scmp.ge.s32.totalorder %s17_s26, 6   ;;  %s2294_s25 = smov %s2296_s27 }
 0x143   :  { %16 = sbr.rel (!%p14_p5) target bundleno = 2 (0x2), region = 90 }

// kernel: _forward_impl.13
= control target key start
LH: loop header
LB: loop body
LE: loop exit
PB: predicated region body
PF: predicated region fallthrough
CT: control target
= control target key end

     0   :  { %s2759_s12 = smov 0   ;;  %s2761_s13 = smov 0   ;;  %s3068_s0 = inlined_call_operand.vmem [shape: bf16[4,16,8192], index: 0, kind: input, shape index: {}]   ;;  %s3069_s1 = inlined_call_operand.vmem [shape: bf16[4,3,16], index: 1, kind: input, shape index: {}]   ;;  %s3070_s2 = inlined_call_operand.vmem [shape: f32[3,1], index: 2, kind: input, shape index: {}]   ;;  %s3071_s3 = inlined_call_operand.vmem [shape: f32[4,3,8192], index: 3, kind: output, shape index: {}]  }
   0x1   :  { %s2763_s14 = smov 0  }
   0x2 LB: > { %s25_s15 = sadd.s32 1, %s2732_s13  ;;  %p2454_p0 = scmp.ge.s32.totalorder %s2736_s14, 1  ;;  %s2736_s14 = sphi %s2763_s14, %s13_s14   ;;  %s2732_s13 = sphi %s2761_s13, %s3073_s13   ;;  %s2728_s12 = sphi %s2759_s12, %s3072_s12  }
   0x3   : > { %p27_p1 = scmp.ge.s32.totalorder %s25_s15, 4  ;;  %p167_p2 = scmp.lt.s32.totalorder %s2736_s14, 5 }
   0x5   : > { %s3075_s15 = smov (%p27_p1, %s25_s15), 0  ;;  %p168_p3 = pnand %p2454_p0, %p167_p2 }
   0x6   : > { %p204_p4 = scmp.lt.s32.totalorder (!%p168_p3), %s2728_s12, 3  ;;  %v293_v0 = vld [vmem:[%s3070_s2] sm:$0x7] (!%p168_p3)  ;;  %v2738_v1 = vmov (!%p168_p3), 0   ;;  %vm619_vm0 = vcmask (!%p168_p3), 130048  }
   0x7   : > { %171 = sbr.rel (%p168_p3) target bundleno = 382 (0x17e), region = 32  ;;  %655 = vmatprep.mubr.bf16.mxu0 (!%p168_p3), %v2738_v1  ;;  %696 = vmatprep.mubr.bf16.mxu1 (!%p168_p3), %v2738_v1 }
   0x8   : > { %2585 = vset.pattern.permute.xlu0 (!%p168_p3), %v2738_v1 }
   0x9   : > { %296 = vperm.xlu0 (!%p168_p3), %2585, %v293_v0  }
   0xe   : > { %s3077_s12 = smov (!%p204_p4, %s2728_s12), 3 }
   0xf   : > { %s2558_s18 = sshll.u32 %s3077_s12, 9  ;;  %s2457_s19 = sshll.u32 %s3077_s12, 1 }
  0x10   : > { %s2790_s22 = scalar_lea.vmem %s3068_s0, %s2558_s18  ;;  %s216_s25 = scalar_lea.vmem %s3069_s1, %s2457_s19 }
  0x11   : > { %v229_v2 = vld [vmem:[%s2790_s22] sm:$0xff]  ;;  %v230_v4 = vld [vmem:[%s2790_s22 + $0x8] sm:$0xff]  ;;  %v231_v8 = vld [vmem:[%s2790_s22 + $0x10] sm:$0xff]  ;;  %s2559_s26 = sshll.u32 %s3077_s12, 8 }
  0x12   : > { %v261_v3 = vld [vmem:[%s2790_s22 + $0x100] sm:$0xff]  ;;  %v262_v6 = vld [vmem:[%s2790_s22 + $0x108] sm:$0xff]  ;;  %v263_v11 = vld [vmem:[%s2790_s22 + $0x110] sm:$0xff]  ;;  %s2973_s29 = scalar_lea.vmem %s3071_s3, %s2559_s26 }
  0x13   : > { %v2461_v5 = vcombine.high %v229_v2, %v261_v3  ;;  %v2460_v7 = vcombine.low %v229_v2, %v261_v3  ;;  %v2463_v9 = vcombine.high %v230_v4, %v262_v6  ;;  %v2462_v10 = vcombine.low %v230_v4, %v262_v6  ;;  %v232_v12 = vld [vmem:[%s2790_s22 + $0x18] sm:$0xff]  ;;  %v233_v16 = vld [vmem:[%s2790_s22 + $0x20] sm:$0xff]  ;;  %v234_v20 = vld [vmem:[%s2790_s22 + $0x28] sm:$0xff] }
  0x14   : > { %v264_v13 = vld [vmem:[%s2790_s22 + $0x118] sm:$0xff]  ;;  %v2465_v14 = vcombine.high %v231_v8, %v263_v11  ;;  %v265_v17 = vld [vmem:[%s2790_s22 + $0x120] sm:$0xff]  ;;  %v2464_v19 = vcombine.low %v231_v8, %v263_v11  ;;  %v266_v21 = vld [vmem:[%s2790_s22 + $0x128] sm:$0xff] }
  0x15   : > { %623 = vmatprep.subr.bf16.mxu0 %v2461_v5  ;;  %v2467_v15 = vcombine.high %v232_v12, %v264_v13  ;;  %664 = vmatprep.subr.bf16.mxu1 %v2463_v9  ;;  %v2805_v18 = vld [vmem:[%s216_s25] sm:$0x3]  ;;  %v2466_v22 = vcombine.low %v232_v12, %v264_v13  ;;  %v2469_v23 = vcombine.high %v233_v16, %v265_v17  ;;  %v235_v25 = vld [vmem:[%s2790_s22 + $0x30] sm:$0xff]  ;;  %v236_v28 = vld [vmem:[%s2790_s22 + $0x38] sm:$0xff] }
  0x16   : > { %624 = vmatpush1.bf16.msra.mxu0 %v2460_v7  ;;  %665 = vmatpush1.bf16.msra.mxu1 %v2462_v10  ;;  %v2471_v24 = vcombine.high %v234_v20, %v266_v21  ;;  %v267_v26 = vld [vmem:[%s2790_s22 + $0x130] sm:$0xff]  ;;  %v2468_v27 = vcombine.low %v233_v16, %v265_v17  ;;  %v268_v29 = vld [vmem:[%s2790_s22 + $0x138] sm:$0xff]  ;;  %v2470_v30 = vcombine.low %v234_v20, %v266_v21  ;;  %v237_v33 = vld [vmem:[%s2790_s22 + $0x40] sm:$0xff] }
  0x17   : > { %705 = vmatprep.subr.bf16.mxu0 %v2465_v14  ;;  %746 = vmatprep.subr.bf16.mxu1 %v2467_v15  ;;  %v2473_v31 = vcombine.high %v235_v25, %v267_v26  ;;  %v2475_v32 = vcombine.high %v236_v28, %v268_v29  ;;  %v269_v34 = vld [vmem:[%s2790_s22 + $0x140] sm:$0xff]  ;;  %v2472_v35 = vcombine.low %v235_v25, %v267_v26  ;;  %v238_v36 = vld [vmem:[%s2790_s22 + $0x48] sm:$0xff]  ;;  %v239_v41 = vld [vmem:[%s2790_s22 + $0x50] sm:$0xff] }
  0x18   : > { %v270_v37 = vld [vmem:[%s2790_s22 + $0x148] sm:$0xff]  ;;  %v2474_v38 = vcombine.low %v236_v28, %v268_v29  ;;  %v2477_v39 = vcombine.high %v237_v33, %v269_v34  ;;  %v271_v42 = vld [vmem:[%s2790_s22 + $0x150] sm:$0xff]  ;;  %v2476_v43 = vcombine.low %v237_v33, %v269_v34  ;;  %v240_v44 = vld [vmem:[%s2790_s22 + $0x58] sm:$0xff] }
  0x19   : > { %2524 = vmatmul.mubr.msk.bf16.vlgmr.msra.gmra.mrb[0].mxu0 %vm619_vm0, %v2805_v18  ;;  %2525 = vmatmul.mubr.msk.bf16.vlgmr.msra.gmra.mrb[0].mxu1 %vm619_vm0, %v2805_v18  ;;  %v2479_v40 = vcombine.high %v238_v36, %v270_v37  ;;  %v272_v45 = vld [vmem:[%s2790_s22 + $0x158] sm:$0xff]  ;;  %v2478_v46 = vcombine.low %v238_v36, %v270_v37  ;;  %v2481_v47 = vcombine.high %v239_v41, %v271_v42  ;;  %v241_v49 = vld [vmem:[%s2790_s22 + $0x60] sm:$0xff]  ;;  %v242_v52 = vld [vmem:[%s2790_s22 + $0x68] sm:$0xff] }
  0x1a   : > { %706 = vmatpush1.bf16.msra.mxu0 %v2464_v19  ;;  %747 = vmatpush1.bf16.msra.mxu1 %v2466_v22  ;;  %v2483_v48 = vcombine.high %v240_v44, %v272_v45  ;;  %v273_v50 = vld [vmem:[%s2790_s22 + $0x160] sm:$0xff]  ;;  %v2480_v51 = vcombine.low %v239_v41, %v271_v42  ;;  %v274_v53 = vld [vmem:[%s2790_s22 + $0x168] sm:$0xff]  ;;  %v2482_v54 = vcombine.low %v240_v44, %v272_v45  ;;  %v243_v57 = vld [vmem:[%s2790_s22 + $0x70] sm:$0xff] }
  0x1b   : > { %737 = vmatprep.mubr.bf16.mxu0 %v2738_v1  ;;  %778 = vmatprep.mubr.bf16.mxu1 %v2738_v1  ;;  %v2485_v55 = vcombine.high %v241_v49, %v273_v50  ;;  %v2487_v56 = vcombine.high %v242_v52, %v274_v53  ;;  %v275_v58 = vld [vmem:[%s2790_s22 + $0x170] sm:$0xff]  ;;  %v2484_v59 = vcombine.low %v241_v49, %v273_v50  ;;  %v244_v60 = vld [vmem:[%s2790_s22 + $0x78] sm:$0xff]  ;;  %v245_v2 = vld [vmem:[%s2790_s22 + $0x80] sm:$0xff] }
  0x1c   : > { %787 = vmatprep.subr.bf16.mxu0 %v2469_v23  ;;  %828 = vmatprep.subr.bf16.mxu1 %v2471_v24  ;;  %v276_v61 = vld [vmem:[%s2790_s22 + $0x178] sm:$0xff]  ;;  %v2486_v62 = vcombine.low %v242_v52, %v274_v53  ;;  %v2489_v63 = vcombine.high %v243_v57, %v275_v58  ;;  %v277_v3 = vld [vmem:[%s2790_s22 + $0x180] sm:$0xff]  ;;  %v2488_v4 = vcombine.low %v243_v57, %v275_v58  ;;  %v246_v5 = vld [vmem:[%s2790_s22 + $0x88] sm:$0xff] }
  0x1d   : > { %v2491_v0 = vcombine.high %v244_v60, %v276_v61  ;;  %v278_v6 = vld [vmem:[%s2790_s22 + $0x188] sm:$0xff]  ;;  %v2490_v7 = vcombine.low %v244_v60, %v276_v61  ;;  %v2493_v8 = vcombine.high %v245_v2, %v277_v3  ;;  %v247_v10 = vld [vmem:[%s2790_s22 + $0x90] sm:$0xff]  ;;  %v2492_v12 = vcombine.low %v245_v2, %v277_v3  ;;  %v248_v13 = vld [vmem:[%s2790_s22 + $0x98] sm:$0xff] }
  0x1e   : > { %v2495_v9 = vcombine.high %v246_v5, %v278_v6  ;;  %v279_v11 = vld [vmem:[%s2790_s22 + $0x190] sm:$0xff]  ;;  %v280_v14 = vld [vmem:[%s2790_s22 + $0x198] sm:$0xff]  ;;  %v2494_v15 = vcombine.low %v246_v5, %v278_v6  ;;  %v249_v19 = vld [vmem:[%s2790_s22 + $0xa0] sm:$0xff] }
  0x1f   : > { %v2497_v16 = vcombine.high %v247_v10, %v279_v11  ;;  %v2499_v17 = vcombine.high %v248_v13, %v280_v14  ;;  %v281_v20 = vld [vmem:[%s2790_s22 + $0x1a0] sm:$0xff]  ;;  %v2496_v21 = vcombine.low %v247_v10, %v279_v11  ;;  %v250_v22 = vld [vmem:[%s2790_s22 + $0xa8] sm:$0xff]  ;;  %v2498_v24 = vcombine.low %v248_v13, %v280_v14  ;;  %v283_v28 = vld [vmem:[%s2790_s22 + $0x1b0] sm:$0xff] }
  0x20   : > { %v282_v23 = vld [vmem:[%s2790_s22 + $0x1a8] sm:$0xff]  ;;  %v2501_v25 = vcombine.high %v249_v19, %v281_v20  ;;  %v2500_v29 = vcombine.low %v249_v19, %v281_v20  ;;  %v285_v36 = vld [vmem:[%s2790_s22 + $0x1c0] sm:$0xff]  ;;  %v287_v44 = vld [vmem:[%s2790_s22 + $0x1d0] sm:$0xff] }
  0x21   : > { %2526 = vmatmul.mubr.msk.bf16.vlgmr.msra.gmra.mrb[4].mxu0 %vm619_vm0, %v2805_v18  ;;  %2527 = vmatmul.mubr.msk.bf16.vlgmr.msra.gmra.mrb[4].mxu1 %vm619_vm0, %v2805_v18  ;;  %v2503_v26 = vcombine.high %v250_v22, %v282_v23  ;;  %v289_v52 = vld [vmem:[%s2790_s22 + $0x1e0] sm:$0xff]  ;;  %v291_v60 = vld [vmem:[%s2790_s22 + $0x1f0] sm:$0xff] }
  0x22   : > { %788 = vmatpush1.bf16.msra.mxu0 %v2468_v27  ;;  %829 = vmatpush1.bf16.msra.mxu1 %v2470_v30  ;;  %v251_v27 = vld [vmem:[%s2790_s22 + $0xb0] sm:$0xff]  ;;  %v252_v30 = vld [vmem:[%s2790_s22 + $0xb8] sm:$0xff] }
  0x23   : > { %819 = vmatprep.mubr.bf16.mxu0 %v2738_v1  ;;  %860 = vmatprep.mubr.bf16.mxu1 %v2738_v1  ;;  %v2505_v33 = vcombine.high %v251_v27, %v283_v28  ;;  %v2504_v37 = vcombine.low %v251_v27, %v283_v28 }
  0x24   : > { %869 = vmatprep.subr.bf16.mxu0 %v2473_v31  ;;  %910 = vmatprep.subr.bf16.mxu1 %v2475_v32  ;;  %v284_v31 = vld [vmem:[%s2790_s22 + $0x1b8] sm:$0xff]  ;;  %v2502_v32 = vcombine.low %v250_v22, %v282_v23 }
  0x25   : > { %v2507_v34 = vcombine.high %v252_v30, %v284_v31 }
  0x29   : > { %2528 = vmatmul.mubr.msk.bf16.vlgmr.msra.gmra.mrb[8].mxu0 %vm619_vm0, %v2805_v18  ;;  %2529 = vmatmul.mubr.msk.bf16.vlgmr.msra.gmra.mrb[8].mxu1 %vm619_vm0, %v2805_v18 }
  0x2a   : > { %870 = vmatpush1.bf16.msra.mxu0 %v2472_v35  ;;  %911 = vmatpush1.bf16.msra.mxu1 %v2474_v38  ;;  %v253_v35 = vld [vmem:[%s2790_s22 + $0xc0] sm:$0xff]  ;;  %v254_v38 = vld [vmem:[%s2790_s22 + $0xc8] sm:$0xff] }
  0x2b   : > { %901 = vmatprep.mubr.bf16.mxu0 %v2738_v1  ;;  %942 = vmatprep.mubr.bf16.mxu1 %v2738_v1  ;;  %v2509_v41 = vcombine.high %v253_v35, %v285_v36  ;;  %v2508_v45 = vcombine.low %v253_v35, %v285_v36 }
  0x2c   : > { %951 = vmatprep.subr.bf16.mxu0 %v2477_v39  ;;  %992 = vmatprep.subr.bf16.mxu1 %v2479_v40  ;;  %v286_v39 = vld [vmem:[%s2790_s22 + $0x1c8] sm:$0xff]  ;;  %v2506_v40 = vcombine.low %v252_v30, %v284_v31 }
  0x2d   : > { %v2511_v42 = vcombine.high %v254_v38, %v286_v39 }
  0x31   : > { %2530 = vmatmul.mubr.msk.bf16.vlgmr.msra.gmra.mrb[12].mxu0 %vm619_vm0, %v2805_v18  ;;  %2531 = vmatmul.mubr.msk.bf16.vlgmr.msra.gmra.mrb[12].mxu1 %vm619_vm0, %v2805_v18 }
  0x32   : > { %952 = vmatpush1.bf16.msra.mxu0 %v2476_v43  ;;  %993 = vmatpush1.bf16.msra.mxu1 %v2478_v46  ;;  %v255_v43 = vld [vmem:[%s2790_s22 + $0xd0] sm:$0xff]  ;;  %v256_v46 = vld [vmem:[%s2790_s22 + $0xd8] sm:$0xff] }
  0x33   : > { %983 = vmatprep.mubr.bf16.mxu0 %v2738_v1  ;;  %1024 = vmatprep.mubr.bf16.mxu1 %v2738_v1  ;;  %v2513_v49 = vcombine.high %v255_v43, %v287_v44  ;;  %v2512_v53 = vcombine.low %v255_v43, %v287_v44 }
  0x34   : > { %1033 = vmatprep.subr.bf16.mxu0 %v2481_v47  ;;  %1074 = vmatprep.subr.bf16.mxu1 %v2483_v48  ;;  %v288_v47 = vld [vmem:[%s2790_s22 + $0x1d8] sm:$0xff]  ;;  %v2510_v48 = vcombine.low %v254_v38, %v286_v39 }
  0x35   : > { %v2515_v50 = vcombine.high %v256_v46, %v288_v47 }
  0x39   : > { %2532 = vmatmul.mubr.msk.bf16.vlgmr.msra.gmra.mrb[16].mxu0 %vm619_vm0, %v2805_v18  ;;  %2533 = vmatmul.mubr.msk.bf16.vlgmr.msra.gmra.mrb[16].mxu1 %vm619_vm0, %v2805_v18 }
  0x3a   : > { %1034 = vmatpush1.bf16.msra.mxu0 %v2480_v51  ;;  %1075 = vmatpush1.bf16.msra.mxu1 %v2482_v54  ;;  %v257_v51 = vld [vmem:[%s2790_s22 + $0xe0] sm:$0xff]  ;;  %v258_v54 = vld [vmem:[%s2790_s22 + $0xe8] sm:$0xff] }
  0x3b   : > { %1065 = vmatprep.mubr.bf16.mxu0 %v2738_v1  ;;  %1106 = vmatprep.mubr.bf16.mxu1 %v2738_v1  ;;  %v2517_v57 = vcombine.high %v257_v51, %v289_v52  ;;  %v2516_v61 = vcombine.low %v257_v51, %v289_v52 }
  0x3c   : > { %1115 = vmatprep.subr.bf16.mxu0 %v2485_v55  ;;  %1156 = vmatprep.subr.bf16.mxu1 %v2487_v56  ;;  %v290_v55 = vld [vmem:[%s2790_s22 + $0x1e8] sm:$0xff]  ;;  %v2514_v56 = vcombine.low %v256_v46, %v288_v47 }
  0x3d   : > { %v2519_v58 = vcombine.high %v258_v54, %v290_v55 }
  0x41   : > { %2534 = vmatmul.mubr.msk.bf16.vlgmr.msra.gmra.mrb[20].mxu0 %vm619_vm0, %v2805_v18  ;;  %2535 = vmatmul.mubr.msk.bf16.vlgmr.msra.gmra.mrb[20].mxu1 %vm619_vm0, %v2805_v18 }
  0x42   : > { %1116 = vmatpush1.bf16.msra.mxu0 %v2484_v59  ;;  %1157 = vmatpush1.bf16.msra.mxu1 %v2486_v62  ;;  %v259_v59 = vld [vmem:[%s2790_s22 + $0xf0] sm:$0xff]  ;;  %v260_v62 = vld [vmem:[%s2790_s22 + $0xf8] sm:$0xff] }
  0x43   : > { %1147 = vmatprep.mubr.bf16.mxu0 %v2738_v1  ;;  %1188 = vmatprep.mubr.bf16.mxu1 %v2738_v1  ;;  %v2521_v2 = vcombine.high %v259_v59, %v291_v60 }
  0x44   : > { %1197 = vmatprep.subr.bf16.mxu0 %v2489_v63  ;;  %1238 = vmatprep.subr.bf16.mxu1 %v2491_v0  ;;  %v292_v63 = vld [vmem:[%s2790_s22 + $0x1f8] sm:$0xff]  ;;  %v2518_v0 = vcombine.low %v258_v54, %v290_v55 }
  0x45   : > { %v2523_v3 = vcombine.high %v260_v62, %v292_v63  ;;  %v2522_v5 = vcombine.low %v260_v62, %v292_v63 }
  0x49   : > { %2536 = vmatmul.mubr.msk.bf16.vlgmr.msra.gmra.mrb[24].mxu0 %vm619_vm0, %v2805_v18  ;;  %2537 = vmatmul.mubr.msk.bf16.vlgmr.msra.gmra.mrb[24].mxu1 %vm619_vm0, %v2805_v18 }
  0x4a   : > { %1198 = vmatpush1.bf16.msra.mxu0 %v2488_v4  ;;  %1239 = vmatpush1.bf16.msra.mxu1 %v2490_v7  ;;  %v2520_v4 = vcombine.low %v259_v59, %v291_v60 }
  0x4b   : > { %1229 = vmatprep.mubr.bf16.mxu0 %v2738_v1  ;;  %1270 = vmatprep.mubr.bf16.mxu1 %v2738_v1 }
  0x4c   : > { %1279 = vmatprep.subr.bf16.mxu0 %v2493_v8  ;;  %1320 = vmatprep.subr.bf16.mxu1 %v2495_v9 }
  0x51   : > { %2538 = vmatmul.mubr.msk.bf16.vlgmr.msra.gmra.mrb[28].mxu0 %vm619_vm0, %v2805_v18  ;;  %2539 = vmatmul.mubr.msk.bf16.vlgmr.msra.gmra.mrb[28].mxu1 %vm619_vm0, %v2805_v18 }
  0x52   : > { %1280 = vmatpush1.bf16.msra.mxu0 %v2492_v12  ;;  %1321 = vmatpush1.bf16.msra.mxu1 %v2494_v15 }
  0x53   : > { %1311 = vmatprep.mubr.bf16.mxu0 %v2738_v1  ;;  %1352 = vmatprep.mubr.bf16.mxu1 %v2738_v1 }
  0x54   : > { %1361 = vmatprep.subr.bf16.mxu0 %v2497_v16  ;;  %1402 = vmatprep.subr.bf16.mxu1 %v2499_v17 }
  0x59   : > { %2540 = vmatmul.mubr.msk.bf16.vlgmr.msra.gmra.mrb[32].mxu0 %vm619_vm0, %v2805_v18  ;;  %2541 = vmatmul.mubr.msk.bf16.vlgmr.msra.gmra.mrb[32].mxu1 %vm619_vm0, %v2805_v18 }
  0x5a   : > { %1362 = vmatpush1.bf16.msra.mxu0 %v2496_v21  ;;  %1403 = vmatpush1.bf16.msra.mxu1 %v2498_v24 }
  0x5b   : > { %1393 = vmatprep.mubr.bf16.mxu0 %v2738_v1  ;;  %1434 = vmatprep.mubr.bf16.mxu1 %v2738_v1 }
  0x5c   : > { %1443 = vmatprep.subr.bf16.mxu0 %v2501_v25  ;;  %1484 = vmatprep.subr.bf16.mxu1 %v2503_v26 }
  0x61   : > { %2542 = vmatmul.mubr.msk.bf16.vlgmr.msra.gmra.mrb[36].mxu0 %vm619_vm0, %v2805_v18  ;;  %2543 = vmatmul.mubr.msk.bf16.vlgmr.msra.gmra.mrb[36].mxu1 %vm619_vm0, %v2805_v18 }
  0x62   : > { %1444 = vmatpush1.bf16.msra.mxu0 %v2500_v29  ;;  %1485 = vmatpush1.bf16.msra.mxu1 %v2502_v32 }
  0x63   : > { %1475 = vmatprep.mubr.bf16.mxu0 %v2738_v1  ;;  %1516 = vmatprep.mubr.bf16.mxu1 %v2738_v1 }
  0x64   : > { %1525 = vmatprep.subr.bf16.mxu0 %v2505_v33  ;;  %1566 = vmatprep.subr.bf16.mxu1 %v2507_v34 }
  0x69   : > { %2544 = vmatmul.mubr.msk.bf16.vlgmr.msra.gmra.mrb[40].mxu0 %vm619_vm0, %v2805_v18  ;;  %2545 = vmatmul.mubr.msk.bf16.vlgmr.msra.gmra.mrb[40].mxu1 %vm619_vm0, %v2805_v18 }
  0x6a   : > { %1526 = vmatpush1.bf16.msra.mxu0 %v2504_v37  ;;  %1567 = vmatpush1.bf16.msra.mxu1 %v2506_v40 }
  0x6b   : > { %1557 = vmatprep.mubr.bf16.mxu0 %v2738_v1  ;;  %1598 = vmatprep.mubr.bf16.mxu1 %v2738_v1 }
  0x6c   : > { %1607 = vmatprep.subr.bf16.mxu0 %v2509_v41  ;;  %1648 = vmatprep.subr.bf16.mxu1 %v2511_v42 }
  0x71   : > { %2546 = vmatmul.mubr.msk.bf16.vlgmr.msra.gmra.mrb[44].mxu0 %vm619_vm0, %v2805_v18  ;;  %2547 = vmatmul.mubr.msk.bf16.vlgmr.msra.gmra.mrb[44].mxu1 %vm619_vm0, %v2805_v18 }
  0x72   : > { %1608 = vmatpush1.bf16.msra.mxu0 %v2508_v45  ;;  %1649 = vmatpush1.bf16.msra.mxu1 %v2510_v48 }
  0x73   : > { %1639 = vmatprep.mubr.bf16.mxu0 %v2738_v1  ;;  %1680 = vmatprep.mubr.bf16.mxu1 %v2738_v1 }
  0x74   : > { %1689 = vmatprep.subr.bf16.mxu0 %v2513_v49  ;;  %1730 = vmatprep.subr.bf16.mxu1 %v2515_v50 }
  0x79   : > { %2548 = vmatmul.mubr.msk.bf16.vlgmr.msra.gmra.mrb[48].mxu0 %vm619_vm0, %v2805_v18  ;;  %2549 = vmatmul.mubr.msk.bf16.vlgmr.msra.gmra.mrb[48].mxu1 %vm619_vm0, %v2805_v18 }
  0x7a   : > { %1690 = vmatpush1.bf16.msra.mxu0 %v2512_v53  ;;  %1731 = vmatpush1.bf16.msra.mxu1 %v2514_v56 }
  0x7b   : > { %1721 = vmatprep.mubr.bf16.mxu0 %v2738_v1  ;;  %1762 = vmatprep.mubr.bf16.mxu1 %v2738_v1 }
  0x7c   : > { %1771 = vmatprep.subr.bf16.mxu0 %v2517_v57  ;;  %1812 = vmatprep.subr.bf16.mxu1 %v2519_v58 }
  0x81   : > { %2550 = vmatmul.mubr.msk.bf16.vlgmr.msra.gmra.mrb[52].mxu0 %vm619_vm0, %v2805_v18  ;;  %2551 = vmatmul.mubr.msk.bf16.vlgmr.msra.gmra.mrb[52].mxu1 %vm619_vm0, %v2805_v18 }
  0x82   : > { %1772 = vmatpush1.bf16.msra.mxu0 %v2516_v61  ;;  %1813 = vmatpush1.bf16.msra.mxu1 %v2518_v0 }
  0x83   : > { %1803 = vmatprep.mubr.bf16.mxu0 %v2738_v1  ;;  %1844 = vmatprep.mubr.bf16.mxu1 %v2738_v1 }
  0x84   : > { %1853 = vmatprep.subr.bf16.mxu0 %v2521_v2  ;;  %1894 = vmatprep.subr.bf16.mxu1 %v2523_v3 }
  0x88   : > { %v2955_v6 = vpop.permute.xlu0 %296 }
  0x89   : > { %2552 = vmatmul.mubr.msk.bf16.vlgmr.msra.gmra.mrb[56].mxu0 %vm619_vm0, %v2805_v18  ;;  %2553 = vmatmul.mubr.msk.bf16.vlgmr.msra.gmra.mrb[56].mxu1 %vm619_vm0, %v2805_v18 }
  0x8a   : > { %1854 = vmatpush1.bf16.msra.mxu0 %v2520_v4  ;;  %1895 = vmatpush1.bf16.msra.mxu1 %v2522_v5 }
  0x8b   : > { %1885 = vmatprep.mubr.bf16.mxu0 %v2738_v1  ;;  %1926 = vmatprep.mubr.bf16.mxu1 %v2738_v1 }
  0x91   : > { %2554 = vmatmul.mubr.msk.bf16.vlgmr.msra.gmra.mrb[60].mxu0 %vm619_vm0, %v2805_v18  ;;  %2555 = vmatmul.mubr.msk.bf16.vlgmr.msra.gmra.mrb[60].mxu1 %vm619_vm0, %v2805_v18 }
  0xec   : > { %v657_v7 = vpop.f32.mrb[0].mxu0  ;;  %v698_v8 = vpop.f32.mrb[0].mxu1 }
  0xed   : > { %v658_v9 = vadd.f32 %v657_v7, %v2955_v6  ;;  %v659_v10 = vpop.f32.mrb[1].mxu0  ;;  %v699_v12 = vadd.f32 %v698_v8, %v2955_v6  ;;  %v700_v13 = vpop.f32.mrb[1].mxu1 }
  0xee   : > { %v660_v11 = vadd.f32 %v659_v10, %v2955_v6  ;;  %v661_v14 = vpop.f32.mrb[2].mxu0  ;;  %v701_v15 = vadd.f32 %v700_v13, %v2955_v6  ;;  %v702_v16 = vpop.f32.mrb[2].mxu1 }
  0xef   : > { %v1935_v1 = vmul.f32 0.5, %v658_v9  ;;  %v662_v17 = vpop.f32.mrb[3].mxu0  ;;  %v1937_v18 = vmul.f32 0.5, %v699_v12  ;;  %v703_v20 = vpop.f32.mrb[3].mxu1 }
  0xf0   : > { %v1936_v19 = vmul.f32 0.5, %v660_v11  ;;  %v1938_v21 = vmul.f32 0.5, %v701_v15 }
  0xf1   : > { %2586 = vtanh.f32 %v1935_v1 }
  0xf2   : > { %2588 = vtanh.f32 %v1936_v19 }
  0xf3   : > { %2590 = vtanh.f32 %v1937_v18 }
  0xf4   : > { %2592 = vtanh.f32 %v1938_v21  ;;  %v739_v22 = vpop.f32.mrb[4].mxu0  ;;  %v780_v24 = vpop.f32.mrb[4].mxu1 }
  0xf5   : > { %v740_v23 = vadd.f32 %v739_v22, %v2955_v6  ;;  %v741_v25 = vpop.f32.mrb[5].mxu0  ;;  %v781_v26 = vadd.f32 %v780_v24, %v2955_v6  ;;  %v782_v28 = vpop.f32.mrb[5].mxu1 }
  0xf6   : > { %v742_v27 = vadd.f32 %v741_v25, %v2955_v6  ;;  %v743_v29 = vpop.f32.mrb[6].mxu0  ;;  %v783_v31 = vadd.f32 %v782_v28, %v2955_v6  ;;  %v784_v32 = vpop.f32.mrb[6].mxu1 }
  0xf7   : > { %v1939_v30 = vmul.f32 0.5, %v740_v23  ;;  %v744_v33 = vpop.f32.mrb[7].mxu0  ;;  %v1941_v34 = vmul.f32 0.5, %v781_v26  ;;  %v785_v36 = vpop.f32.mrb[7].mxu1 }
  0xf8   : > { %v1940_v35 = vmul.f32 0.5, %v742_v27  ;;  %v1942_v37 = vmul.f32 0.5, %v783_v31 }
  0xf9   : > { %2594 = vtanh.f32 %v1939_v30 }
  0xfa   : > { %2596 = vtanh.f32 %v1941_v34 }
  0xfb   : > { %v2587_v38 = vpop.eup %2586  ;;  %2598 = vtanh.f32 %v1940_v35 }
  0xfc   : > { %v2589_v39 = vpop.eup %2588  ;;  %v2063_v40 = vmul.f32 0.5, %v2587_v38  ;;  %2600 = vtanh.f32 %v1942_v37  ;;  %v821_v41 = vpop.f32.mrb[8].mxu0 }
  0xfd   : > { %v2591_v42 = vpop.eup %2590  ;;  %v2064_v43 = vmul.f32 0.5, %v2589_v39  ;;  %v822_v44 = vadd.f32 %v821_v41, %v2955_v6  ;;  %v862_v45 = vpop.f32.mrb[8].mxu1 }
  0xfe   : > { %v823_v46 = vpop.f32.mrb[9].mxu0  ;;  %v2593_v47 = vpop.eup %2592  ;;  %v2127_v48 = vadd.f32 0.5, %v2063_v40  ;;  %v2065_v49 = vmul.f32 0.5, %v2591_v42  ;;  %v863_v50 = vadd.f32 %v862_v45, %v2955_v6 }
  0xff   : > { %v824_v51 = vadd.f32 %v823_v46, %v2955_v6  ;;  %v864_v52 = vpop.f32.mrb[9].mxu1  ;;  %v825_v53 = vpop.f32.mrb[10].mxu0  ;;  %v2128_v54 = vadd.f32 0.5, %v2064_v43  ;;  %v2066_v55 = vmul.f32 0.5, %v2593_v47  ;;  %v1943_v56 = vmul.f32 0.5, %v822_v44 }
 0x100   : > { %v865_v57 = vadd.f32 %v864_v52, %v2955_v6  ;;  %v866_v58 = vpop.f32.mrb[10].mxu1  ;;  %v826_v59 = vpop.f32.mrb[11].mxu0  ;;  %v2129_v60 = vadd.f32 0.5, %v2065_v49  ;;  %v1945_v61 = vmul.f32 0.5, %v863_v50 }
 0x101   : > { %v1944_v62 = vmul.f32 0.5, %v824_v51  ;;  %v867_v63 = vpop.f32.mrb[11].mxu1  ;;  %v2255_v0 = vcombine.low %v2127_v48, %v2128_v54  ;;  %v2130_v2 = vadd.f32 0.5, %v2066_v55  ;;  %2602 = vtanh.f32 %v1943_v56 }
 0x102   : > { %v1946_v3 = vmul.f32 0.5, %v865_v57  ;;  %2604 = vtanh.f32 %v1945_v61 }
 0x103   : > { %v2595_v4 = vpop.eup %2594  ;;  %2319 = vst [vmem:[%s2973_s29] sm:$0x77] %v2255_v0  ;;  %v2256_v5 = vcombine.low %v2129_v60, %v2130_v2  ;;  %2606 = vtanh.f32 %v1944_v62 }
 0x104   : > { %v2597_v7 = vpop.eup %2596  ;;  %v2067_v8 = vmul.f32 0.5, %v2595_v4  ;;  %2608 = vtanh.f32 %v1946_v3  ;;  %v903_v9 = vpop.f32.mrb[12].mxu0 }
 0x105   : > { %v2599_v10 = vpop.eup %2598  ;;  %2320 = vst [vmem:[%s2973_s29 + $0x8] sm:$0x77] %v2256_v5  ;;  %v2069_v11 = vmul.f32 0.5, %v2597_v7  ;;  %v904_v12 = vadd.f32 %v903_v9, %v2955_v6  ;;  %v944_v13 = vpop.f32.mrb[12].mxu1 }
 0x106   : > { %v905_v14 = vpop.f32.mrb[13].mxu0  ;;  %v2601_v1 = vpop.eup %2600  ;;  %v2131_v15 = vadd.f32 0.5, %v2067_v8  ;;  %v2068_v16 = vmul.f32 0.5, %v2599_v10  ;;  %v945_v17 = vadd.f32 %v944_v13, %v2955_v6 }
 0x107   : > { %v906_v19 = vadd.f32 %v905_v14, %v2955_v6  ;;  %v946_v18 = vpop.f32.mrb[13].mxu1  ;;  %v907_v20 = vpop.f32.mrb[14].mxu0  ;;  %v2133_v21 = vadd.f32 0.5, %v2069_v11  ;;  %v2070_v22 = vmul.f32 0.5, %v2601_v1  ;;  %v1947_v23 = vmul.f32 0.5, %v904_v12 }
 0x108   : > { %v947_v24 = vadd.f32 %v946_v18, %v2955_v6  ;;  %v948_v25 = vpop.f32.mrb[14].mxu1  ;;  %v908_v26 = vpop.f32.mrb[15].mxu0  ;;  %v2132_v27 = vadd.f32 0.5, %v2068_v16  ;;  %v1949_v28 = vmul.f32 0.5, %v945_v17 }
 0x109   : > { %v1948_v29 = vmul.f32 0.5, %v906_v19  ;;  %v949_v30 = vpop.f32.mrb[15].mxu1  ;;  %v2134_v31 = vadd.f32 0.5, %v2070_v22  ;;  %2610 = vtanh.f32 %v1947_v23 }
 0x10a   : > { %v1950_v32 = vmul.f32 0.5, %v947_v24  ;;  %v2257_v33 = vcombine.low %v2131_v15, %v2132_v27  ;;  %2612 = vtanh.f32 %v1949_v28 }
 0x10b   : > { %v2603_v34 = vpop.eup %2602  ;;  %v2258_v35 = vcombine.low %v2133_v21, %v2134_v31  ;;  %2614 = vtanh.f32 %v1948_v29 }
 0x10c   : > { %v2605_v36 = vpop.eup %2604  ;;  %2321 = vst [vmem:[%s2973_s29 + $0x10] sm:$0x77] %v2257_v33  ;;  %v2071_v37 = vmul.f32 0.5, %v2603_v34  ;;  %2616 = vtanh.f32 %v1950_v32  ;;  %v985_v38 = vpop.f32.mrb[16].mxu0 }
 0x10d   : > { %v2607_v39 = vpop.eup %2606  ;;  %2322 = vst [vmem:[%s2973_s29 + $0x18] sm:$0x77] %v2258_v35  ;;  %v2073_v40 = vmul.f32 0.5, %v2605_v36  ;;  %v986_v41 = vadd.f32 %v985_v38, %v2955_v6  ;;  %v1026_v42 = vpop.f32.mrb[16].mxu1 }
 0x10e   : > { %v987_v43 = vpop.f32.mrb[17].mxu0  ;;  %v2609_v44 = vpop.eup %2608  ;;  %v2135_v45 = vadd.f32 0.5, %v2071_v37  ;;  %v2072_v46 = vmul.f32 0.5, %v2607_v39  ;;  %v1027_v47 = vadd.f32 %v1026_v42, %v2955_v6 }
 0x10f   : > { %v988_v48 = vadd.f32 %v987_v43, %v2955_v6  ;;  %v1028_v49 = vpop.f32.mrb[17].mxu1  ;;  %v989_v50 = vpop.f32.mrb[18].mxu0  ;;  %v2137_v51 = vadd.f32 0.5, %v2073_v40  ;;  %v2074_v52 = vmul.f32 0.5, %v2609_v44  ;;  %v1951_v53 = vmul.f32 0.5, %v986_v41 }
 0x110   : > { %v1029_v54 = vadd.f32 %v1028_v49, %v2955_v6  ;;  %v1030_v55 = vpop.f32.mrb[18].mxu1  ;;  %v990_v56 = vpop.f32.mrb[19].mxu0  ;;  %v2136_v57 = vadd.f32 0.5, %v2072_v46  ;;  %v1953_v58 = vmul.f32 0.5, %v1027_v47 }
 0x111   : > { %v1952_v59 = vmul.f32 0.5, %v988_v48  ;;  %v1031_v60 = vpop.f32.mrb[19].mxu1  ;;  %v2138_v61 = vadd.f32 0.5, %v2074_v52  ;;  %2618 = vtanh.f32 %v1951_v53 }
 0x112   : > { %v1954_v62 = vmul.f32 0.5, %v1029_v54  ;;  %v2259_v63 = vcombine.low %v2135_v45, %v2136_v57  ;;  %2620 = vtanh.f32 %v1953_v58 }
 0x113   : > { %v2611_v0 = vpop.eup %2610  ;;  %v2260_v2 = vcombine.low %v2137_v51, %v2138_v61  ;;  %2622 = vtanh.f32 %v1952_v59 }
 0x114   : > { %v2613_v3 = vpop.eup %2612  ;;  %2323 = vst [vmem:[%s2973_s29 + $0x20] sm:$0x77] %v2259_v63  ;;  %v2075_v4 = vmul.f32 0.5, %v2611_v0  ;;  %2624 = vtanh.f32 %v1954_v62  ;;  %v1067_v5 = vpop.f32.mrb[20].mxu0 }
 0x115   : > { %v2615_v7 = vpop.eup %2614  ;;  %2324 = vst [vmem:[%s2973_s29 + $0x28] sm:$0x77] %v2260_v2  ;;  %v2077_v8 = vmul.f32 0.5, %v2613_v3  ;;  %v1068_v9 = vadd.f32 %v1067_v5, %v2955_v6  ;;  %v1108_v10 = vpop.f32.mrb[20].mxu1 }
 0x116   : > { %v1069_v11 = vpop.f32.mrb[21].mxu0  ;;  %v2617_v12 = vpop.eup %2616  ;;  %v2139_v13 = vadd.f32 0.5, %v2075_v4  ;;  %v2076_v14 = vmul.f32 0.5, %v2615_v7  ;;  %v1109_v1 = vadd.f32 %v1108_v10, %v2955_v6 }
 0x117   : > { %v1070_v15 = vadd.f32 %v1069_v11, %v2955_v6  ;;  %v1110_v16 = vpop.f32.mrb[21].mxu1  ;;  %v1071_v17 = vpop.f32.mrb[22].mxu0  ;;  %v2141_v19 = vadd.f32 0.5, %v2077_v8  ;;  %v2078_v18 = vmul.f32 0.5, %v2617_v12  ;;  %v1955_v20 = vmul.f32 0.5, %v1068_v9 }
 0x118   : > { %v1111_v21 = vadd.f32 %v1110_v16, %v2955_v6  ;;  %v1112_v22 = vpop.f32.mrb[22].mxu1  ;;  %v1072_v23 = vpop.f32.mrb[23].mxu0  ;;  %v2140_v24 = vadd.f32 0.5, %v2076_v14  ;;  %v1957_v25 = vmul.f32 0.5, %v1109_v1 }
 0x119   : > { %v1956_v26 = vmul.f32 0.5, %v1070_v15  ;;  %v1113_v27 = vpop.f32.mrb[23].mxu1  ;;  %v2142_v28 = vadd.f32 0.5, %v2078_v18  ;;  %2626 = vtanh.f32 %v1955_v20 }
 0x11a   : > { %v1958_v29 = vmul.f32 0.5, %v1111_v21  ;;  %v2261_v30 = vcombine.low %v2139_v13, %v2140_v24  ;;  %2628 = vtanh.f32 %v1957_v25 }
 0x11b   : > { %v2619_v31 = vpop.eup %2618  ;;  %v2262_v32 = vcombine.low %v2141_v19, %v2142_v28  ;;  %2630 = vtanh.f32 %v1956_v26 }
 0x11c   : > { %v2621_v33 = vpop.eup %2620  ;;  %2325 = vst [vmem:[%s2973_s29 + $0x30] sm:$0x77] %v2261_v30  ;;  %v2079_v34 = vmul.f32 0.5, %v2619_v31  ;;  %2632 = vtanh.f32 %v1958_v29  ;;  %v1149_v35 = vpop.f32.mrb[24].mxu0 }
 0x11d   : > { %v2623_v36 = vpop.eup %2622  ;;  %2326 = vst [vmem:[%s2973_s29 + $0x38] sm:$0x77] %v2262_v32  ;;  %v2081_v37 = vmul.f32 0.5, %v2621_v33  ;;  %v1150_v38 = vadd.f32 %v1149_v35, %v2955_v6  ;;  %v1190_v39 = vpop.f32.mrb[24].mxu1 }
 0x11e   : > { %v1151_v40 = vpop.f32.mrb[25].mxu0  ;;  %v2625_v41 = vpop.eup %2624  ;;  %v2143_v42 = vadd.f32 0.5, %v2079_v34  ;;  %v2080_v43 = vmul.f32 0.5, %v2623_v36  ;;  %v1191_v44 = vadd.f32 %v1190_v39, %v2955_v6 }
 0x11f   : > { %v1152_v45 = vadd.f32 %v1151_v40, %v2955_v6  ;;  %v1192_v46 = vpop.f32.mrb[25].mxu1  ;;  %v1153_v47 = vpop.f32.mrb[26].mxu0  ;;  %v2145_v48 = vadd.f32 0.5, %v2081_v37  ;;  %v2082_v49 = vmul.f32 0.5, %v2625_v41  ;;  %v1959_v50 = vmul.f32 0.5, %v1150_v38 }
 0x120   : > { %v1193_v51 = vadd.f32 %v1192_v46, %v2955_v6  ;;  %v1194_v52 = vpop.f32.mrb[26].mxu1  ;;  %v1154_v53 = vpop.f32.mrb[27].mxu0  ;;  %v2144_v54 = vadd.f32 0.5, %v2080_v43  ;;  %v1961_v55 = vmul.f32 0.5, %v1191_v44 }
 0x121   : > { %v1960_v56 = vmul.f32 0.5, %v1152_v45  ;;  %v1195_v57 = vpop.f32.mrb[27].mxu1  ;;  %v2146_v58 = vadd.f32 0.5, %v2082_v49  ;;  %2634 = vtanh.f32 %v1959_v50 }
 0x122   : > { %v1962_v59 = vmul.f32 0.5, %v1193_v51  ;;  %v2263_v60 = vcombine.low %v2143_v42, %v2144_v54  ;;  %2636 = vtanh.f32 %v1961_v55 }
 0x123   : > { %v2627_v61 = vpop.eup %2626  ;;  %v2264_v62 = vcombine.low %v2145_v48, %v2146_v58  ;;  %2638 = vtanh.f32 %v1960_v56 }
 0x124   : > { %v2629_v63 = vpop.eup %2628  ;;  %2327 = vst [vmem:[%s2973_s29 + $0x40] sm:$0x77] %v2263_v60  ;;  %v2083_v0 = vmul.f32 0.5, %v2627_v61  ;;  %2640 = vtanh.f32 %v1962_v59  ;;  %v1231_v2 = vpop.f32.mrb[28].mxu0 }
 0x125   : > { %v2631_v3 = vpop.eup %2630  ;;  %2328 = vst [vmem:[%s2973_s29 + $0x48] sm:$0x77] %v2264_v62  ;;  %v2085_v4 = vmul.f32 0.5, %v2629_v63  ;;  %v1232_v5 = vadd.f32 %v1231_v2, %v2955_v6  ;;  %v1272_v7 = vpop.f32.mrb[28].mxu1 }
 0x126   : > { %v1233_v8 = vpop.f32.mrb[29].mxu0  ;;  %v2633_v9 = vpop.eup %2632  ;;  %v2147_v10 = vadd.f32 0.5, %v2083_v0  ;;  %v2084_v11 = vmul.f32 0.5, %v2631_v3  ;;  %v1273_v12 = vadd.f32 %v1272_v7, %v2955_v6 }
 0x127   : > { %v1234_v13 = vadd.f32 %v1233_v8, %v2955_v6  ;;  %v1274_v14 = vpop.f32.mrb[29].mxu1  ;;  %v1235_v1 = vpop.f32.mrb[30].mxu0  ;;  %v2149_v15 = vadd.f32 0.5, %v2085_v4  ;;  %v2086_v16 = vmul.f32 0.5, %v2633_v9  ;;  %v1963_v17 = vmul.f32 0.5, %v1232_v5 }
 0x128   : > { %v1275_v19 = vadd.f32 %v1274_v14, %v2955_v6  ;;  %v1276_v18 = vpop.f32.mrb[30].mxu1  ;;  %v1236_v20 = vpop.f32.mrb[31].mxu0  ;;  %v2148_v21 = vadd.f32 0.5, %v2084_v11  ;;  %v1965_v22 = vmul.f32 0.5, %v1273_v12 }
 0x129   : > { %v1964_v23 = vmul.f32 0.5, %v1234_v13  ;;  %v1277_v24 = vpop.f32.mrb[31].mxu1  ;;  %v2150_v25 = vadd.f32 0.5, %v2086_v16  ;;  %2642 = vtanh.f32 %v1963_v17 }
 0x12a   : > { %v1966_v26 = vmul.f32 0.5, %v1275_v19  ;;  %v2265_v27 = vcombine.low %v2147_v10, %v2148_v21  ;;  %2644 = vtanh.f32 %v1965_v22 }
 0x12b   : > { %v2635_v28 = vpop.eup %2634  ;;  %v2266_v29 = vcombine.low %v2149_v15, %v2150_v25  ;;  %2646 = vtanh.f32 %v1964_v23 }
 0x12c   : > { %v2637_v30 = vpop.eup %2636  ;;  %2329 = vst [vmem:[%s2973_s29 + $0x50] sm:$0x77] %v2265_v27  ;;  %v2087_v31 = vmul.f32 0.5, %v2635_v28  ;;  %2648 = vtanh.f32 %v1966_v26  ;;  %v1313_v32 = vpop.f32.mrb[32].mxu0 }
 0x12d   : > { %v2639_v33 = vpop.eup %2638  ;;  %2330 = vst [vmem:[%s2973_s29 + $0x58] sm:$0x77] %v2266_v29  ;;  %v2089_v34 = vmul.f32 0.5, %v2637_v30  ;;  %v1314_v35 = vadd.f32 %v1313_v32, %v2955_v6  ;;  %v1354_v36 = vpop.f32.mrb[32].mxu1 }
 0x12e   : > { %v1315_v37 = vpop.f32.mrb[33].mxu0  ;;  %v2641_v38 = vpop.eup %2640  ;;  %v2151_v39 = vadd.f32 0.5, %v2087_v31  ;;  %v2088_v40 = vmul.f32 0.5, %v2639_v33  ;;  %v1355_v41 = vadd.f32 %v1354_v36, %v2955_v6 }
 0x12f   : > { %v1316_v42 = vadd.f32 %v1315_v37, %v2955_v6  ;;  %v1356_v43 = vpop.f32.mrb[33].mxu1  ;;  %v1317_v44 = vpop.f32.mrb[34].mxu0  ;;  %v2153_v45 = vadd.f32 0.5, %v2089_v34  ;;  %v2090_v46 = vmul.f32 0.5, %v2641_v38  ;;  %v1967_v47 = vmul.f32 0.5, %v1314_v35 }
 0x130   : > { %v1357_v48 = vadd.f32 %v1356_v43, %v2955_v6  ;;  %v1358_v49 = vpop.f32.mrb[34].mxu1  ;;  %v1318_v50 = vpop.f32.mrb[35].mxu0  ;;  %v2152_v51 = vadd.f32 0.5, %v2088_v40  ;;  %v1969_v52 = vmul.f32 0.5, %v1355_v41 }
 0x131   : > { %v1968_v53 = vmul.f32 0.5, %v1316_v42  ;;  %v1359_v54 = vpop.f32.mrb[35].mxu1  ;;  %v2154_v55 = vadd.f32 0.5, %v2090_v46  ;;  %2650 = vtanh.f32 %v1967_v47 }
 0x132   : > { %v1970_v56 = vmul.f32 0.5, %v1357_v48  ;;  %v2267_v57 = vcombine.low %v2151_v39, %v2152_v51  ;;  %2652 = vtanh.f32 %v1969_v52 }
 0x133   : > { %v2643_v58 = vpop.eup %2642  ;;  %v2268_v59 = vcombine.low %v2153_v45, %v2154_v55  ;;  %2654 = vtanh.f32 %v1968_v53 }
 0x134   : > { %v2645_v60 = vpop.eup %2644  ;;  %2331 = vst [vmem:[%s2973_s29 + $0x60] sm:$0x77] %v2267_v57  ;;  %v2091_v61 = vmul.f32 0.5, %v2643_v58  ;;  %2656 = vtanh.f32 %v1970_v56  ;;  %v1395_v62 = vpop.f32.mrb[36].mxu0 }
 0x135   : > { %v2647_v63 = vpop.eup %2646  ;;  %2332 = vst [vmem:[%s2973_s29 + $0x68] sm:$0x77] %v2268_v59  ;;  %v2093_v0 = vmul.f32 0.5, %v2645_v60  ;;  %v1396_v2 = vadd.f32 %v1395_v62, %v2955_v6  ;;  %v1436_v3 = vpop.f32.mrb[36].mxu1 }
 0x136   : > { %v1397_v4 = vpop.f32.mrb[37].mxu0  ;;  %v2649_v5 = vpop.eup %2648  ;;  %v2155_v7 = vadd.f32 0.5, %v2091_v61  ;;  %v2092_v8 = vmul.f32 0.5, %v2647_v63  ;;  %v1437_v9 = vadd.f32 %v1436_v3, %v2955_v6 }
 0x137   : > { %v1398_v10 = vadd.f32 %v1397_v4, %v2955_v6  ;;  %v1438_v11 = vpop.f32.mrb[37].mxu1  ;;  %v1399_v12 = vpop.f32.mrb[38].mxu0  ;;  %v2157_v13 = vadd.f32 0.5, %v2093_v0  ;;  %v2094_v14 = vmul.f32 0.5, %v2649_v5  ;;  %v1971_v1 = vmul.f32 0.5, %v1396_v2 }
 0x138   : > { %v1439_v15 = vadd.f32 %v1438_v11, %v2955_v6  ;;  %v1440_v16 = vpop.f32.mrb[38].mxu1  ;;  %v1400_v17 = vpop.f32.mrb[39].mxu0  ;;  %v2156_v19 = vadd.f32 0.5, %v2092_v8  ;;  %v1973_v18 = vmul.f32 0.5, %v1437_v9 }
 0x139   : > { %v1972_v20 = vmul.f32 0.5, %v1398_v10  ;;  %v1441_v21 = vpop.f32.mrb[39].mxu1  ;;  %v2158_v22 = vadd.f32 0.5, %v2094_v14  ;;  %2658 = vtanh.f32 %v1971_v1 }
 0x13a   : > { %v1974_v23 = vmul.f32 0.5, %v1439_v15  ;;  %v2269_v24 = vcombine.low %v2155_v7, %v2156_v19  ;;  %2660 = vtanh.f32 %v1973_v18 }
 0x13b   : > { %v2651_v25 = vpop.eup %2650  ;;  %v2270_v26 = vcombine.low %v2157_v13, %v2158_v22  ;;  %2662 = vtanh.f32 %v1972_v20 }
 0x13c   : > { %v2653_v27 = vpop.eup %2652  ;;  %2333 = vst [vmem:[%s2973_s29 + $0x70] sm:$0x77] %v2269_v24  ;;  %v2095_v28 = vmul.f32 0.5, %v2651_v25  ;;  %2664 = vtanh.f32 %v1974_v23  ;;  %v1477_v29 = vpop.f32.mrb[40].mxu0 }
 0x13d   : > { %v2655_v30 = vpop.eup %2654  ;;  %2334 = vst [vmem:[%s2973_s29 + $0x78] sm:$0x77] %v2270_v26  ;;  %v2097_v31 = vmul.f32 0.5, %v2653_v27  ;;  %v1478_v32 = vadd.f32 %v1477_v29, %v2955_v6  ;;  %v1518_v33 = vpop.f32.mrb[40].mxu1 }
 0x13e   : > { %v1479_v34 = vpop.f32.mrb[41].mxu0  ;;  %v2657_v35 = vpop.eup %2656  ;;  %v2159_v36 = vadd.f32 0.5, %v2095_v28  ;;  %v2096_v37 = vmul.f32 0.5, %v2655_v30  ;;  %v1519_v38 = vadd.f32 %v1518_v33, %v2955_v6 }
 0x13f   : > { %v1480_v39 = vadd.f32 %v1479_v34, %v2955_v6  ;;  %v1520_v40 = vpop.f32.mrb[41].mxu1  ;;  %v1481_v41 = vpop.f32.mrb[42].mxu0  ;;  %v2161_v42 = vadd.f32 0.5, %v2097_v31  ;;  %v2098_v43 = vmul.f32 0.5, %v2657_v35  ;;  %v1975_v44 = vmul.f32 0.5, %v1478_v32 }
 0x140   : > { %v1521_v45 = vadd.f32 %v1520_v40, %v2955_v6  ;;  %v1522_v46 = vpop.f32.mrb[42].mxu1  ;;  %v1482_v47 = vpop.f32.mrb[43].mxu0  ;;  %v2160_v48 = vadd.f32 0.5, %v2096_v37  ;;  %v1977_v49 = vmul.f32 0.5, %v1519_v38 }
 0x141   : > { %v1976_v50 = vmul.f32 0.5, %v1480_v39  ;;  %v1523_v51 = vpop.f32.mrb[43].mxu1  ;;  %v2162_v52 = vadd.f32 0.5, %v2098_v43  ;;  %2666 = vtanh.f32 %v1975_v44 }
 0x142   : > { %v1978_v53 = vmul.f32 0.5, %v1521_v45  ;;  %v2271_v54 = vcombine.low %v2159_v36, %v2160_v48  ;;  %2668 = vtanh.f32 %v1977_v49 }
 0x143   : > { %v2659_v55 = vpop.eup %2658  ;;  %v2272_v56 = vcombine.low %v2161_v42, %v2162_v52  ;;  %2670 = vtanh.f32 %v1976_v50 }
 0x144   : > { %v2661_v57 = vpop.eup %2660  ;;  %2335 = vst [vmem:[%s2973_s29 + $0x80] sm:$0x77] %v2271_v54  ;;  %v2099_v58 = vmul.f32 0.5, %v2659_v55  ;;  %2672 = vtanh.f32 %v1978_v53  ;;  %v1559_v59 = vpop.f32.mrb[44].mxu0 }
 0x145   : > { %v2663_v60 = vpop.eup %2662  ;;  %2336 = vst [vmem:[%s2973_s29 + $0x88] sm:$0x77] %v2272_v56  ;;  %v2101_v61 = vmul.f32 0.5, %v2661_v57  ;;  %v1560_v62 = vadd.f32 %v1559_v59, %v2955_v6  ;;  %v1600_v63 = vpop.f32.mrb[44].mxu1 }
 0x146   : > { %v1561_v0 = vpop.f32.mrb[45].mxu0  ;;  %v2665_v2 = vpop.eup %2664  ;;  %v2163_v3 = vadd.f32 0.5, %v2099_v58  ;;  %v2100_v4 = vmul.f32 0.5, %v2663_v60  ;;  %v1601_v5 = vadd.f32 %v1600_v63, %v2955_v6 }
 0x147   : > { %v1562_v7 = vadd.f32 %v1561_v0, %v2955_v6  ;;  %v1602_v8 = vpop.f32.mrb[45].mxu1  ;;  %v1563_v9 = vpop.f32.mrb[46].mxu0  ;;  %v2165_v10 = vadd.f32 0.5, %v2101_v61  ;;  %v2102_v11 = vmul.f32 0.5, %v2665_v2  ;;  %v1979_v12 = vmul.f32 0.5, %v1560_v62 }
 0x148   : > { %v1603_v13 = vadd.f32 %v1602_v8, %v2955_v6  ;;  %v1604_v14 = vpop.f32.mrb[46].mxu1  ;;  %v1564_v1 = vpop.f32.mrb[47].mxu0  ;;  %v2164_v15 = vadd.f32 0.5, %v2100_v4  ;;  %v1981_v16 = vmul.f32 0.5, %v1601_v5 }
 0x149   : > { %v1980_v17 = vmul.f32 0.5, %v1562_v7  ;;  %v1605_v19 = vpop.f32.mrb[47].mxu1  ;;  %v2166_v18 = vadd.f32 0.5, %v2102_v11  ;;  %2674 = vtanh.f32 %v1979_v12 }
 0x14a   : > { %v1982_v20 = vmul.f32 0.5, %v1603_v13  ;;  %v2273_v21 = vcombine.low %v2163_v3, %v2164_v15  ;;  %2676 = vtanh.f32 %v1981_v16 }
 0x14b   : > { %v2667_v22 = vpop.eup %2666  ;;  %v2274_v23 = vcombine.low %v2165_v10, %v2166_v18  ;;  %2678 = vtanh.f32 %v1980_v17 }
 0x14c   : > { %v2669_v24 = vpop.eup %2668  ;;  %2337 = vst [vmem:[%s2973_s29 + $0x90] sm:$0x77] %v2273_v21  ;;  %v2103_v25 = vmul.f32 0.5, %v2667_v22  ;;  %2680 = vtanh.f32 %v1982_v20  ;;  %v1641_v26 = vpop.f32.mrb[48].mxu0 }
 0x14d   : > { %v2671_v27 = vpop.eup %2670  ;;  %2338 = vst [vmem:[%s2973_s29 + $0x98] sm:$0x77] %v2274_v23  ;;  %v2105_v28 = vmul.f32 0.5, %v2669_v24  ;;  %v1642_v29 = vadd.f32 %v1641_v26, %v2955_v6  ;;  %v1682_v30 = vpop.f32.mrb[48].mxu1 }
 0x14e   : > { %v1643_v31 = vpop.f32.mrb[49].mxu0  ;;  %v2673_v32 = vpop.eup %2672  ;;  %v2167_v33 = vadd.f32 0.5, %v2103_v25  ;;  %v2104_v34 = vmul.f32 0.5, %v2671_v27  ;;  %v1683_v35 = vadd.f32 %v1682_v30, %v2955_v6 }
 0x14f   : > { %v1644_v36 = vadd.f32 %v1643_v31, %v2955_v6  ;;  %v1684_v37 = vpop.f32.mrb[49].mxu1  ;;  %v1645_v38 = vpop.f32.mrb[50].mxu0  ;;  %v2169_v39 = vadd.f32 0.5, %v2105_v28  ;;  %v2106_v40 = vmul.f32 0.5, %v2673_v32  ;;  %v1983_v41 = vmul.f32 0.5, %v1642_v29 }
 0x150   : > { %v1685_v42 = vadd.f32 %v1684_v37, %v2955_v6  ;;  %v1686_v43 = vpop.f32.mrb[50].mxu1  ;;  %v1646_v44 = vpop.f32.mrb[51].mxu0  ;;  %v2168_v45 = vadd.f32 0.5, %v2104_v34  ;;  %v1985_v46 = vmul.f32 0.5, %v1683_v35 }
 0x151   : > { %v1984_v47 = vmul.f32 0.5, %v1644_v36  ;;  %v1687_v48 = vpop.f32.mrb[51].mxu1  ;;  %v2170_v49 = vadd.f32 0.5, %v2106_v40  ;;  %2682 = vtanh.f32 %v1983_v41 }
 0x152   : > { %v1986_v50 = vmul.f32 0.5, %v1685_v42  ;;  %v2275_v51 = vcombine.low %v2167_v33, %v2168_v45  ;;  %2684 = vtanh.f32 %v1985_v46 }
 0x153   : > { %v2675_v52 = vpop.eup %2674  ;;  %v2276_v53 = vcombine.low %v2169_v39, %v2170_v49  ;;  %2686 = vtanh.f32 %v1984_v47 }
 0x154   : > { %v2677_v54 = vpop.eup %2676  ;;  %2339 = vst [vmem:[%s2973_s29 + $0xa0] sm:$0x77] %v2275_v51  ;;  %v2107_v55 = vmul.f32 0.5, %v2675_v52  ;;  %2688 = vtanh.f32 %v1986_v50  ;;  %v1723_v56 = vpop.f32.mrb[52].mxu0 }
 0x155   : > { %v2679_v57 = vpop.eup %2678  ;;  %2340 = vst [vmem:[%s2973_s29 + $0xa8] sm:$0x77] %v2276_v53  ;;  %v2109_v58 = vmul.f32 0.5, %v2677_v54  ;;  %v1724_v59 = vadd.f32 %v1723_v56, %v2955_v6  ;;  %v1764_v60 = vpop.f32.mrb[52].mxu1 }
 0x156   : > { %v1725_v61 = vpop.f32.mrb[53].mxu0  ;;  %v2681_v62 = vpop.eup %2680  ;;  %v2171_v63 = vadd.f32 0.5, %v2107_v55  ;;  %v2108_v0 = vmul.f32 0.5, %v2679_v57  ;;  %v1765_v2 = vadd.f32 %v1764_v60, %v2955_v6 }
 0x157   : > { %v1726_v3 = vadd.f32 %v1725_v61, %v2955_v6  ;;  %v1766_v4 = vpop.f32.mrb[53].mxu1  ;;  %v1727_v5 = vpop.f32.mrb[54].mxu0  ;;  %v2173_v7 = vadd.f32 0.5, %v2109_v58  ;;  %v2110_v8 = vmul.f32 0.5, %v2681_v62  ;;  %v1987_v9 = vmul.f32 0.5, %v1724_v59 }
 0x158   : > { %v1767_v10 = vadd.f32 %v1766_v4, %v2955_v6  ;;  %v1768_v11 = vpop.f32.mrb[54].mxu1  ;;  %v1728_v12 = vpop.f32.mrb[55].mxu0  ;;  %v2172_v13 = vadd.f32 0.5, %v2108_v0  ;;  %v1989_v14 = vmul.f32 0.5, %v1765_v2 }
 0x159   : > { %v1988_v1 = vmul.f32 0.5, %v1726_v3  ;;  %v1769_v15 = vpop.f32.mrb[55].mxu1  ;;  %v2174_v16 = vadd.f32 0.5, %v2110_v8  ;;  %2690 = vtanh.f32 %v1987_v9 }
 0x15a   : > { %v1990_v17 = vmul.f32 0.5, %v1767_v10  ;;  %v2277_v19 = vcombine.low %v2171_v63, %v2172_v13  ;;  %2692 = vtanh.f32 %v1989_v14 }
 0x15b   : > { %v2683_v18 = vpop.eup %2682  ;;  %v2278_v20 = vcombine.low %v2173_v7, %v2174_v16  ;;  %2694 = vtanh.f32 %v1988_v1 }
 0x15c   : > { %v2685_v21 = vpop.eup %2684  ;;  %2341 = vst [vmem:[%s2973_s29 + $0xb0] sm:$0x77] %v2277_v19  ;;  %v2111_v22 = vmul.f32 0.5, %v2683_v18  ;;  %2696 = vtanh.f32 %v1990_v17  ;;  %v1805_v23 = vpop.f32.mrb[56].mxu0 }
 0x15d   : > { %v2687_v24 = vpop.eup %2686  ;;  %2342 = vst [vmem:[%s2973_s29 + $0xb8] sm:$0x77] %v2278_v20  ;;  %v2113_v25 = vmul.f32 0.5, %v2685_v21  ;;  %v1806_v26 = vadd.f32 %v1805_v23, %v2955_v6  ;;  %v1846_v27 = vpop.f32.mrb[56].mxu1 }
 0x15e   : > { %v1807_v28 = vpop.f32.mrb[57].mxu0  ;;  %v2689_v29 = vpop.eup %2688  ;;  %v2175_v30 = vadd.f32 0.5, %v2111_v22  ;;  %v2112_v31 = vmul.f32 0.5, %v2687_v24  ;;  %v1847_v32 = vadd.f32 %v1846_v27, %v2955_v6 }
 0x15f   : > { %v1808_v33 = vadd.f32 %v1807_v28, %v2955_v6  ;;  %v1848_v34 = vpop.f32.mrb[57].mxu1  ;;  %v1809_v35 = vpop.f32.mrb[58].mxu0  ;;  %v2177_v36 = vadd.f32 0.5, %v2113_v25  ;;  %v2114_v37 = vmul.f32 0.5, %v2689_v29  ;;  %v1991_v38 = vmul.f32 0.5, %v1806_v26 }
 0x160   : > { %v1849_v39 = vadd.f32 %v1848_v34, %v2955_v6  ;;  %v1850_v40 = vpop.f32.mrb[58].mxu1  ;;  %v1810_v41 = vpop.f32.mrb[59].mxu0  ;;  %v2176_v42 = vadd.f32 0.5, %v2112_v31  ;;  %v1993_v43 = vmul.f32 0.5, %v1847_v32 }
 0x161   : > { %v1992_v44 = vmul.f32 0.5, %v1808_v33  ;;  %v1851_v45 = vpop.f32.mrb[59].mxu1  ;;  %v2178_v46 = vadd.f32 0.5, %v2114_v37  ;;  %2698 = vtanh.f32 %v1991_v38 }
 0x162   : > { %v1994_v47 = vmul.f32 0.5, %v1849_v39  ;;  %v2279_v48 = vcombine.low %v2175_v30, %v2176_v42  ;;  %2700 = vtanh.f32 %v1993_v43 }
 0x163   : > { %v2691_v49 = vpop.eup %2690  ;;  %v2280_v50 = vcombine.low %v2177_v36, %v2178_v46  ;;  %2702 = vtanh.f32 %v1992_v44 }
 0x164   : > { %v2693_v51 = vpop.eup %2692  ;;  %2343 = vst [vmem:[%s2973_s29 + $0xc0] sm:$0x77] %v2279_v48  ;;  %v2115_v52 = vmul.f32 0.5, %v2691_v49  ;;  %2704 = vtanh.f32 %v1994_v47  ;;  %v1887_v53 = vpop.f32.mrb[60].mxu0 }
 0x165   : > { %v2695_v54 = vpop.eup %2694  ;;  %2344 = vst [vmem:[%s2973_s29 + $0xc8] sm:$0x77] %v2280_v50  ;;  %v2117_v55 = vmul.f32 0.5, %v2693_v51  ;;  %v1888_v56 = vadd.f32 %v1887_v53, %v2955_v6  ;;  %v1928_v57 = vpop.f32.mrb[60].mxu1 }
 0x166   : > { %v1889_v58 = vpop.f32.mrb[61].mxu0  ;;  %v2697_v59 = vpop.eup %2696  ;;  %v2179_v60 = vadd.f32 0.5, %v2115_v52  ;;  %v2116_v61 = vmul.f32 0.5, %v2695_v54  ;;  %v1929_v62 = vadd.f32 %v1928_v57, %v2955_v6 }
 0x167   : > { %v1890_v63 = vadd.f32 %v1889_v58, %v2955_v6  ;;  %v1930_v0 = vpop.f32.mrb[61].mxu1  ;;  %v1891_v2 = vpop.f32.mrb[62].mxu0  ;;  %v2181_v3 = vadd.f32 0.5, %v2117_v55  ;;  %v2118_v4 = vmul.f32 0.5, %v2697_v59  ;;  %v1995_v5 = vmul.f32 0.5, %v1888_v56 }
 0x168   : > { %v1931_v7 = vadd.f32 %v1930_v0, %v2955_v6  ;;  %v1932_v8 = vpop.f32.mrb[62].mxu1  ;;  %v1892_v9 = vpop.f32.mrb[63].mxu0  ;;  %v2180_v10 = vadd.f32 0.5, %v2116_v61  ;;  %v1997_v11 = vmul.f32 0.5, %v1929_v62 }
 0x169   : > { %v1996_v12 = vmul.f32 0.5, %v1890_v63  ;;  %v1933_v13 = vpop.f32.mrb[63].mxu1  ;;  %v2182_v14 = vadd.f32 0.5, %v2118_v4  ;;  %2706 = vtanh.f32 %v1995_v5 }
 0x16a   : > { %v1998_v1 = vmul.f32 0.5, %v1931_v7  ;;  %v2281_v15 = vcombine.low %v2179_v60, %v2180_v10  ;;  %2708 = vtanh.f32 %v1997_v11 }
 0x16b   : > { %v2699_v16 = vpop.eup %2698  ;;  %v2282_v17 = vcombine.low %v2181_v3, %v2182_v14  ;;  %2710 = vtanh.f32 %v1996_v12 }
 0x16c   : > { %v2701_v19 = vpop.eup %2700  ;;  %2345 = vst [vmem:[%s2973_s29 + $0xd0] sm:$0x77] %v2281_v15  ;;  %v2119_v18 = vmul.f32 0.5, %v2699_v16  ;;  %2712 = vtanh.f32 %v1998_v1 }
 0x16d   : > { %v2703_v6 = vpop.eup %2702  ;;  %2346 = vst [vmem:[%s2973_s29 + $0xd8] sm:$0x77] %v2282_v17  ;;  %v2121_v20 = vmul.f32 0.5, %v2701_v19 }
 0x16e   : > { %v2705_v21 = vpop.eup %2704  ;;  %v2183_v22 = vadd.f32 0.5, %v2119_v18  ;;  %v2120_v23 = vmul.f32 0.5, %v2703_v6 }
 0x16f   : > { %v2185_v24 = vadd.f32 0.5, %v2121_v20  ;;  %v2122_v25 = vmul.f32 0.5, %v2705_v21 }
 0x170   : > { %v2184_v26 = vadd.f32 0.5, %v2120_v23 }
 0x171   : > { %v2186_v27 = vadd.f32 0.5, %v2122_v25 }
 0x172   : > { %v2283_v28 = vcombine.low %v2183_v22, %v2184_v26 }
 0x173   : > { %v2707_v29 = vpop.eup %2706  ;;  %v2284_v30 = vcombine.low %v2185_v24, %v2186_v27 }
 0x174   : > { %v2709_v31 = vpop.eup %2708  ;;  %2347 = vst [vmem:[%s2973_s29 + $0xe0] sm:$0x77] %v2283_v28  ;;  %v2123_v32 = vmul.f32 0.5, %v2707_v29 }
 0x175   : > { %v2711_v33 = vpop.eup %2710  ;;  %2348 = vst [vmem:[%s2973_s29 + $0xe8] sm:$0x77] %v2284_v30  ;;  %v2125_v34 = vmul.f32 0.5, %v2709_v31 }
 0x176   : > { %v2713_v35 = vpop.eup %2712  ;;  %v2187_v36 = vadd.f32 0.5, %v2123_v32  ;;  %v2124_v37 = vmul.f32 0.5, %v2711_v33 }
 0x177   : > { %v2189_v38 = vadd.f32 0.5, %v2125_v34  ;;  %v2126_v39 = vmul.f32 0.5, %v2713_v35 }
 0x178   : > { %v2188_v40 = vadd.f32 0.5, %v2124_v37 }
 0x179   : > { %v2190_v41 = vadd.f32 0.5, %v2126_v39 }
 0x17a   : > { %v2285_v42 = vcombine.low %v2187_v36, %v2188_v40 }
 0x17b   : > { %v2286_v43 = vcombine.low %v2189_v38, %v2190_v41 }
 0x17c   : > { %2349 = vst [vmem:[%s2973_s29 + $0xf0] sm:$0x77] %v2285_v42 }
 0x17d   : > { %2350 = vst [vmem:[%s2973_s29 + $0xf8] sm:$0x77] %v2286_v43 }
 0x17e PF: > { %s13_s14 = sadd.s32 1, %s2736_s14   ;;  %s3072_s12 = smov %s2732_s13 }
 0x17f   : > { %p10_p5 = scmp.ge.s32.totalorder %s13_s14, 6   ;;  %s3073_s13 = smov %s3075_s15 }
 0x181   :  { %12 = sbr.rel (!%p10_p5) target bundleno = 2 (0x2), region = 65 }

</bundles_post_ra>
